<compile_context>
chip_gen: v7x
topology: tpu7x:2x2x1
jax: 0.10.0
libtpu: 0.0.40
codegen_flags: <defaults>
</compile_context>

<pallas_src>
from functools import partial

import numpy as np
import jax
import jax.numpy as jnp
from jax.experimental import pallas as pl
from jax.experimental.pallas import tpu as pltpu

IN_HW = 448
OUT_HW = 160
CHANNELS = 3
FACE_EMB_DIM = 512
SPEAKER_EMB_DIM = 256
VMEM_LIMIT = 32 * 1024 * 1024  # v7x scoped default; comfortable on v5e/v6e as well


# ---------------------------------------------------------------------------
# Bilinear interpolation matrix (PyTorch F.interpolate, align_corners=False, no antialias)
# ---------------------------------------------------------------------------
def _bilinear_matrix(in_size: int, out_size: int) -> np.ndarray:
    scale = in_size / out_size
    i = np.arange(out_size)
    src = np.maximum(scale * (i + 0.5) - 0.5, 0.0)
    p0 = np.minimum(np.floor(src).astype(np.int64), in_size - 1)
    p1 = np.minimum(p0 + 1, in_size - 1)
    lam = (src - p0).astype(np.float32)
    m = np.zeros((out_size, in_size), dtype=np.float32)
    m[i, p0] += (1.0 - lam)
    m[i, p1] += lam
    return m


def _make_resize_mats(input_range: str):
    """A: row-interp matrix with the input scale AND the *2 of (x-0.5)/0.5 folded in
    (resize is linear, so this is exact).  Bc: per-channel column-interp matrices of shape
    (3, 448*3, 160) so the second matmul consumes the NHWC (H, W*C) row layout and emits the
    channel slab directly -> kernel writes (G, 3, 160, 160) with no post-kernel transpose."""
    m = _bilinear_matrix(IN_HW, OUT_HW)                      # (160, 448)
    if input_range == "0-255":
        scale = 2.0 / 255.0
    elif input_range == "0-1":
        scale = 2.0
    else:
        raise ValueError("input_range must be either '0-255' or '0-1'")
    a_scaled = (scale * m).astype(np.float32)                # (160, 448)
    bc = np.zeros((CHANNELS, IN_HW * CHANNELS, OUT_HW), dtype=np.float32)
    for c in range(CHANNELS):
        # input rows w*3+c (channel c of NHWC) -> output columns w_out of channel slab c
        bc[c, c::CHANNELS, :] = m.T
    return a_scaled, bc


def _pick_group(B: int) -> int:
    """Images per grid step: amortize per-step pipeline overhead while keeping
    grid length >= 2 (v7x megacore) and VMEM blocks small."""
    for g in (4, 3, 2):
        if B % g == 0 and B // g >= 2:
            return g
    return 1


def _to_bf16(x):
    """u8/int input -> bf16 via i32 -> f32 (only guaranteed-supported Mosaic conversions);
    float input -> bf16 directly."""
    if jnp.issubdtype(x.dtype, jnp.integer):
        x = x.astype(jnp.int32).astype(jnp.float32)
    return x.astype(jnp.bfloat16)


# ---------------------------------------------------------------------------
# Kernel 1: resize + normalize, G images per grid step, NCHW output written in-kernel.
#   a_ref  : (160, 448)        bf16 row-interp matrix (2/255 or 2.0 folded in)
#   bc_ref : (3, 1344, 160)    bf16 per-channel column-interp matrices
#   x_ref  : (G, 448, 1344)    uint8 (or float) NHWC view (H, W*C)
#   o_ref  : (G, 3, 160, 160)  bf16, values in [-1, 1]
# ---------------------------------------------------------------------------
def _make_resize_kernel(G: int):
    def kernel(a_ref, bc_ref, x_ref, o_ref):
        a = a_ref[...]                                                   # (160, 448) bf16
        rows = []
        for g in range(G):                                               # static unroll, G<=4
            xg = _to_bf16(x_ref[g])                                      # (448, 1344) bf16
            rows.append(jnp.dot(a, xg, preferred_element_type=jnp.float32))  # (160, 1344)
        tmp = rows[0] if G == 1 else jnp.concatenate(rows, axis=0)       # (G*160, 1344) f32
        tmp = tmp.astype(jnp.bfloat16)
        for c in range(CHANNELS):
            oc = jnp.dot(tmp, bc_ref[c], preferred_element_type=jnp.float32) - 1.0  # (G*160,160)
            o_ref[:, c] = oc.reshape(G, OUT_HW, OUT_HW).astype(o_ref.dtype)
    return kernel


def resize_and_normalize(x, input_range: str = "0-255"):
    """x: [B, 448, 448, 3] NHWC (uint8 preferred; float also accepted)
       -> [B, 3, 160, 160] bf16 in [-1, 1]."""
    B, H, W, C = x.shape
    assert H == IN_HW and W == IN_HW and C == CHANNELS
    a_np, bc_np = _make_resize_mats(input_range)
    A = jnp.asarray(a_np, dtype=jnp.bfloat16)                # (160, 448)
    Bc = jnp.asarray(bc_np, dtype=jnp.bfloat16)              # (3, 1344, 160)
    # Free view of the NHWC buffer: no HBM transpose / copy / dtype cast before the kernel.
    x_flat = x.reshape(B, IN_HW, IN_HW * CHANNELS)

    G = _pick_group(B)
    grid = (B // G,)

    out = pl.pallas_call(
        _make_resize_kernel(G),
        out_shape=jax.ShapeDtypeStruct((B, CHANNELS, OUT_HW, OUT_HW), jnp.bfloat16),
        grid_spec=pltpu.PrefetchScalarGridSpec(
            num_scalar_prefetch=0,
            grid=grid,
            in_specs=[
                pl.BlockSpec((OUT_HW, IN_HW), lambda i: (0, 0)),
                pl.BlockSpec((CHANNELS, IN_HW * CHANNELS, OUT_HW), lambda i: (0, 0, 0)),
                pl.BlockSpec((G, IN_HW, IN_HW * CHANNELS), lambda i: (i, 0, 0)),
            ],
            out_specs=pl.BlockSpec((G, CHANNELS, OUT_HW, OUT_HW), lambda i: (i, 0, 0, 0)),
        ),
        compiler_params=pltpu.CompilerParams(
            dimension_semantics=("parallel",),          # independent image groups -> megacore
            vmem_limit_bytes=VMEM_LIMIT,
        ),
    )(A, Bc, x_flat)
    return out                                               # (B, 3, 160, 160) bf16


# ---------------------------------------------------------------------------
# Frozen face model stand-in.
# TODO(synk): InceptionResnetV1('casia-webface') has no clean Pallas equivalent here;
# replaced by a deterministic avg-pool + linear projection producing the same (B, 512) output.
# ---------------------------------------------------------------------------
def frozen_face_stub(x_norm, w_face, b_face):
    B = x_norm.shape[0]
    x = x_norm.astype(jnp.float32)
    pooled = x.reshape(B, CHANNELS, 16, OUT_HW // 16, 16, OUT_HW // 16).mean(axis=(3, 5))
    feat = pooled.reshape(B, CHANNELS * 16 * 16)
    return feat @ w_face + b_face  # (B, 512)


# ---------------------------------------------------------------------------
# Kernel 2: transform MLP — Linear(512,1024) ReLU, Linear(1024,1024) ReLU,
# Linear(1024,512) ReLU, Linear(512,256).  bf16 weights, f32 accumulation.
# ---------------------------------------------------------------------------
def _mlp_kernel(x_ref, w1_ref, b1_ref, w2_ref, b2_ref, w3_ref, b3_ref, w4_ref, b4_ref, o_ref):
    h = x_ref[...].astype(jnp.bfloat16)
    h = jnp.maximum(jnp.dot(h, w1_ref[...], preferred_element_type=jnp.float32) + b1_ref[...], 0.0)
    h = jnp.maximum(jnp.dot(h.astype(jnp.bfloat16), w2_ref[...],
                            preferred_element_type=jnp.float32) + b2_ref[...], 0.0)
    h = jnp.maximum(jnp.dot(h.astype(jnp.bfloat16), w3_ref[...],
                            preferred_element_type=jnp.float32) + b3_ref[...], 0.0)
    o_ref[...] = jnp.dot(h.astype(jnp.bfloat16), w4_ref[...],
                         preferred_element_type=jnp.float32) + b4_ref[...]


def transform_mlp(face_emb, params, tb_max=256):
    B, _ = face_emb.shape
    (w1, b1), (w2, b2), (w3, b3), (w4, b4) = params

    if B <= tb_max:
        tb, Bp, x = B, B, face_emb
    else:
        tb = tb_max
        Bp = int(pl.cdiv(B, tb)) * tb
        x = jnp.pad(face_emb, ((0, Bp - B), (0, 0))) if Bp != B else face_emb
    grid = (Bp // tb,)

    def batch_spec(shape):
        nd = len(shape)
        return pl.BlockSpec((tb,) + tuple(shape[1:]),
                            lambda i, _nd=nd: (i,) + (0,) * (_nd - 1))

    def resident_spec(shape):
        # constant block index -> DMA'd once, stays resident across all batch blocks
        nd = len(shape)
        return pl.BlockSpec(tuple(shape), lambda i, _nd=nd: (0,) * _nd)

    weights = (w1, b1, w2, b2, w3, b3, w4, b4)
    out = pl.pallas_call(
        _mlp_kernel,
        out_shape=jax.ShapeDtypeStruct((Bp, SPEAKER_EMB_DIM), jnp.float32),
        grid_spec=pltpu.PrefetchScalarGridSpec(
            num_scalar_prefetch=0,
            grid=grid,
            in_specs=[batch_spec(x.shape)] + [resident_spec(a.shape) for a in weights],
            out_specs=batch_spec((Bp, SPEAKER_EMB_DIM)),
        ),
        compiler_params=pltpu.CompilerParams(
            # weight-streaming bound at small B: keep the batch axis sequential so the
            # ~4.25 MB of weights is fetched exactly once (do not split across v7x TCs).
            dimension_semantics=("arbitrary",),
            vmem_limit_bytes=VMEM_LIMIT,
        ),
    )(x, *weights)
    return out[:B] if Bp != B else out


# ---------------------------------------------------------------------------
# Deterministic parameter init (matches nn.Linear default U(-1/sqrt(fan_in), +1/sqrt(fan_in))).
# Weights stored bf16 (kernel accumulates f32); biases stay f32.
# ---------------------------------------------------------------------------
def init_linear(key, fan_in, fan_out):
    kw, kb = jax.random.split(key)
    bound = 1.0 / float(np.sqrt(fan_in))
    w = jax.random.uniform(kw, (fan_in, fan_out), jnp.float32, -bound, bound).astype(jnp.bfloat16)
    b = jax.random.uniform(kb, (1, fan_out), jnp.float32, -bound, bound)
    return w, b


@partial(jax.jit, static_argnames=("input_range",))
def face_to_speaker_forward(x, w_face, b_face, mlp_params, input_range="0-255"):
    """Full forward: NHWC image [B,448,448,3] (uint8 or float) -> speaker embedding (B, 256)."""
    x_norm = resize_and_normalize(x, input_range)            # Pallas kernel 1 (NCHW bf16)
    face_emb = frozen_face_stub(x_norm, w_face, b_face)      # frozen-model stand-in (glue)
    speaker_emb = transform_mlp(face_emb, mlp_params)        # Pallas kernel 2
    return speaker_emb


# ---------------------------------------------------------------------------
# Pure-JAX f32 reference (same math, no Pallas) for a loose numerical check.
# ---------------------------------------------------------------------------
def _reference_forward(x, w_face, b_face, mlp_params):
    m = jnp.asarray(_bilinear_matrix(IN_HW, OUT_HW), jnp.float32)
    x_nchw = jnp.transpose(x.astype(jnp.float32), (0, 3, 1, 2)) / 255.0
    resized = jnp.einsum("oh,bchw,pw->bcop", m, x_nchw, m)
    x_norm = (resized - 0.5) / 0.5
    face_emb = frozen_face_stub(x_norm, w_face, b_face)
    h = face_emb
    for i, (w, b) in enumerate(mlp_params):
        h = h @ w.astype(jnp.float32) + b
        if i < 3:
            h = jnp.maximum(h, 0.0)
    return x_norm, h


if __name__ == "__main__":
    key = jax.random.PRNGKey(0)
    k_x, k_face, k1, k2, k3, k4 = jax.random.split(key, 6)

    B = 2
    # uint8 ingestion: 4x fewer HBM bytes streamed by kernel 1 than f32 pixels.
    x = jax.random.randint(k_x, (B, IN_HW, IN_HW, CHANNELS), 0, 256,
                           dtype=jnp.int32).astype(jnp.uint8)

    # frozen face-model stand-in parameters (deterministic)
    face_fan_in = CHANNELS * 16 * 16
    fb = 1.0 / float(np.sqrt(face_fan_in))
    w_face = jax.random.uniform(k_face, (face_fan_in, FACE_EMB_DIM), jnp.float32, -fb, fb)
    b_face = jnp.zeros((1, FACE_EMB_DIM), jnp.float32)

    mlp_params = (
        init_linear(k1, FACE_EMB_DIM, 1024),
        init_linear(k2, 1024, 1024),
        init_linear(k3, 1024, 512),
        init_linear(k4, 512, SPEAKER_EMB_DIM),
    )

    speaker_emb = face_to_speaker_forward(x, w_face, b_face, mlp_params)
    speaker_emb = jax.block_until_ready(speaker_emb)
    assert speaker_emb.shape == (B, SPEAKER_EMB_DIM)
    assert bool(jnp.all(jnp.isfinite(speaker_emb)))

    # Loose numerical check vs f32 reference (bf16 interp weights / activations / output
    # are an accepted approximation vs PyTorch's f32 F.interpolate: ~0.4% rel error).
    x_norm_kernel = jax.block_until_ready(resize_and_normalize(x, "0-255"))
    x_norm_ref, speaker_ref = _reference_forward(x, w_face, b_face, mlp_params)
    resize_err = float(jnp.max(jnp.abs(x_norm_kernel.astype(jnp.float32) - x_norm_ref)))
    final_err = float(jnp.max(jnp.abs(speaker_emb - speaker_ref)))
    assert resize_err < 0.1, f"resize mismatch: {resize_err}"
    assert final_err < 0.2, f"speaker-emb mismatch: {final_err}"

    print("KERNEL_OK")
</pallas_src>

<mosaic_0001>
module attributes {stable_mosaic.version = 11 : i64} {
  func.func @kernel(%arg0: i32, %arg1: memref<160x448xbf16, #tpu.memory_space<vmem>>, %arg2: memref<3x1344x160xbf16, #tpu.memory_space<vmem>>, %arg3: memref<1x448x1344xi8, #tpu.memory_space<vmem>>, %arg4: memref<1x3x160x160xbf16, #tpu.memory_space<vmem>>) attributes {dimension_semantics = [#tpu.dimension_semantics<parallel>], iteration_bounds = array<i64: 2>, scalar_prefetch = 0 : i64, scratch_operands = 0 : i64, tpu.core_type = #tpu.core_type<tc>, window_params = [{pipeline_mode = #tpu.pipeline_mode<synchronous>, transform_indices = @transform_0, window_bounds = array<i64: 160, 448>}, {pipeline_mode = #tpu.pipeline_mode<synchronous>, transform_indices = @transform_1, window_bounds = array<i64: 3, 1344, 160>}, {transform_indices = @transform_2, window_bounds = array<i64: 1, 448, 1344>}, {transform_indices = @transform_3, window_bounds = array<i64: 1, 3, 160, 160>}]} {
    %c0 = arith.constant 0 : index
    %c0_0 = arith.constant 0 : index
    %0 = vector.load %arg1[%c0, %c0_0] : memref<160x448xbf16, #tpu.memory_space<vmem>>, vector<160x448xbf16>
    %c0_1 = arith.constant 0 : index
    %c0_2 = arith.constant 0 : index
    %c0_3 = arith.constant 0 : index
    %1 = vector.load %arg3[%c0_1, %c0_2, %c0_3] : memref<1x448x1344xi8, #tpu.memory_space<vmem>>, vector<1x448x1344xi8>
    %2 = vector.shape_cast %1 : vector<1x448x1344xi8> to vector<448x1344xi8>
    %3 = arith.extui %2 : vector<448x1344xi8> to vector<448x1344xi32>
    %4 = arith.sitofp %3 : vector<448x1344xi32> to vector<448x1344xf32>
    %5 = arith.truncf %4 : vector<448x1344xf32> to vector<448x1344xbf16>
    %cst = arith.constant dense<0.000000e+00> : vector<160x1344xf32>
    %6 = tpu.matmul %0, %5, %cst {dimension_numbers = #tpu.dot_dimension_numbers<[1], [0], [0], [1], [0, 0, 1, 1], [], []>} : vector<160x448xbf16>, vector<448x1344xbf16>, vector<160x1344xf32> -> vector<160x1344xf32>
    %7 = arith.truncf %6 : vector<160x1344xf32> to vector<160x1344xbf16>
    %c0_4 = arith.constant 0 : index
    %c0_5 = arith.constant 0 : index
    %c0_6 = arith.constant 0 : index
    %8 = vector.load %arg2[%c0_4, %c0_5, %c0_6] : memref<3x1344x160xbf16, #tpu.memory_space<vmem>>, vector<1x1344x160xbf16>
    %9 = vector.shape_cast %8 : vector<1x1344x160xbf16> to vector<1344x160xbf16>
    %cst_7 = arith.constant dense<0.000000e+00> : vector<160x160xf32>
    %10 = tpu.matmul %7, %9, %cst_7 {dimension_numbers = #tpu.dot_dimension_numbers<[1], [0], [0], [1], [0, 0, 1, 1], [], []>} : vector<160x1344xbf16>, vector<1344x160xbf16>, vector<160x160xf32> -> vector<160x160xf32>
    %cst_8 = arith.constant 1.000000e+00 : f32
    %11 = vector.broadcast %cst_8 : f32 to vector<160x160xf32>
    %12 = arith.subf %10, %11 : vector<160x160xf32>
    %13 = vector.shape_cast %12 : vector<160x160xf32> to vector<1x160x160xf32>
    %14 = arith.truncf %13 : vector<1x160x160xf32> to vector<1x160x160xbf16>
    %c0_9 = arith.constant 0 : index
    %c0_10 = arith.constant 0 : index
    %c0_11 = arith.constant 0 : index
    %c0_12 = arith.constant 0 : index
    %15 = vector.load %arg4[%c0_9, %c0_10, %c0_11, %c0_12] : memref<1x3x160x160xbf16, #tpu.memory_space<vmem>>, vector<1x1x160x160xbf16>
    %16 = vector.shape_cast %15 : vector<1x1x160x160xbf16> to vector<1x160x160xbf16>
    %17 = vector.shape_cast %14 : vector<1x160x160xbf16> to vector<1x1x160x160xbf16>
    tpu.vector_store %arg4[%c0_9, %c0_10, %c0_11, %c0_12], %17 {strides = array<i32>} : memref<1x3x160x160xbf16, #tpu.memory_space<vmem>>, vector<1x1x160x160xbf16>,
    %c1 = arith.constant 1 : index
    %c0_13 = arith.constant 0 : index
    %c0_14 = arith.constant 0 : index
    %18 = vector.load %arg2[%c1, %c0_13, %c0_14] : memref<3x1344x160xbf16, #tpu.memory_space<vmem>>, vector<1x1344x160xbf16>
    %19 = vector.shape_cast %18 : vector<1x1344x160xbf16> to vector<1344x160xbf16>
    %cst_15 = arith.constant dense<0.000000e+00> : vector<160x160xf32>
    %20 = tpu.matmul %7, %19, %cst_15 {dimension_numbers = #tpu.dot_dimension_numbers<[1], [0], [0], [1], [0, 0, 1, 1], [], []>} : vector<160x1344xbf16>, vector<1344x160xbf16>, vector<160x160xf32> -> vector<160x160xf32>
    %cst_16 = arith.constant 1.000000e+00 : f32
    %21 = vector.broadcast %cst_16 : f32 to vector<160x160xf32>
    %22 = arith.subf %20, %21 : vector<160x160xf32>
    %23 = vector.shape_cast %22 : vector<160x160xf32> to vector<1x160x160xf32>
    %24 = arith.truncf %23 : vector<1x160x160xf32> to vector<1x160x160xbf16>
    %c0_17 = arith.constant 0 : index
    %c1_18 = arith.constant 1 : index
    %c0_19 = arith.constant 0 : index
    %c0_20 = arith.constant 0 : index
    %25 = vector.load %arg4[%c0_17, %c1_18, %c0_19, %c0_20] : memref<1x3x160x160xbf16, #tpu.memory_space<vmem>>, vector<1x1x160x160xbf16>
    %26 = vector.shape_cast %25 : vector<1x1x160x160xbf16> to vector<1x160x160xbf16>
    %27 = vector.shape_cast %24 : vector<1x160x160xbf16> to vector<1x1x160x160xbf16>
    tpu.vector_store %arg4[%c0_17, %c1_18, %c0_19, %c0_20], %27 {strides = array<i32>} : memref<1x3x160x160xbf16, #tpu.memory_space<vmem>>, vector<1x1x160x160xbf16>,
    %c2 = arith.constant 2 : index
    %c0_21 = arith.constant 0 : index
    %c0_22 = arith.constant 0 : index
    %28 = vector.load %arg2[%c2, %c0_21, %c0_22] : memref<3x1344x160xbf16, #tpu.memory_space<vmem>>, vector<1x1344x160xbf16>
    %29 = vector.shape_cast %28 : vector<1x1344x160xbf16> to vector<1344x160xbf16>
    %cst_23 = arith.constant dense<0.000000e+00> : vector<160x160xf32>
    %30 = tpu.matmul %7, %29, %cst_23 {dimension_numbers = #tpu.dot_dimension_numbers<[1], [0], [0], [1], [0, 0, 1, 1], [], []>} : vector<160x1344xbf16>, vector<1344x160xbf16>, vector<160x160xf32> -> vector<160x160xf32>
    %cst_24 = arith.constant 1.000000e+00 : f32
    %31 = vector.broadcast %cst_24 : f32 to vector<160x160xf32>
    %32 = arith.subf %30, %31 : vector<160x160xf32>
    %33 = vector.shape_cast %32 : vector<160x160xf32> to vector<1x160x160xf32>
    %34 = arith.truncf %33 : vector<1x160x160xf32> to vector<1x160x160xbf16>
    %c0_25 = arith.constant 0 : index
    %c2_26 = arith.constant 2 : index
    %c0_27 = arith.constant 0 : index
    %c0_28 = arith.constant 0 : index
    %35 = vector.load %arg4[%c0_25, %c2_26, %c0_27, %c0_28] : memref<1x3x160x160xbf16, #tpu.memory_space<vmem>>, vector<1x1x160x160xbf16>
    %36 = vector.shape_cast %35 : vector<1x1x160x160xbf16> to vector<1x160x160xbf16>
    %37 = vector.shape_cast %34 : vector<1x160x160xbf16> to vector<1x1x160x160xbf16>
    tpu.vector_store %arg4[%c0_25, %c2_26, %c0_27, %c0_28], %37 {strides = array<i32>} : memref<1x3x160x160xbf16, #tpu.memory_space<vmem>>, vector<1x1x160x160xbf16>,
    return
  }
  func.func @transform_0(%arg0: i32) -> (i32, i32) {
    %c0_i32 = arith.constant 0 : i32
    %c0_i32_0 = arith.constant 0 : i32
    %c0_i32_1 = arith.constant 0 : i32
    return %c0_i32, %c0_i32_0 : i32, i32
  }
  func.func @transform_1(%arg0: i32) -> (i32, i32, i32) {
    %c0_i32 = arith.constant 0 : i32
    %c0_i32_0 = arith.constant 0 : i32
    %c0_i32_1 = arith.constant 0 : i32
    %c0_i32_2 = arith.constant 0 : i32
    return %c0_i32, %c0_i32_0, %c0_i32_1 : i32, i32, i32
  }
  func.func @transform_2(%arg0: i32) -> (i32, i32, i32) {
    %c0_i32 = arith.constant 0 : i32
    %c0_i32_0 = arith.constant 0 : i32
    %c0_i32_1 = arith.constant 0 : i32
    return %arg0, %c0_i32, %c0_i32_0 : i32, i32, i32
  }
  func.func @transform_3(%arg0: i32) -> (i32, i32, i32, i32) {
    %c0_i32 = arith.constant 0 : i32
    %c0_i32_0 = arith.constant 0 : i32
    %c0_i32_1 = arith.constant 0 : i32
    %c0_i32_2 = arith.constant 0 : i32
    return %arg0, %c0_i32, %c0_i32_0, %c0_i32_1 : i32, i32, i32, i32
  }
}

module attributes {stable_mosaic.version = 11 : i64} {
  func.func @_mlp_kernel(%arg0: i32, %arg1: memref<2x512xf32, #tpu.memory_space<vmem>>, %arg2: memref<512x1024xbf16, #tpu.memory_space<vmem>>, %arg3: memref<1x1024xf32, #tpu.memory_space<vmem>>, %arg4: memref<1024x1024xbf16, #tpu.memory_space<vmem>>, %arg5: memref<1x1024xf32, #tpu.memory_space<vmem>>, %arg6: memref<1024x512xbf16, #tpu.memory_space<vmem>>, %arg7: memref<1x512xf32, #tpu.memory_space<vmem>>, %arg8: memref<512x256xbf16, #tpu.memory_space<vmem>>, %arg9: memref<1x256xf32, #tpu.memory_space<vmem>>, %arg10: memref<2x256xf32, #tpu.memory_space<vmem>>) attributes {dimension_semantics = [#tpu.dimension_semantics<arbitrary>], iteration_bounds = array<i64: 1>, scalar_prefetch = 0 : i64, scratch_operands = 0 : i64, tpu.core_type = #tpu.core_type<tc>, window_params = [{transform_indices = @transform_0, window_bounds = array<i64: 2, 512>}, {pipeline_mode = #tpu.pipeline_mode<synchronous>, transform_indices = @transform_1, window_bounds = array<i64: 512, 1024>}, {pipeline_mode = #tpu.pipeline_mode<synchronous>, transform_indices = @transform_2, window_bounds = array<i64: 1, 1024>}, {pipeline_mode = #tpu.pipeline_mode<synchronous>, transform_indices = @transform_3, window_bounds = array<i64: 1024, 1024>}, {pipeline_mode = #tpu.pipeline_mode<synchronous>, transform_indices = @transform_4, window_bounds = array<i64: 1, 1024>}, {pipeline_mode = #tpu.pipeline_mode<synchronous>, transform_indices = @transform_5, window_bounds = array<i64: 1024, 512>}, {pipeline_mode = #tpu.pipeline_mode<synchronous>, transform_indices = @transform_6, window_bounds = array<i64: 1, 512>}, {pipeline_mode = #tpu.pipeline_mode<synchronous>, transform_indices = @transform_7, window_bounds = array<i64: 512, 256>}, {pipeline_mode = #tpu.pipeline_mode<synchronous>, transform_indices = @transform_8, window_bounds = array<i64: 1, 256>}, {transform_indices = @transform_9, window_bounds = array<i64: 2, 256>}]} {
    %c0 = arith.constant 0 : index
    %c0_0 = arith.constant 0 : index
    %0 = vector.load %arg1[%c0, %c0_0] : memref<2x512xf32, #tpu.memory_space<vmem>>, vector<2x512xf32>
    %1 = arith.truncf %0 : vector<2x512xf32> to vector<2x512xbf16>
    %c0_1 = arith.constant 0 : index
    %c0_2 = arith.constant 0 : index
    %2 = vector.load %arg2[%c0_1, %c0_2] : memref<512x1024xbf16, #tpu.memory_space<vmem>>, vector<512x1024xbf16>
    %cst = arith.constant dense<0.000000e+00> : vector<2x1024xf32>
    %3 = tpu.matmul %1, %2, %cst {dimension_numbers = #tpu.dot_dimension_numbers<[1], [0], [0], [1], [0, 0, 1, 1], [], []>} : vector<2x512xbf16>, vector<512x1024xbf16>, vector<2x1024xf32> -> vector<2x1024xf32>
    %c0_3 = arith.constant 0 : index
    %c0_4 = arith.constant 0 : index
    %4 = vector.load %arg3[%c0_3, %c0_4] : memref<1x1024xf32, #tpu.memory_space<vmem>>, vector<1x1024xf32>
    %5 = vector.broadcast %4 : vector<1x1024xf32> to vector<2x1024xf32>
    %6 = arith.addf %3, %5 : vector<2x1024xf32>
    %cst_5 = arith.constant 0.000000e+00 : f32
    %7 = vector.broadcast %cst_5 : f32 to vector<2x1024xf32>
    %8 = arith.maximumf %6, %7 : vector<2x1024xf32>
    %9 = arith.truncf %8 : vector<2x1024xf32> to vector<2x1024xbf16>
    %c0_6 = arith.constant 0 : index
    %c0_7 = arith.constant 0 : index
    %10 = vector.load %arg4[%c0_6, %c0_7] : memref<1024x1024xbf16, #tpu.memory_space<vmem>>, vector<1024x1024xbf16>
    %cst_8 = arith.constant dense<0.000000e+00> : vector<2x1024xf32>
    %11 = tpu.matmul %9, %10, %cst_8 {dimension_numbers = #tpu.dot_dimension_numbers<[1], [0], [0], [1], [0, 0, 1, 1], [], []>} : vector<2x1024xbf16>, vector<1024x1024xbf16>, vector<2x1024xf32> -> vector<2x1024xf32>
    %c0_9 = arith.constant 0 : index
    %c0_10 = arith.constant 0 : index
    %12 = vector.load %arg5[%c0_9, %c0_10] : memref<1x1024xf32, #tpu.memory_space<vmem>>, vector<1x1024xf32>
    %13 = vector.broadcast %12 : vector<1x1024xf32> to vector<2x1024xf32>
    %14 = arith.addf %11, %13 : vector<2x1024xf32>
    %cst_11 = arith.constant 0.000000e+00 : f32
    %15 = vector.broadcast %cst_11 : f32 to vector<2x1024xf32>
    %16 = arith.maximumf %14, %15 : vector<2x1024xf32>
    %17 = arith.truncf %16 : vector<2x1024xf32> to vector<2x1024xbf16>
    %c0_12 = arith.constant 0 : index
    %c0_13 = arith.constant 0 : index
    %18 = vector.load %arg6[%c0_12, %c0_13] : memref<1024x512xbf16, #tpu.memory_space<vmem>>, vector<1024x512xbf16>
    %cst_14 = arith.constant dense<0.000000e+00> : vector<2x512xf32>
    %19 = tpu.matmul %17, %18, %cst_14 {dimension_numbers = #tpu.dot_dimension_numbers<[1], [0], [0], [1], [0, 0, 1, 1], [], []>} : vector<2x1024xbf16>, vector<1024x512xbf16>, vector<2x512xf32> -> vector<2x512xf32>
    %c0_15 = arith.constant 0 : index
    %c0_16 = arith.constant 0 : index
    %20 = vector.load %arg7[%c0_15, %c0_16] : memref<1x512xf32, #tpu.memory_space<vmem>>, vector<1x512xf32>
    %21 = vector.broadcast %20 : vector<1x512xf32> to vector<2x512xf32>
    %22 = arith.addf %19, %21 : vector<2x512xf32>
    %cst_17 = arith.constant 0.000000e+00 : f32
    %23 = vector.broadcast %cst_17 : f32 to vector<2x512xf32>
    %24 = arith.maximumf %22, %23 : vector<2x512xf32>
    %25 = arith.truncf %24 : vector<2x512xf32> to vector<2x512xbf16>
    %c0_18 = arith.constant 0 : index
    %c0_19 = arith.constant 0 : index
    %26 = vector.load %arg8[%c0_18, %c0_19] : memref<512x256xbf16, #tpu.memory_space<vmem>>, vector<512x256xbf16>
    %cst_20 = arith.constant dense<0.000000e+00> : vector<2x256xf32>
    %27 = tpu.matmul %25, %26, %cst_20 {dimension_numbers = #tpu.dot_dimension_numbers<[1], [0], [0], [1], [0, 0, 1, 1], [], []>} : vector<2x512xbf16>, vector<512x256xbf16>, vector<2x256xf32> -> vector<2x256xf32>
    %c0_21 = arith.constant 0 : index
    %c0_22 = arith.constant 0 : index
    %28 = vector.load %arg9[%c0_21, %c0_22] : memref<1x256xf32, #tpu.memory_space<vmem>>, vector<1x256xf32>
    %29 = vector.broadcast %28 : vector<1x256xf32> to vector<2x256xf32>
    %30 = arith.addf %27, %29 : vector<2x256xf32>
    %c0_23 = arith.constant 0 : index
    %c0_24 = arith.constant 0 : index
    %31 = vector.load %arg10[%c0_23, %c0_24] : memref<2x256xf32, #tpu.memory_space<vmem>>, vector<2x256xf32>
    tpu.vector_store %arg10[%c0_23, %c0_24], %30 {strides = array<i32>} : memref<2x256xf32, #tpu.memory_space<vmem>>, vector<2x256xf32>,
    return
  }
  func.func @transform_0(%arg0: i32) -> (i32, i32) {
    %c0_i32 = arith.constant 0 : i32
    %c0_i32_0 = arith.constant 0 : i32
    return %arg0, %c0_i32 : i32, i32
  }
  func.func @transform_1(%arg0: i32) -> (i32, i32) {
    %c0_i32 = arith.constant 0 : i32
    %c0_i32_0 = arith.constant 0 : i32
    %c0_i32_1 = arith.constant 0 : i32
    return %c0_i32, %c0_i32_0 : i32, i32
  }
  func.func @transform_2(%arg0: i32) -> (i32, i32) {
    %c0_i32 = arith.constant 0 : i32
    %c0_i32_0 = arith.constant 0 : i32
    %c0_i32_1 = arith.constant 0 : i32
    return %c0_i32, %c0_i32_0 : i32, i32
  }
  func.func @transform_3(%arg0: i32) -> (i32, i32) {
    %c0_i32 = arith.constant 0 : i32
    %c0_i32_0 = arith.constant 0 : i32
    %c0_i32_1 = arith.constant 0 : i32
    return %c0_i32, %c0_i32_0 : i32, i32
  }
  func.func @transform_4(%arg0: i32) -> (i32, i32) {
    %c0_i32 = arith.constant 0 : i32
    %c0_i32_0 = arith.constant 0 : i32
    %c0_i32_1 = arith.constant 0 : i32
    return %c0_i32, %c0_i32_0 : i32, i32
  }
  func.func @transform_5(%arg0: i32) -> (i32, i32) {
    %c0_i32 = arith.constant 0 : i32
    %c0_i32_0 = arith.constant 0 : i32
    %c0_i32_1 = arith.constant 0 : i32
    return %c0_i32, %c0_i32_0 : i32, i32
  }
  func.func @transform_6(%arg0: i32) -> (i32, i32) {
    %c0_i32 = arith.constant 0 : i32
    %c0_i32_0 = arith.constant 0 : i32
    %c0_i32_1 = arith.constant 0 : i32
    return %c0_i32, %c0_i32_0 : i32, i32
  }
  func.func @transform_7(%arg0: i32) -> (i32, i32) {
    %c0_i32 = arith.constant 0 : i32
    %c0_i32_0 = arith.constant 0 : i32
    %c0_i32_1 = arith.constant 0 : i32
    return %c0_i32, %c0_i32_0 : i32, i32
  }
  func.func @transform_8(%arg0: i32) -> (i32, i32) {
    %c0_i32 = arith.constant 0 : i32
    %c0_i32_0 = arith.constant 0 : i32
    %c0_i32_1 = arith.constant 0 : i32
    return %c0_i32, %c0_i32_0 : i32, i32
  }
  func.func @transform_9(%arg0: i32) -> (i32, i32) {
    %c0_i32 = arith.constant 0 : i32
    %c0_i32_0 = arith.constant 0 : i32
    return %arg0, %c0_i32 : i32, i32
  }
}

</mosaic_0001>

<bundles_post_ra>
// kernel: face_to_speaker_forward.2
= control target key start
LH: loop header
LB: loop body
LE: loop exit
PB: predicated region body
PF: predicated region fallthrough
CT: control target
= control target key end

     0   :  { %s11692_s12 = smov 0   ;;  %s15465_s0 = inlined_call_operand.vmem [shape: bf16[160,448], index: 0, kind: input, shape index: {}]   ;;  %s15466_s1 = inlined_call_operand.vmem [shape: bf16[3,1344,160], index: 1, kind: input, shape index: {}]   ;;  %s15467_s2 = inlined_call_operand.vmem [shape: u8[2,448,1344], index: 2, kind: input, shape index: {}]   ;;  %s15468_s3 = inlined_call_operand.vmem [shape: bf16[2,3,160,160], index: 3, kind: output, shape index: {}]  }
   0x1 LB: > { %s8611_s13 = sadd.s32 4294967295, %s11669_s12   ;;  %p8615_p0 = scmp.ge.s32.totalorder %s11669_s12, 1  ;;  %s11669_s12 = sphi %s11692_s12, %s13_s12  }
   0x2   : > { %p137_p1 = scmp.lt.s32.totalorder %s11669_s12, 3 }
   0x4   : > { %p138_p2 = pnand %p8615_p0, %p137_p1 }
   0x6   : > { %141 = sbr.rel (%p138_p2) target bundleno = 1564 (0x61c), region = 32 }
   0xd   : > { %p161_p3 = scmp.lt.s32.totalorder %s8611_s13, 1  ;;  %v10765_v0 = vld [vmem:[%s15465_s0 + $0xc] ss:$16 sps:$4 sm:$0xff]   ;;  %vm864_vm0 = vcmask 523264   ;;  %v10771_v1 = vld [vmem:[%s15465_s0 + $0x4] ss:$16 sps:$4 sm:$0xff]  }
   0xe   : > { %8658 = vmatprep.mubr.msk.bf16.mxu0 %vm864_vm0, %v10765_v0  ;;  %927 = vmatprep.mubr.bf16.mxu1 %v10771_v1  ;;  %vm4557_vm1 = vcmask 1043456   ;;  %vm4558_vm2 = vcmask 261124  }
   0xf   : > { %s15924_s13 = smov (!%p161_p3, %s8611_s13), 1  ;;  %vm14816_vm3 = vmor %vm4558_vm2, %vm4557_vm1 }
  0x10   : > { %s10754_s18 = smul.u32 1232, %s15924_s13 }
  0x11   : > { %s10755_s14 = smul.u32 480, %s15924_s13 }
  0x12   : > { %s11713_s21 = scalar_lea.vmem %s15467_s2, %s10754_s18 }
  0x13   : > { %v213_v2 = vld [vmem:[%s11713_s21 + $0x8] sm:$0xff]  ;;  %v212_v4 = vld [vmem:[%s11713_s21] sm:$0xff]  ;;  %v223_v18 = vld [vmem:[%s11713_s21 + $0x58] sm:$0xff]  ;;  %s14814_s13 = scalar_lea.vmem %s15468_s3, %s10755_s14 }
  0x14   : > { %v301_v3 = vld [vmem:[%s11713_s21 + $0x2c8] sm:$0xff]  ;;  %v367_v5 = vunpack.c.l.u8.bf16 %v213_v2  ;;  %v378_v6 = vunpack.c.h.u8.bf16 %v213_v2  ;;  %v300_v9 = vld [vmem:[%s11713_s21 + $0x2c0] sm:$0xff]  ;;  %v366_v10 = vunpack.c.l.u8.bf16 %v212_v4  ;;  %v377_v14 = vunpack.c.h.u8.bf16 %v212_v4  ;;  %v311_v19 = vld [vmem:[%s11713_s21 + $0x318] sm:$0xff] }
  0x15   : > { %v543_v7 = vunpack.c.l.u8.bf16 %v301_v3  ;;  %v554_v8 = vunpack.c.h.u8.bf16 %v301_v3  ;;  %v542_v11 = vunpack.c.l.u8.bf16 %v300_v9  ;;  %v224_v12 = vld [vmem:[%s11713_s21 + $0x60] sm:$0xff]  ;;  %v553_v15 = vunpack.c.h.u8.bf16 %v300_v9  ;;  %v235_v24 = vld [vmem:[%s11713_s21 + $0xb8] sm:$0xff]  ;;  %v234_v30 = vld [vmem:[%s11713_s21 + $0xb0] sm:$0xff] }
  0x16   : > { %v312_v13 = vld [vmem:[%s11713_s21 + $0x320] sm:$0xff]  ;;  %895 = vmatprep.subr.bf16.mxu1 %v367_v5  ;;  %v389_v16 = vunpack.c.l.u8.bf16 %v224_v12  ;;  %v388_v20 = vunpack.c.l.u8.bf16 %v223_v18  ;;  %v564_v21 = vunpack.c.l.u8.bf16 %v311_v19  ;;  %v400_v22 = vunpack.c.h.u8.bf16 %v224_v12  ;;  %v323_v25 = vld [vmem:[%s11713_s21 + $0x378] sm:$0xff]  ;;  %v322_v31 = vld [vmem:[%s11713_s21 + $0x370] sm:$0xff] }
  0x17   : > { %1028 = vmatprep.subr.bf16.mxu0 %v543_v7  ;;  %896 = vmatpush1.bf16.msra.mxu1 %v366_v10  ;;  %v565_v17 = vunpack.c.l.u8.bf16 %v312_v13  ;;  %v576_v23 = vunpack.c.h.u8.bf16 %v312_v13  ;;  %v399_v26 = vunpack.c.h.u8.bf16 %v223_v18  ;;  %v575_v27 = vunpack.c.h.u8.bf16 %v311_v19  ;;  %v246_v36 = vld [vmem:[%s11713_s21 + $0x110] sm:$0xff]  ;;  %v245_v42 = vld [vmem:[%s11713_s21 + $0x108] sm:$0xff]  ;;  %v256_v54 = vld [vmem:[%s11713_s21 + $0x160] sm:$0xff] }
  0x18   : > { %1029 = vmatpush1.bf16.msra.mxu0 %v542_v11  ;;  %897 = vmatprep.subr.bf16.mxu1 %v378_v6  ;;  %v411_v28 = vunpack.c.l.u8.bf16 %v235_v24  ;;  %v587_v29 = vunpack.c.l.u8.bf16 %v323_v25  ;;  %v410_v32 = vunpack.c.l.u8.bf16 %v234_v30  ;;  %v586_v33 = vunpack.c.l.u8.bf16 %v322_v31  ;;  %v334_v37 = vld [vmem:[%s11713_s21 + $0x3d0] sm:$0xff]  ;;  %v333_v43 = vld [vmem:[%s11713_s21 + $0x3c8] sm:$0xff]  ;;  %v344_v55 = vld [vmem:[%s11713_s21 + $0x420] sm:$0xff] }
  0x19   : > { %1030 = vmatprep.subr.bf16.mxu0 %v554_v8  ;;  %v422_v34 = vunpack.c.h.u8.bf16 %v235_v24  ;;  %v598_v35 = vunpack.c.h.u8.bf16 %v323_v25  ;;  %v421_v38 = vunpack.c.h.u8.bf16 %v234_v30  ;;  %v597_v39 = vunpack.c.h.u8.bf16 %v322_v31  ;;  %v257_v48 = vld [vmem:[%s11713_s21 + $0x168] sm:$0xff]  ;;  %v268_v60 = vld [vmem:[%s11713_s21 + $0x1c0] sm:$0xff]  ;;  %v267_v2 = vld [vmem:[%s11713_s21 + $0x1b8] sm:$0xff] }
  0x1a   : > { %v433_v40 = vunpack.c.l.u8.bf16 %v246_v36  ;;  %v609_v41 = vunpack.c.l.u8.bf16 %v334_v37  ;;  %v432_v44 = vunpack.c.l.u8.bf16 %v245_v42  ;;  %v608_v45 = vunpack.c.l.u8.bf16 %v333_v43  ;;  %v345_v49 = vld [vmem:[%s11713_s21 + $0x428] sm:$0xff]  ;;  %v356_v61 = vld [vmem:[%s11713_s21 + $0x480] sm:$0xff]  ;;  %v355_v3 = vld [vmem:[%s11713_s21 + $0x478] sm:$0xff] }
  0x1b   : > { %898 = vmatpush1.bf16.msra.mxu1 %v377_v14  ;;  %v444_v46 = vunpack.c.h.u8.bf16 %v246_v36  ;;  %v620_v47 = vunpack.c.h.u8.bf16 %v334_v37  ;;  %v443_v50 = vunpack.c.h.u8.bf16 %v245_v42  ;;  %v619_v51 = vunpack.c.h.u8.bf16 %v333_v43  ;;  %v279_v8 = vld [vmem:[%s11713_s21 + $0x218] sm:$0xff]  ;;  %v305_v9 = vld [vmem:[%s11713_s21 + $0x2e8] sm:$0xff]  ;;  %v278_v10 = vld [vmem:[%s11713_s21 + $0x210] sm:$0xff] }
  0x1c   : > { %1031 = vmatpush1.bf16.msra.mxu0 %v553_v15  ;;  %899 = vmatprep.subr.bf16.mxu1 %v389_v16  ;;  %v455_v52 = vunpack.c.l.u8.bf16 %v257_v48  ;;  %v631_v53 = vunpack.c.l.u8.bf16 %v345_v49  ;;  %v454_v56 = vunpack.c.l.u8.bf16 %v256_v54  ;;  %v630_v57 = vunpack.c.l.u8.bf16 %v344_v55  ;;  %v304_v13 = vld [vmem:[%s11713_s21 + $0x2e0] sm:$0xff]  ;;  %v11746_v15 = vld [vmem:[%s15465_s0 + $0x8] ss:$16 sps:$4 sm:$0xff]   ;;  %v290_v19 = vld [vmem:[%s11713_s21 + $0x270] sm:$0xff] }
  0x1d   : > { %1032 = vmatprep.subr.bf16.mxu0 %v565_v17  ;;  %v466_v58 = vunpack.c.h.u8.bf16 %v257_v48  ;;  %v642_v59 = vunpack.c.h.u8.bf16 %v345_v49  ;;  %v465_v62 = vunpack.c.h.u8.bf16 %v256_v54  ;;  %v641_v63 = vunpack.c.h.u8.bf16 %v344_v55  ;;  %v11751_v17 = vld [vmem:[%s15465_s0 + $0x2c] ss:$16 sps:$4 sm:$0xff]   ;;  %v214_v37 = vld [vmem:[%s11713_s21 + $0x10] sm:$0xff] }
  0x1e   : > { %v477_v0 = vunpack.c.l.u8.bf16 %v268_v60  ;;  %v653_v1 = vunpack.c.l.u8.bf16 %v356_v61  ;;  %v476_v4 = vunpack.c.l.u8.bf16 %v267_v2  ;;  %v652_v5 = vunpack.c.l.u8.bf16 %v355_v3  ;;  %v289_v24 = vld [vmem:[%s11713_s21 + $0x268] sm:$0xff]  ;;  %v11807_v55 = vld [vmem:[%s15465_s0 + $0x20] ss:$16 sps:$4 sm:$0xff]  }
  0x1f   : > { %900 = vmatpush1.bf16.msra.mxu1 %v388_v20  ;;  %v488_v6 = vunpack.c.h.u8.bf16 %v268_v60  ;;  %v664_v7 = vunpack.c.h.u8.bf16 %v356_v61  ;;  %v487_v11 = vunpack.c.h.u8.bf16 %v267_v2  ;;  %v663_v12 = vunpack.c.h.u8.bf16 %v355_v3  ;;  %v11795_v48 = vld [vmem:[%s15465_s0 + $0x6c] ss:$16 sps:$4 sm:$0xff]   ;;  %v236_v3 = vld [vmem:[%s11713_s21 + $0xc0] sm:$0xff] }
  0x20   : > { %1033 = vmatpush1.bf16.msra.mxu0 %v564_v21  ;;  %901 = vmatprep.subr.bf16.mxu1 %v400_v22  ;;  %v499_v14 = vunpack.c.l.u8.bf16 %v279_v8  ;;  %v547_v16 = vunpack.c.l.u8.bf16 %v305_v9  ;;  %v498_v18 = vunpack.c.l.u8.bf16 %v278_v10  ;;  %v510_v20 = vunpack.c.h.u8.bf16 %v279_v8  ;;  %v316_v22 = vld [vmem:[%s11713_s21 + $0x340] sm:$0xff]  ;;  %v225_v54 = vld [vmem:[%s11713_s21 + $0x68] sm:$0xff] }
  0x21   : > { %1034 = vmatprep.subr.bf16.mxu0 %v576_v23  ;;  %v546_v21 = vunpack.c.l.u8.bf16 %v304_v13  ;;  %v558_v23 = vunpack.c.h.u8.bf16 %v305_v9  ;;  %v509_v25 = vunpack.c.h.u8.bf16 %v278_v10  ;;  %v569_v30 = vunpack.c.l.u8.bf16 %v316_v22  ;;  %v11823_v61 = vld [vmem:[%s15465_s0 + $0x8c] ss:$16 sps:$4 sm:$0xff]   ;;  %v11841_v8 = vld [vmem:[%s15465_s0 + $0x88] ss:$16 sps:$4 sm:$0xff]   ;;  %v11846_v10 = vld [vmem:[%s15465_s0 + $0x64] ss:$16 sps:$4 sm:$0xff]  }
  0x22   : > { %v520_v31 = vunpack.c.l.u8.bf16 %v289_v24  ;;  %v580_v36 = vunpack.c.h.u8.bf16 %v316_v22  ;;  %v247_v22 = vld [vmem:[%s11713_s21 + $0x118] sm:$0xff] }
  0x23   : > { %902 = vmatpush1.bf16.msra.mxu1 %v399_v26  ;;  %v315_v26 = vld [vmem:[%s11713_s21 + $0x338] sm:$0xff] }
  0x24   : > { %1035 = vmatpush1.bf16.msra.mxu0 %v575_v27  ;;  %903 = vmatprep.subr.bf16.mxu1 %v411_v28  ;;  %v521_v27 = vunpack.c.l.u8.bf16 %v290_v19  ;;  %v11763_v28 = vld [vmem:[%s15465_s0 + $0x28] ss:$16 sps:$4 sm:$0xff]   ;;  %v579_v43 = vunpack.c.h.u8.bf16 %v315_v26 }
  0x25   : > { %1036 = vmatprep.subr.bf16.mxu0 %v587_v29  ;;  %v557_v29 = vunpack.c.h.u8.bf16 %v304_v13  ;;  %v412_v13 = vunpack.c.l.u8.bf16 %v236_v3 }
  0x27   : > { %904 = vmatpush1.bf16.msra.mxu1 %v410_v32  ;;  %v11768_v32 = vld [vmem:[%s15465_s0 + $0x4c] ss:$16 sps:$4 sm:$0xff]  }
  0x28   : > { %1037 = vmatpush1.bf16.msra.mxu0 %v586_v33  ;;  %905 = vmatprep.subr.bf16.mxu1 %v422_v34  ;;  %v532_v33 = vunpack.c.h.u8.bf16 %v290_v19  ;;  %v215_v34 = vld [vmem:[%s11713_s21 + $0x18] sm:$0xff] }
  0x29   : > { %1038 = vmatprep.subr.bf16.mxu0 %v598_v35  ;;  %v568_v35 = vunpack.c.l.u8.bf16 %v315_v26  ;;  %v369_v42 = vunpack.c.l.u8.bf16 %v215_v34  ;;  %v380_v49 = vunpack.c.h.u8.bf16 %v215_v34  ;;  %v11875_v26 = vld [vmem:[%s15465_s0 + $0x84] ss:$16 sps:$4 sm:$0xff]  }
  0x2b   : > { %906 = vmatpush1.bf16.msra.mxu1 %v421_v38  ;;  %v327_v38 = vld [vmem:[%s11713_s21 + $0x398] sm:$0xff] }
  0x2c   : > { %1039 = vmatpush1.bf16.msra.mxu0 %v597_v39  ;;  %907 = vmatprep.subr.bf16.mxu1 %v433_v40  ;;  %v531_v39 = vunpack.c.h.u8.bf16 %v289_v24  ;;  %v11779_v40 = vld [vmem:[%s15465_s0] ss:$16 sps:$4 sm:$0xff]   ;;  %v11870_v24 = vld [vmem:[%s15465_s0 + $0xa8] ss:$16 sps:$4 sm:$0xff]  }
  0x2d   : > { %1040 = vmatprep.subr.bf16.mxu0 %v609_v41  ;;  %v11784_v41 = vld [vmem:[%s15465_s0 + $0x48] ss:$16 sps:$4 sm:$0xff]  }
  0x2f   : > { %908 = vmatpush1.bf16.msra.mxu1 %v432_v44  ;;  %v326_v44 = vld [vmem:[%s11713_s21 + $0x390] sm:$0xff] }
  0x30   : > { %1041 = vmatpush1.bf16.msra.mxu0 %v608_v45  ;;  %909 = vmatprep.subr.bf16.mxu1 %v444_v46  ;;  %v11790_v45 = vld [vmem:[%s15465_s0 + $0x24] ss:$16 sps:$4 sm:$0xff]   ;;  %v591_v46 = vunpack.c.l.u8.bf16 %v327_v38  ;;  %v601_v60 = vunpack.c.h.u8.bf16 %v326_v44 }
  0x31   : > { %1042 = vmatprep.subr.bf16.mxu0 %v620_v47  ;;  %v368_v47 = vunpack.c.l.u8.bf16 %v214_v37 }
  0x33   : > { %910 = vmatpush1.bf16.msra.mxu1 %v443_v50  ;;  %v226_v50 = vld [vmem:[%s11713_s21 + $0x70] sm:$0xff] }
  0x34   : > { %1043 = vmatpush1.bf16.msra.mxu0 %v619_v51  ;;  %911 = vmatprep.subr.bf16.mxu1 %v455_v52  ;;  %v590_v51 = vunpack.c.l.u8.bf16 %v326_v44  ;;  %v602_v52 = vunpack.c.h.u8.bf16 %v327_v38  ;;  %v445_v44 = vunpack.c.h.u8.bf16 %v247_v22 }
  0x35   : > { %1044 = vmatprep.subr.bf16.mxu0 %v631_v53  ;;  %v379_v53 = vunpack.c.h.u8.bf16 %v214_v37 }
  0x37   : > { %912 = vmatpush1.bf16.msra.mxu1 %v454_v56  ;;  %v11812_v56 = vld [vmem:[%s15465_s0 + $0x68] ss:$16 sps:$4 sm:$0xff]  }
  0x38   : > { %1045 = vmatpush1.bf16.msra.mxu0 %v630_v57  ;;  %913 = vmatprep.subr.bf16.mxu1 %v466_v58  ;;  %v391_v57 = vunpack.c.l.u8.bf16 %v226_v50  ;;  %v338_v58 = vld [vmem:[%s11713_s21 + $0x3f0] sm:$0xff] }
  0x39   : > { %1046 = vmatprep.subr.bf16.mxu0 %v642_v59  ;;  %v11818_v59 = vld [vmem:[%s15465_s0 + $0x44] ss:$16 sps:$4 sm:$0xff]   ;;  %v613_v2 = vunpack.c.l.u8.bf16 %v338_v58 }
  0x3b   : > { %914 = vmatpush1.bf16.msra.mxu1 %v465_v62  ;;  %v390_v62 = vunpack.c.l.u8.bf16 %v225_v54 }
  0x3c   : > { %1047 = vmatpush1.bf16.msra.mxu0 %v641_v63  ;;  %915 = vmatprep.subr.bf16.mxu1 %v477_v0  ;;  %v337_v63 = vld [vmem:[%s11713_s21 + $0x3e8] sm:$0xff]  ;;  %v402_v0 = vunpack.c.h.u8.bf16 %v226_v50 }
  0x3d   : > { %1048 = vmatprep.subr.bf16.mxu0 %v653_v1  ;;  %v237_v1 = vld [vmem:[%s11713_s21 + $0xc8] sm:$0xff] }
  0x3e   : > { %v413_v9 = vunpack.c.l.u8.bf16 %v237_v1 }
  0x3f   : > { %916 = vmatpush1.bf16.msra.mxu1 %v476_v4  ;;  %v612_v4 = vunpack.c.l.u8.bf16 %v337_v63 }
  0x40   : > { %1049 = vmatpush1.bf16.msra.mxu0 %v652_v5  ;;  %917 = vmatprep.subr.bf16.mxu1 %v488_v6  ;;  %v401_v5 = vunpack.c.h.u8.bf16 %v225_v54  ;;  %v624_v6 = vunpack.c.h.u8.bf16 %v338_v58  ;;  %v270_v58 = vld [vmem:[%s11713_s21 + $0x1d0] sm:$0xff] }
  0x41   : > { %1050 = vmatprep.subr.bf16.mxu0 %v664_v7  ;;  %v11836_v7 = vld [vmem:[%s15465_s0 + $0x40] ss:$16 sps:$4 sm:$0xff]  }
  0x43   : > { %918 = vmatpush1.bf16.msra.mxu1 %v487_v11  ;;  %v349_v11 = vld [vmem:[%s11713_s21 + $0x448] sm:$0xff] }
  0x44   : > { %1051 = vmatpush1.bf16.msra.mxu0 %v663_v12  ;;  %919 = vmatprep.subr.bf16.mxu1 %v499_v14  ;;  %v11852_v12 = vld [vmem:[%s15465_s0 + $0xac] ss:$16 sps:$4 sm:$0xff]   ;;  %v248_v14 = vld [vmem:[%s11713_s21 + $0x120] sm:$0xff]  ;;  %v635_v19 = vunpack.c.l.u8.bf16 %v349_v11  ;;  %v646_v34 = vunpack.c.h.u8.bf16 %v349_v11 }
  0x45   : > { %1560 = vmatprep.subr.bf16.mxu0 %v547_v16  ;;  %v424_v16 = vunpack.c.h.u8.bf16 %v237_v1  ;;  %v280_v11 = vld [vmem:[%s11713_s21 + $0x220] sm:$0xff] }
  0x47   : > { %1061 = vmatmul.mubr.bf16.vlgmr.msra.gmra.mrb[0].mxu0 %v11746_v15  ;;  %920 = vmatpush1.bf16.msra.mxu1 %v498_v18  ;;  %v623_v18 = vunpack.c.h.u8.bf16 %v337_v63  ;;  %v11925_v63 = vld [vmem:[%s15465_s0 + $0xa0] ss:$16 sps:$4 sm:$0xff]  }
  0x48   : > { %8659 = vmatprep.mubr.msk.bf16.mxu0 %vm864_vm0, %v11751_v17  ;;  %921 = vmatprep.subr.bf16.mxu1 %v510_v20  ;;  %v348_v20 = vld [vmem:[%s11713_s21 + $0x440] sm:$0xff] }
  0x49   : > { %1561 = vmatpush1.bf16.msra.mxu0 %v546_v21  ;;  %v423_v21 = vunpack.c.h.u8.bf16 %v236_v3  ;;  %v645_v37 = vunpack.c.h.u8.bf16 %v348_v20  ;;  %v11940_v3 = vld [vmem:[%s15465_s0 + $0x10c] ss:$16 sps:$4 sm:$0xff]  }
  0x4a   : > { %1562 = vmatprep.subr.bf16.mxu0 %v558_v23  ;;  %v11865_v23 = vld [vmem:[%s15465_s0 + $0x60] ss:$16 sps:$4 sm:$0xff]  }
  0x4b   : > { %922 = vmatpush1.bf16.msra.mxu1 %v509_v25  ;;  %v435_v25 = vunpack.c.l.u8.bf16 %v248_v14 }
  0x4c   : > { %923 = vmatprep.subr.bf16.mxu1 %v521_v27  ;;  %v11880_v27 = vld [vmem:[%s15465_s0 + $0xcc] ss:$16 sps:$4 sm:$0xff]  }
  0x4d   : > { %1563 = vmatpush1.bf16.msra.mxu0 %v557_v29  ;;  %v634_v29 = vunpack.c.l.u8.bf16 %v348_v20  ;;  %v11967_v20 = vld [vmem:[%s15465_s0 + $0x12c] ss:$16 sps:$4 sm:$0xff]  }
  0x4e   : > { %1564 = vmatprep.subr.bf16.mxu0 %v569_v30  ;;  %v360_v30 = vld [vmem:[%s11713_s21 + $0x4a0] sm:$0xff] }
  0x4f   : > { %1071 = vmatmul.mubr.bf16.gmra.mrb[4].mxu0 %v11763_v28  ;;  %924 = vmatpush1.bf16.msra.mxu1 %v520_v31  ;;  %v434_v31 = vunpack.c.l.u8.bf16 %v247_v22  ;;  %v657_v38 = vunpack.c.l.u8.bf16 %v360_v30 }
  0x50   : > { %8660 = vmatprep.mubr.msk.bf16.mxu0 %vm864_vm0, %v11768_v32  ;;  %925 = vmatprep.subr.bf16.mxu1 %v532_v33  ;;  %v259_v33 = vld [vmem:[%s11713_s21 + $0x178] sm:$0xff] }
  0x51   : > { %1565 = vmatpush1.bf16.msra.mxu0 %v568_v35  ;;  %v359_v35 = vld [vmem:[%s11713_s21 + $0x498] sm:$0xff]  ;;  %v468_v54 = vunpack.c.h.u8.bf16 %v259_v33 }
  0x52   : > { %1566 = vmatprep.subr.bf16.mxu0 %v580_v36  ;;  %v446_v36 = vunpack.c.h.u8.bf16 %v248_v14  ;;  %v656_v50 = vunpack.c.l.u8.bf16 %v359_v35  ;;  %v11957_v14 = vld [vmem:[%s15465_s0 + $0x108] ss:$16 sps:$4 sm:$0xff]  }
  0x53   : > { %926 = vmatpush1.bf16.msra.mxu1 %v531_v39  ;;  %v258_v39 = vld [vmem:[%s11713_s21 + $0x170] sm:$0xff] }
  0x54   : > { %1161 = vmatprep.subr.bf16.mxu1 %v369_v42  ;;  %v11894_v42 = vld [vmem:[%s15465_s0 + $0x80] ss:$16 sps:$4 sm:$0xff]   ;;  %v467_v1 = vunpack.c.h.u8.bf16 %v258_v39 }
  0x55   : > { %1567 = vmatpush1.bf16.msra.mxu0 %v579_v43  ;;  %v11899_v43 = vld [vmem:[%s15465_s0 + $0xc8] ss:$16 sps:$4 sm:$0xff]  }
  0x56   : > { %1568 = vmatprep.subr.bf16.mxu0 %v591_v46  ;;  %928 = vmatmul.mubr.bf16.vlgmr.msra.gmra.mrb[0].mxu1 %v11779_v40  ;;  %v11904_v46 = vld [vmem:[%s15465_s0 + $0xa4] ss:$16 sps:$4 sm:$0xff]  }
  0x57   : > { %1081 = vmatmul.mubr.bf16.gmra.mrb[8].mxu0 %v11784_v41  ;;  %1162 = vmatpush1.bf16.msra.mxu1 %v368_v47  ;;  %v11909_v47 = vld [vmem:[%s15465_s0 + $0xec] ss:$16 sps:$4 sm:$0xff]  }
  0x58   : > { %937 = vmatprep.mubr.bf16.mxu1 %v11790_v45  ;;  %1163 = vmatprep.subr.bf16.mxu1 %v380_v49  ;;  %v457_v49 = vunpack.c.l.u8.bf16 %v259_v33  ;;  %v511_v33 = vunpack.c.h.u8.bf16 %v280_v11 }
  0x59   : > { %8661 = vmatprep.mubr.msk.bf16.mxu0 %vm864_vm0, %v11795_v48  ;;  %1569 = vmatpush1.bf16.msra.mxu0 %v590_v51  ;;  %v11912_v51 = vld [vmem:[%s11713_s21 + $0x48] sm:$0xff] }
  0x5a   : > { %1570 = vmatprep.subr.bf16.mxu0 %v602_v52  ;;  %v456_v52 = vunpack.c.l.u8.bf16 %v258_v39  ;;  %v11998_v39 = vld [vmem:[%s15465_s0 + $0xc] ss:$16 sps:$4 sm:$0xff]  }
  0x5b   : > { %1164 = vmatpush1.bf16.msra.mxu1 %v379_v53  ;;  %v668_v53 = vunpack.c.h.u8.bf16 %v360_v30  ;;  %v11979_v30 = vld [vmem:[%s15465_s0 + $0xe0] ss:$16 sps:$4 sm:$0xff]  }
  0x5c   : > { %1165 = vmatprep.subr.bf16.mxu1 %v391_v57  ;;  %v667_v57 = vunpack.c.h.u8.bf16 %v359_v35  ;;  %v11989_v35 = vld [vmem:[%s15465_s0 + $0x104] ss:$16 sps:$4 sm:$0xff]  }
  0x5d   : > { %1571 = vmatpush1.bf16.msra.mxu0 %v601_v60  ;;  %v375_v60 = vunpack.c.l.u8.bf16 %v11912_v51 }
  0x5e   : > { %938 = vmatmul.mubr.bf16.gmra.mrb[4].mxu1 %v11807_v55  ;;  %1572 = vmatprep.subr.bf16.mxu0 %v613_v2  ;;  %v11935_v2 = vld [vmem:[%s15465_s0 + $0xc4] ss:$16 sps:$4 sm:$0xff]  }
  0x5f   : > { %1091 = vmatmul.mubr.bf16.gmra.mrb[12].mxu0 %v11812_v56  ;;  %1166 = vmatpush1.bf16.msra.mxu1 %v390_v62  ;;  %v269_v62 = vld [vmem:[%s11713_s21 + $0x1c8] sm:$0xff] }
  0x60   : > { %947 = vmatprep.mubr.bf16.mxu1 %v11818_v59  ;;  %8662 = vmatprep.mubr.msk.bf16.mxu0 %vm864_vm0, %v11823_v61 }
  0x61   : > { %1167 = vmatprep.subr.bf16.mxu1 %v402_v0  ;;  %1573 = vmatpush1.bf16.msra.mxu0 %v612_v4  ;;  %v11930_v0 = vld [vmem:[%s15465_s0 + $0xe8] ss:$16 sps:$4 sm:$0xff]   ;;  %v479_v4 = vunpack.c.l.u8.bf16 %v270_v58 }
  0x62   : > { %1574 = vmatprep.subr.bf16.mxu0 %v624_v6  ;;  %v490_v6 = vunpack.c.h.u8.bf16 %v270_v58  ;;  %v386_v58 = vunpack.c.h.u8.bf16 %v11912_v51 }
  0x63   : > { %1168 = vmatpush1.bf16.msra.mxu1 %v401_v5  ;;  %v478_v5 = vunpack.c.l.u8.bf16 %v269_v62 }
  0x64   : > { %1169 = vmatprep.subr.bf16.mxu1 %v413_v9  ;;  %v281_v9 = vld [vmem:[%s11713_s21 + $0x228] sm:$0xff] }
  0x65   : > { %1575 = vmatpush1.bf16.msra.mxu0 %v623_v18  ;;  %v11962_v18 = vld [vmem:[%s15465_s0 + $0xe4] ss:$16 sps:$4 sm:$0xff]   ;;  %v512_v22 = vunpack.c.h.u8.bf16 %v281_v9 }
  0x66   : > { %948 = vmatmul.mubr.bf16.gmra.mrb[8].mxu1 %v11836_v7  ;;  %1576 = vmatprep.subr.bf16.mxu0 %v635_v19  ;;  %v501_v19 = vunpack.c.l.u8.bf16 %v281_v9 }
  0x67   : > { %1101 = vmatmul.mubr.bf16.gmra.mrb[16].mxu0 %v11841_v8  ;;  %1170 = vmatpush1.bf16.msra.mxu1 %v412_v13  ;;  %v11952_v13 = vld [vmem:[%s15465_s0 + $0xc0] ss:$16 sps:$4 sm:$0xff]  }
  0x68   : > { %957 = vmatprep.mubr.bf16.mxu1 %v11846_v10  ;;  %8663 = vmatprep.mubr.msk.bf16.mxu0 %vm864_vm0, %v11852_v12 }
  0x69   : > { %1171 = vmatprep.subr.bf16.mxu1 %v424_v16  ;;  %1577 = vmatpush1.bf16.msra.mxu0 %v634_v29  ;;  %v489_v16 = vunpack.c.h.u8.bf16 %v269_v62  ;;  %v291_v29 = vld [vmem:[%s11713_s21 + $0x278] sm:$0xff]  ;;  %v12024_v62 = vld [vmem:[%s15465_s0 + $0x120] ss:$16 sps:$4 sm:$0xff]  }
  0x6a   : > { %1578 = vmatprep.subr.bf16.mxu0 %v646_v34 }
  0x6b   : > { %1172 = vmatpush1.bf16.msra.mxu1 %v423_v21  ;;  %v500_v21 = vunpack.c.l.u8.bf16 %v280_v11  ;;  %v242_v11 = vld [vmem:[%s11713_s21 + $0xf0] sm:$0xff] }
  0x6c   : > { %1173 = vmatprep.subr.bf16.mxu1 %v435_v25  ;;  %v292_v25 = vld [vmem:[%s11713_s21 + $0x280] sm:$0xff] }
  0x6d   : > { %1579 = vmatpush1.bf16.msra.mxu0 %v645_v37  ;;  %v523_v34 = vunpack.c.l.u8.bf16 %v292_v25  ;;  %v534_v37 = vunpack.c.h.u8.bf16 %v292_v25  ;;  %v313_v25 = vld [vmem:[%s11713_s21 + $0x328] sm:$0xff] }
  0x6e   : > { %958 = vmatmul.mubr.bf16.gmra.mrb[12].mxu1 %v11865_v23  ;;  %1580 = vmatprep.subr.bf16.mxu0 %v657_v38  ;;  %v303_v38 = vld [vmem:[%s11713_s21 + $0x2d8] sm:$0xff] }
  0x6f   : > { %1111 = vmatmul.mubr.bf16.gmra.mrb[20].mxu0 %v11870_v24  ;;  %967 = vmatprep.mubr.bf16.mxu1 %v11875_v26 }
  0x70   : > { %8664 = vmatprep.mubr.msk.bf16.mxu0 %vm864_vm0, %v11880_v27  ;;  %1174 = vmatpush1.bf16.msra.mxu1 %v434_v31  ;;  %v11984_v31 = vld [vmem:[%s15465_s0 + $0x128] ss:$16 sps:$4 sm:$0xff]  }
  0x71   : > { %1175 = vmatprep.subr.bf16.mxu1 %v446_v36  ;;  %1581 = vmatpush1.bf16.msra.mxu0 %v656_v50  ;;  %v522_v36 = vunpack.c.l.u8.bf16 %v291_v29  ;;  %v533_v50 = vunpack.c.h.u8.bf16 %v291_v29 }
  0x72   : > { %1582 = vmatprep.subr.bf16.mxu0 %v668_v53  ;;  %v12011_v53 = vld [vmem:[%s15465_s0 + $0x124] ss:$16 sps:$4 sm:$0xff]  }
  0x74   : > { %1176 = vmatpush1.bf16.msra.mxu1 %v445_v44  ;;  %v220_v44 = vld [vmem:[%s11713_s21 + $0x40] sm:$0xff] }
  0x75   : > { %1177 = vmatprep.subr.bf16.mxu1 %v457_v49  ;;  %1583 = vmatpush1.bf16.msra.mxu0 %v667_v57  ;;  %v12006_v49 = vld [vmem:[%s15465_s0 + $0x100] ss:$16 sps:$4 sm:$0xff]  }
  0x76   : > { %968 = vmatmul.mubr.bf16.gmra.mrb[16].mxu1 %v11894_v42  ;;  %1959 = vmatprep.subr.bf16.mxu0 %v375_v60  ;;  %v232_v57 = vld [vmem:[%s11713_s21 + $0xa0] sm:$0xff]  ;;  %v231_v60 = vld [vmem:[%s11713_s21 + $0x98] sm:$0xff] }
  0x77   : > { %1121 = vmatmul.mubr.bf16.gmra.mrb[24].mxu0 %v11899_v43  ;;  %977 = vmatprep.mubr.bf16.mxu1 %v11904_v46  ;;  %v397_v51 = vunpack.c.l.u8.bf16 %v232_v57  ;;  %v407_v9 = vunpack.c.h.u8.bf16 %v231_v60 }
  0x78   : > { %8665 = vmatprep.mubr.msk.bf16.mxu0 %vm864_vm0, %v11909_v47  ;;  %1178 = vmatpush1.bf16.msra.mxu1 %v456_v52  ;;  %v545_v52 = vunpack.c.l.u8.bf16 %v303_v38 }
  0x79   : > { %1179 = vmatprep.subr.bf16.mxu1 %v468_v54  ;;  %v374_v54 = vunpack.c.l.u8.bf16 %v220_v44 }
  0x7c   : > { %1180 = vmatpush1.bf16.msra.mxu1 %v467_v1  ;;  %v385_v1 = vunpack.c.h.u8.bf16 %v220_v44  ;;  %v577_v44 = vunpack.c.h.u8.bf16 %v313_v25 }
  0x7d   : > { %1181 = vmatprep.subr.bf16.mxu1 %v479_v4  ;;  %v396_v4 = vunpack.c.l.u8.bf16 %v231_v60 }
  0x7e   : > { %978 = vmatmul.mubr.bf16.gmra.mrb[20].mxu1 %v11925_v63 }
  0x7f   : > { %1131 = vmatmul.mubr.bf16.gmra.mrb[28].mxu0 %v11930_v0  ;;  %987 = vmatprep.mubr.bf16.mxu1 %v11935_v2 }
  0x80   : > { %8666 = vmatprep.mubr.msk.bf16.mxu0 %vm864_vm0, %v11940_v3  ;;  %1182 = vmatpush1.bf16.msra.mxu1 %v478_v5  ;;  %v243_v5 = vld [vmem:[%s11713_s21 + $0xf8] sm:$0xff] }
  0x81   : > { %1183 = vmatprep.subr.bf16.mxu1 %v490_v6  ;;  %v12033_v6 = vld [vmem:[%s15465_s0 + $0x4] ss:$16 sps:$4 sm:$0xff]   ;;  %v430_v29 = vunpack.c.h.u8.bf16 %v243_v5 }
  0x84   : > { %1184 = vmatpush1.bf16.msra.mxu1 %v489_v16  ;;  %v419_v16 = vunpack.c.l.u8.bf16 %v243_v5 }
  0x85   : > { %1185 = vmatprep.subr.bf16.mxu1 %v501_v19 }
  0x86   : > { %988 = vmatmul.mubr.bf16.gmra.mrb[24].mxu1 %v11952_v13 }
  0x87   : > { %1141 = vmatmul.mubr.bf16.gmra.mrb[32].mxu0 %v11957_v14  ;;  %997 = vmatprep.mubr.bf16.mxu1 %v11962_v18 }
  0x88   : > { %8667 = vmatprep.mubr.msk.bf16.mxu0 %vm864_vm0, %v11967_v20  ;;  %1186 = vmatpush1.bf16.msra.mxu1 %v500_v21  ;;  %v314_v21 = vld [vmem:[%s11713_s21 + $0x330] sm:$0xff] }
  0x89   : > { %1187 = vmatprep.subr.bf16.mxu1 %v512_v22  ;;  %v418_v22 = vunpack.c.l.u8.bf16 %v242_v11 }
  0x8c   : > { %1188 = vmatpush1.bf16.msra.mxu1 %v511_v33  ;;  %v567_v33 = vunpack.c.l.u8.bf16 %v314_v21 }
  0x8d   : > { %1189 = vmatprep.subr.bf16.mxu1 %v523_v34  ;;  %v429_v34 = vunpack.c.h.u8.bf16 %v242_v11 }
  0x8e   : > { %998 = vmatmul.mubr.bf16.gmra.mrb[28].mxu1 %v11979_v30 }
  0x8f   : > { %1151 = vmatmul.mubr.bf16.gmra.mrb[36].mxu0 %v11984_v31  ;;  %1007 = vmatprep.mubr.bf16.mxu1 %v11989_v35 }
  0x90   : > { %8678 = vmatprep.mubr.msk.bf16.mxu0 %vm864_vm0, %v11998_v39  ;;  %1190 = vmatpush1.bf16.msra.mxu1 %v522_v36  ;;  %v566_v36 = vunpack.c.l.u8.bf16 %v313_v25 }
  0x91   : > { %1191 = vmatprep.subr.bf16.mxu1 %v534_v37  ;;  %v578_v37 = vunpack.c.h.u8.bf16 %v314_v21  ;;  %v287_v21 = vld [vmem:[%s11713_s21 + $0x258] sm:$0xff] }
  0x94   : > { %1192 = vmatpush1.bf16.msra.mxu1 %v533_v50  ;;  %v324_v50 = vld [vmem:[%s11713_s21 + $0x380] sm:$0xff] }
  0x95   : > { %1294 = vmatprep.subr.bf16.mxu1 %v545_v52 }
  0x96   : > { %1008 = vmatmul.mubr.bf16.gmra.mrb[32].mxu1 %v12006_v49 }
  0x97   : > { %1593 = vmatmul.mubr.bf16.vlgmr.msra.gmra.mrb[40].mxu0 %v11746_v15  ;;  %1017 = vmatprep.mubr.bf16.mxu1 %v12011_v53  ;;  %v408_v15 = vunpack.c.h.u8.bf16 %v232_v57  ;;  %v265_v57 = vld [vmem:[%s11713_s21 + $0x1a8] sm:$0xff] }
  0x98   : > { %8679 = vmatprep.mubr.msk.bf16.mxu0 %vm864_vm0, %v11751_v17  ;;  %1960 = vmatpush1.bf16.msra.mxu0 %v374_v54  ;;  %v302_v17 = vld [vmem:[%s11713_s21 + $0x2d0] sm:$0xff]  ;;  %v463_v60 = vunpack.c.l.u8.bf16 %v265_v57 }
  0x99   : > { %1961 = vmatprep.subr.bf16.mxu0 %v386_v58  ;;  %v544_v19 = vunpack.c.l.u8.bf16 %v302_v17  ;;  %v336_v58 = vld [vmem:[%s11713_s21 + $0x3e0] sm:$0xff] }
  0x9a   : > { %v611_v5 = vunpack.c.l.u8.bf16 %v336_v58  ;;  %v622_v11 = vunpack.c.h.u8.bf16 %v336_v58  ;;  %v330_v58 = vld [vmem:[%s11713_s21 + $0x3b0] sm:$0xff] }
  0x9c   : > { %1962 = vmatpush1.bf16.msra.mxu0 %v385_v1 }
  0x9d   : > { %1963 = vmatprep.subr.bf16.mxu0 %v397_v51 }
  0x9e   : > { %1018 = vmatmul.mubr.bf16.gmra.mrb[36].mxu1 %v12024_v62 }
  0x9f   : > { %1603 = vmatmul.mubr.bf16.gmra.mrb[44].mxu0 %v11763_v28  ;;  %1193 = vmatprep.mubr.bf16.mxu1 %v12033_v6  ;;  %v556_v28 = vunpack.c.h.u8.bf16 %v303_v38  ;;  %v325_v38 = vld [vmem:[%s11713_s21 + $0x388] sm:$0xff] }
  0xa0   : > { %8680 = vmatprep.mubr.msk.bf16.mxu0 %vm864_vm0, %v11768_v32  ;;  %1964 = vmatpush1.bf16.msra.mxu0 %v396_v4  ;;  %v555_v32 = vunpack.c.h.u8.bf16 %v302_v17  ;;  %v589_v54 = vunpack.c.l.u8.bf16 %v325_v38  ;;  %v600_v1 = vunpack.c.h.u8.bf16 %v325_v38  ;;  %v599_v4 = vunpack.c.h.u8.bf16 %v324_v50  ;;  %v297_v38 = vld [vmem:[%s11713_s21 + $0x2a8] sm:$0xff] }
  0xa1   : > { %1965 = vmatprep.subr.bf16.mxu0 %v408_v15  ;;  %v276_v15 = vld [vmem:[%s11713_s21 + $0x200] sm:$0xff]  ;;  %v474_v17 = vunpack.c.h.u8.bf16 %v265_v57  ;;  %v331_v57 = vld [vmem:[%s11713_s21 + $0x3b8] sm:$0xff] }
  0xa4   : > { %1966 = vmatpush1.bf16.msra.mxu0 %v407_v9  ;;  %v347_v9 = vld [vmem:[%s11713_s21 + $0x438] sm:$0xff] }
  0xa5   : > { %1967 = vmatprep.subr.bf16.mxu0 %v419_v16  ;;  %v346_v16 = vld [vmem:[%s11713_s21 + $0x430] sm:$0xff]  ;;  %v633_v25 = vunpack.c.l.u8.bf16 %v347_v9 }
  0xa6   : > { %1194 = vmatmul.mubr.bf16.vlgmr.msra.gmra.mrb[40].mxu1 %v11779_v40  ;;  %v254_v40 = vld [vmem:[%s11713_s21 + $0x150] sm:$0xff] }
  0xa7   : > { %1613 = vmatmul.mubr.bf16.gmra.mrb[48].mxu0 %v11784_v41  ;;  %1295 = vmatpush1.bf16.msra.mxu1 %v544_v19  ;;  %v253_v41 = vld [vmem:[%s11713_s21 + $0x148] sm:$0xff]  ;;  %v452_v52 = vunpack.c.h.u8.bf16 %v254_v40 }
  0xa8   : > { %1203 = vmatprep.mubr.bf16.mxu1 %v11790_v45  ;;  %1296 = vmatprep.subr.bf16.mxu1 %v556_v28  ;;  %v441_v45 = vunpack.c.l.u8.bf16 %v254_v40  ;;  %v643_v40 = vunpack.c.h.u8.bf16 %v346_v16 }
  0xa9   : > { %8681 = vmatprep.mubr.msk.bf16.mxu0 %vm864_vm0, %v11795_v48  ;;  %1968 = vmatpush1.bf16.msra.mxu0 %v418_v22  ;;  %v440_v48 = vunpack.c.l.u8.bf16 %v253_v41  ;;  %v496_v22 = vunpack.c.h.u8.bf16 %v276_v15 }
  0xaa   : > { %1969 = vmatprep.subr.bf16.mxu0 %v430_v29  ;;  %v507_v29 = vunpack.c.l.u8.bf16 %v287_v21 }
  0xab   : > { %1297 = vmatpush1.bf16.msra.mxu1 %v555_v32  ;;  %v358_v32 = vld [vmem:[%s11713_s21 + $0x490] sm:$0xff] }
  0xac   : > { %1298 = vmatprep.subr.bf16.mxu1 %v567_v33 }
  0xad   : > { %1970 = vmatpush1.bf16.msra.mxu0 %v429_v34  ;;  %v298_v34 = vld [vmem:[%s11713_s21 + $0x2b0] sm:$0xff] }
  0xae   : > { %1204 = vmatmul.mubr.bf16.gmra.mrb[44].mxu1 %v11807_v55  ;;  %1971 = vmatprep.subr.bf16.mxu0 %v441_v45  ;;  %v264_v55 = vld [vmem:[%s11713_s21 + $0x1a0] sm:$0xff]  ;;  %v12085_v45 = vld [vmem:[%s11713_s21 + $0x28] sm:$0xff] }
  0xaf   : > { %1623 = vmatmul.mubr.bf16.gmra.mrb[52].mxu0 %v11812_v56  ;;  %1213 = vmatprep.mubr.bf16.mxu1 %v11818_v59  ;;  %v588_v56 = vunpack.c.l.u8.bf16 %v324_v50  ;;  %v451_v59 = vunpack.c.h.u8.bf16 %v253_v41  ;;  %v462_v51 = vunpack.c.l.u8.bf16 %v264_v55  ;;  %v655_v41 = vunpack.c.l.u8.bf16 %v358_v32 }
  0xb0   : > { %1299 = vmatpush1.bf16.msra.mxu1 %v566_v36  ;;  %8682 = vmatprep.mubr.msk.bf16.mxu0 %vm864_vm0, %v11823_v61  ;;  %v335_v61 = vld [vmem:[%s11713_s21 + $0x3d8] sm:$0xff]  ;;  %v518_v36 = vunpack.c.h.u8.bf16 %v287_v21  ;;  %v540_v50 = vunpack.c.h.u8.bf16 %v298_v34 }
  0xb1   : > { %1300 = vmatprep.subr.bf16.mxu1 %v578_v37  ;;  %1972 = vmatpush1.bf16.msra.mxu0 %v440_v48  ;;  %v621_v28 = vunpack.c.h.u8.bf16 %v335_v61  ;;  %v357_v37 = vld [vmem:[%s11713_s21 + $0x488] sm:$0xff]  ;;  %v528_v48 = vunpack.c.l.u8.bf16 %v297_v38 }
  0xb2   : > { %1973 = vmatprep.subr.bf16.mxu0 %v452_v52  ;;  %v371_v52 = vunpack.c.l.u8.bf16 %v12085_v45 }
  0xb4   : > { %1301 = vmatpush1.bf16.msra.mxu1 %v577_v44  ;;  %v665_v44 = vunpack.c.h.u8.bf16 %v357_v37 }
  0xb5   : > { %1302 = vmatprep.subr.bf16.mxu1 %v589_v54  ;;  %1974 = vmatpush1.bf16.msra.mxu0 %v451_v59  ;;  %v309_v54 = vld [vmem:[%s11713_s21 + $0x308] sm:$0xff]  ;;  %v595_v59 = vunpack.c.l.u8.bf16 %v331_v57 }
  0xb6   : > { %1214 = vmatmul.mubr.bf16.gmra.mrb[48].mxu1 %v11836_v7  ;;  %1975 = vmatprep.subr.bf16.mxu0 %v463_v60  ;;  %v275_v7 = vld [vmem:[%s11713_s21 + $0x1f8] sm:$0xff] }
  0xb7   : > { %1633 = vmatmul.mubr.bf16.gmra.mrb[56].mxu0 %v11841_v8  ;;  %1223 = vmatprep.mubr.bf16.mxu1 %v11846_v10  ;;  %v473_v8 = vunpack.c.h.u8.bf16 %v264_v55  ;;  %v610_v10 = vunpack.c.l.u8.bf16 %v335_v61  ;;  %v484_v19 = vunpack.c.l.u8.bf16 %v275_v7  ;;  %v12133_v55 = vld [vmem:[%s15465_s0 + $0x44] ss:$16 sps:$4 sm:$0xff]  }
  0xb8   : > { %8683 = vmatprep.mubr.msk.bf16.mxu0 %vm864_vm0, %v11852_v12  ;;  %1303 = vmatpush1.bf16.msra.mxu1 %v588_v56  ;;  %v485_v12 = vunpack.c.l.u8.bf16 %v276_v15  ;;  %v216_v56 = vld [vmem:[%s11713_s21 + $0x20] sm:$0xff]  ;;  %v606_v15 = vunpack.c.h.u8.bf16 %v331_v57 }
  0xb9   : > { %1304 = vmatprep.subr.bf16.mxu1 %v600_v1  ;;  %1976 = vmatpush1.bf16.msra.mxu0 %v462_v51  ;;  %v370_v60 = vunpack.c.l.u8.bf16 %v216_v56  ;;  %v382_v1 = vunpack.c.h.u8.bf16 %v12085_v45  ;;  %v228_v61 = vld [vmem:[%s11713_s21 + $0x80] sm:$0xff]  ;;  %v12143_v51 = vld [vmem:[%s15465_s0 + $0x8] ss:$16 sps:$4 sm:$0xff]  }
  0xba   : > { %1977 = vmatprep.subr.bf16.mxu0 %v474_v17  ;;  %v381_v17 = vunpack.c.h.u8.bf16 %v216_v56  ;;  %v260_v56 = vld [vmem:[%s11713_s21 + $0x180] sm:$0xff] }
  0xbc   : > { %1305 = vmatpush1.bf16.msra.mxu1 %v599_v4  ;;  %v12149_v4 = vld [vmem:[%s15465_s0 + $0x40] ss:$16 sps:$4 sm:$0xff]  }
  0xbd   : > { %1306 = vmatprep.subr.bf16.mxu1 %v611_v5  ;;  %1978 = vmatpush1.bf16.msra.mxu0 %v473_v8  ;;  %v12155_v5 = vld [vmem:[%s15465_s0 + $0x2c] ss:$16 sps:$4 sm:$0xff]   ;;  %v12163_v8 = vld [vmem:[%s15465_s0 + $0x64] ss:$16 sps:$4 sm:$0xff]  }
  0xbe   : > { %1224 = vmatmul.mubr.bf16.gmra.mrb[52].mxu1 %v11865_v23  ;;  %1979 = vmatprep.subr.bf16.mxu0 %v485_v12  ;;  %v495_v23 = vunpack.c.h.u8.bf16 %v275_v7  ;;  %v227_v7 = vld [vmem:[%s11713_s21 + $0x78] sm:$0xff]  ;;  %v605_v12 = vunpack.c.h.u8.bf16 %v330_v58 }
  0xbf   : > { %1643 = vmatmul.mubr.bf16.gmra.mrb[60].mxu0 %v11870_v24  ;;  %1233 = vmatprep.mubr.bf16.mxu1 %v11875_v26  ;;  %v286_v24 = vld [vmem:[%s11713_s21 + $0x250] sm:$0xff]  ;;  %v632_v26 = vunpack.c.l.u8.bf16 %v346_v16  ;;  %v392_v16 = vunpack.c.l.u8.bf16 %v227_v7 }
  0xc0   : > { %8684 = vmatprep.mubr.msk.bf16.mxu0 %vm864_vm0, %v11880_v27  ;;  %1307 = vmatpush1.bf16.msra.mxu1 %v610_v10  ;;  %v644_v27 = vunpack.c.h.u8.bf16 %v347_v9  ;;  %v506_v33 = vunpack.c.l.u8.bf16 %v286_v24  ;;  %v393_v10 = vunpack.c.l.u8.bf16 %v228_v61  ;;  %v342_v9 = vld [vmem:[%s11713_s21 + $0x410] sm:$0xff] }
  0xc1   : > { %1308 = vmatprep.subr.bf16.mxu1 %v622_v11  ;;  %1980 = vmatpush1.bf16.msra.mxu0 %v484_v19  ;;  %v341_v11 = vld [vmem:[%s11713_s21 + $0x408] sm:$0xff]  ;;  %v404_v19 = vunpack.c.h.u8.bf16 %v228_v61  ;;  %v617_v21 = vunpack.c.l.u8.bf16 %v342_v9 }
  0xc2   : > { %1981 = vmatprep.subr.bf16.mxu0 %v496_v22  ;;  %v12172_v22 = vld [vmem:[%s15465_s0 + $0x28] ss:$16 sps:$4 sm:$0xff]  }
  0xc3   : > { %v12256_v61 = vld [vmem:[%s15465_s0 + $0x88] ss:$16 sps:$4 sm:$0xff]  }
  0xc4   : > { %1309 = vmatpush1.bf16.msra.mxu1 %v621_v28  ;;  %v239_v28 = vld [vmem:[%s11713_s21 + $0xd8] sm:$0xff] }
  0xc5   : > { %1310 = vmatprep.subr.bf16.mxu1 %v633_v25  ;;  %1982 = vmatpush1.bf16.msra.mxu0 %v495_v23  ;;  %v12178_v25 = vld [vmem:[%s15465_s0 + $0x60] ss:$16 sps:$4 sm:$0xff]   ;;  %v616_v23 = vunpack.c.l.u8.bf16 %v341_v11 }
  0xc6   : > { %1234 = vmatmul.mubr.bf16.gmra.mrb[56].mxu1 %v11894_v42  ;;  %1983 = vmatprep.subr.bf16.mxu0 %v507_v29  ;;  %v517_v42 = vunpack.c.h.u8.bf16 %v286_v24  ;;  %v12184_v24 = vld [vmem:[%s15465_s0 + $0x4c] ss:$16 sps:$4 sm:$0xff]   ;;  %v628_v29 = vunpack.c.h.u8.bf16 %v342_v9 }
  0xc7   : > { %1653 = vmatmul.mubr.bf16.gmra.mrb[64].mxu0 %v11899_v43  ;;  %1243 = vmatprep.mubr.bf16.mxu1 %v11904_v46  ;;  %v654_v43 = vunpack.c.l.u8.bf16 %v357_v37  ;;  %v529_v46 = vunpack.c.l.u8.bf16 %v298_v34  ;;  %v627_v37 = vunpack.c.h.u8.bf16 %v341_v11 }
  0xc8   : > { %8685 = vmatprep.mubr.msk.bf16.mxu0 %vm864_vm0, %v11909_v47  ;;  %1311 = vmatpush1.bf16.msra.mxu1 %v632_v26  ;;  %v666_v47 = vunpack.c.h.u8.bf16 %v358_v32  ;;  %v403_v26 = vunpack.c.h.u8.bf16 %v227_v7  ;;  %v415_v32 = vunpack.c.l.u8.bf16 %v239_v28  ;;  %v12276_v7 = vld [vmem:[%s15465_s0 + $0xe4] ss:$16 sps:$4 sm:$0xff]  }
  0xc9   : > { %1312 = vmatprep.subr.bf16.mxu1 %v644_v27  ;;  %1984 = vmatpush1.bf16.msra.mxu0 %v506_v33  ;;  %v12191_v27 = vld [vmem:[%s15465_s0 + $0x84] ss:$16 sps:$4 sm:$0xff]  }
  0xca   : > { %1985 = vmatprep.subr.bf16.mxu0 %v518_v36  ;;  %v238_v33 = vld [vmem:[%s11713_s21 + $0xd0] sm:$0xff]  ;;  %v426_v36 = vunpack.c.h.u8.bf16 %v239_v28 }
  0xcb   : > { %v414_v34 = vunpack.c.l.u8.bf16 %v238_v33  ;;  %v425_v45 = vunpack.c.h.u8.bf16 %v238_v33  ;;  %v12292_v33 = vld [vmem:[%s15465_s0 + $0xe0] ss:$16 sps:$4 sm:$0xff]  }
  0xcc   : > { %1313 = vmatpush1.bf16.msra.mxu1 %v643_v40  ;;  %v353_v40 = vld [vmem:[%s11713_s21 + $0x468] sm:$0xff] }
  0xcd   : > { %1314 = vmatprep.subr.bf16.mxu1 %v655_v41  ;;  %1986 = vmatpush1.bf16.msra.mxu0 %v517_v42  ;;  %v250_v41 = vld [vmem:[%s11713_s21 + $0x130] sm:$0xff]  ;;  %v12200_v42 = vld [vmem:[%s15465_s0 + $0x48] ss:$16 sps:$4 sm:$0xff]  }
  0xce   : > { %1244 = vmatmul.mubr.bf16.gmra.mrb[60].mxu1 %v11925_v63  ;;  %1987 = vmatprep.subr.bf16.mxu0 %v529_v46  ;;  %v539_v63 = vunpack.c.h.u8.bf16 %v297_v38  ;;  %v12206_v38 = vld [vmem:[%s15465_s0 + $0x80] ss:$16 sps:$4 sm:$0xff]  }
  0xcf   : > { %1663 = vmatmul.mubr.bf16.gmra.mrb[68].mxu0 %v11930_v0  ;;  %1253 = vmatprep.mubr.bf16.mxu1 %v11935_v2  ;;  %v551_v0 = vunpack.c.l.u8.bf16 %v309_v54  ;;  %v308_v2 = vld [vmem:[%s11713_s21 + $0x300] sm:$0xff] }
  0xd0   : > { %8686 = vmatprep.mubr.msk.bf16.mxu0 %vm864_vm0, %v11940_v3  ;;  %1315 = vmatpush1.bf16.msra.mxu1 %v654_v43  ;;  %v550_v3 = vunpack.c.l.u8.bf16 %v308_v2  ;;  %v639_v43 = vunpack.c.l.u8.bf16 %v353_v40  ;;  %v352_v46 = vld [vmem:[%s11713_s21 + $0x460] sm:$0xff] }
  0xd1   : > { %1316 = vmatprep.subr.bf16.mxu1 %v666_v47  ;;  %1988 = vmatpush1.bf16.msra.mxu0 %v528_v48  ;;  %v12213_v47 = vld [vmem:[%s15465_s0 + $0x6c] ss:$16 sps:$4 sm:$0xff]   ;;  %v12220_v48 = vld [vmem:[%s15465_s0 + $0xa4] ss:$16 sps:$4 sm:$0xff]  }
  0xd2   : > { %1989 = vmatprep.subr.bf16.mxu0 %v540_v50  ;;  %v249_v50 = vld [vmem:[%s11713_s21 + $0x128] sm:$0xff] }
  0xd4   : > { %1317 = vmatpush1.bf16.msra.mxu1 %v665_v44  ;;  %v437_v44 = vunpack.c.l.u8.bf16 %v250_v41 }
  0xd5   : > { %1427 = vmatprep.subr.bf16.mxu1 %v371_v52  ;;  %1990 = vmatpush1.bf16.msra.mxu0 %v539_v63  ;;  %v638_v52 = vunpack.c.l.u8.bf16 %v352_v46  ;;  %v448_v63 = vunpack.c.h.u8.bf16 %v250_v41 }
  0xd6   : > { %1254 = vmatmul.mubr.bf16.gmra.mrb[64].mxu1 %v11952_v13  ;;  %2092 = vmatprep.subr.bf16.mxu0 %v551_v0  ;;  %v562_v13 = vunpack.c.h.u8.bf16 %v309_v54  ;;  %v436_v54 = vunpack.c.l.u8.bf16 %v249_v50  ;;  %v364_v0 = vld [vmem:[%s11713_s21 + $0x4c0] sm:$0xff] }
  0xd7   : > { %1673 = vmatmul.mubr.bf16.gmra.mrb[72].mxu0 %v11957_v14  ;;  %1263 = vmatprep.mubr.bf16.mxu1 %v11962_v18  ;;  %v320_v14 = vld [vmem:[%s11713_s21 + $0x360] sm:$0xff] }
  0xd8   : > { %8687 = vmatprep.mubr.msk.bf16.mxu0 %vm864_vm0, %v11967_v20  ;;  %v12109_v18 = vld [vmem:[%s15465_s0] ss:$16 sps:$4 sm:$0xff]   ;;  %v12116_v20 = vld [vmem:[%s15465_s0 + $0x24] ss:$16 sps:$4 sm:$0xff]  }
  0xde   : > { %1264 = vmatmul.mubr.bf16.gmra.mrb[68].mxu1 %v11979_v30  ;;  %v561_v30 = vunpack.c.h.u8.bf16 %v308_v2  ;;  %v261_v2 = vld [vmem:[%s11713_s21 + $0x188] sm:$0xff] }
  0xdf   : > { %1683 = vmatmul.mubr.bf16.gmra.mrb[76].mxu0 %v11984_v31  ;;  %1273 = vmatprep.mubr.bf16.mxu1 %v11989_v35  ;;  %v573_v31 = vunpack.c.l.u8.bf16 %v320_v14  ;;  %v319_v35 = vld [vmem:[%s11713_s21 + $0x358] sm:$0xff]  ;;  %v459_v57 = vunpack.c.l.u8.bf16 %v261_v2 }
  0xe0   : > { %1991 = vmatprep.mubr.bf16.mxu0 %v12033_v6  ;;  %v584_v6 = vunpack.c.h.u8.bf16 %v320_v14  ;;  %v12235_v14 = vld [vmem:[%s15465_s0 + $0xa0] ss:$16 sps:$4 sm:$0xff]  }
  0xe6   : > { %1274 = vmatmul.mubr.bf16.gmra.mrb[72].mxu1 %v12006_v49  ;;  %v572_v49 = vunpack.c.l.u8.bf16 %v319_v35 }
  0xe7   : > { %1992 = vmatmul.mubr.bf16.vlgmr.msra.gmra.mrb[80].mxu0 %v12109_v18  ;;  %1283 = vmatprep.mubr.bf16.mxu1 %v12011_v53  ;;  %v12125_v53 = vld [vmem:[%s15465_s0 + $0x20] ss:$16 sps:$4 sm:$0xff]  }
  0xe8   : > { %2001 = vmatprep.mubr.bf16.mxu0 %v12116_v20  ;;  %2093 = vmatpush1.bf16.msra.mxu0 %v550_v3  ;;  %v650_v3 = vunpack.c.h.u8.bf16 %v353_v40  ;;  %v12299_v40 = vld [vmem:[%s15465_s0 + $0xcc] ss:$16 sps:$4 sm:$0xff]  }
  0xe9   : > { %2094 = vmatprep.subr.bf16.mxu0 %v562_v13  ;;  %v12229_v13 = vld [vmem:[%s15465_s0 + $0x68] ss:$16 sps:$4 sm:$0xff]  }
  0xec   : > { %2095 = vmatpush1.bf16.msra.mxu0 %v561_v30  ;;  %v649_v30 = vunpack.c.h.u8.bf16 %v352_v46  ;;  %v282_v46 = vld [vmem:[%s11713_s21 + $0x230] sm:$0xff] }
  0xed   : > { %2096 = vmatprep.subr.bf16.mxu0 %v573_v31  ;;  %v12241_v31 = vld [vmem:[%s15465_s0 + $0x8c] ss:$16 sps:$4 sm:$0xff]  }
  0xee   : > { %1284 = vmatmul.mubr.bf16.gmra.mrb[76].mxu1 %v12024_v62  ;;  %v583_v62 = vunpack.c.h.u8.bf16 %v319_v35  ;;  %v447_v35 = vunpack.c.h.u8.bf16 %v249_v50  ;;  %v502_v50 = vunpack.c.l.u8.bf16 %v282_v46 }
  0xef   : > { %2002 = vmatmul.mubr.bf16.gmra.mrb[84].mxu0 %v12125_v53  ;;  %8668 = vmatprep.mubr.msk.bf16.mxu1 %vm864_vm0, %v11998_v39  ;;  %v594_v39 = vunpack.c.l.u8.bf16 %v330_v58 }
  0xf0   : > { %2011 = vmatprep.mubr.bf16.mxu0 %v12133_v55  ;;  %2097 = vmatpush1.bf16.msra.mxu0 %v572_v49  ;;  %v661_v49 = vunpack.c.l.u8.bf16 %v364_v0 }
  0xf1   : > { %2098 = vmatprep.subr.bf16.mxu0 %v584_v6  ;;  %v12248_v6 = vld [vmem:[%s15465_s0 + $0xc4] ss:$16 sps:$4 sm:$0xff]  }
  0xf4   : > { %2099 = vmatpush1.bf16.msra.mxu0 %v583_v62  ;;  %v363_v62 = vld [vmem:[%s11713_s21 + $0x4b8] sm:$0xff] }
  0xf5   : > { %2100 = vmatprep.subr.bf16.mxu0 %v595_v59  ;;  %v458_v59 = vunpack.c.l.u8.bf16 %v260_v56  ;;  %v660_v58 = vunpack.c.l.u8.bf16 %v363_v62  ;;  %v671_v9 = vunpack.c.h.u8.bf16 %v363_v62  ;;  %v293_v62 = vld [vmem:[%s11713_s21 + $0x288] sm:$0xff] }
  0xf6   : > { %1327 = vmatmul.mubr.bf16.vlgmr.msra.gmra.mrb[40].mxu1 %v12143_v51 }
  0xf7   : > { %2012 = vmatmul.mubr.bf16.gmra.mrb[88].mxu0 %v12149_v4  ;;  %1428 = vmatpush1.bf16.msra.mxu1 %v370_v60  ;;  %v470_v60 = vunpack.c.h.u8.bf16 %v261_v2  ;;  %v294_v2 = vld [vmem:[%s11713_s21 + $0x290] sm:$0xff] }
  0xf8   : > { %8669 = vmatprep.mubr.msk.bf16.mxu1 %vm864_vm0, %v12155_v5  ;;  %1429 = vmatprep.subr.bf16.mxu1 %v382_v1  ;;  %v672_v1 = vunpack.c.h.u8.bf16 %v364_v0  ;;  %v12319_v0 = vld [vmem:[%s15465_s0 + $0x100] ss:$16 sps:$4 sm:$0xff]  }
  0xf9   : > { %2021 = vmatprep.mubr.bf16.mxu0 %v12163_v8  ;;  %2101 = vmatpush1.bf16.msra.mxu0 %v594_v39  ;;  %v12262_v39 = vld [vmem:[%s15465_s0 + $0xc0] ss:$16 sps:$4 sm:$0xff]  }
  0xfa   : > { %2102 = vmatprep.subr.bf16.mxu0 %v606_v15  ;;  %v272_v15 = vld [vmem:[%s11713_s21 + $0x1e0] sm:$0xff] }
  0xfb   : > { %1430 = vmatpush1.bf16.msra.mxu1 %v381_v17  ;;  %v12269_v17 = vld [vmem:[%s15465_s0 + $0xac] ss:$16 sps:$4 sm:$0xff]  }
  0xfc   : > { %1431 = vmatprep.subr.bf16.mxu1 %v393_v10  ;;  %v469_v10 = vunpack.c.h.u8.bf16 %v260_v56  ;;  %v525_v56 = vunpack.c.l.u8.bf16 %v294_v2 }
  0xfd   : > { %2103 = vmatpush1.bf16.msra.mxu0 %v605_v12  ;;  %v481_v12 = vunpack.c.l.u8.bf16 %v272_v15 }
  0xfe   : > { %1337 = vmatmul.mubr.bf16.gmra.mrb[44].mxu1 %v12172_v22  ;;  %2104 = vmatprep.subr.bf16.mxu0 %v617_v21 }
  0xff   : > { %2022 = vmatmul.mubr.bf16.gmra.mrb[92].mxu0 %v12178_v25  ;;  %1432 = vmatpush1.bf16.msra.mxu1 %v392_v16  ;;  %v271_v16 = vld [vmem:[%s11713_s21 + $0x1d8] sm:$0xff] }
 0x100   : > { %8670 = vmatprep.mubr.msk.bf16.mxu1 %vm864_vm0, %v12184_v24  ;;  %1433 = vmatprep.subr.bf16.mxu1 %v404_v19  ;;  %v10827_v19 = vld [vmem:[%s15466_s1 + $0x4] ss:$8 sps:$4 sm:$0xff]   ;;  %v491_v41 = vunpack.c.h.u8.bf16 %v271_v16 }
 0x101   : > { %2031 = vmatprep.mubr.bf16.mxu0 %v12191_v27  ;;  %2105 = vmatpush1.bf16.msra.mxu0 %v616_v23  ;;  %v480_v23 = vunpack.c.l.u8.bf16 %v271_v16 }
 0x102   : > { %2106 = vmatprep.subr.bf16.mxu0 %v628_v29  ;;  %v492_v29 = vunpack.c.h.u8.bf16 %v272_v15 }
 0x103   : > { %1434 = vmatpush1.bf16.msra.mxu1 %v403_v26 }
 0x104   : > { %1435 = vmatprep.subr.bf16.mxu1 %v415_v32  ;;  %v12286_v32 = vld [vmem:[%s15465_s0 + $0xa8] ss:$16 sps:$4 sm:$0xff]  }
 0x105   : > { %2107 = vmatpush1.bf16.msra.mxu0 %v627_v37 }
 0x106   : > { %1347 = vmatmul.mubr.bf16.gmra.mrb[48].mxu1 %v12200_v42  ;;  %2108 = vmatprep.subr.bf16.mxu0 %v639_v43 }
 0x107   : > { %2032 = vmatmul.mubr.bf16.gmra.mrb[96].mxu0 %v12206_v38  ;;  %1436 = vmatpush1.bf16.msra.mxu1 %v414_v34  ;;  %v283_v34 = vld [vmem:[%s11713_s21 + $0x238] sm:$0xff] }
 0x108   : > { %8671 = vmatprep.mubr.msk.bf16.mxu1 %vm864_vm0, %v12213_v47  ;;  %2041 = vmatprep.mubr.bf16.mxu0 %v12220_v48  ;;  %v503_v43 = vunpack.c.l.u8.bf16 %v283_v34 }
 0x109   : > { %1437 = vmatprep.subr.bf16.mxu1 %v426_v36  ;;  %2109 = vmatpush1.bf16.msra.mxu0 %v638_v52  ;;  %v12306_v36 = vld [vmem:[%s15465_s0 + $0x104] ss:$16 sps:$4 sm:$0xff]  }
 0x10a   : > { %2110 = vmatprep.subr.bf16.mxu0 %v650_v3  ;;  %v12326_v3 = vld [vmem:[%s15465_s0 + $0xec] ss:$16 sps:$4 sm:$0xff]  }
 0x10b   : > { %1438 = vmatpush1.bf16.msra.mxu1 %v425_v45 }
 0x10c   : > { %1439 = vmatprep.subr.bf16.mxu1 %v437_v44 }
 0x10d   : > { %2111 = vmatpush1.bf16.msra.mxu0 %v649_v30  ;;  %v12333_v30 = vld [vmem:[%s15465_s0 + $0x124] ss:$16 sps:$4 sm:$0xff]  }
 0x10e   : > { %1357 = vmatmul.mubr.bf16.gmra.mrb[52].mxu1 %v12229_v13  ;;  %2112 = vmatprep.subr.bf16.mxu0 %v661_v49 }
 0x10f   : > { %2042 = vmatmul.mubr.bf16.gmra.mrb[100].mxu0 %v12235_v14  ;;  %8672 = vmatprep.mubr.msk.bf16.mxu1 %vm864_vm0, %v12241_v31 }
 0x110   : > { %1440 = vmatpush1.bf16.msra.mxu1 %v436_v54  ;;  %2051 = vmatprep.mubr.bf16.mxu0 %v12248_v6  ;;  %v514_v54 = vunpack.c.h.u8.bf16 %v283_v34 }
 0x111   : > { %1441 = vmatprep.subr.bf16.mxu1 %v448_v63  ;;  %2113 = vmatpush1.bf16.msra.mxu0 %v660_v58  ;;  %v12313_v63 = vld [vmem:[%s15465_s0 + $0xc8] ss:$16 sps:$4 sm:$0xff]  }
 0x112   : > { %2114 = vmatprep.subr.bf16.mxu0 %v672_v1 }
 0x114   : > { %1442 = vmatpush1.bf16.msra.mxu1 %v447_v35  ;;  %v513_v35 = vunpack.c.h.u8.bf16 %v282_v46  ;;  %v535_v46 = vunpack.c.h.u8.bf16 %v293_v62 }
 0x115   : > { %1443 = vmatprep.subr.bf16.mxu1 %v459_v57  ;;  %2115 = vmatpush1.bf16.msra.mxu0 %v671_v9 }
 0x116   : > { %1367 = vmatmul.mubr.bf16.gmra.mrb[56].mxu1 %v12256_v61  ;;  %3599 = vmatprep.subr.bf16.mxu0 %v10827_v19  ;;  %v524_v19 = vunpack.c.l.u8.bf16 %v293_v62 }
 0x117   : > { %2052 = vmatmul.mubr.bf16.gmra.mrb[104].mxu0 %v12262_v39  ;;  %8673 = vmatprep.mubr.msk.bf16.mxu1 %vm864_vm0, %v12269_v17 }
 0x118   : > { %2061 = vmatprep.mubr.bf16.mxu0 %v12276_v7  ;;  %1444 = vmatpush1.bf16.msra.mxu1 %v458_v59 }
 0x119   : > { %1445 = vmatprep.subr.bf16.mxu1 %v470_v60 }
 0x11a   : > { %v1062_v11 = vpop.f32.mrb[0].mxu0 }
 0x11b   : > { %v1064_v28 = vpop.f32.mrb[1].mxu0 }
 0x11c   : > { %v1066_v21 = vpop.f32.mrb[2].mxu0  ;;  %1446 = vmatpush1.bf16.msra.mxu1 %v469_v10 }
 0x11d   : > { %v1068_v26 = vpop.f32.mrb[3].mxu0  ;;  %1447 = vmatprep.subr.bf16.mxu1 %v481_v12 }
 0x11e   : > { %1377 = vmatmul.mubr.bf16.gmra.mrb[60].mxu1 %v12286_v32 }
 0x11f   : > { %2062 = vmatmul.mubr.bf16.gmra.mrb[108].mxu0 %v12292_v33  ;;  %8674 = vmatprep.mubr.msk.bf16.mxu1 %vm864_vm0, %v12299_v40 }
 0x120   : > { %2071 = vmatprep.mubr.bf16.mxu0 %v12306_v36  ;;  %1448 = vmatpush1.bf16.msra.mxu1 %v480_v23 }
 0x121   : > { %1449 = vmatprep.subr.bf16.mxu1 %v492_v29  ;;  %v536_v29 = vunpack.c.h.u8.bf16 %v294_v2 }
 0x122   : > { %v1072_v37 = vpop.f32.mrb[4].mxu0 }
 0x123   : > { %v1074_v45 = vpop.f32.mrb[5].mxu0 }
 0x124   : > { %v1076_v44 = vpop.f32.mrb[6].mxu0  ;;  %1450 = vmatpush1.bf16.msra.mxu1 %v491_v41  ;;  %v12359_v41 = vld [vmem:[%s15465_s0 + $0x10c] ss:$16 sps:$4 sm:$0xff]  }
 0x125   : > { %v1078_v52 = vpop.f32.mrb[7].mxu0  ;;  %1451 = vmatprep.subr.bf16.mxu1 %v503_v43  ;;  %v11618_v43 = vld [vmem:[%s15465_s0 + $0xc] ss:$16 sps:$4 sm:$0xff]  }
 0x126   : > { %1387 = vmatmul.mubr.bf16.gmra.mrb[64].mxu1 %v12313_v63 }
 0x127   : > { %2072 = vmatmul.mubr.bf16.gmra.mrb[112].mxu0 %v12319_v0  ;;  %8675 = vmatprep.mubr.msk.bf16.mxu1 %vm864_vm0, %v12326_v3 }
 0x128   : > { %2081 = vmatprep.mubr.bf16.mxu0 %v12333_v30  ;;  %1452 = vmatpush1.bf16.msra.mxu1 %v502_v50 }
 0x129   : > { %v929_v49 = vpop.f32.mrb[0].mxu1  ;;  %1453 = vmatprep.subr.bf16.mxu1 %v514_v54 }
 0x12a   : > { %v1082_v57 = vpop.f32.mrb[8].mxu0  ;;  %v1063_v59 = vadd.f32 %v1062_v11, %v929_v49  ;;  %v931_v58 = vpop.f32.mrb[1].mxu1  ;;  %v12342_v11 = vld [vmem:[%s15465_s0 + $0xe8] ss:$16 sps:$4 sm:$0xff]  }
 0x12b   : > { %v1084_v60 = vpop.f32.mrb[9].mxu0  ;;  %v1065_v1 = vadd.f32 %v1064_v28, %v931_v58  ;;  %v933_v15 = vpop.f32.mrb[2].mxu1  ;;  %v12348_v28 = vld [vmem:[%s15465_s0 + $0x120] ss:$16 sps:$4 sm:$0xff]  }
 0x12c   : > { %v1086_v10 = vpop.f32.mrb[10].mxu0  ;;  %v1067_v9 = vadd.f32 %v1066_v21, %v933_v15  ;;  %v935_v12 = vpop.f32.mrb[3].mxu1  ;;  %1454 = vmatpush1.bf16.msra.mxu1 %v513_v35  ;;  %v12352_v21 = vld [vmem:[%s11713_s21 + $0x38] sm:$0xff] }
 0x12d   : > { %v1088_v16 = vpop.f32.mrb[11].mxu0  ;;  %v1069_v23 = vadd.f32 %v1068_v26, %v935_v12  ;;  %1455 = vmatprep.subr.bf16.mxu1 %v525_v56  ;;  %v373_v2 = vunpack.c.l.u8.bf16 %v12352_v21 }
 0x12e   : > { %v12337_v34 = vpack.c.bf16 %v1067_v9, %v1063_v59  ;;  %1397 = vmatmul.mubr.bf16.gmra.mrb[68].mxu1 %v12342_v11 }
 0x12f   : > { %2082 = vmatmul.mubr.bf16.gmra.mrb[116].mxu0 %v12348_v28  ;;  %v12354_v26 = vpack.c.bf16 %v1069_v23, %v1065_v1  ;;  %8676 = vmatprep.mubr.msk.bf16.mxu1 %vm864_vm0, %v12359_v41  ;;  %v10830_v23 = vld [vmem:[%s15466_s1 + $0x14] ss:$8 sps:$4 sm:$0xff]  }
 0x130   : > { %15651 = vst [vmem:[#allocation2_spill] sm:$0xff] %v12337_v34  ;;  %8698 = vmatprep.mubr.msk.bf16.mxu0 %vm864_vm0, %v11618_v43  ;;  %1456 = vmatpush1.bf16.msra.mxu1 %v524_v19  ;;  %v10825_v19 = vld [vmem:[%s15466_s1] ss:$8 sps:$4 sm:$0xff]  }
 0x131   : > { %15652 = vst [vmem:[#allocation3_spill] sm:$0xff] %v12354_v26  ;;  %v939_v50 = vpop.f32.mrb[4].mxu1  ;;  %1457 = vmatprep.subr.bf16.mxu1 %v536_v29  ;;  %v10828_v29 = vld [vmem:[%s15466_s1 + $0x10] ss:$8 sps:$4 sm:$0xff]  }
 0x132   : > { %v1092_v54 = vpop.f32.mrb[12].mxu0  ;;  %v1073_v35 = vadd.f32 %v1072_v37, %v939_v50  ;;  %v941_v49 = vpop.f32.mrb[5].mxu1 }
 0x133   : > { %v1094_v56 = vpop.f32.mrb[13].mxu0  ;;  %v1075_v59 = vadd.f32 %v1074_v45, %v941_v49  ;;  %v943_v58 = vpop.f32.mrb[6].mxu1  ;;  %v12379_v45 = vld [vmem:[%s15465_s0 + $0x108] ss:$16 sps:$4 sm:$0xff]  }
 0x134   : > { %v1096_v1 = vpop.f32.mrb[14].mxu0  ;;  %v1077_v15 = vadd.f32 %v1076_v44, %v943_v58  ;;  %v945_v9 = vpop.f32.mrb[7].mxu1  ;;  %1458 = vmatpush1.bf16.msra.mxu1 %v535_v46  ;;  %v10833_v46 = vld [vmem:[%s15466_s1 + $0x24] ss:$8 sps:$4 sm:$0xff]  }
 0x135   : > { %v1098_v12 = vpop.f32.mrb[15].mxu0  ;;  %v1079_v62 = vadd.f32 %v1078_v52, %v945_v9  ;;  %1693 = vmatprep.subr.bf16.mxu1 %v373_v2  ;;  %v12388_v52 = vld [vmem:[%s15465_s0 + $0x12c] ss:$16 sps:$4 sm:$0xff]  }
 0x136   : > { %v12374_v37 = vpack.c.bf16 %v1077_v15, %v1073_v35  ;;  %1407 = vmatmul.mubr.bf16.gmra.mrb[72].mxu1 %v12379_v45 }
 0x137   : > { %2125 = vmatmul.mubr.bf16.vlgmr.msra.gmra.mrb[80].mxu0 %v12143_v51  ;;  %v12383_v44 = vpack.c.bf16 %v1079_v62, %v1075_v59  ;;  %8677 = vmatprep.mubr.msk.bf16.mxu1 %vm864_vm0, %v12388_v52 }
 0x138   : > { %15653 = vst [vmem:[#allocation4_spill] sm:$0xff] %v12374_v37  ;;  %8699 = vmatprep.mubr.msk.bf16.mxu0 %vm864_vm0, %v12155_v5  ;;  %3600 = vmatpush1.bf16.msra.mxu0 %v10825_v19  ;;  %v10831_v19 = vld [vmem:[%s15466_s1 + $0x20] ss:$8 sps:$4 sm:$0xff]   ;;  %v230_v37 = vld [vmem:[%s11713_s21 + $0x90] sm:$0xff] }
 0x139   : > { %15654 = vst [vmem:[#allocation5_spill] sm:$0xff] %v12383_v44  ;;  %v949_v43 = vpop.f32.mrb[8].mxu1  ;;  %3601 = vmatprep.subr.bf16.mxu0 %v10830_v23 }
 0x13a   : > { %v12397_v51 = vpop.f32.mrb[16].mxu0  ;;  %v1083_v50 = vadd.f32 %v1082_v57, %v949_v43  ;;  %v951_v2 = vpop.f32.mrb[9].mxu1  ;;  %v10836_v57 = vld [vmem:[%s15466_s1 + $0x34] ss:$8 sps:$4 sm:$0xff]   ;;  %v10834_v43 = vld [vmem:[%s15466_s1 + $0x30] ss:$8 sps:$4 sm:$0xff]  }
 0x13b   : > { %v12402_v35 = vpop.f32.mrb[17].mxu0  ;;  %v1085_v49 = vadd.f32 %v1084_v60, %v951_v2  ;;  %v953_v59 = vpop.f32.mrb[10].mxu1 }
 0x13c   : > { %v12404_v5 = vpop.f32.mrb[18].mxu0  ;;  %v1087_v58 = vadd.f32 %v1086_v10, %v953_v59  ;;  %v955_v15 = vpop.f32.mrb[11].mxu1  ;;  %3602 = vmatpush1.bf16.msra.mxu0 %v10828_v29  ;;  %v12419_v10 = vld [vmem:[%s15465_s0 + $0x128] ss:$16 sps:$4 sm:$0xff]   ;;  %v218_v29 = vld [vmem:[%s11713_s21 + $0x30] sm:$0xff] }
 0x13d   : > { %v12406_v9 = vpop.f32.mrb[19].mxu0  ;;  %v1089_v62 = vadd.f32 %v1088_v16, %v955_v15  ;;  %3603 = vmatprep.subr.bf16.mxu0 %v10833_v46  ;;  %v12428_v16 = vld [vmem:[%s15465_s0 + $0x4] ss:$16 sps:$4 sm:$0xff]   ;;  %v372_v15 = vunpack.c.l.u8.bf16 %v218_v29 }
 0x13e   : > { %v12414_v60 = vpack.c.bf16 %v1087_v58, %v1083_v50  ;;  %1417 = vmatmul.mubr.bf16.gmra.mrb[76].mxu1 %v12419_v10  ;;  %15657 = vst [vmem:[#allocation8_spill] sm:$0xff] %v12428_v16  ;;  %v10839_v50 = vld [vmem:[%s15466_s1 + $0x44] ss:$8 sps:$4 sm:$0xff]  }
 0x13f   : > { %2135 = vmatmul.mubr.bf16.gmra.mrb[84].mxu0 %v12172_v22  ;;  %v12423_v23 = vpack.c.bf16 %v1089_v62, %v1085_v49  ;;  %1459 = vmatprep.mubr.bf16.mxu1 %v12428_v16  ;;  %v384_v16 = vunpack.c.h.u8.bf16 %v12352_v21  ;;  %v10842_v21 = vld [vmem:[%s15466_s1 + $0x54] ss:$8 sps:$4 sm:$0xff]  }
 0x140   : > { %15655 = vst [vmem:[#allocation6_spill] sm:$0xff] %v12414_v60  ;;  %8700 = vmatprep.mubr.msk.bf16.mxu0 %vm864_vm0, %v12184_v24  ;;  %3604 = vmatpush1.bf16.msra.mxu0 %v10831_v19 }
 0x141   : > { %15656 = vst [vmem:[#allocation7_spill] sm:$0xff] %v12423_v23  ;;  %v959_v46 = vpop.f32.mrb[12].mxu1  ;;  %3605 = vmatprep.subr.bf16.mxu0 %v10836_v57 }
 0x142   : > { %v12437_v22 = vpop.f32.mrb[20].mxu0  ;;  %v1093_v2 = vadd.f32 %v1092_v54, %v959_v46  ;;  %v961_v49 = vpop.f32.mrb[13].mxu1  ;;  %v10837_v54 = vld [vmem:[%s15466_s1 + $0x40] ss:$8 sps:$4 sm:$0xff]  }
 0x143   : > { %v12442_v59 = vpop.f32.mrb[21].mxu0  ;;  %v1095_v24 = vadd.f32 %v1094_v56, %v961_v49  ;;  %v963_v58 = vpop.f32.mrb[14].mxu1 }
 0x144   : > { %v12444_v19 = vpop.f32.mrb[22].mxu0  ;;  %v1097_v62 = vadd.f32 %v1096_v1, %v963_v58  ;;  %v965_v60 = vpop.f32.mrb[15].mxu1  ;;  %3606 = vmatpush1.bf16.msra.mxu0 %v10834_v43  ;;  %v229_v43 = vld [vmem:[%s11713_s21 + $0x88] sm:$0xff] }
 0x145   : > { %v12447_v23 = vpop.f32.mrb[23].mxu0  ;;  %v1099_v57 = vadd.f32 %v1098_v12, %v965_v60  ;;  %3607 = vmatprep.subr.bf16.mxu0 %v10839_v50  ;;  %v383_v12 = vunpack.c.h.u8.bf16 %v218_v29  ;;  %v395_v60 = vunpack.c.l.u8.bf16 %v230_v37 }
 0x146   : > { %v12453_v56 = vpack.c.bf16 %v1097_v62, %v1093_v2  ;;  %1460 = vmatmul.mubr.bf16.vlgmr.msra.gmra.mrb[80].mxu1 %v12109_v18 }
 0x147   : > { %2145 = vmatmul.mubr.bf16.gmra.mrb[88].mxu0 %v12200_v42  ;;  %v12460_v1 = vpack.c.bf16 %v1099_v57, %v1095_v24  ;;  %1694 = vmatpush1.bf16.msra.mxu1 %v372_v15  ;;  %v10840_v42 = vld [vmem:[%s15466_s1 + $0x50] ss:$8 sps:$4 sm:$0xff]   ;;  %v406_v15 = vunpack.c.h.u8.bf16 %v230_v37  ;;  %v241_v57 = vld [vmem:[%s11713_s21 + $0xe8] sm:$0xff] }
 0x148   : > { %15658 = vst [vmem:[#allocation9_spill] sm:$0xff] %v12453_v56  ;;  %1469 = vmatprep.mubr.bf16.mxu1 %v12116_v20  ;;  %1695 = vmatprep.subr.bf16.mxu1 %v384_v16  ;;  %v394_v16 = vunpack.c.l.u8.bf16 %v229_v43  ;;  %v10843_v37 = vld [vmem:[%s15466_s1 + $0x60] ss:$8 sps:$4 sm:$0xff]  }
 0x149   : > { %15659 = vst [vmem:[#allocation10_spill] sm:$0xff] %v12460_v1  ;;  %8701 = vmatprep.mubr.msk.bf16.mxu0 %vm864_vm0, %v12213_v47  ;;  %v969_v46 = vpop.f32.mrb[16].mxu1  ;;  %3608 = vmatpush1.bf16.msra.mxu0 %v10837_v54 }
 0x14a   : > { %v12466_v18 = vpop.f32.mrb[24].mxu0  ;;  %v1103_v50 = vadd.f32 %v12397_v51, %v969_v46  ;;  %v971_v29 = vpop.f32.mrb[17].mxu1  ;;  %3609 = vmatprep.subr.bf16.mxu0 %v10842_v21  ;;  %v10848_v21 = vld [vmem:[%s15466_s1 + $0x74] ss:$8 sps:$4 sm:$0xff]  }
 0x14b   : > { %v12472_v2 = vpop.f32.mrb[25].mxu0  ;;  %v1105_v20 = vadd.f32 %v12402_v35, %v971_v29  ;;  %v973_v47 = vpop.f32.mrb[18].mxu1  ;;  %1696 = vmatpush1.bf16.msra.mxu1 %v383_v12  ;;  %v10845_v35 = vld [vmem:[%s15466_s1 + $0x64] ss:$8 sps:$4 sm:$0xff]  }
 0x14c   : > { %v12475_v49 = vpop.f32.mrb[26].mxu0  ;;  %v1107_v24 = vadd.f32 %v12404_v5, %v973_v47  ;;  %v975_v58 = vpop.f32.mrb[19].mxu1  ;;  %1697 = vmatprep.subr.bf16.mxu1 %v395_v60 }
 0x14d   : > { %v12478_v62 = vpop.f32.mrb[27].mxu0  ;;  %v1109_v51 = vadd.f32 %v12406_v9, %v975_v58  ;;  %3610 = vmatpush1.bf16.msra.mxu0 %v10840_v42  ;;  %v405_v9 = vunpack.c.h.u8.bf16 %v229_v43  ;;  %v252_v58 = vld [vmem:[%s11713_s21 + $0x140] sm:$0xff] }
 0x14e   : > { %v12485_v54 = vpack.c.bf16 %v1107_v24, %v1103_v50  ;;  %1470 = vmatmul.mubr.bf16.gmra.mrb[84].mxu1 %v12125_v53  ;;  %v417_v53 = vunpack.c.l.u8.bf16 %v241_v57  ;;  %3611 = vmatprep.subr.bf16.mxu0 %v10845_v35  ;;  %v251_v35 = vld [vmem:[%s11713_s21 + $0x138] sm:$0xff] }
 0x14f   : > { %2155 = vmatmul.mubr.bf16.gmra.mrb[92].mxu0 %v12229_v13  ;;  %v12492_v5 = vpack.c.bf16 %v1109_v51, %v1105_v20  ;;  %1698 = vmatpush1.bf16.msra.mxu1 %v394_v16  ;;  %v240_v13 = vld [vmem:[%s11713_s21 + $0xe0] sm:$0xff]  ;;  %v428_v16 = vunpack.c.h.u8.bf16 %v241_v57  ;;  %v439_v57 = vunpack.c.l.u8.bf16 %v252_v58 }
 0x150   : > { %15660 = vst [vmem:[#allocation11_spill] sm:$0xff] %v12485_v54  ;;  %1479 = vmatprep.mubr.bf16.mxu1 %v12133_v55  ;;  %1699 = vmatprep.subr.bf16.mxu1 %v406_v15  ;;  %v416_v29 = vunpack.c.l.u8.bf16 %v240_v13 }
 0x151   : > { %15661 = vst [vmem:[#allocation12_spill] sm:$0xff] %v12492_v5  ;;  %8702 = vmatprep.mubr.msk.bf16.mxu0 %vm864_vm0, %v12241_v31  ;;  %v979_v12 = vpop.f32.mrb[20].mxu1  ;;  %3612 = vmatpush1.bf16.msra.mxu0 %v10843_v37 }
 0x152   : > { %v12501_v60 = vpop.f32.mrb[28].mxu0  ;;  %v1113_v46 = vadd.f32 %v12437_v22, %v979_v12  ;;  %v981_v42 = vpop.f32.mrb[21].mxu1  ;;  %3613 = vmatprep.subr.bf16.mxu0 %v10848_v21 }
 0x153   : > { %v12504_v55 = vpop.f32.mrb[29].mxu0  ;;  %v1115_v43 = vadd.f32 %v12442_v59, %v981_v42  ;;  %v983_v50 = vpop.f32.mrb[22].mxu1  ;;  %1700 = vmatpush1.bf16.msra.mxu1 %v405_v9  ;;  %v10846_v59 = vld [vmem:[%s15466_s1 + $0x70] ss:$8 sps:$4 sm:$0xff]  }
 0x154   : > { %v12507_v31 = vpop.f32.mrb[30].mxu0  ;;  %v1117_v20 = vadd.f32 %v12444_v19, %v983_v50  ;;  %v985_v47 = vpop.f32.mrb[23].mxu1  ;;  %1701 = vmatprep.subr.bf16.mxu1 %v417_v53  ;;  %v10851_v19 = vld [vmem:[%s15466_s1 + $0x84] ss:$8 sps:$4 sm:$0xff]  }
 0x155   : > { %v12510_v22 = vpop.f32.mrb[31].mxu0  ;;  %v1119_v24 = vadd.f32 %v12447_v23, %v985_v47  ;;  %v427_v23 = vunpack.c.h.u8.bf16 %v240_v13  ;;  %3614 = vmatpush1.bf16.msra.mxu0 %v10846_v59  ;;  %v438_v13 = vunpack.c.l.u8.bf16 %v251_v35 }
 0x156   : > { %v12517_v15 = vpack.c.bf16 %v1117_v20, %v1113_v46  ;;  %1480 = vmatmul.mubr.bf16.gmra.mrb[88].mxu1 %v12149_v4  ;;  %v10849_v4 = vld [vmem:[%s15466_s1 + $0x80] ss:$8 sps:$4 sm:$0xff]   ;;  %3615 = vmatprep.subr.bf16.mxu0 %v10851_v19 }
 0x157   : > { %2165 = vmatmul.mubr.bf16.gmra.mrb[96].mxu0 %v12256_v61  ;;  %v12524_v51 = vpack.c.bf16 %v1119_v24, %v1115_v43  ;;  %1702 = vmatpush1.bf16.msra.mxu1 %v416_v29  ;;  %v450_v43 = vunpack.c.h.u8.bf16 %v252_v58  ;;  %v10854_v29 = vld [vmem:[%s15466_s1 + $0x94] ss:$8 sps:$4 sm:$0xff]  }
 0x158   : > { %15662 = vst [vmem:[#allocation13_spill] sm:$0xff] %v12517_v15  ;;  %1489 = vmatprep.mubr.bf16.mxu1 %v12163_v8  ;;  %8703 = vmatprep.mubr.msk.bf16.mxu0 %vm864_vm0, %v12269_v17  ;;  %v262_v24 = vld [vmem:[%s11713_s21 + $0x190] sm:$0xff] }
 0x159   : > { %15663 = vst [vmem:[#allocation14_spill] sm:$0xff] %v12524_v51  ;;  %1703 = vmatprep.subr.bf16.mxu1 %v428_v16  ;;  %v989_v37 = vpop.f32.mrb[24].mxu1  ;;  %3616 = vmatpush1.bf16.msra.mxu0 %v10849_v4  ;;  %v10857_v16 = vld [vmem:[%s15466_s1 + $0xa4] ss:$8 sps:$4 sm:$0xff]   ;;  %v460_v4 = vunpack.c.l.u8.bf16 %v262_v24 }
 0x15a   : > { %v12533_v61 = vpop.f32.mrb[32].mxu0  ;;  %v1123_v9 = vadd.f32 %v12466_v18, %v989_v37  ;;  %v991_v21 = vpop.f32.mrb[25].mxu1  ;;  %3617 = vmatprep.subr.bf16.mxu0 %v10854_v29 }
 0x15b   : > { %v12536_v8 = vpop.f32.mrb[33].mxu0  ;;  %v1125_v17 = vadd.f32 %v12472_v2, %v991_v21  ;;  %v993_v53 = vpop.f32.mrb[26].mxu1  ;;  %1704 = vmatpush1.bf16.msra.mxu1 %v427_v23  ;;  %v263_v2 = vld [vmem:[%s11713_s21 + $0x198] sm:$0xff] }
 0x15c   : > { %v12539_v12 = vpop.f32.mrb[34].mxu0  ;;  %v1127_v46 = vadd.f32 %v12475_v49, %v993_v53  ;;  %v995_v42 = vpop.f32.mrb[27].mxu1  ;;  %1705 = vmatprep.subr.bf16.mxu1 %v439_v57  ;;  %v10852_v49 = vld [vmem:[%s15466_s1 + $0x90] ss:$8 sps:$4 sm:$0xff]  }
 0x15d   : > { %v12542_v50 = vpop.f32.mrb[35].mxu0  ;;  %v1129_v18 = vadd.f32 %v12478_v62, %v995_v42  ;;  %v449_v62 = vunpack.c.h.u8.bf16 %v251_v35  ;;  %3618 = vmatpush1.bf16.msra.mxu0 %v10852_v49 }
 0x15e   : > { %v12549_v20 = vpack.c.bf16 %v1127_v46, %v1123_v9  ;;  %1490 = vmatmul.mubr.bf16.gmra.mrb[92].mxu1 %v12178_v25  ;;  %v461_v25 = vunpack.c.l.u8.bf16 %v263_v2  ;;  %3619 = vmatprep.subr.bf16.mxu0 %v10857_v16  ;;  %v471_v46 = vunpack.c.h.u8.bf16 %v262_v24 }
 0x15f   : > { %2175 = vmatmul.mubr.bf16.gmra.mrb[100].mxu0 %v12286_v32  ;;  %v12556_v47 = vpack.c.bf16 %v1129_v18, %v1125_v17  ;;  %1499 = vmatprep.mubr.bf16.mxu1 %v12191_v27  ;;  %v472_v17 = vunpack.c.h.u8.bf16 %v263_v2 }
 0x160   : > { %15664 = vst [vmem:[#allocation15_spill] sm:$0xff] %v12549_v20  ;;  %1706 = vmatpush1.bf16.msra.mxu1 %v438_v13  ;;  %8704 = vmatprep.mubr.msk.bf16.mxu0 %vm864_vm0, %v12299_v40 }
 0x161   : > { %15665 = vst [vmem:[#allocation16_spill] sm:$0xff] %v12556_v47  ;;  %1707 = vmatprep.subr.bf16.mxu1 %v450_v43  ;;  %v999_v32 = vpop.f32.mrb[28].mxu1  ;;  %v273_v43 = vld [vmem:[%s11713_s21 + $0x1e8] sm:$0xff] }
 0x162   : > { %v12565_v59 = vpop.f32.mrb[36].mxu0  ;;  %v1133_v58 = vadd.f32 %v12501_v60, %v999_v32  ;;  %v1001_v19 = vpop.f32.mrb[29].mxu1  ;;  %v10855_v60 = vld [vmem:[%s15466_s1 + $0xa0] ss:$8 sps:$4 sm:$0xff]   ;;  %v482_v24 = vunpack.c.l.u8.bf16 %v273_v43 }
 0x163   : > { %v12568_v27 = vpop.f32.mrb[37].mxu0  ;;  %v1135_v23 = vadd.f32 %v12504_v55, %v1001_v19  ;;  %v1003_v57 = vpop.f32.mrb[30].mxu1  ;;  %v10860_v55 = vld [vmem:[%s15466_s1 + $0xb4] ss:$8 sps:$4 sm:$0xff]   ;;  %3620 = vmatpush1.bf16.msra.mxu0 %v10855_v60  ;;  %v10861_v32 = vld [vmem:[%s15466_s1 + $0xc0] ss:$8 sps:$4 sm:$0xff]  }
 0x164   : > { %1708 = vmatpush1.bf16.msra.mxu1 %v449_v62  ;;  %v12571_v40 = vpop.f32.mrb[38].mxu0  ;;  %v1137_v35 = vadd.f32 %v12507_v31, %v1003_v57  ;;  %v1005_v37 = vpop.f32.mrb[31].mxu1  ;;  %v274_v31 = vld [vmem:[%s11713_s21 + $0x1f0] sm:$0xff]  ;;  %3621 = vmatprep.subr.bf16.mxu0 %v10860_v55  ;;  %v284_v60 = vld [vmem:[%s11713_s21 + $0x240] sm:$0xff] }
 0x165   : > { %1709 = vmatprep.subr.bf16.mxu1 %v461_v25  ;;  %v12577_v9 = vpop.f32.mrb[39].mxu0  ;;  %v1139_v21 = vadd.f32 %v12510_v22, %v1005_v37  ;;  %v10858_v22 = vld [vmem:[%s15466_s1 + $0xb0] ss:$8 sps:$4 sm:$0xff]   ;;  %v494_v19 = vunpack.c.h.u8.bf16 %v274_v31 }
 0x166   : > { %v12583_v53 = vpack.c.bf16 %v1137_v35, %v1133_v58  ;;  %1500 = vmatmul.mubr.bf16.gmra.mrb[96].mxu1 %v12206_v38  ;;  %v10863_v38 = vld [vmem:[%s15466_s1 + $0xc4] ss:$8 sps:$4 sm:$0xff]   ;;  %v493_v35 = vunpack.c.h.u8.bf16 %v273_v43 }
 0x167   : > { %2185 = vmatmul.mubr.bf16.gmra.mrb[104].mxu0 %v12313_v63  ;;  %v12588_v13 = vpack.c.bf16 %v1139_v21, %v1135_v23  ;;  %1509 = vmatprep.mubr.bf16.mxu1 %v12220_v48  ;;  %v483_v63 = vunpack.c.l.u8.bf16 %v274_v31  ;;  %v285_v23 = vld [vmem:[%s11713_s21 + $0x248] sm:$0xff] }
 0x168   : > { %15666 = vst [vmem:[#allocation17_spill] sm:$0xff] %v12583_v53  ;;  %8705 = vmatprep.mubr.msk.bf16.mxu0 %vm864_vm0, %v12326_v3  ;;  %1710 = vmatpush1.bf16.msra.mxu1 %v460_v4 }
 0x169   : > { %15667 = vst [vmem:[#allocation18_spill] sm:$0xff] %v12588_v13  ;;  %v1009_v42 = vpop.f32.mrb[32].mxu1  ;;  %1711 = vmatprep.subr.bf16.mxu1 %v472_v17  ;;  %3622 = vmatpush1.bf16.msra.mxu0 %v10858_v22 }
 0x16a   : > { %v12600_v48 = vpop.f32.mrb[40].mxu0  ;;  %v1143_v3 = vadd.f32 %v12533_v61, %v1009_v42  ;;  %v1011_v18 = vpop.f32.mrb[33].mxu1  ;;  %3623 = vmatprep.subr.bf16.mxu0 %v10863_v38  ;;  %v10867_v42 = vld [vmem:[%s15466_s1 + $0xe0] ss:$8 sps:$4 sm:$0xff]   ;;  %v504_v38 = vunpack.c.l.u8.bf16 %v284_v60 }
 0x16b   : > { %v12603_v29 = vpop.f32.mrb[41].mxu0  ;;  %v1145_v2 = vadd.f32 %v12536_v8, %v1011_v18  ;;  %v1013_v49 = vpop.f32.mrb[34].mxu1  ;;  %v10866_v8 = vld [vmem:[%s15466_s1 + $0xd4] ss:$8 sps:$4 sm:$0xff]  }
 0x16c   : > { %v12606_v62 = vpop.f32.mrb[42].mxu0  ;;  %v1147_v16 = vadd.f32 %v12539_v12, %v1013_v49  ;;  %v1015_v25 = vpop.f32.mrb[35].mxu1  ;;  %1712 = vmatpush1.bf16.msra.mxu1 %v471_v46  ;;  %v10875_v49 = vld [vmem:[%s15466_s1 + $0x104] ss:$8 sps:$4 sm:$0xff]  }
 0x16d   : > { %v12612_v61 = vpop.f32.mrb[43].mxu0  ;;  %v1149_v58 = vadd.f32 %v12542_v50, %v1015_v25  ;;  %1713 = vmatprep.subr.bf16.mxu1 %v483_v63  ;;  %3624 = vmatpush1.bf16.msra.mxu0 %v10861_v32  ;;  %v10864_v50 = vld [vmem:[%s15466_s1 + $0xd0] ss:$8 sps:$4 sm:$0xff]  }
 0x16e   : > { %v12618_v12 = vpack.c.bf16 %v1147_v16, %v1143_v3  ;;  %1510 = vmatmul.mubr.bf16.gmra.mrb[100].mxu1 %v12235_v14  ;;  %3625 = vmatprep.subr.bf16.mxu0 %v10866_v8  ;;  %v10869_v14 = vld [vmem:[%s15466_s1 + $0xe4] ss:$8 sps:$4 sm:$0xff]  }
 0x16f   : > { %2195 = vmatmul.mubr.bf16.gmra.mrb[108].mxu0 %v12342_v11  ;;  %v12623_v57 = vpack.c.bf16 %v1149_v58, %v1145_v2  ;;  %1519 = vmatprep.mubr.bf16.mxu1 %v12248_v6  ;;  %v505_v11 = vunpack.c.l.u8.bf16 %v285_v23  ;;  %v296_v3 = vld [vmem:[%s11713_s21 + $0x2a0] sm:$0xff]  ;;  %v515_v2 = vunpack.c.h.u8.bf16 %v284_v60  ;;  %v307_v58 = vld [vmem:[%s11713_s21 + $0x2f8] sm:$0xff] }
 0x170   : > { %15668 = vst [vmem:[#allocation19_spill] sm:$0xff] %v12618_v12  ;;  %8706 = vmatprep.mubr.msk.bf16.mxu0 %vm864_vm0, %v12359_v41  ;;  %1714 = vmatpush1.bf16.msra.mxu1 %v482_v24  ;;  %v538_v24 = vunpack.c.h.u8.bf16 %v296_v3 }
 0x171   : > { %15669 = vst [vmem:[#allocation20_spill] sm:$0xff] %v12623_v57  ;;  %v1019_v37 = vpop.f32.mrb[36].mxu1  ;;  %1715 = vmatprep.subr.bf16.mxu1 %v494_v19  ;;  %3626 = vmatpush1.bf16.msra.mxu0 %v10864_v50  ;;  %v549_v19 = vunpack.c.l.u8.bf16 %v307_v58 }
 0x172   : > { %v12635_v6 = vpop.f32.mrb[44].mxu0  ;;  %v1153_v41 = vadd.f32 %v12565_v59, %v1019_v37  ;;  %v1021_v4 = vpop.f32.mrb[37].mxu1  ;;  %3627 = vmatprep.subr.bf16.mxu0 %v10869_v14  ;;  %v10876_v37 = vld [vmem:[%s15466_s1 + $0x110] ss:$8 sps:$4 sm:$0xff]   ;;  %v10881_v14 = vld [vmem:[%s15466_s1 + $0x124] ss:$8 sps:$4 sm:$0xff]  }
 0x173   : > { %v12638_v21 = vpop.f32.mrb[45].mxu0  ;;  %v1155_v55 = vadd.f32 %v12568_v27, %v1021_v4  ;;  %v1023_v17 = vpop.f32.mrb[38].mxu1  ;;  %v10872_v27 = vld [vmem:[%s15466_s1 + $0xf4] ss:$8 sps:$4 sm:$0xff]  }
 0x174   : > { %v12641_v31 = vpop.f32.mrb[46].mxu0  ;;  %v1157_v22 = vadd.f32 %v12571_v40, %v1023_v17  ;;  %v1025_v46 = vpop.f32.mrb[39].mxu1  ;;  %1716 = vmatpush1.bf16.msra.mxu1 %v493_v35  ;;  %v516_v40 = vunpack.c.h.u8.bf16 %v285_v23  ;;  %v10884_v4 = vld [vmem:[%s15466_s1 + $0x134] ss:$8 sps:$4 sm:$0xff]   ;;  %v15673_v17 = vld [vmem:[#allocation7_spill] sm:$0xff] }
 0x175   : > { %v12647_v59 = vpop.f32.mrb[47].mxu0  ;;  %v1159_v63 = vadd.f32 %v12577_v9, %v1025_v46  ;;  %1717 = vmatprep.subr.bf16.mxu1 %v505_v11  ;;  %3628 = vmatpush1.bf16.msra.mxu0 %v10867_v42  ;;  %v10870_v9 = vld [vmem:[%s15466_s1 + $0xf0] ss:$8 sps:$4 sm:$0xff]  }
 0x176   : > { %v12653_v43 = vpack.c.bf16 %v1157_v22, %v1153_v41  ;;  %1520 = vmatmul.mubr.bf16.gmra.mrb[104].mxu1 %v12262_v39  ;;  %3629 = vmatprep.subr.bf16.mxu0 %v10872_v27  ;;  %v527_v39 = vunpack.c.l.u8.bf16 %v296_v3  ;;  %v15674_v22 = vld [vmem:[#allocation8_spill] sm:$0xff]  ;;  %v560_v3 = vunpack.c.h.u8.bf16 %v307_v58 }
 0x177   : > { %2205 = vmatmul.mubr.bf16.gmra.mrb[112].mxu0 %v12379_v45  ;;  %v12658_v18 = vpack.c.bf16 %v1159_v63, %v1155_v55  ;;  %1529 = vmatprep.mubr.bf16.mxu1 %v12276_v7  ;;  %v295_v45 = vld [vmem:[%s11713_s21 + $0x298] sm:$0xff]  ;;  %v15672_v55 = vld [vmem:[#allocation4_spill] sm:$0xff] }
 0x178   : > { %15670 = vst [vmem:[#allocation21_spill] sm:$0xff] %v12653_v43  ;;  %8707 = vmatprep.mubr.msk.bf16.mxu0 %vm864_vm0, %v12388_v52  ;;  %1718 = vmatpush1.bf16.msra.mxu1 %v504_v38  ;;  %v526_v25 = vunpack.c.l.u8.bf16 %v295_v45  ;;  %v537_v8 = vunpack.c.h.u8.bf16 %v295_v45  ;;  %v306_v46 = vld [vmem:[%s11713_s21 + $0x2f0] sm:$0xff]  ;;  %v10887_v38 = vld [vmem:[%s15466_s1 + $0x144] ss:$8 sps:$4 sm:$0xff]  }
 0x179   : > { %15671 = vst [vmem:[#allocation22_spill] sm:$0xff] %v12658_v18  ;;  %1719 = vmatprep.subr.bf16.mxu1 %v516_v40  ;;  %3630 = vmatpush1.bf16.msra.mxu0 %v10870_v9  ;;  %v10882_v42 = vld [vmem:[%s15466_s1 + $0x130] ss:$8 sps:$4 sm:$0xff]   ;;  %v548_v27 = vunpack.c.l.u8.bf16 %v306_v46  ;;  %v12758_v58 = vld [vmem:[%s15465_s0 + $0x24] ss:$16 sps:$4 sm:$0xff]  }
 0x17a   : > { %v12670_v7 = vpop.f32.mrb[48].mxu0  ;;  %3732 = vmatprep.subr.bf16.mxu0 %v10875_v49  ;;  %v12747_v45 = vld [vmem:[%s15465_s0] ss:$16 sps:$4 sm:$0xff]  }
 0x17b   : > { %v12672_v16 = vpop.f32.mrb[49].mxu0  ;;  %v15675_v49 = vld [vmem:[#allocation6_spill] sm:$0xff] }
 0x17c   : > { %v12674_v52 = vpop.f32.mrb[50].mxu0  ;;  %1720 = vmatpush1.bf16.msra.mxu1 %v515_v2  ;;  %v318_v2 = vld [vmem:[%s11713_s21 + $0x350] sm:$0xff] }
 0x17d   : > { %v12676_v32 = vpop.f32.mrb[51].mxu0  ;;  %1721 = vmatprep.subr.bf16.mxu1 %v527_v39  ;;  %v10885_v39 = vld [vmem:[%s15466_s1 + $0x140] ss:$8 sps:$4 sm:$0xff]  }
 0x17e   : > { %1530 = vmatmul.mubr.bf16.gmra.mrb[108].mxu1 %v12292_v33  ;;  %v10873_v33 = vld [vmem:[%s15466_s1 + $0x100] ss:$8 sps:$4 sm:$0xff]  }
 0x17f   : > { %2215 = vmatmul.mubr.bf16.gmra.mrb[116].mxu0 %v12419_v10  ;;  %1539 = vmatprep.mubr.bf16.mxu1 %v12306_v36  ;;  %v10878_v36 = vld [vmem:[%s15466_s1 + $0x114] ss:$8 sps:$4 sm:$0xff]  }
 0x180   : > { %3631 = vmatprep.mubr.bf16.mxu0 %v12354_v26  ;;  %1722 = vmatpush1.bf16.msra.mxu1 %v526_v25  ;;  %v10890_v25 = vld [vmem:[%s15466_s1 + $0x154] ss:$8 sps:$4 sm:$0xff]  }
 0x181   : > { %1723 = vmatprep.subr.bf16.mxu1 %v538_v24  ;;  %v559_v24 = vunpack.c.h.u8.bf16 %v306_v46  ;;  %v582_v46 = vunpack.c.h.u8.bf16 %v318_v2 }
 0x182   : > { %v12683_v23 = vpop.f32.mrb[52].mxu0 }
 0x183   : > { %v12685_v50 = vpop.f32.mrb[53].mxu0 }
 0x184   : > { %v12687_v35 = vpop.f32.mrb[54].mxu0  ;;  %1724 = vmatpush1.bf16.msra.mxu1 %v537_v8  ;;  %v571_v8 = vunpack.c.l.u8.bf16 %v318_v2  ;;  %v12794_v2 = vld [vmem:[%s15465_s0 + $0x44] ss:$16 sps:$4 sm:$0xff]  }
 0x185   : > { %v12692_v10 = vpop.f32.mrb[55].mxu0  ;;  %1826 = vmatprep.subr.bf16.mxu1 %v549_v19  ;;  %v317_v19 = vld [vmem:[%s11713_s21 + $0x348] sm:$0xff] }
 0x186   : > { %1540 = vmatmul.mubr.bf16.gmra.mrb[112].mxu1 %v12319_v0 }
 0x187   : > { %3632 = vmatmul.mubr.bf16.vlgmr.msra.gmra.mrb[120].mxu0 %v12337_v34  ;;  %1549 = vmatprep.mubr.bf16.mxu1 %v12333_v30  ;;  %v10879_v30 = vld [vmem:[%s15466_s1 + $0x120] ss:$8 sps:$4 sm:$0xff]   ;;  %v350_v34 = vld [vmem:[%s11713_s21 + $0x450] sm:$0xff] }
 0x188   : > { %3641 = vmatprep.mubr.bf16.mxu0 %v12383_v44  ;;  %3733 = vmatpush1.bf16.msra.mxu0 %v10873_v33  ;;  %v10888_v33 = vld [vmem:[%s15466_s1 + $0x150] ss:$8 sps:$4 sm:$0xff]  }
 0x189   : > { %3734 = vmatprep.subr.bf16.mxu0 %v10878_v36 }
 0x18a   : > { %v12707_v11 = vpop.f32.mrb[56].mxu0 }
 0x18b   : > { %v12709_v0 = vpop.f32.mrb[57].mxu0 }
 0x18c   : > { %v12711_v60 = vpop.f32.mrb[58].mxu0  ;;  %3735 = vmatpush1.bf16.msra.mxu0 %v10876_v37 }
 0x18d   : > { %v12716_v41 = vpop.f32.mrb[59].mxu0  ;;  %3736 = vmatprep.subr.bf16.mxu0 %v10881_v14 }
 0x18e   : > { %1550 = vmatmul.mubr.bf16.gmra.mrb[116].mxu1 %v12348_v28 }
 0x18f   : > { %3642 = vmatmul.mubr.bf16.gmra.mrb[124].mxu0 %v15672_v55  ;;  %1725 = vmatprep.mubr.bf16.mxu1 %v15674_v22 }
 0x190   : > { %3651 = vmatprep.mubr.bf16.mxu0 %v15673_v17  ;;  %3737 = vmatpush1.bf16.msra.mxu0 %v10879_v30  ;;  %v570_v30 = vunpack.c.l.u8.bf16 %v317_v19 }
 0x191   : > { %3738 = vmatprep.subr.bf16.mxu0 %v10884_v4  ;;  %v10893_v4 = vld [vmem:[%s15466_s1 + $0x164] ss:$8 sps:$4 sm:$0xff]  }
 0x192   : > { %v12732_v63 = vpop.f32.mrb[60].mxu0 }
 0x193   : > { %v12734_v28 = vpop.f32.mrb[61].mxu0 }
 0x194   : > { %v12736_v40 = vpop.f32.mrb[62].mxu0  ;;  %3739 = vmatpush1.bf16.msra.mxu0 %v10882_v42  ;;  %v10891_v42 = vld [vmem:[%s15466_s1 + $0x160] ss:$8 sps:$4 sm:$0xff]  }
 0x195   : > { %v12738_v9 = vpop.f32.mrb[63].mxu0  ;;  %3740 = vmatprep.subr.bf16.mxu0 %v10887_v38  ;;  %v12782_v38 = vld [vmem:[%s15465_s0 + $0x20] ss:$16 sps:$4 sm:$0xff]  }
 0x196   : > { %1726 = vmatmul.mubr.bf16.vlgmr.msra.gmra.mrb[120].mxu1 %v12747_v45 }
 0x197   : > { %3652 = vmatmul.mubr.bf16.gmra.mrb[128].mxu0 %v15675_v49  ;;  %1827 = vmatpush1.bf16.msra.mxu1 %v548_v27  ;;  %v329_v27 = vld [vmem:[%s11713_s21 + $0x3a8] sm:$0xff]  ;;  %v339_v49 = vld [vmem:[%s11713_s21 + $0x3f8] sm:$0xff] }
 0x198   : > { %3661 = vmatprep.mubr.bf16.mxu0 %v12460_v1  ;;  %1735 = vmatprep.mubr.bf16.mxu1 %v12758_v58 }
 0x199   : > { %1828 = vmatprep.subr.bf16.mxu1 %v560_v3  ;;  %3741 = vmatpush1.bf16.msra.mxu0 %v10885_v39  ;;  %v10896_v3 = vld [vmem:[%s15466_s1 + $0x174] ss:$8 sps:$4 sm:$0xff]   ;;  %v581_v39 = vunpack.c.h.u8.bf16 %v317_v19  ;;  %v10899_v19 = vld [vmem:[%s15466_s1 + $0x184] ss:$8 sps:$4 sm:$0xff]  }
 0x19a   : > { %v12765_v36 = vpop.f32.mrb[64].mxu0  ;;  %3742 = vmatprep.subr.bf16.mxu0 %v10890_v25  ;;  %v593_v25 = vunpack.c.l.u8.bf16 %v329_v27 }
 0x19b   : > { %v12767_v37 = vpop.f32.mrb[65].mxu0  ;;  %1829 = vmatpush1.bf16.msra.mxu1 %v559_v24  ;;  %v328_v24 = vld [vmem:[%s11713_s21 + $0x3a0] sm:$0xff] }
 0x19c   : > { %v12769_v14 = vpop.f32.mrb[66].mxu0  ;;  %1830 = vmatprep.subr.bf16.mxu1 %v571_v8  ;;  %v10894_v8 = vld [vmem:[%s15466_s1 + $0x170] ss:$8 sps:$4 sm:$0xff]  }
 0x19d   : > { %v12774_v22 = vpop.f32.mrb[67].mxu0  ;;  %3743 = vmatpush1.bf16.msra.mxu0 %v10888_v33 }
 0x19e   : > { %1736 = vmatmul.mubr.bf16.gmra.mrb[124].mxu1 %v12782_v38  ;;  %3744 = vmatprep.subr.bf16.mxu0 %v10893_v4 }
 0x19f   : > { %3662 = vmatmul.mubr.bf16.gmra.mrb[132].mxu0 %v12453_v56  ;;  %1745 = vmatprep.mubr.bf16.mxu1 %v12794_v2 }
 0x1a0   : > { %3671 = vmatprep.mubr.bf16.mxu0 %v12492_v5  ;;  %1831 = vmatpush1.bf16.msra.mxu1 %v570_v30  ;;  %v592_v30 = vunpack.c.l.u8.bf16 %v328_v24 }
 0x1a1   : > { %1832 = vmatprep.subr.bf16.mxu1 %v582_v46  ;;  %3745 = vmatpush1.bf16.msra.mxu0 %v10891_v42  ;;  %v10897_v46 = vld [vmem:[%s15466_s1 + $0x180] ss:$8 sps:$4 sm:$0xff]   ;;  %v604_v42 = vunpack.c.h.u8.bf16 %v329_v27  ;;  %v12830_v27 = vld [vmem:[%s15465_s0 + $0x64] ss:$16 sps:$4 sm:$0xff]  }
 0x1a2   : > { %v12801_v33 = vpop.f32.mrb[68].mxu0  ;;  %3746 = vmatprep.subr.bf16.mxu0 %v10896_v3  ;;  %v12818_v3 = vld [vmem:[%s15465_s0 + $0x40] ss:$16 sps:$4 sm:$0xff]  }
 0x1a3   : > { %v12803_v5 = vpop.f32.mrb[69].mxu0 }
 0x1a4   : > { %v12805_v56 = vpop.f32.mrb[70].mxu0  ;;  %1833 = vmatpush1.bf16.msra.mxu1 %v581_v39  ;;  %v10902_v39 = vld [vmem:[%s15466_s1 + $0x194] ss:$8 sps:$4 sm:$0xff]  }
 0x1a5   : > { %v12810_v4 = vpop.f32.mrb[71].mxu0  ;;  %1834 = vmatprep.subr.bf16.mxu1 %v593_v25  ;;  %3747 = vmatpush1.bf16.msra.mxu0 %v10894_v8  ;;  %v340_v25 = vld [vmem:[%s11713_s21 + $0x400] sm:$0xff]  ;;  %v603_v8 = vunpack.c.h.u8.bf16 %v328_v24 }
 0x1a6   : > { %1746 = vmatmul.mubr.bf16.gmra.mrb[128].mxu1 %v12818_v3  ;;  %3748 = vmatprep.subr.bf16.mxu0 %v10899_v19  ;;  %v615_v1 = vunpack.c.l.u8.bf16 %v340_v25  ;;  %v10905_v24 = vld [vmem:[%s15466_s1 + $0x1a4] ss:$8 sps:$4 sm:$0xff]  }
 0x1a7   : > { %3672 = vmatmul.mubr.bf16.gmra.mrb[136].mxu0 %v12485_v54  ;;  %1755 = vmatprep.mubr.bf16.mxu1 %v12830_v27  ;;  %v10900_v54 = vld [vmem:[%s15466_s1 + $0x190] ss:$8 sps:$4 sm:$0xff]  }
 0x1a8   : > { %3681 = vmatprep.mubr.bf16.mxu0 %v12524_v51  ;;  %1835 = vmatpush1.bf16.msra.mxu1 %v592_v30  ;;  %v614_v30 = vunpack.c.l.u8.bf16 %v339_v49 }
 0x1a9   : > { %3749 = vmatpush1.bf16.msra.mxu0 %v10897_v46  ;;  %1836 = vmatprep.subr.bf16.mxu1 %v604_v42  ;;  %v10903_v46 = vld [vmem:[%s15466_s1 + $0x1a0] ss:$8 sps:$4 sm:$0xff]   ;;  %v626_v42 = vunpack.c.h.u8.bf16 %v340_v25  ;;  %v12866_v25 = vld [vmem:[%s15465_s0 + $0x84] ss:$16 sps:$4 sm:$0xff]  }
 0x1aa   : > { %v12837_v17 = vpop.f32.mrb[72].mxu0  ;;  %3750 = vmatprep.subr.bf16.mxu0 %v10902_v39  ;;  %v12854_v39 = vld [vmem:[%s15465_s0 + $0x60] ss:$16 sps:$4 sm:$0xff]  }
 0x1ab   : > { %v12839_v51 = vpop.f32.mrb[73].mxu0 }
 0x1ac   : > { %v12841_v55 = vpop.f32.mrb[74].mxu0  ;;  %1837 = vmatpush1.bf16.msra.mxu1 %v603_v8  ;;  %v625_v8 = vunpack.c.h.u8.bf16 %v339_v49  ;;  %v10911_v49 = vld [vmem:[%s15466_s1 + $0x1c4] ss:$8 sps:$4 sm:$0xff]  }
 0x1ad   : > { %v12846_v19 = vpop.f32.mrb[75].mxu0  ;;  %3751 = vmatpush1.bf16.msra.mxu0 %v10900_v54  ;;  %1838 = vmatprep.subr.bf16.mxu1 %v615_v1  ;;  %v10908_v54 = vld [vmem:[%s15466_s1 + $0x1b4] ss:$8 sps:$4 sm:$0xff]  }
 0x1ae   : > { %15676 = vst [vmem:[#allocation8_spill] sm:$0xff] %v12846_v19  ;;  %1756 = vmatmul.mubr.bf16.gmra.mrb[132].mxu1 %v12854_v39  ;;  %v351_v1 = vld [vmem:[%s11713_s21 + $0x458] sm:$0xff]  ;;  %3752 = vmatprep.subr.bf16.mxu0 %v10905_v24  ;;  %v636_v24 = vunpack.c.l.u8.bf16 %v350_v34 }
 0x1af   : > { %3682 = vmatmul.mubr.bf16.gmra.mrb[140].mxu0 %v12517_v15  ;;  %1765 = vmatprep.mubr.bf16.mxu1 %v12866_v25  ;;  %v10906_v15 = vld [vmem:[%s15466_s1 + $0x1b0] ss:$8 sps:$4 sm:$0xff]   ;;  %v637_v44 = vunpack.c.l.u8.bf16 %v351_v1 }
 0x1b0   : > { %3691 = vmatprep.mubr.bf16.mxu0 %v12556_v47  ;;  %1839 = vmatpush1.bf16.msra.mxu1 %v614_v30 }
 0x1b1   : > { %3753 = vmatpush1.bf16.msra.mxu0 %v10903_v46  ;;  %1840 = vmatprep.subr.bf16.mxu1 %v626_v42  ;;  %v10909_v46 = vld [vmem:[%s15466_s1 + $0x1c0] ss:$8 sps:$4 sm:$0xff]   ;;  %v648_v42 = vunpack.c.h.u8.bf16 %v351_v1  ;;  %v647_v1 = vunpack.c.h.u8.bf16 %v350_v34 }
 0x1b2   : > { %v12873_v26 = vpop.f32.mrb[76].mxu0  ;;  %3754 = vmatprep.subr.bf16.mxu0 %v10908_v54  ;;  %v12890_v54 = vld [vmem:[%s15465_s0 + $0x80] ss:$16 sps:$4 sm:$0xff]  }
 0x1b3   : > { %15677 = vst [vmem:[#allocation23_spill] sm:$0xff] %v12873_v26  ;;  %v12875_v47 = vpop.f32.mrb[77].mxu0  ;;  %v10915_v34 = vld [vmem:[%s15466_s1 + $0x1e0] ss:$8 sps:$4 sm:$0xff]  }
 0x1b4   : > { %15678 = vst [vmem:[#allocation24_spill] sm:$0xff] %v12875_v47  ;;  %v12877_v19 = vpop.f32.mrb[78].mxu0  ;;  %1841 = vmatpush1.bf16.msra.mxu1 %v625_v8  ;;  %v362_v8 = vld [vmem:[%s11713_s21 + $0x4b0] sm:$0xff] }
 0x1b5   : > { %15679 = vst [vmem:[#allocation25_spill] sm:$0xff] %v12877_v19  ;;  %v12882_v30 = vpop.f32.mrb[79].mxu0  ;;  %3755 = vmatpush1.bf16.msra.mxu0 %v10906_v15  ;;  %1842 = vmatprep.subr.bf16.mxu1 %v637_v44  ;;  %v10914_v15 = vld [vmem:[%s15466_s1 + $0x1d4] ss:$8 sps:$4 sm:$0xff]   ;;  %v361_v19 = vld [vmem:[%s11713_s21 + $0x4a8] sm:$0xff] }
 0x1b6   : > { %15680 = vst [vmem:[#allocation26_spill] sm:$0xff] %v12882_v30  ;;  %1766 = vmatmul.mubr.bf16.gmra.mrb[136].mxu1 %v12890_v54  ;;  %v12902_v44 = vld [vmem:[%s15465_s0 + $0xa4] ss:$16 sps:$4 sm:$0xff]   ;;  %3756 = vmatprep.subr.bf16.mxu0 %v10911_v49  ;;  %v659_v30 = vunpack.c.l.u8.bf16 %v362_v8  ;;  %v658_v47 = vunpack.c.l.u8.bf16 %v361_v19  ;;  %v670_v49 = vunpack.c.h.u8.bf16 %v362_v8 }
 0x1b7   : > { %3692 = vmatmul.mubr.bf16.gmra.mrb[144].mxu0 %v12549_v20  ;;  %1775 = vmatprep.mubr.bf16.mxu1 %v12902_v44  ;;  %v10912_v20 = vld [vmem:[%s15466_s1 + $0x1d0] ss:$8 sps:$4 sm:$0xff]  }
 0x1b8   : > { %3701 = vmatprep.mubr.bf16.mxu0 %v12588_v13  ;;  %1843 = vmatpush1.bf16.msra.mxu1 %v636_v24  ;;  %v10917_v13 = vld [vmem:[%s15466_s1 + $0x1e4] ss:$8 sps:$4 sm:$0xff]   ;;  %v12918_v24 = vld [vmem:[%s15465_s0 + $0xa0] ss:$16 sps:$4 sm:$0xff]  }
 0x1b9   : > { %3757 = vmatpush1.bf16.msra.mxu0 %v10909_v46  ;;  %1844 = vmatprep.subr.bf16.mxu1 %v648_v42  ;;  %v10920_v46 = vld [vmem:[%s15466_s1 + $0x1f4] ss:$8 sps:$4 sm:$0xff]   ;;  %v669_v42 = vunpack.c.h.u8.bf16 %v361_v19 }
 0x1ba   : > { %3758 = vmatprep.subr.bf16.mxu0 %v10914_v15  ;;  %v10918_v15 = vld [vmem:[%s15466_s1 + $0x1f0] ss:$8 sps:$4 sm:$0xff]  }
 0x1bc   : > { %1845 = vmatpush1.bf16.msra.mxu1 %v647_v1  ;;  %v10923_v1 = vld [vmem:[%s15466_s1 + $0x204] ss:$8 sps:$4 sm:$0xff]  }
 0x1bd   : > { %3759 = vmatpush1.bf16.msra.mxu0 %v10912_v20  ;;  %1846 = vmatprep.subr.bf16.mxu1 %v659_v30  ;;  %v12926_v20 = vld [vmem:[%s11713_s21 + $0x1b0] sm:$0xff] }
 0x1be   : > { %1776 = vmatmul.mubr.bf16.gmra.mrb[140].mxu1 %v12918_v24  ;;  %v12932_v30 = vld [vmem:[%s15465_s0 + $0xc4] ss:$16 sps:$4 sm:$0xff]   ;;  %3760 = vmatprep.subr.bf16.mxu0 %v10917_v13  ;;  %v464_v8 = vunpack.c.l.u8.bf16 %v12926_v20 }
 0x1bf   : > { %3702 = vmatmul.mubr.bf16.gmra.mrb[148].mxu0 %v12583_v53  ;;  %15681 = vst [vmem:[#allocation27_spill] sm:$0xff] %v12932_v30  ;;  %1785 = vmatprep.mubr.bf16.mxu1 %v12932_v30  ;;  %v12953_v13 = vld [vmem:[%s15465_s0 + $0xe4] ss:$16 sps:$4 sm:$0xff]  }
 0x1c0   : > { %3711 = vmatprep.mubr.bf16.mxu0 %v12623_v57  ;;  %1847 = vmatpush1.bf16.msra.mxu1 %v658_v47  ;;  %v12945_v47 = vld [vmem:[%s15465_s0 + $0xc0] ss:$16 sps:$4 sm:$0xff]   ;;  %15683 = vst [vmem:[#allocation29_spill] sm:$0xff] %v12953_v13 }
 0x1c1   : > { %3761 = vmatpush1.bf16.msra.mxu0 %v10915_v34  ;;  %1848 = vmatprep.subr.bf16.mxu1 %v670_v49  ;;  %15682 = vst [vmem:[#allocation28_spill] sm:$0xff] %v12945_v47  ;;  %v12987_v57 = vld [vmem:[%s15465_s0 + $0x100] ss:$16 sps:$4 sm:$0xff]  }
 0x1c2   : > { %3762 = vmatprep.subr.bf16.mxu0 %v10920_v46  ;;  %15690 = vst [vmem:[#allocation36_spill] sm:$0xff] %v12987_v57 }
 0x1c4   : > { %1849 = vmatpush1.bf16.msra.mxu1 %v669_v42 }
 0x1c5   : > { %3763 = vmatpush1.bf16.msra.mxu0 %v10918_v15  ;;  %9870 = vmatprep.subr.bf16.mxu1 %v464_v8  ;;  %v12963_v8 = vld [vmem:[%s15465_s0 + $0xe0] ss:$16 sps:$4 sm:$0xff]  }
 0x1c6   : > { %1786 = vmatmul.mubr.bf16.gmra.mrb[144].mxu1 %v12945_v47  ;;  %3865 = vmatprep.subr.bf16.mxu0 %v10923_v1  ;;  %15686 = vst [vmem:[#allocation32_spill] sm:$0xff] %v12963_v8  ;;  %v12971_v1 = vld [vmem:[%s15465_s0 + $0x104] ss:$16 sps:$4 sm:$0xff]   ;;  %v13048_v47 = vld [vmem:[%s15465_s0 + $0x8] ss:$16 sps:$4 sm:$0xff]  }
 0x1c7   : > { %3712 = vmatmul.mubr.bf16.gmra.mrb[152].mxu0 %v12618_v12  ;;  %1795 = vmatprep.mubr.bf16.mxu1 %v12953_v13  ;;  %15687 = vst [vmem:[#allocation33_spill] sm:$0xff] %v12971_v1  ;;  %v10921_v12 = vld [vmem:[%s15466_s1 + $0x200] ss:$8 sps:$4 sm:$0xff]   ;;  %15698 = vst [vmem:[#allocation44_spill] sm:$0xff] %v13048_v47 }
 0x1c8   : > { %3721 = vmatprep.mubr.bf16.mxu0 %v12658_v18  ;;  %v10933_v13 = vld [vmem:[%s15466_s1 + $0x240] ss:$8 sps:$4 sm:$0xff]  }
 0x1c9   : > { %v1328_v19 = vpop.f32.mrb[40].mxu1 }
 0x1ca   : > { %v1330_v34 = vpop.f32.mrb[41].mxu1 }
 0x1cb   : > { %v1332_v49 = vpop.f32.mrb[42].mxu1 }
 0x1cc   : > { %v12956_v46 = vpack.c.bf16 %v1332_v49, %v1328_v19  ;;  %v1334_v42 = vpop.f32.mrb[43].mxu1 }
 0x1cd   : > { %v12958_v15 = vpack.c.bf16 %v1334_v42, %v1330_v34 }
 0x1ce   : > { %15684 = vst [vmem:[#allocation30_spill] sm:$0xff] %v12956_v46  ;;  %1796 = vmatmul.mubr.bf16.gmra.mrb[148].mxu1 %v12963_v8 }
 0x1cf   : > { %15685 = vst [vmem:[#allocation31_spill] sm:$0xff] %v12958_v15  ;;  %3722 = vmatmul.mubr.bf16.gmra.mrb[156].mxu0 %v12653_v43  ;;  %1805 = vmatprep.mubr.bf16.mxu1 %v12971_v1  ;;  %v13017_v1 = vld [vmem:[%s15465_s0 + $0x120] ss:$16 sps:$4 sm:$0xff]  }
 0x1d0   : > { %3764 = vmatprep.mubr.bf16.mxu0 %v12958_v15  ;;  %v10926_v15 = vld [vmem:[%s15466_s1 + $0x214] ss:$8 sps:$4 sm:$0xff]   ;;  %15694 = vst [vmem:[#allocation40_spill] sm:$0xff] %v13017_v1 }
 0x1d1   : > { %v1338_v19 = vpop.f32.mrb[44].mxu1 }
 0x1d2   : > { %v1340_v34 = vpop.f32.mrb[45].mxu1 }
 0x1d3   : > { %v1342_v49 = vpop.f32.mrb[46].mxu1 }
 0x1d4   : > { %v12974_v42 = vpack.c.bf16 %v1342_v49, %v1338_v19  ;;  %v1344_v18 = vpop.f32.mrb[47].mxu1  ;;  %v10924_v19 = vld [vmem:[%s15466_s1 + $0x210] ss:$8 sps:$4 sm:$0xff]   ;;  %v10929_v49 = vld [vmem:[%s15466_s1 + $0x224] ss:$8 sps:$4 sm:$0xff]  }
 0x1d5   : > { %v12979_v43 = vpack.c.bf16 %v1344_v18, %v1340_v34  ;;  %v12995_v18 = vld [vmem:[%s15465_s0 + $0x124] ss:$16 sps:$4 sm:$0xff]  }
 0x1d6   : > { %15688 = vst [vmem:[#allocation34_spill] sm:$0xff] %v12974_v42  ;;  %1806 = vmatmul.mubr.bf16.gmra.mrb[152].mxu1 %v12987_v57  ;;  %15691 = vst [vmem:[#allocation37_spill] sm:$0xff] %v12995_v18 }
 0x1d7   : > { %15689 = vst [vmem:[#allocation35_spill] sm:$0xff] %v12979_v43  ;;  %3765 = vmatmul.mubr.bf16.vlgmr.msra.gmra.mrb[120].mxu0 %v12956_v46  ;;  %1815 = vmatprep.mubr.bf16.mxu1 %v12995_v18 }
 0x1d8   : > { %3774 = vmatprep.mubr.bf16.mxu0 %v12979_v43  ;;  %3866 = vmatpush1.bf16.msra.mxu0 %v10921_v12  ;;  %v10927_v12 = vld [vmem:[%s15466_s1 + $0x220] ss:$8 sps:$4 sm:$0xff]  }
 0x1d9   : > { %v1348_v34 = vpop.f32.mrb[48].mxu1  ;;  %3867 = vmatprep.subr.bf16.mxu0 %v10926_v15  ;;  %v10932_v15 = vld [vmem:[%s15466_s1 + $0x234] ss:$8 sps:$4 sm:$0xff]  }
 0x1da   : > { %v1350_v43 = vpop.f32.mrb[49].mxu1 }
 0x1db   : > { %v1352_v46 = vpop.f32.mrb[50].mxu1 }
 0x1dc   : > { %v13004_v53 = vpack.c.bf16 %v1352_v46, %v1348_v34  ;;  %v1354_v57 = vpop.f32.mrb[51].mxu1  ;;  %3868 = vmatpush1.bf16.msra.mxu0 %v10924_v19  ;;  %v10930_v46 = vld [vmem:[%s15466_s1 + $0x230] ss:$8 sps:$4 sm:$0xff]   ;;  %v10935_v34 = vld [vmem:[%s15466_s1 + $0x244] ss:$8 sps:$4 sm:$0xff]  }
 0x1dd   : > { %v13009_v18 = vpack.c.bf16 %v1354_v57, %v1350_v43  ;;  %3869 = vmatprep.subr.bf16.mxu0 %v10929_v49  ;;  %v13025_v57 = vld [vmem:[%s15465_s0 + $0xc] ss:$16 sps:$4 sm:$0xff]   ;;  %v222_v43 = vld [vmem:[%s11713_s21 + $0x50] sm:$0xff] }
 0x1de   : > { %15692 = vst [vmem:[#allocation38_spill] sm:$0xff] %v13004_v53  ;;  %1816 = vmatmul.mubr.bf16.gmra.mrb[156].mxu1 %v13017_v1  ;;  %15695 = vst [vmem:[#allocation41_spill] sm:$0xff] %v13025_v57 }
 0x1df   : > { %15693 = vst [vmem:[#allocation39_spill] sm:$0xff] %v13009_v18  ;;  %3775 = vmatmul.mubr.bf16.gmra.mrb[124].mxu0 %v12974_v42  ;;  %8688 = vmatprep.mubr.msk.bf16.mxu1 %vm864_vm0, %v13025_v57  ;;  %v376_v42 = vunpack.c.l.u8.bf16 %v222_v43  ;;  %v475_v57 = vunpack.c.h.u8.bf16 %v12926_v20  ;;  %v10938_v20 = vld [vmem:[%s15466_s1 + $0x254] ss:$8 sps:$4 sm:$0xff]  }
 0x1e0   : > { %3784 = vmatprep.mubr.bf16.mxu0 %v13009_v18  ;;  %3870 = vmatpush1.bf16.msra.mxu0 %v10927_v12 }
 0x1e1   : > { %v1358_v19 = vpop.f32.mrb[52].mxu1  ;;  %3871 = vmatprep.subr.bf16.mxu0 %v10932_v15  ;;  %v277_v15 = vld [vmem:[%s11713_s21 + $0x208] sm:$0xff] }
 0x1e2   : > { %v1360_v49 = vpop.f32.mrb[53].mxu1 }
 0x1e3   : > { %v1362_v18 = vpop.f32.mrb[54].mxu1 }
 0x1e4   : > { %v13036_v1 = vpack.c.bf16 %v1362_v18, %v1358_v19  ;;  %v1364_v8 = vpop.f32.mrb[55].mxu1  ;;  %3872 = vmatpush1.bf16.msra.mxu0 %v10930_v46  ;;  %v13059_v18 = vld [vmem:[%s15465_s0 + $0x2c] ss:$16 sps:$4 sm:$0xff]   ;;  %v486_v46 = vunpack.c.l.u8.bf16 %v277_v15 }
 0x1e5   : > { %v13039_v12 = vpack.c.bf16 %v1364_v8, %v1360_v49  ;;  %3873 = vmatprep.subr.bf16.mxu0 %v10935_v34  ;;  %v387_v8 = vunpack.c.h.u8.bf16 %v222_v43  ;;  %15699 = vst [vmem:[#allocation45_spill] sm:$0xff] %v13059_v18  ;;  %v10936_v34 = vld [vmem:[%s15466_s1 + $0x250] ss:$8 sps:$4 sm:$0xff]  }
 0x1e6   : > { %15696 = vst [vmem:[#allocation42_spill] sm:$0xff] %v13036_v1  ;;  %1859 = vmatmul.mubr.bf16.vlgmr.msra.gmra.mrb[120].mxu1 %v13048_v47 }
 0x1e7   : > { %15697 = vst [vmem:[#allocation43_spill] sm:$0xff] %v13039_v12  ;;  %3785 = vmatmul.mubr.bf16.gmra.mrb[128].mxu0 %v13004_v53  ;;  %9871 = vmatpush3.bf16.msra.mxu1 %v376_v42  ;;  %v233_v42 = vld [vmem:[%s11713_s21 + $0xa8] sm:$0xff] }
 0x1e8   : > { %3794 = vmatprep.mubr.bf16.mxu0 %v13039_v12  ;;  %8689 = vmatprep.mubr.msk.bf16.mxu1 %vm864_vm0, %v13059_v18  ;;  %v398_v47 = vunpack.c.l.u8.bf16 %v233_v42  ;;  %v10939_v18 = vld [vmem:[%s15466_s1 + $0x260] ss:$8 sps:$4 sm:$0xff]  }
 0x1e9   : > { %9872 = vmatprep.subr.bf16.mxu1 %v475_v57  ;;  %v1368_v19 = vpop.f32.mrb[56].mxu1  ;;  %3874 = vmatpush1.bf16.msra.mxu0 %v10933_v13  ;;  %v10941_v57 = vld [vmem:[%s15466_s1 + $0x264] ss:$8 sps:$4 sm:$0xff]  }
 0x1ea   : > { %v1370_v49 = vpop.f32.mrb[57].mxu1  ;;  %3875 = vmatprep.subr.bf16.mxu0 %v10938_v20  ;;  %v497_v20 = vunpack.c.h.u8.bf16 %v277_v15  ;;  %v13092_v15 = vld [vmem:[%s15465_s0 + $0x4c] ss:$16 sps:$4 sm:$0xff]  }
 0x1eb   : > { %v1372_v43 = vpop.f32.mrb[58].mxu1  ;;  %9873 = vmatpush3.bf16.msra.mxu1 %v387_v8  ;;  %v13080_v8 = vld [vmem:[%s15465_s0 + $0x28] ss:$16 sps:$4 sm:$0xff]   ;;  %15703 = vst [vmem:[#allocation49_spill] sm:$0xff] %v13092_v15 }
 0x1ec   : > { %v13067_v12 = vpack.c.bf16 %v1372_v43, %v1368_v19  ;;  %v1374_v53 = vpop.f32.mrb[59].mxu1  ;;  %9874 = vmatprep.subr.bf16.mxu1 %v486_v46  ;;  %15702 = vst [vmem:[#allocation48_spill] sm:$0xff] %v13080_v8  ;;  %v288_v46 = vld [vmem:[%s11713_s21 + $0x260] sm:$0xff]  ;;  %v409_v19 = vunpack.c.h.u8.bf16 %v233_v42 }
 0x1ed   : > { %v13072_v13 = vpack.c.bf16 %v1374_v53, %v1370_v49  ;;  %3876 = vmatpush1.bf16.msra.mxu0 %v10936_v34  ;;  %v10944_v53 = vld [vmem:[%s15466_s1 + $0x274] ss:$8 sps:$4 sm:$0xff]   ;;  %v10942_v49 = vld [vmem:[%s15466_s1 + $0x270] ss:$8 sps:$4 sm:$0xff]   ;;  %v508_v43 = vunpack.c.l.u8.bf16 %v288_v46 }
 0x1ee   : > { %15700 = vst [vmem:[#allocation46_spill] sm:$0xff] %v13067_v12  ;;  %1869 = vmatmul.mubr.bf16.gmra.mrb[124].mxu1 %v13080_v8  ;;  %3877 = vmatprep.subr.bf16.mxu0 %v10941_v57  ;;  %v10945_v57 = vld [vmem:[%s15466_s1 + $0x280] ss:$8 sps:$4 sm:$0xff]  }
 0x1ef   : > { %15701 = vst [vmem:[#allocation47_spill] sm:$0xff] %v13072_v13  ;;  %3795 = vmatmul.mubr.bf16.gmra.mrb[132].mxu0 %v13036_v1  ;;  %8690 = vmatprep.mubr.msk.bf16.mxu1 %vm864_vm0, %v13092_v15 }
 0x1f0   : > { %3804 = vmatprep.mubr.bf16.mxu0 %v13072_v13  ;;  %9875 = vmatpush3.bf16.msra.mxu1 %v398_v47  ;;  %v244_v13 = vld [vmem:[%s11713_s21 + $0x100] sm:$0xff] }
 0x1f1   : > { %v1378_v34 = vpop.f32.mrb[60].mxu1  ;;  %3878 = vmatpush1.bf16.msra.mxu0 %v10939_v18  ;;  %9876 = vmatprep.subr.bf16.mxu1 %v497_v20  ;;  %v10947_v47 = vld [vmem:[%s15466_s1 + $0x284] ss:$8 sps:$4 sm:$0xff]   ;;  %v420_v18 = vunpack.c.l.u8.bf16 %v244_v13  ;;  %v519_v20 = vunpack.c.h.u8.bf16 %v288_v46  ;;  %v431_v46 = vunpack.c.h.u8.bf16 %v244_v13 }
 0x1f2   : > { %v1380_v1 = vpop.f32.mrb[61].mxu1  ;;  %3879 = vmatprep.subr.bf16.mxu0 %v10944_v53  ;;  %v13125_v53 = vld [vmem:[%s15465_s0 + $0x6c] ss:$16 sps:$4 sm:$0xff]  }
 0x1f3   : > { %v1382_v8 = vpop.f32.mrb[62].mxu1 }
 0x1f4   : > { %v13100_v26 = vpack.c.bf16 %v1382_v8, %v1378_v34  ;;  %v1384_v30 = vpop.f32.mrb[63].mxu1  ;;  %9877 = vmatpush3.bf16.msra.mxu1 %v409_v19  ;;  %v13113_v8 = vld [vmem:[%s15465_s0 + $0x48] ss:$16 sps:$4 sm:$0xff]  }
 0x1f5   : > { %v13105_v42 = vpack.c.bf16 %v1384_v30, %v1380_v1  ;;  %3880 = vmatpush1.bf16.msra.mxu0 %v10942_v49  ;;  %9878 = vmatprep.subr.bf16.mxu1 %v508_v43  ;;  %15706 = vst [vmem:[#allocation52_spill] sm:$0xff] %v13113_v8  ;;  %v10950_v30 = vld [vmem:[%s15466_s1 + $0x294] ss:$8 sps:$4 sm:$0xff]   ;;  %v10948_v34 = vld [vmem:[%s15466_s1 + $0x290] ss:$8 sps:$4 sm:$0xff]  }
 0x1f6   : > { %15704 = vst [vmem:[#allocation50_spill] sm:$0xff] %v13100_v26  ;;  %1879 = vmatmul.mubr.bf16.gmra.mrb[128].mxu1 %v13113_v8  ;;  %v299_v1 = vld [vmem:[%s11713_s21 + $0x2b8] sm:$0xff]  ;;  %3881 = vmatprep.subr.bf16.mxu0 %v10947_v47  ;;  %v10953_v47 = vld [vmem:[%s15466_s1 + $0x2a4] ss:$8 sps:$4 sm:$0xff]  }
 0x1f7   : > { %15705 = vst [vmem:[#allocation51_spill] sm:$0xff] %v13105_v42  ;;  %3805 = vmatmul.mubr.bf16.gmra.mrb[136].mxu0 %v13067_v12  ;;  %8691 = vmatprep.mubr.msk.bf16.mxu1 %vm864_vm0, %v13125_v53  ;;  %v530_v49 = vunpack.c.l.u8.bf16 %v299_v1  ;;  %v255_v43 = vld [vmem:[%s11713_s21 + $0x158] sm:$0xff] }
 0x1f8   : > { %3814 = vmatprep.mubr.bf16.mxu0 %v13105_v42  ;;  %9879 = vmatpush3.bf16.msra.mxu1 %v420_v18  ;;  %v442_v13 = vunpack.c.l.u8.bf16 %v255_v43 }
 0x1f9   : > { %v1388_v19 = vpop.f32.mrb[64].mxu1  ;;  %3882 = vmatpush1.bf16.msra.mxu0 %v10945_v57  ;;  %9880 = vmatprep.subr.bf16.mxu1 %v519_v20  ;;  %v10951_v57 = vld [vmem:[%s15466_s1 + $0x2a0] ss:$8 sps:$4 sm:$0xff]   ;;  %v541_v20 = vunpack.c.h.u8.bf16 %v299_v1 }
 0x1fa   : > { %v1390_v42 = vpop.f32.mrb[65].mxu1  ;;  %3883 = vmatprep.subr.bf16.mxu0 %v10950_v30  ;;  %v453_v30 = vunpack.c.h.u8.bf16 %v255_v43  ;;  %v10957_v43 = vld [vmem:[%s15466_s1 + $0x2c0] ss:$8 sps:$4 sm:$0xff]  }
 0x1fb   : > { %v1392_v12 = vpop.f32.mrb[66].mxu1 }
 0x1fc   : > { %v13133_v8 = vpack.c.bf16 %v1392_v12, %v1388_v19  ;;  %v1394_v15 = vpop.f32.mrb[67].mxu1  ;;  %9881 = vmatpush3.bf16.msra.mxu1 %v431_v46  ;;  %v13146_v12 = vld [vmem:[%s15465_s0 + $0x68] ss:$16 sps:$4 sm:$0xff]  }
 0x1fd   : > { %v13138_v18 = vpack.c.bf16 %v1394_v15, %v1390_v42  ;;  %3884 = vmatpush1.bf16.msra.mxu0 %v10948_v34  ;;  %9882 = vmatprep.subr.bf16.mxu1 %v530_v49  ;;  %v10956_v15 = vld [vmem:[%s15466_s1 + $0x2b4] ss:$8 sps:$4 sm:$0xff]   ;;  %v10954_v46 = vld [vmem:[%s15466_s1 + $0x2b0] ss:$8 sps:$4 sm:$0xff]  }
 0x1fe   : > { %15707 = vst [vmem:[#allocation53_spill] sm:$0xff] %v13133_v8  ;;  %1889 = vmatmul.mubr.bf16.gmra.mrb[132].mxu1 %v13146_v12  ;;  %v13157_v42 = vld [vmem:[%s15465_s0 + $0x8c] ss:$16 sps:$4 sm:$0xff]   ;;  %3885 = vmatprep.subr.bf16.mxu0 %v10953_v47 }
 0x1ff   : > { %15708 = vst [vmem:[#allocation54_spill] sm:$0xff] %v13138_v18  ;;  %3815 = vmatmul.mubr.bf16.gmra.mrb[140].mxu0 %v13100_v26  ;;  %15709 = vst [vmem:[#allocation55_spill] sm:$0xff] %v13157_v42  ;;  %8692 = vmatprep.mubr.msk.bf16.mxu1 %vm864_vm0, %v13157_v42  ;;  %v10959_v26 = vld [vmem:[%s15466_s1 + $0x2c4] ss:$8 sps:$4 sm:$0xff]  }
 0x200   : > { %3824 = vmatprep.mubr.bf16.mxu0 %v13138_v18  ;;  %9883 = vmatpush3.bf16.msra.mxu1 %v442_v13  ;;  %v15547_v13 = vmov 0  }
 0x201   : > { %v1398_v1 = vpop.f32.mrb[68].mxu1  ;;  %3886 = vmatpush1.bf16.msra.mxu0 %v10951_v57  ;;  %9884 = vmatprep.subr.bf16.mxu1 %v541_v20  ;;  %v13178_v57 = vld [vmem:[%s15465_s0 + $0x88] ss:$16 sps:$4 sm:$0xff]   ;;  %v13189_v20 = vld [vmem:[%s15465_s0 + $0xac] ss:$16 sps:$4 sm:$0xff]  }
 0x202   : > { %v1400_v19 = vpop.f32.mrb[69].mxu1  ;;  %3887 = vmatprep.subr.bf16.mxu0 %v10956_v15  ;;  %15712 = vst [vmem:[#allocation58_spill] sm:$0xff] %v13178_v57  ;;  %15713 = vst [vmem:[#allocation59_spill] sm:$0xff] %v13189_v20 }
 0x203   : > { %v1402_v34 = vpop.f32.mrb[70].mxu1 }
 0x204   : > { %v13164_v49 = vpack.c.bf16 %v1402_v34, %v1398_v1  ;;  %v1404_v18 = vpop.f32.mrb[71].mxu1  ;;  %9885 = vmatpush3.bf16.msra.mxu1 %v453_v30  ;;  %v10960_v1 = vld [vmem:[%s15466_s1 + $0x2d0] ss:$8 sps:$4 sm:$0xff]  }
 0x205   : > { %v13169_v47 = vpack.c.bf16 %v1404_v18, %v1400_v19  ;;  %3888 = vmatpush1.bf16.msra.mxu0 %v10954_v46  ;;  %2338 = vmatprep.subr.bf16.mxu1 %v15547_v13  ;;  %v10962_v18 = vld [vmem:[%s15466_s1 + $0x2d4] ss:$8 sps:$4 sm:$0xff]  }
 0x206   : > { %15710 = vst [vmem:[#allocation56_spill] sm:$0xff] %v13164_v49  ;;  %1899 = vmatmul.mubr.bf16.gmra.mrb[136].mxu1 %v13178_v57  ;;  %3889 = vmatprep.subr.bf16.mxu0 %v10959_v26  ;;  %v10965_v26 = vld [vmem:[%s15466_s1 + $0x2e4] ss:$8 sps:$4 sm:$0xff]  }
 0x207   : > { %15711 = vst [vmem:[#allocation57_spill] sm:$0xff] %v13169_v47  ;;  %3825 = vmatmul.mubr.bf16.gmra.mrb[144].mxu0 %v13133_v8  ;;  %8693 = vmatprep.mubr.msk.bf16.mxu1 %vm864_vm0, %v13189_v20 }
 0x208   : > { %3834 = vmatprep.mubr.bf16.mxu0 %v13169_v47 }
 0x209   : > { %v1408_v15 = vpop.f32.mrb[72].mxu1  ;;  %3890 = vmatpush1.bf16.msra.mxu0 %v10957_v43 }
 0x20a   : > { %v2126_v30 = vpop.f32.mrb[80].mxu0  ;;  %v1410_v46 = vpop.f32.mrb[73].mxu1  ;;  %3891 = vmatprep.subr.bf16.mxu0 %v10962_v18  ;;  %v10963_v18 = vld [vmem:[%s15466_s1 + $0x2e0] ss:$8 sps:$4 sm:$0xff]  }
 0x20b   : > { %v2128_v19 = vpop.f32.mrb[81].mxu0  ;;  %v1412_v34 = vpop.f32.mrb[74].mxu1 }
 0x20c   : > { %v2130_v13 = vpop.f32.mrb[82].mxu0  ;;  %v13196_v47 = vpack.c.bf16 %v1412_v34, %v1408_v15  ;;  %v1414_v57 = vpop.f32.mrb[75].mxu1 }
 0x20d   : > { %v13198_v8 = vpack.c.bf16 %v2130_v13, %v2126_v30  ;;  %v2132_v42 = vpop.f32.mrb[83].mxu0  ;;  %v13203_v43 = vpack.c.bf16 %v1414_v57, %v1410_v46  ;;  %3892 = vmatpush1.bf16.msra.mxu0 %v10960_v1  ;;  %v13213_v13 = vld [vmem:[%s15465_s0 + $0xa8] ss:$16 sps:$4 sm:$0xff]   ;;  %v10968_v57 = vld [vmem:[%s15466_s1 + $0x2f4] ss:$8 sps:$4 sm:$0xff]  }
 0x20e   : > { %15714 = vst [vmem:[#allocation60_spill] sm:$0xff] %v13196_v47  ;;  %v13205_v20 = vpack.c.bf16 %v2132_v42, %v2128_v19  ;;  %15718 = vst [vmem:[#allocation64_spill] sm:$0xff] %v13213_v13  ;;  %1909 = vmatmul.mubr.bf16.gmra.mrb[140].mxu1 %v13213_v13  ;;  %v13224_v42 = vld [vmem:[%s15465_s0 + $0xcc] ss:$16 sps:$4 sm:$0xff]   ;;  %3893 = vmatprep.subr.bf16.mxu0 %v10965_v26  ;;  %v10966_v1 = vld [vmem:[%s15466_s1 + $0x2f0] ss:$8 sps:$4 sm:$0xff]  }
 0x20f   : > { %15715 = vst [vmem:[#allocation61_spill] sm:$0xff] %v13198_v8  ;;  %15716 = vst [vmem:[#allocation62_spill] sm:$0xff] %v13203_v43  ;;  %3835 = vmatmul.mubr.bf16.gmra.mrb[148].mxu0 %v13164_v49  ;;  %8694 = vmatprep.mubr.msk.bf16.mxu1 %vm864_vm0, %v13224_v42  ;;  %v10971_v26 = vld [vmem:[%s15466_s1 + $0x304] ss:$8 sps:$4 sm:$0xff]  }
 0x210   : > { %15717 = vst [vmem:[#allocation63_spill] sm:$0xff] %v13205_v20  ;;  %3844 = vmatprep.mubr.bf16.mxu0 %v13203_v43  ;;  %15719 = vst [vmem:[#allocation65_spill] sm:$0xff] %v13224_v42 }
 0x211   : > { %v1418_v15 = vpop.f32.mrb[76].mxu1  ;;  %3894 = vmatpush1.bf16.msra.mxu0 %v10963_v18 }
 0x212   : > { %v2136_v30 = vpop.f32.mrb[84].mxu0  ;;  %v1420_v46 = vpop.f32.mrb[77].mxu1  ;;  %3895 = vmatprep.subr.bf16.mxu0 %v10968_v57  ;;  %v13245_v57 = vld [vmem:[%s15465_s0 + $0xc8] ss:$16 sps:$4 sm:$0xff]  }
 0x213   : > { %v2138_v19 = vpop.f32.mrb[85].mxu0  ;;  %v1422_v34 = vpop.f32.mrb[78].mxu1  ;;  %15724 = vst [vmem:[#allocation70_spill] sm:$0xff] %v13245_v57 }
 0x214   : > { %v2140_v43 = vpop.f32.mrb[86].mxu0  ;;  %v13231_v49 = vpack.c.bf16 %v1422_v34, %v1418_v15  ;;  %v1424_v20 = vpop.f32.mrb[79].mxu1 }
 0x215   : > { %v13233_v8 = vpack.c.bf16 %v2140_v43, %v2136_v30  ;;  %v2142_v13 = vpop.f32.mrb[87].mxu0  ;;  %v13238_v18 = vpack.c.bf16 %v1424_v20, %v1420_v46  ;;  %3896 = vmatpush1.bf16.msra.mxu0 %v10966_v1  ;;  %v13253_v43 = vld [vmem:[%s15465_s0 + $0xec] ss:$16 sps:$4 sm:$0xff]  }
 0x216   : > { %15720 = vst [vmem:[#allocation66_spill] sm:$0xff] %v13231_v49  ;;  %v13240_v42 = vpack.c.bf16 %v2142_v13, %v2138_v19  ;;  %1919 = vmatmul.mubr.bf16.gmra.mrb[144].mxu1 %v13245_v57  ;;  %15725 = vst [vmem:[#allocation71_spill] sm:$0xff] %v13253_v43  ;;  %3998 = vmatprep.subr.bf16.mxu0 %v10971_v26 }
 0x217   : > { %15721 = vst [vmem:[#allocation67_spill] sm:$0xff] %v13233_v8  ;;  %15722 = vst [vmem:[#allocation68_spill] sm:$0xff] %v13238_v18  ;;  %3845 = vmatmul.mubr.bf16.gmra.mrb[152].mxu0 %v13196_v47  ;;  %8695 = vmatprep.mubr.msk.bf16.mxu1 %vm864_vm0, %v13253_v43 }
 0x218   : > { %15723 = vst [vmem:[#allocation69_spill] sm:$0xff] %v13240_v42  ;;  %3854 = vmatprep.mubr.bf16.mxu0 %v13238_v18 }
 0x219   : > { %v1461_v20 = vpop.f32.mrb[80].mxu1 }
 0x21a   : > { %v2146_v13 = vpop.f32.mrb[88].mxu0  ;;  %v1595_v15 = vadd.f32 %v12600_v48, %v1461_v20  ;;  %v1463_v30 = vpop.f32.mrb[81].mxu1  ;;  %v13270_v48 = vld [vmem:[%s15465_s0 + $0xe8] ss:$16 sps:$4 sm:$0xff]  }
 0x21b   : > { %v2148_v1 = vpop.f32.mrb[89].mxu0  ;;  %v1597_v46 = vadd.f32 %v12603_v29, %v1463_v30  ;;  %v1465_v19 = vpop.f32.mrb[82].mxu1  ;;  %v10969_v30 = vld [vmem:[%s15466_s1 + $0x300] ss:$8 sps:$4 sm:$0xff]  }
 0x21c   : > { %v2150_v34 = vpop.f32.mrb[90].mxu0  ;;  %v1599_v18 = vadd.f32 %v12606_v62, %v1465_v19  ;;  %v1467_v8 = vpop.f32.mrb[83].mxu1  ;;  %v13279_v62 = vld [vmem:[%s15465_s0 + $0x10c] ss:$16 sps:$4 sm:$0xff]  }
 0x21d   : > { %v13260_v47 = vpack.c.bf16 %v2150_v34, %v2146_v13  ;;  %v2152_v42 = vpop.f32.mrb[91].mxu0  ;;  %v1601_v57 = vadd.f32 %v12612_v61, %v1467_v8 }
 0x21e   : > { %v13263_v43 = vpack.c.bf16 %v2152_v42, %v2148_v1  ;;  %v13265_v26 = vpack.c.bf16 %v1599_v18, %v1595_v15  ;;  %1929 = vmatmul.mubr.bf16.gmra.mrb[148].mxu1 %v13270_v48 }
 0x21f   : > { %15726 = vst [vmem:[#allocation72_spill] sm:$0xff] %v13260_v47  ;;  %3855 = vmatmul.mubr.bf16.gmra.mrb[156].mxu0 %v13231_v49  ;;  %v13274_v29 = vpack.c.bf16 %v1601_v57, %v1597_v46  ;;  %8696 = vmatprep.mubr.msk.bf16.mxu1 %vm864_vm0, %v13279_v62 }
 0x220   : > { %15727 = vst [vmem:[#allocation73_spill] sm:$0xff] %v13263_v43  ;;  %15728 = vst [vmem:[#allocation74_spill] sm:$0xff] %v13265_v26 }
 0x221   : > { %15729 = vst [vmem:[#allocation75_spill] sm:$0xff] %v13274_v29  ;;  %v1471_v61 = vpop.f32.mrb[84].mxu1  ;;  %3897 = vmatprep.mubr.bf16.mxu0 %v13274_v29 }
 0x222   : > { %v2156_v8 = vpop.f32.mrb[92].mxu0  ;;  %v1605_v42 = vadd.f32 %v12635_v6, %v1471_v61  ;;  %v1473_v18 = vpop.f32.mrb[85].mxu1  ;;  %v10974_v6 = vld [vmem:[%s15466_s1 + $0x314] ss:$8 sps:$4 sm:$0xff]  }
 0x223   : > { %v2158_v20 = vpop.f32.mrb[93].mxu0  ;;  %v1607_v13 = vadd.f32 %v12638_v21, %v1473_v18  ;;  %v1475_v57 = vpop.f32.mrb[86].mxu1  ;;  %v13303_v18 = vld [vmem:[%s15465_s0 + $0x108] ss:$16 sps:$4 sm:$0xff]  }
 0x224   : > { %v2160_v15 = vpop.f32.mrb[94].mxu0  ;;  %v1609_v1 = vadd.f32 %v12641_v31, %v1475_v57  ;;  %v1477_v19 = vpop.f32.mrb[87].mxu1 }
 0x225   : > { %v13290_v46 = vpack.c.bf16 %v2160_v15, %v2156_v8  ;;  %v2162_v34 = vpop.f32.mrb[95].mxu0  ;;  %v1611_v61 = vadd.f32 %v12647_v59, %v1477_v19  ;;  %v13312_v8 = vld [vmem:[%s15465_s0 + $0x12c] ss:$16 sps:$4 sm:$0xff]   ;;  %v10972_v59 = vld [vmem:[%s15466_s1 + $0x310] ss:$8 sps:$4 sm:$0xff]  }
 0x226   : > { %v13296_v29 = vpack.c.bf16 %v2162_v34, %v2158_v20  ;;  %v13298_v21 = vpack.c.bf16 %v1609_v1, %v1605_v42  ;;  %1939 = vmatmul.mubr.bf16.gmra.mrb[152].mxu1 %v13303_v18  ;;  %v10977_v42 = vld [vmem:[%s15466_s1 + $0x324] ss:$8 sps:$4 sm:$0xff]  }
 0x227   : > { %15730 = vst [vmem:[#allocation76_spill] sm:$0xff] %v13290_v46  ;;  %3898 = vmatmul.mubr.bf16.vlgmr.msra.gmra.mrb[120].mxu0 %v13265_v26  ;;  %v13307_v31 = vpack.c.bf16 %v1611_v61, %v1607_v13  ;;  %8697 = vmatprep.mubr.msk.bf16.mxu1 %vm864_vm0, %v13312_v8 }
 0x228   : > { %15731 = vst [vmem:[#allocation77_spill] sm:$0xff] %v13296_v29  ;;  %15732 = vst [vmem:[#allocation78_spill] sm:$0xff] %v13298_v21  ;;  %3999 = vmatpush1.bf16.msra.mxu0 %v10969_v30 }
 0x229   : > { %15733 = vst [vmem:[#allocation79_spill] sm:$0xff] %v13307_v31  ;;  %4000 = vmatprep.subr.bf16.mxu0 %v10974_v6  ;;  %v1481_v20 = vpop.f32.mrb[88].mxu1  ;;  %3907 = vmatprep.mubr.bf16.mxu0 %v13307_v31  ;;  %v10975_v6 = vld [vmem:[%s15466_s1 + $0x320] ss:$8 sps:$4 sm:$0xff]  }
 0x22a   : > { %v2166_v13 = vpop.f32.mrb[96].mxu0  ;;  %v1615_v57 = vadd.f32 %v12670_v7, %v1481_v20  ;;  %v1483_v15 = vpop.f32.mrb[89].mxu1  ;;  %v10980_v7 = vld [vmem:[%s15466_s1 + $0x334] ss:$8 sps:$4 sm:$0xff]  }
 0x22b   : > { %v2168_v1 = vpop.f32.mrb[97].mxu0  ;;  %v1617_v19 = vadd.f32 %v12672_v16, %v1483_v15  ;;  %v1485_v30 = vpop.f32.mrb[90].mxu1 }
 0x22c   : > { %v2170_v34 = vpop.f32.mrb[98].mxu0  ;;  %4001 = vmatpush1.bf16.msra.mxu0 %v10972_v59  ;;  %v1619_v61 = vadd.f32 %v12674_v52, %v1485_v30  ;;  %v1487_v49 = vpop.f32.mrb[91].mxu1  ;;  %v13342_v52 = vld [vmem:[%s15465_s0 + $0x128] ss:$16 sps:$4 sm:$0xff]  }
 0x22d   : > { %v13329_v26 = vpack.c.bf16 %v2170_v34, %v2166_v13  ;;  %v2172_v31 = vpop.f32.mrb[99].mxu0  ;;  %4002 = vmatprep.subr.bf16.mxu0 %v10977_v42  ;;  %v1621_v16 = vadd.f32 %v12676_v32, %v1487_v49  ;;  %v11662_v13 = vld [vmem:[%s15465_s0 + $0x4] ss:$16 sps:$4 sm:$0xff]   ;;  %v10978_v32 = vld [vmem:[%s15466_s1 + $0x330] ss:$8 sps:$4 sm:$0xff]  }
 0x22e   : > { %v13335_v20 = vpack.c.bf16 %v2172_v31, %v2168_v1  ;;  %v13337_v59 = vpack.c.bf16 %v1619_v61, %v1615_v57  ;;  %1949 = vmatmul.mubr.bf16.gmra.mrb[156].mxu1 %v13342_v52  ;;  %v310_v49 = vld [vmem:[%s11713_s21 + $0x310] sm:$0xff]  ;;  %v10983_v31 = vld [vmem:[%s15466_s1 + $0x344] ss:$8 sps:$4 sm:$0xff]  }
 0x22f   : > { %15734 = vst [vmem:[#allocation80_spill] sm:$0xff] %v13329_v26  ;;  %3908 = vmatmul.mubr.bf16.gmra.mrb[124].mxu0 %v13298_v21  ;;  %v13346_v42 = vpack.c.bf16 %v1621_v16, %v1617_v19  ;;  %2257 = vmatprep.mubr.bf16.mxu1 %v11662_v13  ;;  %v552_v16 = vunpack.c.l.u8.bf16 %v310_v49 }
 0x230   : > { %15735 = vst [vmem:[#allocation81_spill] sm:$0xff] %v13335_v20  ;;  %4003 = vmatpush1.bf16.msra.mxu0 %v10975_v6 }
 0x231   : > { %15736 = vst [vmem:[#allocation82_spill] sm:$0xff] %v13346_v42  ;;  %4004 = vmatprep.subr.bf16.mxu0 %v10980_v7  ;;  %v1491_v57 = vpop.f32.mrb[92].mxu1  ;;  %3917 = vmatprep.mubr.bf16.mxu0 %v13346_v42  ;;  %v10981_v42 = vld [vmem:[%s15466_s1 + $0x340] ss:$8 sps:$4 sm:$0xff]  }
 0x232   : > { %v2176_v15 = vpop.f32.mrb[100].mxu0  ;;  %v1625_v1 = vadd.f32 %v12683_v23, %v1491_v57  ;;  %v1493_v19 = vpop.f32.mrb[93].mxu1 }
 0x233   : > { %v2178_v30 = vpop.f32.mrb[101].mxu0  ;;  %v1627_v34 = vadd.f32 %v12685_v50, %v1493_v19  ;;  %v1495_v6 = vpop.f32.mrb[94].mxu1  ;;  %v10986_v50 = vld [vmem:[%s15466_s1 + $0x354] ss:$8 sps:$4 sm:$0xff]  }
 0x234   : > { %v2180_v61 = vpop.f32.mrb[102].mxu0  ;;  %4005 = vmatpush1.bf16.msra.mxu0 %v10978_v32  ;;  %v1629_v7 = vadd.f32 %v12687_v35, %v1495_v6  ;;  %v1497_v21 = vpop.f32.mrb[95].mxu1 }
 0x235   : > { %v13362_v13 = vpack.c.bf16 %v2180_v61, %v2176_v15  ;;  %v2182_v26 = vpop.f32.mrb[103].mxu0  ;;  %4006 = vmatprep.subr.bf16.mxu0 %v10983_v31  ;;  %v1631_v23 = vadd.f32 %v12692_v10, %v1497_v21  ;;  %v563_v31 = vunpack.c.h.u8.bf16 %v310_v49  ;;  %v15739_v15 = vmov 0   ;;  %v321_v10 = vld [vmem:[%s11713_s21 + $0x368] sm:$0xff] }
 0x236   : > { %v13368_v57 = vpack.c.bf16 %v2182_v26, %v2178_v30  ;;  %v13373_v32 = vpack.c.bf16 %v1629_v7, %v1625_v1  ;;  %2258 = vmatmul.mubr.bf16.vlgmr.msra.gmra.mrb[160].mxu1 %v12747_v45  ;;  %v10984_v26 = vld [vmem:[%s15466_s1 + $0x350] ss:$8 sps:$4 sm:$0xff]   ;;  %v10989_v45 = vld [vmem:[%s15466_s1 + $0x364] ss:$8 sps:$4 sm:$0xff]   ;;  %v574_v6 = vunpack.c.l.u8.bf16 %v321_v10 }
 0x237   : > { %15737 = vst [vmem:[#allocation83_spill] sm:$0xff] %v13362_v13  ;;  %3918 = vmatmul.mubr.bf16.gmra.mrb[128].mxu0 %v13337_v59  ;;  %v13377_v35 = vpack.c.bf16 %v1631_v23, %v1627_v34  ;;  %2339 = vmatpush1.bf16.msra.mxu1 %v552_v16 }
 0x238   : > { %15738 = vst [vmem:[#allocation84_spill] sm:$0xff] %v13368_v57  ;;  %2265 = vmatprep.mubr.bf16.mxu1 %v12758_v58  ;;  %2340 = vmatprep.subr.bf16.mxu1 %v15739_v15 }
 0x239   : > { %4007 = vmatpush1.bf16.msra.mxu0 %v10981_v42  ;;  %v1501_v21 = vpop.f32.mrb[96].mxu1  ;;  %3927 = vmatprep.mubr.bf16.mxu0 %v13377_v35 }
 0x23a   : > { %v2186_v1 = vpop.f32.mrb[104].mxu0  ;;  %4008 = vmatprep.subr.bf16.mxu0 %v10986_v50  ;;  %v1635_v58 = vadd.f32 %v12707_v11, %v1501_v21  ;;  %v1503_v49 = vpop.f32.mrb[97].mxu1  ;;  %v10987_v11 = vld [vmem:[%s15466_s1 + $0x360] ss:$8 sps:$4 sm:$0xff]   ;;  %v585_v21 = vunpack.c.h.u8.bf16 %v321_v10 }
 0x23b   : > { %v2188_v19 = vpop.f32.mrb[105].mxu0  ;;  %v1637_v30 = vadd.f32 %v12709_v0, %v1503_v49  ;;  %v1505_v42 = vpop.f32.mrb[98].mxu1  ;;  %2341 = vmatpush1.bf16.msra.mxu1 %v563_v31 }
 0x23c   : > { %v2190_v34 = vpop.f32.mrb[106].mxu0  ;;  %v1639_v61 = vadd.f32 %v12711_v60, %v1505_v42  ;;  %v1507_v7 = vpop.f32.mrb[99].mxu1  ;;  %2342 = vmatprep.subr.bf16.mxu1 %v15739_v15  ;;  %v10992_v60 = vld [vmem:[%s15466_s1 + $0x374] ss:$8 sps:$4 sm:$0xff]  }
 0x23d   : > { %v13392_v16 = vpack.c.bf16 %v2190_v34, %v2186_v1  ;;  %v2192_v23 = vpop.f32.mrb[107].mxu0  ;;  %4009 = vmatpush1.bf16.msra.mxu0 %v10984_v26  ;;  %v1641_v0 = vadd.f32 %v12716_v41, %v1507_v7  ;;  %v332_v41 = vld [vmem:[%s11713_s21 + $0x3c0] sm:$0xff]  ;;  %v10990_v1 = vld [vmem:[%s15466_s1 + $0x370] ss:$8 sps:$4 sm:$0xff]  }
 0x23e   : > { %v13399_v50 = vpack.c.bf16 %v2192_v23, %v2188_v19  ;;  %4010 = vmatprep.subr.bf16.mxu0 %v10989_v45  ;;  %v13404_v31 = vpack.c.bf16 %v1639_v61, %v1635_v58  ;;  %2266 = vmatmul.mubr.bf16.gmra.mrb[164].mxu1 %v12782_v38  ;;  %v10998_v38 = vld [vmem:[%s15466_s1 + $0x384] ss:$8 sps:$4 sm:$0xff]   ;;  %v596_v34 = vunpack.c.l.u8.bf16 %v332_v41 }
 0x23f   : > { %15740 = vst [vmem:[#allocation85_spill] sm:$0xff] %v13392_v16  ;;  %3928 = vmatmul.mubr.bf16.gmra.mrb[132].mxu0 %v13373_v32  ;;  %v13408_v26 = vpack.c.bf16 %v1641_v0, %v1637_v30  ;;  %2273 = vmatprep.mubr.bf16.mxu1 %v12794_v2 }
 0x240   : > { %15741 = vst [vmem:[#allocation86_spill] sm:$0xff] %v13399_v50  ;;  %2343 = vmatpush1.bf16.msra.mxu1 %v574_v6 }
 0x241   : > { %2344 = vmatprep.subr.bf16.mxu1 %v15739_v15  ;;  %4011 = vmatpush1.bf16.msra.mxu0 %v10987_v11  ;;  %v1511_v45 = vpop.f32.mrb[100].mxu1 }
 0x242   : > { %v2196_v58 = vpop.f32.mrb[108].mxu0  ;;  %3937 = vmatprep.mubr.bf16.mxu0 %v13408_v26  ;;  %4012 = vmatprep.subr.bf16.mxu0 %v10992_v60  ;;  %v1645_v2 = vadd.f32 %v12732_v63, %v1511_v45  ;;  %v1513_v10 = vpop.f32.mrb[101].mxu1  ;;  %v10996_v63 = vld [vmem:[%s15466_s1 + $0x380] ss:$8 sps:$4 sm:$0xff]  }
 0x243   : > { %v2198_v49 = vpop.f32.mrb[109].mxu0  ;;  %v1647_v19 = vadd.f32 %v12734_v28, %v1513_v10  ;;  %v1515_v30 = vpop.f32.mrb[102].mxu1 }
 0x244   : > { %v2200_v42 = vpop.f32.mrb[110].mxu0  ;;  %2345 = vmatpush1.bf16.msra.mxu1 %v585_v21  ;;  %v1649_v6 = vadd.f32 %v12736_v40, %v1515_v30  ;;  %v1517_v7 = vpop.f32.mrb[103].mxu1  ;;  %v11004_v40 = vld [vmem:[%s15466_s1 + $0x394] ss:$8 sps:$4 sm:$0xff]   ;;  %v607_v21 = vunpack.c.h.u8.bf16 %v332_v41 }
 0x245   : > { %v13423_v61 = vpack.c.bf16 %v2200_v42, %v2196_v58  ;;  %v2202_v23 = vpop.f32.mrb[111].mxu0  ;;  %2346 = vmatprep.subr.bf16.mxu1 %v15739_v15  ;;  %4013 = vmatpush1.bf16.msra.mxu0 %v10990_v1  ;;  %v1651_v28 = vadd.f32 %v12738_v9, %v1517_v7  ;;  %v343_v9 = vld [vmem:[%s11713_s21 + $0x418] sm:$0xff] }
 0x246   : > { %v13430_v11 = vpack.c.bf16 %v2202_v23, %v2198_v49  ;;  %4014 = vmatprep.subr.bf16.mxu0 %v10998_v38  ;;  %v13435_v0 = vpack.c.bf16 %v1649_v6, %v1645_v2  ;;  %2274 = vmatmul.mubr.bf16.gmra.mrb[168].mxu1 %v12818_v3  ;;  %v11002_v1 = vld [vmem:[%s15466_s1 + $0x390] ss:$8 sps:$4 sm:$0xff]   ;;  %v11010_v3 = vld [vmem:[%s15466_s1 + $0x3a4] ss:$8 sps:$4 sm:$0xff]  }
 0x247   : > { %15742 = vst [vmem:[#allocation87_spill] sm:$0xff] %v13423_v61  ;;  %3938 = vmatmul.mubr.bf16.gmra.mrb[136].mxu0 %v13404_v31  ;;  %v13439_v60 = vpack.c.bf16 %v1651_v28, %v1647_v19  ;;  %2281 = vmatprep.mubr.bf16.mxu1 %v12830_v27  ;;  %v618_v19 = vunpack.c.l.u8.bf16 %v343_v9  ;;  %v629_v28 = vunpack.c.h.u8.bf16 %v343_v9 }
 0x248   : > { %15743 = vst [vmem:[#allocation88_spill] sm:$0xff] %v13430_v11  ;;  %2347 = vmatpush1.bf16.msra.mxu1 %v596_v34 }
 0x249   : > { %2348 = vmatprep.subr.bf16.mxu1 %v15739_v15  ;;  %4015 = vmatpush1.bf16.msra.mxu0 %v10996_v63  ;;  %v1521_v45 = vpop.f32.mrb[104].mxu1 }
 0x24a   : > { %v2206_v58 = vpop.f32.mrb[112].mxu0  ;;  %3947 = vmatprep.mubr.bf16.mxu0 %v13439_v60  ;;  %4016 = vmatprep.subr.bf16.mxu0 %v11004_v40  ;;  %v1655_v27 = vadd.f32 %v12765_v36, %v1521_v45  ;;  %v1523_v41 = vpop.f32.mrb[105].mxu1  ;;  %v11008_v36 = vld [vmem:[%s15466_s1 + $0x3a0] ss:$8 sps:$4 sm:$0xff]   ;;  %v11017_v40 = vld [vmem:[%s15466_s1 + $0x3b0] ss:$8 sps:$4 sm:$0xff]  }
 0x24b   : > { %v2208_v38 = vpop.f32.mrb[113].mxu0  ;;  %v1657_v2 = vadd.f32 %v12767_v37, %v1523_v41  ;;  %v1525_v10 = vpop.f32.mrb[106].mxu1 }
 0x24c   : > { %v2210_v49 = vpop.f32.mrb[114].mxu0  ;;  %2349 = vmatpush1.bf16.msra.mxu1 %v607_v21  ;;  %v1659_v30 = vadd.f32 %v12769_v14, %v1525_v10  ;;  %v1527_v34 = vpop.f32.mrb[107].mxu1  ;;  %v11019_v14 = vld [vmem:[%s15466_s1 + $0x3b4] ss:$8 sps:$4 sm:$0xff]  }
 0x24d   : > { %v13454_v42 = vpack.c.bf16 %v2210_v49, %v2206_v58  ;;  %v2212_v6 = vpop.f32.mrb[115].mxu0  ;;  %2350 = vmatprep.subr.bf16.mxu1 %v15739_v15  ;;  %4017 = vmatpush1.bf16.msra.mxu0 %v11002_v1  ;;  %v1661_v37 = vadd.f32 %v12774_v22, %v1527_v34  ;;  %v354_v22 = vld [vmem:[%s11713_s21 + $0x470] sm:$0xff] }
 0x24e   : > { %v13461_v7 = vpack.c.bf16 %v2212_v6, %v2208_v38  ;;  %4018 = vmatprep.subr.bf16.mxu0 %v11010_v3  ;;  %v13466_v23 = vpack.c.bf16 %v1659_v30, %v1655_v27  ;;  %2282 = vmatmul.mubr.bf16.gmra.mrb[172].mxu1 %v12854_v39  ;;  %v11025_v39 = vld [vmem:[%s15466_s1 + $0x3c4] ss:$8 sps:$4 sm:$0xff]   ;;  %v640_v41 = vunpack.c.l.u8.bf16 %v354_v22  ;;  %v651_v6 = vunpack.c.h.u8.bf16 %v354_v22 }
 0x24f   : > { %15744 = vst [vmem:[#allocation89_spill] sm:$0xff] %v13454_v42  ;;  %3948 = vmatmul.mubr.bf16.gmra.mrb[140].mxu0 %v13435_v0  ;;  %v13470_v63 = vpack.c.bf16 %v1661_v37, %v1657_v2  ;;  %2289 = vmatprep.mubr.bf16.mxu1 %v12866_v25 }
 0x250   : > { %15745 = vst [vmem:[#allocation90_spill] sm:$0xff] %v13461_v7  ;;  %2351 = vmatpush1.bf16.msra.mxu1 %v618_v19 }
 0x251   : > { %2352 = vmatprep.subr.bf16.mxu1 %v15739_v15  ;;  %4019 = vmatpush1.bf16.msra.mxu0 %v11008_v36  ;;  %v1531_v21 = vpop.f32.mrb[108].mxu1  ;;  %v11029_v36 = vld [vmem:[%s15466_s1 + $0x3d0] ss:$8 sps:$4 sm:$0xff]  }
 0x252   : > { %v2216_v1 = vpop.f32.mrb[116].mxu0  ;;  %3957 = vmatprep.mubr.bf16.mxu0 %v13470_v63  ;;  %4020 = vmatprep.subr.bf16.mxu0 %v11019_v14  ;;  %v1665_v25 = vadd.f32 %v12801_v33, %v1531_v21  ;;  %v1533_v9 = vpop.f32.mrb[109].mxu1  ;;  %v11023_v33 = vld [vmem:[%s15466_s1 + $0x3c0] ss:$8 sps:$4 sm:$0xff]  }
 0x253   : > { %v2218_v45 = vpop.f32.mrb[117].mxu0  ;;  %v1667_v58 = vadd.f32 %v12803_v5, %v1533_v9  ;;  %v1535_v3 = vpop.f32.mrb[110].mxu1 }
 0x254   : > { %v2220_v27 = vpop.f32.mrb[118].mxu0  ;;  %2353 = vmatpush1.bf16.msra.mxu1 %v629_v28  ;;  %v1669_v38 = vadd.f32 %v12805_v56, %v1535_v3  ;;  %v1537_v10 = vpop.f32.mrb[111].mxu1  ;;  %v11031_v56 = vld [vmem:[%s15466_s1 + $0x3d4] ss:$8 sps:$4 sm:$0xff]   ;;  %v10995_v3 = vld [vmem:[%s15466_s1 + $0x544] ss:$8 sps:$4 sm:$0xff]  }
 0x255   : > { %v13485_v2 = vpack.c.bf16 %v2220_v27, %v2216_v1  ;;  %v2222_v49 = vpop.f32.mrb[119].mxu0  ;;  %2354 = vmatprep.subr.bf16.mxu1 %v15739_v15  ;;  %4021 = vmatpush1.bf16.msra.mxu0 %v11017_v40  ;;  %v1671_v5 = vadd.f32 %v12810_v4, %v1537_v10  ;;  %v365_v4 = vld [vmem:[%s11713_s21 + $0x4c8] sm:$0xff]  ;;  %v11044_v27 = vld [vmem:[%s15466_s1 + $0x3f0] ss:$8 sps:$4 sm:$0xff]  }
 0x256   : > { %v13492_v19 = vpack.c.bf16 %v2222_v49, %v2218_v45  ;;  %4022 = vmatprep.subr.bf16.mxu0 %v11025_v39  ;;  %v13497_v30 = vpack.c.bf16 %v1669_v38, %v1665_v25  ;;  %2290 = vmatmul.mubr.bf16.gmra.mrb[176].mxu1 %v12890_v54  ;;  %v11037_v54 = vld [vmem:[%s15466_s1 + $0x3e4] ss:$8 sps:$4 sm:$0xff]   ;;  %v662_v40 = vunpack.c.l.u8.bf16 %v365_v4  ;;  %v11035_v39 = vld [vmem:[%s15466_s1 + $0x3e0] ss:$8 sps:$4 sm:$0xff]   ;;  %v15748_v25 = vld [vmem:[#allocation8_spill] sm:$0xff] }
 0x257   : > { %15746 = vst [vmem:[#allocation91_spill] sm:$0xff] %v13485_v2  ;;  %3958 = vmatmul.mubr.bf16.gmra.mrb[144].mxu0 %v13466_v23  ;;  %v13501_v34 = vpack.c.bf16 %v1671_v5, %v1667_v58  ;;  %2297 = vmatprep.mubr.bf16.mxu1 %v12902_v44  ;;  %v15749_v45 = vld [vmem:[#allocation27_spill] sm:$0xff]  ;;  %v673_v58 = vunpack.c.h.u8.bf16 %v365_v4 }
 0x258   : > { %15747 = vst [vmem:[#allocation92_spill] sm:$0xff] %v13492_v19  ;;  %2355 = vmatpush1.bf16.msra.mxu1 %v640_v41  ;;  %v11052_v41 = vld [vmem:[%s15466_s1 + $0x404] ss:$8 sps:$4 sm:$0xff]  }
 0x259   : > { %2356 = vmatprep.subr.bf16.mxu1 %v15739_v15  ;;  %4023 = vmatpush1.bf16.msra.mxu0 %v11023_v33  ;;  %v1541_v37 = vpop.f32.mrb[112].mxu1  ;;  %v15750_v38 = vld [vmem:[#allocation23_spill] sm:$0xff]  ;;  %v15751_v33 = vld [vmem:[#allocation24_spill] sm:$0xff] }
 0x25a   : > { %3967 = vmatprep.mubr.bf16.mxu0 %v13501_v34  ;;  %4024 = vmatprep.subr.bf16.mxu0 %v11031_v56  ;;  %v1675_v44 = vadd.f32 %v12837_v17, %v1541_v37  ;;  %v1543_v14 = vpop.f32.mrb[113].mxu1  ;;  %v15753_v37 = vld [vmem:[#allocation26_spill] sm:$0xff] }
 0x25b   : > { %v1677_v28 = vadd.f32 %v12839_v51, %v1543_v14  ;;  %v1545_v22 = vpop.f32.mrb[114].mxu1  ;;  %v11046_v51 = vld [vmem:[%s15466_s1 + $0x3f4] ss:$8 sps:$4 sm:$0xff]  }
 0x25c   : > { %2357 = vmatpush1.bf16.msra.mxu1 %v651_v6  ;;  %v1679_v21 = vadd.f32 %v12841_v55, %v1545_v22  ;;  %v1547_v1 = vpop.f32.mrb[115].mxu1  ;;  %v15752_v6 = vld [vmem:[#allocation25_spill] sm:$0xff]  ;;  %v15754_v14 = vld [vmem:[#allocation28_spill] sm:$0xff] }
 0x25d   : > { %2358 = vmatprep.subr.bf16.mxu1 %v15739_v15  ;;  %4025 = vmatpush1.bf16.msra.mxu0 %v11029_v36  ;;  %v1681_v9 = vadd.f32 %v15748_v25, %v1547_v1  ;;  %v15755_v22 = vld [vmem:[#allocation29_spill] sm:$0xff]  ;;  %v15758_v1 = vld [vmem:[#allocation36_spill] sm:$0xff] }
 0x25e   : > { %4026 = vmatprep.subr.bf16.mxu0 %v11037_v54  ;;  %v13524_v17 = vpack.c.bf16 %v1679_v21, %v1675_v44  ;;  %2298 = vmatmul.mubr.bf16.gmra.mrb[180].mxu1 %v12918_v24  ;;  %v15757_v21 = vld [vmem:[#allocation33_spill] sm:$0xff]  ;;  %v15760_v25 = vld [vmem:[#allocation40_spill] sm:$0xff] }
 0x25f   : > { %3968 = vmatmul.mubr.bf16.gmra.mrb[148].mxu0 %v13497_v30  ;;  %v13528_v55 = vpack.c.bf16 %v1681_v9, %v1677_v28  ;;  %2305 = vmatprep.mubr.bf16.mxu1 %v15749_v45  ;;  %v15761_v9 = vld [vmem:[#allocation41_spill] sm:$0xff] }
 0x260   : > { %2359 = vmatpush1.bf16.msra.mxu1 %v662_v40  ;;  %v15756_v40 = vld [vmem:[#allocation32_spill] sm:$0xff] }
 0x261   : > { %2360 = vmatprep.subr.bf16.mxu1 %v15739_v15  ;;  %4027 = vmatpush1.bf16.msra.mxu0 %v11035_v39  ;;  %v1551_v24 = vpop.f32.mrb[116].mxu1  ;;  %v15759_v39 = vld [vmem:[#allocation37_spill] sm:$0xff] }
 0x262   : > { %3977 = vmatprep.mubr.bf16.mxu0 %v13528_v55  ;;  %4028 = vmatprep.subr.bf16.mxu0 %v11046_v51  ;;  %v1685_v10 = vadd.f32 %v15750_v38, %v1551_v24  ;;  %v1553_v49 = vpop.f32.mrb[117].mxu1  ;;  %v10993_v51 = vld [vmem:[%s15466_s1 + $0x540] ss:$8 sps:$4 sm:$0xff]   ;;  %v11001_v45 = vld [vmem:[%s15466_s1 + $0x554] ss:$8 sps:$4 sm:$0xff]  }
 0x263   : > { %v1687_v5 = vadd.f32 %v15751_v33, %v1553_v49  ;;  %v1555_v56 = vpop.f32.mrb[118].mxu1  ;;  %v11007_v24 = vld [vmem:[%s15466_s1 + $0x564] ss:$8 sps:$4 sm:$0xff]   ;;  %v11013_v38 = vld [vmem:[%s15466_s1 + $0x574] ss:$8 sps:$4 sm:$0xff]  }
 0x264   : > { %2361 = vmatpush1.bf16.msra.mxu1 %v673_v58  ;;  %v1689_v4 = vadd.f32 %v15752_v6, %v1555_v56  ;;  %v1557_v36 = vpop.f32.mrb[119].mxu1  ;;  %v15762_v58 = vld [vmem:[#allocation44_spill] sm:$0xff]  ;;  %v15765_v49 = vld [vmem:[#allocation49_spill] sm:$0xff]  ;;  %v11014_v56 = vld [vmem:[%s15466_s1 + $0x580] ss:$8 sps:$4 sm:$0xff]  }
 0x265   : > { %5589 = vmatprep.subr.bf16.mxu1 %v10995_v3  ;;  %4029 = vmatpush1.bf16.msra.mxu0 %v11044_v27  ;;  %v1691_v54 = vadd.f32 %v15753_v37, %v1557_v36  ;;  %v15763_v3 = vld [vmem:[#allocation45_spill] sm:$0xff]  ;;  %v11028_v37 = vld [vmem:[%s15466_s1 + $0x5a4] ss:$8 sps:$4 sm:$0xff]  }
 0x266   : > { %4131 = vmatprep.subr.bf16.mxu0 %v11052_v41  ;;  %v13546_v44 = vpack.c.bf16 %v1689_v4, %v1685_v10  ;;  %2306 = vmatmul.mubr.bf16.gmra.mrb[184].mxu1 %v15754_v14  ;;  %v10999_v27 = vld [vmem:[%s15466_s1 + $0x550] ss:$8 sps:$4 sm:$0xff]   ;;  %v11005_v41 = vld [vmem:[%s15466_s1 + $0x560] ss:$8 sps:$4 sm:$0xff]   ;;  %v11022_v6 = vld [vmem:[%s15466_s1 + $0x594] ss:$8 sps:$4 sm:$0xff]  }
 0x267   : > { %3978 = vmatmul.mubr.bf16.gmra.mrb[152].mxu0 %v13524_v17  ;;  %v13550_v28 = vpack.c.bf16 %v1691_v54, %v1687_v5  ;;  %2313 = vmatprep.mubr.bf16.mxu1 %v15755_v22  ;;  %v15764_v10 = vld [vmem:[#allocation48_spill] sm:$0xff]  ;;  %v11016_v5 = vld [vmem:[%s15466_s1 + $0x584] ss:$8 sps:$4 sm:$0xff]   ;;  %v11026_v54 = vld [vmem:[%s15466_s1 + $0x5a0] ss:$8 sps:$4 sm:$0xff]  }
 0x268   : > { %v11011_v33 = vld [vmem:[%s15466_s1 + $0x570] ss:$8 sps:$4 sm:$0xff]   ;;  %v15767_v14 = vld [vmem:[#allocation55_spill] sm:$0xff] }
 0x269   : > { %3987 = vmatprep.mubr.bf16.mxu0 %v13550_v28  ;;  %v15766_v4 = vld [vmem:[#allocation52_spill] sm:$0xff] }
 0x26a   : > { %v11020_v36 = vld [vmem:[%s15466_s1 + $0x590] ss:$8 sps:$4 sm:$0xff]  }
 0x26b   : > { %v11032_v22 = vld [vmem:[%s15466_s1 + $0x5b0] ss:$8 sps:$4 sm:$0xff]  }
 0x26e   : > { %2314 = vmatmul.mubr.bf16.gmra.mrb[188].mxu1 %v15756_v40  ;;  %v11040_v40 = vld [vmem:[%s15466_s1 + $0x5c4] ss:$8 sps:$4 sm:$0xff]  }
 0x26f   : > { %3988 = vmatmul.mubr.bf16.gmra.mrb[156].mxu0 %v13546_v44  ;;  %2321 = vmatprep.mubr.bf16.mxu1 %v15757_v21  ;;  %v11038_v21 = vld [vmem:[%s15466_s1 + $0x5c0] ss:$8 sps:$4 sm:$0xff]  }
 0x276   : > { %2322 = vmatmul.mubr.bf16.gmra.mrb[192].mxu1 %v15758_v1  ;;  %v15768_v1 = vld [vmem:[#allocation58_spill] sm:$0xff] }
 0x277   : > { %2329 = vmatprep.mubr.bf16.mxu1 %v15759_v39  ;;  %v15769_v39 = vld [vmem:[#allocation59_spill] sm:$0xff] }
 0x27e   : > { %2330 = vmatmul.mubr.bf16.gmra.mrb[196].mxu1 %v15760_v25  ;;  %v11041_v25 = vld [vmem:[%s15466_s1 + $0x5d0] ss:$8 sps:$4 sm:$0xff]  }
 0x27f   : > { %8708 = vmatprep.mubr.msk.bf16.mxu1 %vm864_vm0, %v15761_v9  ;;  %v11049_v9 = vld [vmem:[%s15466_s1 + $0x5e4] ss:$8 sps:$4 sm:$0xff]  }
 0x286   : > { %2371 = vmatmul.mubr.bf16.vlgmr.msra.gmra.mrb[200].mxu1 %v15762_v58  ;;  %v15770_v58 = vld [vmem:[#allocation64_spill] sm:$0xff] }
 0x287   : > { %8709 = vmatprep.mubr.msk.bf16.mxu1 %vm864_vm0, %v15763_v3  ;;  %5590 = vmatpush1.bf16.msra.mxu1 %v10993_v51  ;;  %v11047_v51 = vld [vmem:[%s15466_s1 + $0x5e0] ss:$8 sps:$4 sm:$0xff]   ;;  %v15771_v3 = vld [vmem:[#allocation65_spill] sm:$0xff] }
 0x288   : > { %5591 = vmatprep.subr.bf16.mxu1 %v11001_v45  ;;  %v11055_v45 = vld [vmem:[%s15466_s1 + $0x5f4] ss:$8 sps:$4 sm:$0xff]  }
 0x28b   : > { %5592 = vmatpush1.bf16.msra.mxu1 %v10999_v27  ;;  %v11053_v27 = vld [vmem:[%s15466_s1 + $0x5f0] ss:$8 sps:$4 sm:$0xff]  }
 0x28c   : > { %5593 = vmatprep.subr.bf16.mxu1 %v11007_v24  ;;  %v11061_v24 = vld [vmem:[%s15466_s1 + $0x604] ss:$8 sps:$4 sm:$0xff]  }
 0x28e   : > { %2379 = vmatmul.mubr.bf16.gmra.mrb[204].mxu1 %v15764_v10  ;;  %v15772_v10 = vld [vmem:[#allocation70_spill] sm:$0xff] }
 0x28f   : > { %8710 = vmatprep.mubr.msk.bf16.mxu1 %vm864_vm0, %v15765_v49  ;;  %5594 = vmatpush1.bf16.msra.mxu1 %v11005_v41  ;;  %v11059_v41 = vld [vmem:[%s15466_s1 + $0x600] ss:$8 sps:$4 sm:$0xff]  }
 0x290   : > { %5595 = vmatprep.subr.bf16.mxu1 %v11013_v38  ;;  %v11067_v38 = vld [vmem:[%s15466_s1 + $0x614] ss:$8 sps:$4 sm:$0xff]   ;;  %v15773_v49 = vld [vmem:[#allocation71_spill] sm:$0xff] }
 0x293   : > { %5596 = vmatpush1.bf16.msra.mxu1 %v11011_v33  ;;  %v11065_v33 = vld [vmem:[%s15466_s1 + $0x610] ss:$8 sps:$4 sm:$0xff]  }
 0x294   : > { %5597 = vmatprep.subr.bf16.mxu1 %v11016_v5  ;;  %v11070_v5 = vld [vmem:[%s15466_s1 + $0x624] ss:$8 sps:$4 sm:$0xff]  }
 0x296   : > { %2387 = vmatmul.mubr.bf16.gmra.mrb[208].mxu1 %v15766_v4 }
 0x297   : > { %8711 = vmatprep.mubr.msk.bf16.mxu1 %vm864_vm0, %v13125_v53  ;;  %5598 = vmatpush1.bf16.msra.mxu1 %v11014_v56  ;;  %v11034_v53 = vld [vmem:[%s15466_s1 + $0x5b4] ss:$8 sps:$4 sm:$0xff]  }
 0x298   : > { %5599 = vmatprep.subr.bf16.mxu1 %v11022_v6 }
 0x29b   : > { %5600 = vmatpush1.bf16.msra.mxu1 %v11020_v36 }
 0x29c   : > { %5601 = vmatprep.subr.bf16.mxu1 %v11028_v37 }
 0x29e   : > { %2395 = vmatmul.mubr.bf16.gmra.mrb[212].mxu1 %v13146_v12  ;;  %v11043_v12 = vld [vmem:[%s15466_s1 + $0x5d4] ss:$8 sps:$4 sm:$0xff]  }
 0x29f   : > { %8712 = vmatprep.mubr.msk.bf16.mxu1 %vm864_vm0, %v15767_v14  ;;  %5602 = vmatpush1.bf16.msra.mxu1 %v11026_v54  ;;  %v11068_v54 = vld [vmem:[%s15466_s1 + $0x620] ss:$8 sps:$4 sm:$0xff]  }
 0x2a0   : > { %5603 = vmatprep.subr.bf16.mxu1 %v11034_v53  ;;  %v11050_v14 = vld [vmem:[%s15466_s1 + $0x400] ss:$8 sps:$4 sm:$0xff]  }
 0x2a3   : > { %5604 = vmatpush1.bf16.msra.mxu1 %v11032_v22  ;;  %v11076_v22 = vld [vmem:[%s15466_s1 + $0x634] ss:$8 sps:$4 sm:$0xff]  }
 0x2a4   : > { %5605 = vmatprep.subr.bf16.mxu1 %v11040_v40  ;;  %v11058_v40 = vld [vmem:[%s15466_s1 + $0x414] ss:$8 sps:$4 sm:$0xff]  }
 0x2a6   : > { %2403 = vmatmul.mubr.bf16.gmra.mrb[216].mxu1 %v15768_v1  ;;  %v11091_v1 = vld [vmem:[%s15466_s1 + $0x644] ss:$8 sps:$4 sm:$0xff]  }
 0x2a7   : > { %8713 = vmatprep.mubr.msk.bf16.mxu1 %vm864_vm0, %v15769_v39  ;;  %5606 = vmatpush1.bf16.msra.mxu1 %v11038_v21  ;;  %v11074_v21 = vld [vmem:[%s15466_s1 + $0x630] ss:$8 sps:$4 sm:$0xff]  }
 0x2a8   : > { %5607 = vmatprep.subr.bf16.mxu1 %v11043_v12 }
 0x2ab   : > { %5608 = vmatpush1.bf16.msra.mxu1 %v11041_v25 }
 0x2ac   : > { %5609 = vmatprep.subr.bf16.mxu1 %v11049_v9 }
 0x2ae   : > { %2411 = vmatmul.mubr.bf16.gmra.mrb[220].mxu1 %v15770_v58  ;;  %v11062_v58 = vld [vmem:[%s15466_s1 + $0x420] ss:$8 sps:$4 sm:$0xff]  }
 0x2af   : > { %8714 = vmatprep.mubr.msk.bf16.mxu1 %vm864_vm0, %v15771_v3  ;;  %5610 = vmatpush1.bf16.msra.mxu1 %v11047_v51  ;;  %v11073_v3 = vld [vmem:[%s15466_s1 + $0x434] ss:$8 sps:$4 sm:$0xff]  }
 0x2b0   : > { %5611 = vmatprep.subr.bf16.mxu1 %v11055_v45 }
 0x2b3   : > { %5612 = vmatpush1.bf16.msra.mxu1 %v11053_v27 }
 0x2b4   : > { %5613 = vmatprep.subr.bf16.mxu1 %v11061_v24  ;;  %v11071_v24 = vld [vmem:[%s15466_s1 + $0x430] ss:$8 sps:$4 sm:$0xff]  }
 0x2b6   : > { %2419 = vmatmul.mubr.bf16.gmra.mrb[224].mxu1 %v15772_v10 }
 0x2b7   : > { %8715 = vmatprep.mubr.msk.bf16.mxu1 %vm864_vm0, %v15773_v49  ;;  %5614 = vmatpush1.bf16.msra.mxu1 %v11059_v41 }
 0x2b8   : > { %5615 = vmatprep.subr.bf16.mxu1 %v11067_v38 }
 0x2b9   : > { %v1860_v56 = vpop.f32.mrb[120].mxu1 }
 0x2ba   : > { %v1862_v6 = vpop.f32.mrb[121].mxu1 }
 0x2bb   : > { %v1864_v4 = vpop.f32.mrb[122].mxu1  ;;  %5616 = vmatpush1.bf16.msra.mxu1 %v11065_v33 }
 0x2bc   : > { %v13667_v36 = vpack.c.bf16 %v1864_v4, %v1860_v56  ;;  %v1866_v37 = vpop.f32.mrb[123].mxu1  ;;  %5617 = vmatprep.subr.bf16.mxu1 %v11070_v5  ;;  %v11082_v5 = vld [vmem:[%s15466_s1 + $0x454] ss:$8 sps:$4 sm:$0xff]   ;;  %v15774_v56 = vld [vmem:[#allocation3_spill] sm:$0xff]  ;;  %v11080_v4 = vld [vmem:[%s15466_s1 + $0x450] ss:$8 sps:$4 sm:$0xff]  }
 0x2bd   : > { %v13672_v53 = vpack.c.bf16 %v1866_v37, %v1862_v6 }
 0x2be   : > { %2427 = vmatmul.mubr.bf16.gmra.mrb[228].mxu1 %v13270_v48  ;;  %v11056_v48 = vld [vmem:[%s15466_s1 + $0x410] ss:$8 sps:$4 sm:$0xff]  }
 0x2bf   : > { %4030 = vmatprep.mubr.bf16.mxu0 %v13672_v53  ;;  %8716 = vmatprep.mubr.msk.bf16.mxu1 %vm864_vm0, %v13279_v62  ;;  %v11064_v62 = vld [vmem:[%s15466_s1 + $0x424] ss:$8 sps:$4 sm:$0xff]  }
 0x2c0   : > { %4031 = vmatmul.mubr.bf16.vlgmr.msra.gmra.mrb[120].mxu0 %v13667_v36  ;;  %5618 = vmatpush1.bf16.msra.mxu1 %v11068_v54 }
 0x2c1   : > { %v1870_v12 = vpop.f32.mrb[124].mxu1  ;;  %4132 = vmatpush1.bf16.msra.mxu0 %v11050_v14  ;;  %5619 = vmatprep.subr.bf16.mxu1 %v11076_v22 }
 0x2c2   : > { %v1872_v39 = vpop.f32.mrb[125].mxu1  ;;  %4133 = vmatprep.subr.bf16.mxu0 %v11058_v40  ;;  %v11089_v40 = vld [vmem:[%s15466_s1 + $0x640] ss:$8 sps:$4 sm:$0xff]  }
 0x2c3   : > { %v1874_v25 = vpop.f32.mrb[126].mxu1 }
 0x2c4   : > { %v13700_v9 = vpack.c.bf16 %v1874_v25, %v1870_v12  ;;  %v1876_v51 = vpop.f32.mrb[127].mxu1  ;;  %5620 = vmatpush1.bf16.msra.mxu1 %v11074_v21  ;;  %v11083_v12 = vld [vmem:[%s15466_s1 + $0x460] ss:$8 sps:$4 sm:$0xff]   ;;  %v11095_v25 = vld [vmem:[%s15466_s1 + $0x650] ss:$8 sps:$4 sm:$0xff]  }
 0x2c5   : > { %v13702_v45 = vpack.c.bf16 %v1876_v51, %v1872_v39  ;;  %4134 = vmatpush1.bf16.msra.mxu0 %v11056_v48  ;;  %5722 = vmatprep.subr.bf16.mxu1 %v11091_v1  ;;  %v11097_v48 = vld [vmem:[%s15466_s1 + $0x654] ss:$8 sps:$4 sm:$0xff]   ;;  %v15777_v1 = vld [vmem:[#allocation2_spill] sm:$0xff] }
 0x2c6   : > { %2435 = vmatmul.mubr.bf16.gmra.mrb[232].mxu1 %v13303_v18  ;;  %4135 = vmatprep.subr.bf16.mxu0 %v11064_v62  ;;  %v11079_v18 = vld [vmem:[%s15466_s1 + $0x444] ss:$8 sps:$4 sm:$0xff]   ;;  %v11088_v39 = vld [vmem:[%s15466_s1 + $0x474] ss:$8 sps:$4 sm:$0xff]  }
 0x2c7   : > { %4040 = vmatprep.mubr.bf16.mxu0 %v13702_v45  ;;  %8717 = vmatprep.mubr.msk.bf16.mxu1 %vm864_vm0, %v13312_v8  ;;  %v11077_v8 = vld [vmem:[%s15466_s1 + $0x440] ss:$8 sps:$4 sm:$0xff]   ;;  %v15778_v62 = vld [vmem:[#allocation5_spill] sm:$0xff] }
 0x2c8   : > { %4041 = vmatmul.mubr.bf16.gmra.mrb[124].mxu0 %v13700_v9 }
 0x2c9   : > { %v1880_v27 = vpop.f32.mrb[128].mxu1  ;;  %4136 = vmatpush1.bf16.msra.mxu0 %v11062_v58  ;;  %v11086_v58 = vld [vmem:[%s15466_s1 + $0x470] ss:$8 sps:$4 sm:$0xff]  }
 0x2ca   : > { %v1882_v41 = vpop.f32.mrb[129].mxu1  ;;  %4137 = vmatprep.subr.bf16.mxu0 %v11073_v3  ;;  %v11103_v3 = vld [vmem:[%s15466_s1 + $0x664] ss:$8 sps:$4 sm:$0xff]  }
 0x2cb   : > { %v1884_v38 = vpop.f32.mrb[130].mxu1 }
 0x2cc   : > { %v13721_v10 = vpack.c.bf16 %v1884_v38, %v1880_v27  ;;  %v1886_v49 = vpop.f32.mrb[131].mxu1 }
 0x2cd   : > { %v13723_v33 = vpack.c.bf16 %v1886_v49, %v1882_v41  ;;  %4138 = vmatpush1.bf16.msra.mxu0 %v11071_v24  ;;  %v11094_v24 = vld [vmem:[%s15466_s1 + $0x484] ss:$8 sps:$4 sm:$0xff]   ;;  %v11101_v49 = vld [vmem:[%s15466_s1 + $0x660] ss:$8 sps:$4 sm:$0xff]  }
 0x2ce   : > { %2443 = vmatmul.mubr.bf16.gmra.mrb[236].mxu1 %v13342_v52  ;;  %4139 = vmatprep.subr.bf16.mxu0 %v11079_v18  ;;  %v11085_v52 = vld [vmem:[%s15466_s1 + $0x464] ss:$8 sps:$4 sm:$0xff]  }
 0x2cf   : > { %4050 = vmatprep.mubr.bf16.mxu0 %v13723_v33  ;;  %5621 = vmatprep.mubr.bf16.mxu1 %v15774_v56 }
 0x2d0   : > { %4051 = vmatmul.mubr.bf16.gmra.mrb[128].mxu0 %v13721_v10 }
 0x2d1   : > { %v1890_v6 = vpop.f32.mrb[132].mxu1  ;;  %4140 = vmatpush1.bf16.msra.mxu0 %v11077_v8 }
 0x2d2   : > { %v1892_v37 = vpop.f32.mrb[133].mxu1  ;;  %4141 = vmatprep.subr.bf16.mxu0 %v11082_v5  ;;  %v11092_v5 = vld [vmem:[%s15466_s1 + $0x480] ss:$8 sps:$4 sm:$0xff]  }
 0x2d3   : > { %v1894_v54 = vpop.f32.mrb[134].mxu1 }
 0x2d4   : > { %v13741_v14 = vpack.c.bf16 %v1894_v54, %v1890_v6  ;;  %v1896_v22 = vpop.f32.mrb[135].mxu1  ;;  %v11109_v6 = vld [vmem:[%s15466_s1 + $0x674] ss:$8 sps:$4 sm:$0xff]   ;;  %v11107_v54 = vld [vmem:[%s15466_s1 + $0x670] ss:$8 sps:$4 sm:$0xff]  }
 0x2d5   : > { %v13746_v21 = vpack.c.bf16 %v1896_v22, %v1892_v37  ;;  %4142 = vmatpush1.bf16.msra.mxu0 %v11080_v4  ;;  %v15781_v4 = vld [vmem:[#allocation4_spill] sm:$0xff] }
 0x2d6   : > { %15775 = vst [vmem:[#allocation8_spill] sm:$0xff] %v13741_v14  ;;  %5622 = vmatmul.mubr.bf16.vlgmr.msra.gmra.mrb[240].mxu1 %v15777_v1  ;;  %4143 = vmatprep.subr.bf16.mxu0 %v11085_v52  ;;  %v11100_v37 = vld [vmem:[%s15466_s1 + $0x494] ss:$8 sps:$4 sm:$0xff]   ;;  %v15782_v52 = vld [vmem:[#allocation7_spill] sm:$0xff] }
 0x2d7   : > { %15776 = vst [vmem:[#allocation27_spill] sm:$0xff] %v13746_v21  ;;  %4060 = vmatprep.mubr.bf16.mxu0 %v13746_v21  ;;  %5631 = vmatprep.mubr.bf16.mxu1 %v15778_v62  ;;  %v15808_v21 = vld [vmem:[#allocation19_spill] sm:$0xff] }
 0x2d8   : > { %4061 = vmatmul.mubr.bf16.gmra.mrb[132].mxu0 %v13741_v14  ;;  %5723 = vmatpush1.bf16.msra.mxu1 %v11089_v40  ;;  %v11098_v40 = vld [vmem:[%s15466_s1 + $0x490] ss:$8 sps:$4 sm:$0xff]   ;;  %v11169_v14 = vld [vmem:[%s15466_s1 + $0x744] ss:$8 sps:$4 sm:$0xff]  }
 0x2d9   : > { %v1900_v51 = vpop.f32.mrb[136].mxu1  ;;  %4144 = vmatpush1.bf16.msra.mxu0 %v11083_v12  ;;  %5724 = vmatprep.subr.bf16.mxu1 %v11097_v48  ;;  %v11112_v12 = vld [vmem:[%s15466_s1 + $0x684] ss:$8 sps:$4 sm:$0xff]  }
 0x2da   : > { %v1902_v27 = vpop.f32.mrb[137].mxu1  ;;  %4145 = vmatprep.subr.bf16.mxu0 %v11088_v39  ;;  %v11106_v39 = vld [vmem:[%s15466_s1 + $0x4a4] ss:$8 sps:$4 sm:$0xff]  }
 0x2db   : > { %v1904_v41 = vpop.f32.mrb[138].mxu1 }
 0x2dc   : > { %v13773_v18 = vpack.c.bf16 %v1904_v41, %v1900_v51  ;;  %v1906_v38 = vpop.f32.mrb[139].mxu1  ;;  %5725 = vmatpush1.bf16.msra.mxu1 %v11095_v25  ;;  %v11118_v41 = vld [vmem:[%s15466_s1 + $0x694] ss:$8 sps:$4 sm:$0xff]  }
 0x2dd   : > { %v13778_v8 = vpack.c.bf16 %v1906_v38, %v1902_v27  ;;  %4146 = vmatpush1.bf16.msra.mxu0 %v11086_v58  ;;  %5726 = vmatprep.subr.bf16.mxu1 %v11103_v3  ;;  %v11110_v3 = vld [vmem:[%s15466_s1 + $0x680] ss:$8 sps:$4 sm:$0xff]  }
 0x2de   : > { %15779 = vst [vmem:[#allocation23_spill] sm:$0xff] %v13773_v18  ;;  %5632 = vmatmul.mubr.bf16.gmra.mrb[244].mxu1 %v15781_v4  ;;  %4147 = vmatprep.subr.bf16.mxu0 %v11094_v24  ;;  %v11104_v24 = vld [vmem:[%s15466_s1 + $0x4a0] ss:$8 sps:$4 sm:$0xff]  }
 0x2df   : > { %15780 = vst [vmem:[#allocation24_spill] sm:$0xff] %v13778_v8  ;;  %4070 = vmatprep.mubr.bf16.mxu0 %v13778_v8  ;;  %5641 = vmatprep.mubr.bf16.mxu1 %v15782_v52  ;;  %v15785_v38 = vld [vmem:[#allocation6_spill] sm:$0xff] }
 0x2e0   : > { %4071 = vmatmul.mubr.bf16.gmra.mrb[136].mxu0 %v13773_v18  ;;  %5727 = vmatpush1.bf16.msra.mxu1 %v11101_v49  ;;  %v11115_v49 = vld [vmem:[%s15466_s1 + $0x4b4] ss:$8 sps:$4 sm:$0xff]   ;;  %v15802_v8 = vld [vmem:[#allocation18_spill] sm:$0xff] }
 0x2e1   : > { %v1910_v22 = vpop.f32.mrb[140].mxu1  ;;  %4148 = vmatpush1.bf16.msra.mxu0 %v11092_v5  ;;  %5728 = vmatprep.subr.bf16.mxu1 %v11109_v6  ;;  %v15786_v5 = vld [vmem:[#allocation10_spill] sm:$0xff]  ;;  %v11116_v6 = vld [vmem:[%s15466_s1 + $0x690] ss:$8 sps:$4 sm:$0xff]  }
 0x2e2   : > { %v1912_v48 = vpop.f32.mrb[141].mxu1  ;;  %4149 = vmatprep.subr.bf16.mxu0 %v11100_v37  ;;  %v15797_v18 = vld [vmem:[#allocation13_spill] sm:$0xff] }
 0x2e3   : > { %v1914_v25 = vpop.f32.mrb[142].mxu1 }
 0x2e4   : > { %v13805_v51 = vpack.c.bf16 %v1914_v25, %v1910_v22  ;;  %v1916_v58 = vpop.f32.mrb[143].mxu1  ;;  %5729 = vmatpush1.bf16.msra.mxu1 %v11107_v54  ;;  %v11113_v54 = vld [vmem:[%s15466_s1 + $0x4b0] ss:$8 sps:$4 sm:$0xff]   ;;  %v11124_v22 = vld [vmem:[%s15466_s1 + $0x6a4] ss:$8 sps:$4 sm:$0xff]  }
 0x2e5   : > { %v13810_v27 = vpack.c.bf16 %v1916_v58, %v1912_v48  ;;  %4150 = vmatpush1.bf16.msra.mxu0 %v11098_v40  ;;  %5730 = vmatprep.subr.bf16.mxu1 %v11112_v12  ;;  %v11121_v12 = vld [vmem:[%s15466_s1 + $0x4c4] ss:$8 sps:$4 sm:$0xff]   ;;  %v11122_v58 = vld [vmem:[%s15466_s1 + $0x6a0] ss:$8 sps:$4 sm:$0xff]  }
 0x2e6   : > { %15783 = vst [vmem:[#allocation25_spill] sm:$0xff] %v13805_v51  ;;  %5642 = vmatmul.mubr.bf16.gmra.mrb[248].mxu1 %v15785_v38  ;;  %4151 = vmatprep.subr.bf16.mxu0 %v11106_v39 }
 0x2e7   : > { %15784 = vst [vmem:[#allocation26_spill] sm:$0xff] %v13810_v27  ;;  %4080 = vmatprep.mubr.bf16.mxu0 %v13810_v27  ;;  %5651 = vmatprep.mubr.bf16.mxu1 %v15786_v5 }
 0x2e8   : > { %4081 = vmatmul.mubr.bf16.gmra.mrb[140].mxu0 %v13805_v51  ;;  %5731 = vmatpush1.bf16.msra.mxu1 %v11110_v3  ;;  %v11139_v51 = vld [vmem:[%s15466_s1 + $0x6d4] ss:$8 sps:$4 sm:$0xff]  }
 0x2e9   : > { %v1920_v37 = vpop.f32.mrb[144].mxu1  ;;  %4152 = vmatpush1.bf16.msra.mxu0 %v11104_v24  ;;  %5732 = vmatprep.subr.bf16.mxu1 %v11118_v41  ;;  %v11119_v24 = vld [vmem:[%s15466_s1 + $0x4c0] ss:$8 sps:$4 sm:$0xff]   ;;  %v11130_v41 = vld [vmem:[%s15466_s1 + $0x6b4] ss:$8 sps:$4 sm:$0xff]  }
 0x2ea   : > { %v1922_v40 = vpop.f32.mrb[145].mxu1  ;;  %4153 = vmatprep.subr.bf16.mxu0 %v11115_v49  ;;  %v15789_v49 = vld [vmem:[#allocation9_spill] sm:$0xff] }
 0x2eb   : > { %v1924_v48 = vpop.f32.mrb[146].mxu1 }
 0x2ec   : > { %v13837_v39 = vpack.c.bf16 %v1924_v48, %v1920_v37  ;;  %v1926_v25 = vpop.f32.mrb[147].mxu1  ;;  %5733 = vmatpush1.bf16.msra.mxu1 %v11116_v6  ;;  %v11127_v6 = vld [vmem:[%s15466_s1 + $0x4d4] ss:$8 sps:$4 sm:$0xff]  }
 0x2ed   : > { %v13842_v3 = vpack.c.bf16 %v1926_v25, %v1922_v40  ;;  %4154 = vmatpush1.bf16.msra.mxu0 %v11113_v54  ;;  %5734 = vmatprep.subr.bf16.mxu1 %v11124_v22  ;;  %v15790_v37 = vld [vmem:[#allocation12_spill] sm:$0xff]  ;;  %v11133_v25 = vld [vmem:[%s15466_s1 + $0x4e4] ss:$8 sps:$4 sm:$0xff]  }
 0x2ee   : > { %15787 = vst [vmem:[#allocation28_spill] sm:$0xff] %v13837_v39  ;;  %5652 = vmatmul.mubr.bf16.gmra.mrb[252].mxu1 %v15789_v49  ;;  %4155 = vmatprep.subr.bf16.mxu0 %v11121_v12  ;;  %v11128_v54 = vld [vmem:[%s15466_s1 + $0x6b0] ss:$8 sps:$4 sm:$0xff]   ;;  %v11136_v12 = vld [vmem:[%s15466_s1 + $0x6c4] ss:$8 sps:$4 sm:$0xff]  }
 0x2ef   : > { %15788 = vst [vmem:[#allocation29_spill] sm:$0xff] %v13842_v3  ;;  %4090 = vmatprep.mubr.bf16.mxu0 %v13842_v3  ;;  %5661 = vmatprep.mubr.bf16.mxu1 %v15790_v37  ;;  %v11125_v40 = vld [vmem:[%s15466_s1 + $0x4d0] ss:$8 sps:$4 sm:$0xff]  }
 0x2f0   : > { %4091 = vmatmul.mubr.bf16.gmra.mrb[144].mxu0 %v13837_v39  ;;  %5735 = vmatpush1.bf16.msra.mxu1 %v11122_v58 }
 0x2f1   : > { %v1930_v22 = vpop.f32.mrb[148].mxu1  ;;  %4156 = vmatpush1.bf16.msra.mxu0 %v11119_v24  ;;  %5736 = vmatprep.subr.bf16.mxu1 %v11130_v41  ;;  %v11134_v24 = vld [vmem:[%s15466_s1 + $0x6c0] ss:$8 sps:$4 sm:$0xff]  }
 0x2f2   : > { %v1932_v48 = vpop.f32.mrb[149].mxu1  ;;  %4157 = vmatprep.subr.bf16.mxu0 %v11127_v6  ;;  %v11131_v6 = vld [vmem:[%s15466_s1 + $0x4e0] ss:$8 sps:$4 sm:$0xff]  }
 0x2f3   : > { %v1934_v58 = vpop.f32.mrb[150].mxu1 }
 0x2f4   : > { %v13869_v39 = vpack.c.bf16 %v1934_v58, %v1930_v22  ;;  %v1936_v3 = vpop.f32.mrb[151].mxu1  ;;  %5737 = vmatpush1.bf16.msra.mxu1 %v11128_v54  ;;  %v15793_v22 = vld [vmem:[#allocation11_spill] sm:$0xff]  ;;  %v11142_v54 = vld [vmem:[%s15466_s1 + $0x4f4] ss:$8 sps:$4 sm:$0xff]  }
 0x2f5   : > { %v13874_v41 = vpack.c.bf16 %v1936_v3, %v1932_v48  ;;  %4158 = vmatpush1.bf16.msra.mxu0 %v11125_v40  ;;  %5738 = vmatprep.subr.bf16.mxu1 %v11136_v12  ;;  %v15794_v3 = vld [vmem:[#allocation14_spill] sm:$0xff]  ;;  %v11137_v40 = vld [vmem:[%s15466_s1 + $0x6d0] ss:$8 sps:$4 sm:$0xff]  }
 0x2f6   : > { %15791 = vst [vmem:[#allocation32_spill] sm:$0xff] %v13869_v39  ;;  %5662 = vmatmul.mubr.bf16.gmra.mrb[0].mxu1 %v15793_v22  ;;  %4159 = vmatprep.subr.bf16.mxu0 %v11133_v25  ;;  %v11140_v48 = vld [vmem:[%s15466_s1 + $0x4f0] ss:$8 sps:$4 sm:$0xff]   ;;  %v11145_v25 = vld [vmem:[%s15466_s1 + $0x6e4] ss:$8 sps:$4 sm:$0xff]  }
 0x2f7   : > { %15792 = vst [vmem:[#allocation33_spill] sm:$0xff] %v13874_v41  ;;  %4100 = vmatprep.mubr.bf16.mxu0 %v13874_v41  ;;  %5671 = vmatprep.mubr.bf16.mxu1 %v15794_v3 }
 0x2f8   : > { %4101 = vmatmul.mubr.bf16.gmra.mrb[148].mxu0 %v13869_v39  ;;  %5739 = vmatpush1.bf16.msra.mxu1 %v11134_v24  ;;  %v11148_v24 = vld [vmem:[%s15466_s1 + $0x504] ss:$8 sps:$4 sm:$0xff]  }
 0x2f9   : > { %v1940_v12 = vpop.f32.mrb[152].mxu1  ;;  %4160 = vmatpush1.bf16.msra.mxu0 %v11131_v6  ;;  %5740 = vmatprep.subr.bf16.mxu1 %v11139_v51  ;;  %v11143_v51 = vld [vmem:[%s15466_s1 + $0x6e0] ss:$8 sps:$4 sm:$0xff]  }
 0x2fa   : > { %v1942_v58 = vpop.f32.mrb[153].mxu1  ;;  %4161 = vmatprep.subr.bf16.mxu0 %v11142_v54  ;;  %v11151_v54 = vld [vmem:[%s15466_s1 + $0x6f4] ss:$8 sps:$4 sm:$0xff]  }
 0x2fb   : > { %v1944_v39 = vpop.f32.mrb[154].mxu1 }
 0x2fc   : > { %v13901_v41 = vpack.c.bf16 %v1944_v39, %v1940_v12  ;;  %v1946_v27 = vpop.f32.mrb[155].mxu1  ;;  %5741 = vmatpush1.bf16.msra.mxu1 %v11137_v40  ;;  %v15798_v39 = vld [vmem:[#allocation16_spill] sm:$0xff]  ;;  %v11154_v12 = vld [vmem:[%s15466_s1 + $0x704] ss:$8 sps:$4 sm:$0xff]  }
 0x2fd   : > { %v13906_v6 = vpack.c.bf16 %v1946_v27, %v1942_v58  ;;  %4162 = vmatpush1.bf16.msra.mxu0 %v11140_v48  ;;  %5742 = vmatprep.subr.bf16.mxu1 %v11145_v25  ;;  %v11149_v27 = vld [vmem:[%s15466_s1 + $0x6f0] ss:$8 sps:$4 sm:$0xff]  }
 0x2fe   : > { %15795 = vst [vmem:[#allocation36_spill] sm:$0xff] %v13901_v41  ;;  %5672 = vmatmul.mubr.bf16.gmra.mrb[4].mxu1 %v15797_v18  ;;  %4264 = vmatprep.subr.bf16.mxu0 %v11148_v24  ;;  %v11170_v18 = vld [vmem:[%s15466_s1 + $0x520] ss:$8 sps:$4 sm:$0xff]  }
 0x2ff   : > { %15796 = vst [vmem:[#allocation37_spill] sm:$0xff] %v13906_v6  ;;  %4110 = vmatprep.mubr.bf16.mxu0 %v13906_v6  ;;  %5681 = vmatprep.mubr.bf16.mxu1 %v15798_v39  ;;  %v15801_v6 = vld [vmem:[#allocation15_spill] sm:$0xff] }
 0x300   : > { %4111 = vmatmul.mubr.bf16.gmra.mrb[152].mxu0 %v13901_v41  ;;  %5743 = vmatpush1.bf16.msra.mxu1 %v11143_v51  ;;  %v11152_v51 = vld [vmem:[%s15466_s1 + $0x700] ss:$8 sps:$4 sm:$0xff]  }
 0x301   : > { %v1950_v40 = vpop.f32.mrb[156].mxu1  ;;  %5744 = vmatprep.subr.bf16.mxu1 %v11151_v54  ;;  %v11157_v54 = vld [vmem:[%s15466_s1 + $0x714] ss:$8 sps:$4 sm:$0xff]  }
 0x302   : > { %v1952_v48 = vpop.f32.mrb[157].mxu1 }
 0x303   : > { %v1954_v25 = vpop.f32.mrb[158].mxu1 }
 0x304   : > { %v13921_v58 = vpack.c.bf16 %v1954_v25, %v1950_v40  ;;  %v1956_v24 = vpop.f32.mrb[159].mxu1  ;;  %5745 = vmatpush1.bf16.msra.mxu1 %v11149_v27  ;;  %v11155_v27 = vld [vmem:[%s15466_s1 + $0x710] ss:$8 sps:$4 sm:$0xff]  }
 0x305   : > { %v13926_v41 = vpack.c.bf16 %v1956_v24, %v1952_v48  ;;  %5746 = vmatprep.subr.bf16.mxu1 %v11154_v12  ;;  %v15803_v48 = vld [vmem:[#allocation63_spill] sm:$0xff] }
 0x306   : > { %15799 = vst [vmem:[#allocation40_spill] sm:$0xff] %v13921_v58  ;;  %5682 = vmatmul.mubr.bf16.gmra.mrb[8].mxu1 %v15801_v6  ;;  %v11160_v12 = vld [vmem:[%s15466_s1 + $0x724] ss:$8 sps:$4 sm:$0xff]   ;;  %v15806_v6 = vld [vmem:[#allocation61_spill] sm:$0xff] }
 0x307   : > { %15800 = vst [vmem:[#allocation41_spill] sm:$0xff] %v13926_v41  ;;  %4120 = vmatprep.mubr.bf16.mxu0 %v13926_v41  ;;  %5691 = vmatprep.mubr.bf16.mxu1 %v15802_v8 }
 0x308   : > { %4121 = vmatmul.mubr.bf16.gmra.mrb[156].mxu0 %v13921_v58  ;;  %5747 = vmatpush1.bf16.msra.mxu1 %v11152_v51  ;;  %v11158_v51 = vld [vmem:[%s15466_s1 + $0x720] ss:$8 sps:$4 sm:$0xff]  }
 0x309   : > { %v9886_v40 = vpop.f32.mrb[160].mxu1  ;;  %4163 = vmatprep.mubr.bf16.mxu0 %v15803_v48  ;;  %5748 = vmatprep.subr.bf16.mxu1 %v11157_v54  ;;  %v11146_v54 = vld [vmem:[%s15466_s1 + $0x500] ss:$8 sps:$4 sm:$0xff]   ;;  %v15804_v48 = vld [vmem:[#allocation17_spill] sm:$0xff] }
 0x30a   : > { %v9887_v25 = vpop.f32.mrb[161].mxu1 }
 0x30b   : > { %v13942_v24 = vadd.f32 %v9887_v25, %v9886_v40  ;;  %v9889_v41 = vpop.f32.mrb[162].mxu1  ;;  %v11163_v40 = vld [vmem:[%s15466_s1 + $0x734] ss:$8 sps:$4 sm:$0xff]  }
 0x30c   : > { %v9890_v8 = vpop.f32.mrb[163].mxu1  ;;  %5749 = vmatpush1.bf16.msra.mxu1 %v11155_v27  ;;  %v11166_v27 = vld [vmem:[%s15466_s1 + $0x514] ss:$8 sps:$4 sm:$0xff]  }
 0x30d   : > { %v13947_v58 = vadd.f32 %v9890_v8, %v9889_v41  ;;  %5750 = vmatprep.subr.bf16.mxu1 %v11160_v12  ;;  %v15805_v25 = vld [vmem:[#allocation20_spill] sm:$0xff]  ;;  %v15807_v12 = vld [vmem:[#allocation69_spill] sm:$0xff] }
 0x30e   : > { %5692 = vmatmul.mubr.bf16.gmra.mrb[12].mxu1 %v15804_v48  ;;  %v11161_v8 = vld [vmem:[%s15466_s1 + $0x730] ss:$8 sps:$4 sm:$0xff]  }
 0x30f   : > { %5701 = vmatprep.mubr.bf16.mxu1 %v15805_v25  ;;  %v11164_v48 = vld [vmem:[%s15466_s1 + $0x510] ss:$8 sps:$4 sm:$0xff]  }
 0x310   : > { %4164 = vmatmul.mubr.bf16.vlgmr.msra.gmra.mrb[120].mxu0 %v15806_v6  ;;  %5751 = vmatpush1.bf16.msra.mxu1 %v11158_v51  ;;  %v11172_v51 = vld [vmem:[%s15466_s1 + $0x524] ss:$8 sps:$4 sm:$0xff]  }
 0x311   : > { %v9892_v41 = vpop.f32.mrb[164].mxu1  ;;  %4173 = vmatprep.mubr.bf16.mxu0 %v15807_v12  ;;  %4265 = vmatpush1.bf16.msra.mxu0 %v11146_v54 }
 0x312   : > { %v9893_v25 = vpop.f32.mrb[165].mxu1  ;;  %5752 = vmatprep.subr.bf16.mxu1 %v11163_v40  ;;  %4266 = vmatprep.subr.bf16.mxu0 %v11166_v27  ;;  %v11190_v40 = vld [vmem:[%s15466_s1 + $0x534] ss:$8 sps:$4 sm:$0xff]   ;;  %v15809_v27 = vld [vmem:[#allocation22_spill] sm:$0xff] }
 0x313   : > { %v13974_v6 = vadd.f32 %v9893_v25, %v9892_v41  ;;  %v9895_v39 = vpop.f32.mrb[166].mxu1  ;;  %v15810_v25 = vld [vmem:[#allocation67_spill] sm:$0xff] }
 0x314   : > { %v9896_v12 = vpop.f32.mrb[167].mxu1  ;;  %5753 = vmatpush1.bf16.msra.mxu1 %v11161_v8 }
 0x315   : > { %v13976_v54 = vadd.f32 %v9896_v12, %v9895_v39  ;;  %4267 = vmatpush1.bf16.msra.mxu0 %v11164_v48  ;;  %5855 = vmatprep.subr.bf16.mxu1 %v11169_v14  ;;  %v11188_v14 = vld [vmem:[%s15466_s1 + $0x530] ss:$8 sps:$4 sm:$0xff]   ;;  %v11208_v48 = vld [vmem:[%s15466_s1 + $0xa84] ss:$8 sps:$4 sm:$0xff]  }
 0x316   : > { %5702 = vmatmul.mubr.bf16.gmra.mrb[16].mxu1 %v15808_v21  ;;  %4268 = vmatprep.subr.bf16.mxu0 %v11172_v51 }
 0x317   : > { %5711 = vmatprep.mubr.bf16.mxu1 %v15809_v27 }
 0x318   : > { %4174 = vmatmul.mubr.bf16.gmra.mrb[124].mxu0 %v15810_v25  ;;  %v15811_v25 = vld [vmem:[#allocation21_spill] sm:$0xff] }
 0x319   : > { %v9898_v8 = vpop.f32.mrb[168].mxu1  ;;  %4183 = vmatprep.mubr.bf16.mxu0 %v13263_v43  ;;  %4269 = vmatpush1.bf16.msra.mxu0 %v11170_v18  ;;  %v15812_v18 = vld [vmem:[#allocation31_spill] sm:$0xff] }
 0x31a   : > { %v9899_v39 = vpop.f32.mrb[169].mxu1  ;;  %4270 = vmatprep.subr.bf16.mxu0 %v11190_v40 }
 0x31b   : > { %v13994_v41 = vadd.f32 %v9899_v39, %v9898_v8  ;;  %v9901_v12 = vpop.f32.mrb[170].mxu1  ;;  %v11167_v39 = vld [vmem:[%s15466_s1 + $0x740] ss:$8 sps:$4 sm:$0xff]  }
 0x31c   : > { %v9902_v51 = vpop.f32.mrb[171].mxu1 }
 0x31d   : > { %v13996_v27 = vadd.f32 %v9902_v51, %v9901_v12  ;;  %4271 = vmatpush1.bf16.msra.mxu0 %v11188_v14  ;;  %v11175_v14 = vld [vmem:[%s15466_s1 + $0x754] ss:$8 sps:$4 sm:$0xff]   ;;  %v15813_v51 = vld [vmem:[#allocation30_spill] sm:$0xff] }
 0x31e   : > { %5712 = vmatmul.mubr.bf16.gmra.mrb[20].mxu1 %v15811_v25  ;;  %7577 = vmatprep.subr.bf16.mxu0 %v11208_v48  ;;  %v15818_v25 = vld [vmem:[#allocation38_spill] sm:$0xff] }
 0x31f   : > { %5754 = vmatprep.mubr.bf16.mxu1 %v15812_v18  ;;  %v15815_v18 = vld [vmem:[#allocation34_spill] sm:$0xff] }
 0x320   : > { %4184 = vmatmul.mubr.bf16.gmra.mrb[128].mxu0 %v13260_v47  ;;  %v15814_v47 = vld [vmem:[#allocation35_spill] sm:$0xff] }
 0x321   : > { %v9904_v43 = vpop.f32.mrb[172].mxu1  ;;  %4193 = vmatprep.mubr.bf16.mxu0 %v13296_v29 }
 0x322   : > { %v9905_v40 = vpop.f32.mrb[173].mxu1 }
 0x323   : > { %v14002_v21 = vadd.f32 %v9905_v40, %v9904_v43  ;;  %v9907_v8 = vpop.f32.mrb[174].mxu1  ;;  %v11173_v43 = vld [vmem:[%s15466_s1 + $0x750] ss:$8 sps:$4 sm:$0xff]   ;;  %v11178_v40 = vld [vmem:[%s15466_s1 + $0x764] ss:$8 sps:$4 sm:$0xff]  }
 0x324   : > { %v9908_v12 = vpop.f32.mrb[175].mxu1 }
 0x325   : > { %v14010_v48 = vadd.f32 %v9908_v12, %v9907_v8 }
 0x326   : > { %5755 = vmatmul.mubr.bf16.vlgmr.msra.gmra.mrb[240].mxu1 %v15813_v51 }
 0x327   : > { %5764 = vmatprep.mubr.bf16.mxu1 %v15814_v47  ;;  %5856 = vmatpush1.bf16.msra.mxu1 %v11167_v39  ;;  %v11176_v39 = vld [vmem:[%s15466_s1 + $0x760] ss:$8 sps:$4 sm:$0xff]  }
 0x328   : > { %4194 = vmatmul.mubr.bf16.gmra.mrb[132].mxu0 %v13290_v46  ;;  %5857 = vmatprep.subr.bf16.mxu1 %v11175_v14  ;;  %v11181_v14 = vld [vmem:[%s15466_s1 + $0x774] ss:$8 sps:$4 sm:$0xff]  }
 0x329   : > { %v9910_v29 = vpop.f32.mrb[176].mxu1  ;;  %4203 = vmatprep.mubr.bf16.mxu0 %v13335_v20  ;;  %v15816_v20 = vld [vmem:[#allocation39_spill] sm:$0xff] }
 0x32a   : > { %v9911_v8 = vpop.f32.mrb[177].mxu1 }
 0x32b   : > { %v14022_v12 = vadd.f32 %v9911_v8, %v9910_v29  ;;  %v9913_v51 = vpop.f32.mrb[178].mxu1  ;;  %5858 = vmatpush1.bf16.msra.mxu1 %v11173_v43  ;;  %v11179_v29 = vld [vmem:[%s15466_s1 + $0x770] ss:$8 sps:$4 sm:$0xff]  }
 0x32c   : > { %v9914_v47 = vpop.f32.mrb[179].mxu1  ;;  %5859 = vmatprep.subr.bf16.mxu1 %v11178_v40  ;;  %v15817_v43 = vld [vmem:[#allocation80_spill] sm:$0xff]  ;;  %v11184_v40 = vld [vmem:[%s15466_s1 + $0x784] ss:$8 sps:$4 sm:$0xff]  }
 0x32d   : > { %v14030_v46 = vadd.f32 %v9914_v47, %v9913_v51 }
 0x32e   : > { %5765 = vmatmul.mubr.bf16.gmra.mrb[244].mxu1 %v15815_v18 }
 0x32f   : > { %5774 = vmatprep.mubr.bf16.mxu1 %v15816_v20  ;;  %5860 = vmatpush1.bf16.msra.mxu1 %v11176_v39  ;;  %v11182_v39 = vld [vmem:[%s15466_s1 + $0x780] ss:$8 sps:$4 sm:$0xff]  }
 0x330   : > { %4204 = vmatmul.mubr.bf16.gmra.mrb[136].mxu0 %v15817_v43  ;;  %5861 = vmatprep.subr.bf16.mxu1 %v11181_v14  ;;  %v11187_v14 = vld [vmem:[%s15466_s1 + $0x794] ss:$8 sps:$4 sm:$0xff]  }
 0x331   : > { %v9916_v8 = vpop.f32.mrb[180].mxu1  ;;  %4213 = vmatprep.mubr.bf16.mxu0 %v13368_v57  ;;  %v15819_v57 = vld [vmem:[#allocation43_spill] sm:$0xff] }
 0x332   : > { %v9917_v47 = vpop.f32.mrb[181].mxu1 }
 0x333   : > { %v14042_v51 = vadd.f32 %v9917_v47, %v9916_v8  ;;  %v9919_v18 = vpop.f32.mrb[182].mxu1  ;;  %5862 = vmatpush1.bf16.msra.mxu1 %v11179_v29  ;;  %v11185_v29 = vld [vmem:[%s15466_s1 + $0x790] ss:$8 sps:$4 sm:$0xff]  }
 0x334   : > { %v9920_v20 = vpop.f32.mrb[183].mxu1  ;;  %5863 = vmatprep.subr.bf16.mxu1 %v11184_v40  ;;  %v11193_v40 = vld [vmem:[%s15466_s1 + $0x7a4] ss:$8 sps:$4 sm:$0xff]  }
 0x335   : > { %v14050_v43 = vadd.f32 %v9920_v20, %v9919_v18 }
 0x336   : > { %5775 = vmatmul.mubr.bf16.gmra.mrb[248].mxu1 %v15818_v25  ;;  %v15820_v25 = vld [vmem:[#allocation42_spill] sm:$0xff] }
 0x337   : > { %5784 = vmatprep.mubr.bf16.mxu1 %v15819_v57  ;;  %5864 = vmatpush1.bf16.msra.mxu1 %v11182_v39  ;;  %v11191_v39 = vld [vmem:[%s15466_s1 + $0x7a0] ss:$8 sps:$4 sm:$0xff]  }
 0x338   : > { %4214 = vmatmul.mubr.bf16.gmra.mrb[140].mxu0 %v13362_v13  ;;  %5865 = vmatprep.subr.bf16.mxu1 %v11187_v14  ;;  %v11196_v14 = vld [vmem:[%s15466_s1 + $0x7b4] ss:$8 sps:$4 sm:$0xff]  }
 0x339   : > { %v9922_v8 = vpop.f32.mrb[184].mxu1  ;;  %4223 = vmatprep.mubr.bf16.mxu0 %v13399_v50  ;;  %v15821_v50 = vld [vmem:[#allocation47_spill] sm:$0xff] }
 0x33a   : > { %v9923_v20 = vpop.f32.mrb[185].mxu1 }
 0x33b   : > { %v14062_v18 = vadd.f32 %v9923_v20, %v9922_v8  ;;  %v9925_v47 = vpop.f32.mrb[186].mxu1  ;;  %5866 = vmatpush1.bf16.msra.mxu1 %v11185_v29  ;;  %v11194_v29 = vld [vmem:[%s15466_s1 + $0x7b0] ss:$8 sps:$4 sm:$0xff]  }
 0x33c   : > { %v9926_v57 = vpop.f32.mrb[187].mxu1  ;;  %5867 = vmatprep.subr.bf16.mxu1 %v11193_v40  ;;  %v11199_v40 = vld [vmem:[%s15466_s1 + $0x7c4] ss:$8 sps:$4 sm:$0xff]  }
 0x33d   : > { %v14070_v13 = vadd.f32 %v9926_v57, %v9925_v47 }
 0x33e   : > { %5785 = vmatmul.mubr.bf16.gmra.mrb[252].mxu1 %v15820_v25  ;;  %v15822_v25 = vld [vmem:[#allocation46_spill] sm:$0xff] }
 0x33f   : > { %5794 = vmatprep.mubr.bf16.mxu1 %v15821_v50  ;;  %5868 = vmatpush1.bf16.msra.mxu1 %v11191_v39  ;;  %v11197_v39 = vld [vmem:[%s15466_s1 + $0x7c0] ss:$8 sps:$4 sm:$0xff]  }
 0x340   : > { %4224 = vmatmul.mubr.bf16.gmra.mrb[144].mxu0 %v13392_v16  ;;  %5869 = vmatprep.subr.bf16.mxu1 %v11196_v14  ;;  %v11202_v14 = vld [vmem:[%s15466_s1 + $0x7d4] ss:$8 sps:$4 sm:$0xff]  }
 0x341   : > { %v9928_v8 = vpop.f32.mrb[188].mxu1  ;;  %4233 = vmatprep.mubr.bf16.mxu0 %v13430_v11  ;;  %v15823_v11 = vld [vmem:[#allocation51_spill] sm:$0xff] }
 0x342   : > { %v9929_v57 = vpop.f32.mrb[189].mxu1 }
 0x343   : > { %v14082_v20 = vadd.f32 %v9929_v57, %v9928_v8  ;;  %v9931_v47 = vpop.f32.mrb[190].mxu1  ;;  %5870 = vmatpush1.bf16.msra.mxu1 %v11194_v29  ;;  %v11200_v29 = vld [vmem:[%s15466_s1 + $0x7d0] ss:$8 sps:$4 sm:$0xff]  }
 0x344   : > { %v9932_v50 = vpop.f32.mrb[191].mxu1  ;;  %5871 = vmatprep.subr.bf16.mxu1 %v11199_v40  ;;  %v11205_v40 = vld [vmem:[%s15466_s1 + $0x7e4] ss:$8 sps:$4 sm:$0xff]  }
 0x345   : > { %v14090_v16 = vadd.f32 %v9932_v50, %v9931_v47 }
 0x346   : > { %5795 = vmatmul.mubr.bf16.gmra.mrb[0].mxu1 %v15822_v25  ;;  %v15824_v25 = vld [vmem:[#allocation50_spill] sm:$0xff] }
 0x347   : > { %5804 = vmatprep.mubr.bf16.mxu1 %v15823_v11  ;;  %5872 = vmatpush1.bf16.msra.mxu1 %v11197_v39  ;;  %v11203_v39 = vld [vmem:[%s15466_s1 + $0x7e0] ss:$8 sps:$4 sm:$0xff]  }
 0x348   : > { %4234 = vmatmul.mubr.bf16.gmra.mrb[148].mxu0 %v13423_v61  ;;  %5873 = vmatprep.subr.bf16.mxu1 %v11202_v14  ;;  %v11211_v14 = vld [vmem:[%s15466_s1 + $0x7f4] ss:$8 sps:$4 sm:$0xff]  }
 0x349   : > { %v9934_v8 = vpop.f32.mrb[192].mxu1  ;;  %4243 = vmatprep.mubr.bf16.mxu0 %v13461_v7  ;;  %v15825_v7 = vld [vmem:[#allocation54_spill] sm:$0xff] }
 0x34a   : > { %v9935_v50 = vpop.f32.mrb[193].mxu1 }
 0x34b   : > { %v14102_v57 = vadd.f32 %v9935_v50, %v9934_v8  ;;  %v9937_v47 = vpop.f32.mrb[194].mxu1  ;;  %5874 = vmatpush1.bf16.msra.mxu1 %v11200_v29  ;;  %v11209_v29 = vld [vmem:[%s15466_s1 + $0x7f0] ss:$8 sps:$4 sm:$0xff]  }
 0x34c   : > { %v9938_v11 = vpop.f32.mrb[195].mxu1  ;;  %5875 = vmatprep.subr.bf16.mxu1 %v11205_v40  ;;  %v11217_v40 = vld [vmem:[%s15466_s1 + $0x804] ss:$8 sps:$4 sm:$0xff]  }
 0x34d   : > { %v14110_v61 = vadd.f32 %v9938_v11, %v9937_v47 }
 0x34e   : > { %5805 = vmatmul.mubr.bf16.gmra.mrb[4].mxu1 %v15824_v25  ;;  %v15826_v25 = vld [vmem:[#allocation53_spill] sm:$0xff] }
 0x34f   : > { %5814 = vmatprep.mubr.bf16.mxu1 %v15825_v7  ;;  %5876 = vmatpush1.bf16.msra.mxu1 %v11203_v39  ;;  %v11215_v39 = vld [vmem:[%s15466_s1 + $0x800] ss:$8 sps:$4 sm:$0xff]  }
 0x350   : > { %4244 = vmatmul.mubr.bf16.gmra.mrb[152].mxu0 %v13454_v42  ;;  %5877 = vmatprep.subr.bf16.mxu1 %v11211_v14  ;;  %v11220_v14 = vld [vmem:[%s15466_s1 + $0x814] ss:$8 sps:$4 sm:$0xff]  }
 0x351   : > { %v9940_v8 = vpop.f32.mrb[196].mxu1  ;;  %4253 = vmatprep.mubr.bf16.mxu0 %v13492_v19  ;;  %v15827_v19 = vld [vmem:[#allocation57_spill] sm:$0xff] }
 0x352   : > { %v9941_v11 = vpop.f32.mrb[197].mxu1 }
 0x353   : > { %v14122_v50 = vadd.f32 %v9941_v11, %v9940_v8  ;;  %v9943_v47 = vpop.f32.mrb[198].mxu1  ;;  %5878 = vmatpush1.bf16.msra.mxu1 %v11209_v29  ;;  %v11218_v29 = vld [vmem:[%s15466_s1 + $0x810] ss:$8 sps:$4 sm:$0xff]  }
 0x354   : > { %v9944_v7 = vpop.f32.mrb[199].mxu1  ;;  %5879 = vmatprep.subr.bf16.mxu1 %v11217_v40  ;;  %v11226_v40 = vld [vmem:[%s15466_s1 + $0x824] ss:$8 sps:$4 sm:$0xff]  }
 0x355   : > { %v14130_v42 = vadd.f32 %v9944_v7, %v9943_v47 }
 0x356   : > { %5815 = vmatmul.mubr.bf16.gmra.mrb[8].mxu1 %v15826_v25  ;;  %v11206_v25 = vld [vmem:[%s15466_s1 + $0xa80] ss:$8 sps:$4 sm:$0xff]  }
 0x357   : > { %5824 = vmatprep.mubr.bf16.mxu1 %v15827_v19  ;;  %5880 = vmatpush1.bf16.msra.mxu1 %v11215_v39  ;;  %v11224_v39 = vld [vmem:[%s15466_s1 + $0x820] ss:$8 sps:$4 sm:$0xff]  }
 0x358   : > { %4254 = vmatmul.mubr.bf16.gmra.mrb[156].mxu0 %v13485_v2  ;;  %5881 = vmatprep.subr.bf16.mxu1 %v11220_v14  ;;  %v11232_v14 = vld [vmem:[%s15466_s1 + $0x834] ss:$8 sps:$4 sm:$0xff]  }
 0x359   : > { %v2372_v8 = vpop.f32.mrb[200].mxu1  ;;  %4296 = vmatprep.mubr.bf16.mxu0 %v15739_v15 }
 0x35a   : > { %v2373_v7 = vadd.f32 %v13942_v24, %v2372_v8  ;;  %v2374_v11 = vpop.f32.mrb[201].mxu1  ;;  %v15829_v8 = vld [vmem:[#allocation56_spill] sm:$0xff] }
 0x35b   : > { %v2375_v47 = vpop.f32.mrb[202].mxu1  ;;  %5882 = vmatpush1.bf16.msra.mxu1 %v11218_v29  ;;  %v11214_v29 = vld [vmem:[%s15466_s1 + $0xa94] ss:$8 sps:$4 sm:$0xff]   ;;  %v15830_v11 = vld [vmem:[#allocation62_spill] sm:$0xff] }
 0x35c   : > { %v2376_v19 = vadd.f32 %v13947_v58, %v2375_v47  ;;  %v2377_v2 = vpop.f32.mrb[203].mxu1  ;;  %5883 = vmatprep.subr.bf16.mxu1 %v11226_v40  ;;  %v11212_v40 = vld [vmem:[%s15466_s1 + $0xa90] ss:$8 sps:$4 sm:$0xff]  }
 0x35d   : > { %v11230_v2 = vld [vmem:[%s15466_s1 + $0x830] ss:$8 sps:$4 sm:$0xff]  }
 0x35e   : > { %v14153_v24 = vpack.c.bf16 %v2376_v19, %v2373_v7  ;;  %5825 = vmatmul.mubr.bf16.gmra.mrb[12].mxu1 %v15829_v8  ;;  %v11247_v19 = vld [vmem:[%s15466_s1 + $0x844] ss:$8 sps:$4 sm:$0xff]  }
 0x35f   : > { %5834 = vmatprep.mubr.bf16.mxu1 %v15830_v11  ;;  %5884 = vmatpush1.bf16.msra.mxu1 %v11224_v39  ;;  %v11223_v39 = vld [vmem:[%s15466_s1 + $0xaa4] ss:$8 sps:$4 sm:$0xff]  }
 0x360   : > { %15828 = vst [vmem:[#allocation44_spill] sm:$0xff] %v14153_v24  ;;  %8886 = vmatmul.mubr.msk.bf16.vlgmr.msra.gmra.mrb[120].mxu0 %vm864_vm0, %v14153_v24  ;;  %5885 = vmatprep.subr.bf16.mxu1 %v11232_v14 }
 0x361   : > { %v2380_v58 = vpop.f32.mrb[204].mxu1  ;;  %7578 = vmatpush1.bf16.msra.mxu0 %v11206_v25  ;;  %4306 = vmatprep.mubr.bf16.mxu0 %v15739_v15  ;;  %v11221_v25 = vld [vmem:[%s15466_s1 + $0xaa0] ss:$8 sps:$4 sm:$0xff]  }
 0x362   : > { %v2381_v7 = vadd.f32 %v13974_v6, %v2380_v58  ;;  %v2382_v47 = vpop.f32.mrb[205].mxu1  ;;  %7579 = vmatprep.subr.bf16.mxu0 %v11214_v29  ;;  %v15831_v6 = vld [vmem:[#allocation60_spill] sm:$0xff] }
 0x363   : > { %v2383_v14 = vpop.f32.mrb[206].mxu1  ;;  %5886 = vmatpush1.bf16.msra.mxu1 %v11230_v2  ;;  %v11229_v29 = vld [vmem:[%s15466_s1 + $0xab4] ss:$8 sps:$4 sm:$0xff]  }
 0x364   : > { %v2384_v24 = vadd.f32 %v13976_v54, %v2383_v14  ;;  %v2385_v11 = vpop.f32.mrb[207].mxu1  ;;  %5988 = vmatprep.subr.bf16.mxu1 %v11247_v19  ;;  %v15832_v58 = vld [vmem:[#allocation68_spill] sm:$0xff]  ;;  %v11235_v19 = vld [vmem:[%s15466_s1 + $0xac4] ss:$8 sps:$4 sm:$0xff]  }
 0x365   : > { %7580 = vmatpush1.bf16.msra.mxu0 %v11212_v40 }
 0x366   : > { %v14180_v8 = vpack.c.bf16 %v2384_v24, %v2381_v7  ;;  %5835 = vmatmul.mubr.bf16.gmra.mrb[16].mxu1 %v15831_v6  ;;  %7581 = vmatprep.subr.bf16.mxu0 %v11223_v39  ;;  %v11227_v24 = vld [vmem:[%s15466_s1 + $0xab0] ss:$8 sps:$4 sm:$0xff]   ;;  %v11233_v39 = vld [vmem:[%s15466_s1 + $0xac0] ss:$8 sps:$4 sm:$0xff]  }
 0x367   : > { %5844 = vmatprep.mubr.bf16.mxu1 %v15832_v58 }
 0x368   : > { %8887 = vmatmul.mubr.msk.bf16.gmra.mrb[124].mxu0 %vm864_vm0, %v14180_v8 }
 0x369   : > { %v2388_v54 = vpop.f32.mrb[208].mxu1  ;;  %7582 = vmatpush1.bf16.msra.mxu0 %v11221_v25  ;;  %4316 = vmatprep.mubr.bf16.mxu0 %v15739_v15  ;;  %v15834_v25 = vld [vmem:[#allocation66_spill] sm:$0xff] }
 0x36a   : > { %v2389_v11 = vadd.f32 %v13994_v41, %v2388_v54  ;;  %v2390_v2 = vpop.f32.mrb[209].mxu1  ;;  %7583 = vmatprep.subr.bf16.mxu0 %v11229_v29  ;;  %v11238_v41 = vld [vmem:[%s15466_s1 + $0xad4] ss:$8 sps:$4 sm:$0xff]   ;;  %v15835_v29 = vld [vmem:[#allocation75_spill] sm:$0xff]  ;;  %v11236_v54 = vld [vmem:[%s15466_s1 + $0xad0] ss:$8 sps:$4 sm:$0xff]  }
 0x36b   : > { %v2391_v40 = vpop.f32.mrb[210].mxu1  ;;  %v11241_v2 = vld [vmem:[%s15466_s1 + $0xae4] ss:$8 sps:$4 sm:$0xff]  }
 0x36c   : > { %v2392_v7 = vadd.f32 %v13996_v27, %v2391_v40  ;;  %v2393_v47 = vpop.f32.mrb[211].mxu1  ;;  %v11245_v40 = vld [vmem:[%s15466_s1 + $0x840] ss:$8 sps:$4 sm:$0xff]  }
 0x36d   : > { %7584 = vmatpush1.bf16.msra.mxu0 %v11227_v24 }
 0x36e   : > { %v14201_v14 = vpack.c.bf16 %v2392_v7, %v2389_v11  ;;  %5845 = vmatmul.mubr.bf16.gmra.mrb[20].mxu1 %v15834_v25  ;;  %7585 = vmatprep.subr.bf16.mxu0 %v11235_v19 }
 0x36f   : > { %5887 = vmatprep.mubr.bf16.mxu1 %v15835_v29 }
 0x370   : > { %15833 = vst [vmem:[#allocation45_spill] sm:$0xff] %v14201_v14  ;;  %8888 = vmatmul.mubr.msk.bf16.gmra.mrb[128].mxu0 %vm864_vm0, %v14201_v14 }
 0x371   : > { %v2396_v27 = vpop.f32.mrb[212].mxu1  ;;  %7586 = vmatpush1.bf16.msra.mxu0 %v11233_v39  ;;  %4326 = vmatprep.mubr.bf16.mxu0 %v15739_v15  ;;  %v11253_v39 = vld [vmem:[%s15466_s1 + $0x854] ss:$8 sps:$4 sm:$0xff]  }
 0x372   : > { %v2397_v24 = vadd.f32 %v14002_v21, %v2396_v27  ;;  %v2398_v11 = vpop.f32.mrb[213].mxu1  ;;  %7587 = vmatprep.subr.bf16.mxu0 %v11238_v41  ;;  %v11239_v21 = vld [vmem:[%s15466_s1 + $0xae0] ss:$8 sps:$4 sm:$0xff]  }
 0x373   : > { %v2399_v19 = vpop.f32.mrb[214].mxu1  ;;  %v15837_v27 = vld [vmem:[#allocation74_spill] sm:$0xff]  ;;  %v11244_v11 = vld [vmem:[%s15466_s1 + $0xaf4] ss:$8 sps:$4 sm:$0xff]  }
 0x374   : > { %v2400_v7 = vadd.f32 %v14010_v48, %v2399_v19  ;;  %v2401_v47 = vpop.f32.mrb[215].mxu1  ;;  %v15838_v48 = vld [vmem:[#allocation79_spill] sm:$0xff]  ;;  %v11242_v19 = vld [vmem:[%s15466_s1 + $0xaf0] ss:$8 sps:$4 sm:$0xff]  }
 0x375   : > { %7588 = vmatpush1.bf16.msra.mxu0 %v11236_v54  ;;  %v11251_v54 = vld [vmem:[%s15466_s1 + $0x850] ss:$8 sps:$4 sm:$0xff]   ;;  %v11250_v47 = vld [vmem:[%s15466_s1 + $0xb04] ss:$8 sps:$4 sm:$0xff]  }
 0x376   : > { %v14228_v41 = vpack.c.bf16 %v2400_v7, %v2397_v24  ;;  %5888 = vmatmul.mubr.bf16.vlgmr.msra.gmra.mrb[240].mxu1 %v15837_v27  ;;  %7589 = vmatprep.subr.bf16.mxu0 %v11241_v2  ;;  %v11259_v24 = vld [vmem:[%s15466_s1 + $0x864] ss:$8 sps:$4 sm:$0xff]  }
 0x377   : > { %5897 = vmatprep.mubr.bf16.mxu1 %v15838_v48  ;;  %5989 = vmatpush1.bf16.msra.mxu1 %v11245_v40 }
 0x378   : > { %15836 = vst [vmem:[#allocation48_spill] sm:$0xff] %v14228_v41  ;;  %8889 = vmatmul.mubr.msk.bf16.gmra.mrb[132].mxu0 %vm864_vm0, %v14228_v41  ;;  %5990 = vmatprep.subr.bf16.mxu1 %v11253_v39  ;;  %v11257_v41 = vld [vmem:[%s15466_s1 + $0x860] ss:$8 sps:$4 sm:$0xff]  }
 0x379   : > { %v2404_v2 = vpop.f32.mrb[216].mxu1  ;;  %4336 = vmatprep.mubr.bf16.mxu0 %v15739_v15  ;;  %7590 = vmatpush1.bf16.msra.mxu0 %v11239_v21 }
 0x37a   : > { %v2405_v40 = vadd.f32 %v14022_v12, %v2404_v2  ;;  %v2406_v7 = vpop.f32.mrb[217].mxu1  ;;  %7591 = vmatprep.subr.bf16.mxu0 %v11244_v11  ;;  %v11262_v12 = vld [vmem:[%s15466_s1 + $0x874] ss:$8 sps:$4 sm:$0xff]   ;;  %v11248_v11 = vld [vmem:[%s15466_s1 + $0xb00] ss:$8 sps:$4 sm:$0xff]  }
 0x37b   : > { %v2407_v39 = vpop.f32.mrb[218].mxu1  ;;  %5991 = vmatpush1.bf16.msra.mxu1 %v11251_v54  ;;  %v15840_v54 = vld [vmem:[#allocation78_spill] sm:$0xff] }
 0x37c   : > { %v2408_v21 = vadd.f32 %v14030_v46, %v2407_v39  ;;  %v2409_v14 = vpop.f32.mrb[219].mxu1  ;;  %5992 = vmatprep.subr.bf16.mxu1 %v11259_v24  ;;  %v11256_v46 = vld [vmem:[%s15466_s1 + $0xb14] ss:$8 sps:$4 sm:$0xff]   ;;  %v11260_v24 = vld [vmem:[%s15466_s1 + $0x870] ss:$8 sps:$4 sm:$0xff]  }
 0x37d   : > { %7592 = vmatpush1.bf16.msra.mxu0 %v11242_v19  ;;  %v15841_v14 = vld [vmem:[#allocation82_spill] sm:$0xff] }
 0x37e   : > { %v14261_v2 = vpack.c.bf16 %v2408_v21, %v2405_v40  ;;  %5898 = vmatmul.mubr.bf16.gmra.mrb[244].mxu1 %v15840_v54  ;;  %7593 = vmatprep.subr.bf16.mxu0 %v11250_v47  ;;  %v11268_v19 = vld [vmem:[%s15466_s1 + $0x884] ss:$8 sps:$4 sm:$0xff]  }
 0x37f   : > { %5907 = vmatprep.mubr.bf16.mxu1 %v15841_v14  ;;  %5993 = vmatpush1.bf16.msra.mxu1 %v11257_v41  ;;  %v11254_v41 = vld [vmem:[%s15466_s1 + $0xb10] ss:$8 sps:$4 sm:$0xff]   ;;  %v11265_v39 = vld [vmem:[%s15466_s1 + $0xb24] ss:$8 sps:$4 sm:$0xff]  }
 0x380   : > { %15839 = vst [vmem:[#allocation49_spill] sm:$0xff] %v14261_v2  ;;  %8890 = vmatmul.mubr.msk.bf16.gmra.mrb[136].mxu0 %vm864_vm0, %v14261_v2  ;;  %5994 = vmatprep.subr.bf16.mxu1 %v11262_v12  ;;  %v11266_v12 = vld [vmem:[%s15466_s1 + $0x880] ss:$8 sps:$4 sm:$0xff]  }
 0x381   : > { %v2412_v40 = vpop.f32.mrb[220].mxu1  ;;  %4346 = vmatprep.mubr.bf16.mxu0 %v15739_v15  ;;  %7594 = vmatpush1.bf16.msra.mxu0 %v11248_v11 }
 0x382   : > { %v2413_v7 = vadd.f32 %v14042_v51, %v2412_v40  ;;  %v2414_v47 = vpop.f32.mrb[221].mxu1  ;;  %7595 = vmatprep.subr.bf16.mxu0 %v11256_v46  ;;  %v11274_v51 = vld [vmem:[%s15466_s1 + $0x894] ss:$8 sps:$4 sm:$0xff]   ;;  %v11263_v46 = vld [vmem:[%s15466_s1 + $0xb20] ss:$8 sps:$4 sm:$0xff]  }
 0x383   : > { %v2415_v21 = vpop.f32.mrb[222].mxu1  ;;  %5995 = vmatpush1.bf16.msra.mxu1 %v11260_v24  ;;  %v11280_v24 = vld [vmem:[%s15466_s1 + $0x8a4] ss:$8 sps:$4 sm:$0xff]  }
 0x384   : > { %v2416_v11 = vadd.f32 %v14050_v43, %v2415_v21  ;;  %v2417_v2 = vpop.f32.mrb[223].mxu1  ;;  %5996 = vmatprep.subr.bf16.mxu1 %v11268_v19  ;;  %v11271_v43 = vld [vmem:[%s15466_s1 + $0xb34] ss:$8 sps:$4 sm:$0xff]  }
 0x385   : > { %7596 = vmatpush1.bf16.msra.mxu0 %v11254_v41  ;;  %v11272_v2 = vld [vmem:[%s15466_s1 + $0x890] ss:$8 sps:$4 sm:$0xff]  }
 0x386   : > { %v14294_v40 = vpack.c.bf16 %v2416_v11, %v2413_v7  ;;  %5908 = vmatmul.mubr.bf16.gmra.mrb[248].mxu1 %v13337_v59  ;;  %7597 = vmatprep.subr.bf16.mxu0 %v11265_v39  ;;  %v11269_v41 = vld [vmem:[%s15466_s1 + $0xb30] ss:$8 sps:$4 sm:$0xff]   ;;  %v11277_v39 = vld [vmem:[%s15466_s1 + $0xb44] ss:$8 sps:$4 sm:$0xff]  }
 0x387   : > { %5917 = vmatprep.mubr.bf16.mxu1 %v13377_v35  ;;  %5997 = vmatpush1.bf16.msra.mxu1 %v11266_v12  ;;  %v11278_v12 = vld [vmem:[%s15466_s1 + $0x8a0] ss:$8 sps:$4 sm:$0xff]  }
 0x388   : > { %8891 = vmatmul.mubr.msk.bf16.gmra.mrb[140].mxu0 %vm864_vm0, %v14294_v40  ;;  %5998 = vmatprep.subr.bf16.mxu1 %v11274_v51 }
 0x389   : > { %v2420_v19 = vpop.f32.mrb[224].mxu1  ;;  %4356 = vmatprep.mubr.bf16.mxu0 %v15739_v15  ;;  %7598 = vmatpush1.bf16.msra.mxu0 %v11263_v46  ;;  %v11275_v46 = vld [vmem:[%s15466_s1 + $0xb40] ss:$8 sps:$4 sm:$0xff]  }
 0x38a   : > { %v2421_v7 = vadd.f32 %v14062_v18, %v2420_v19  ;;  %v2422_v47 = vpop.f32.mrb[225].mxu1  ;;  %7599 = vmatprep.subr.bf16.mxu0 %v11271_v43  ;;  %v11286_v18 = vld [vmem:[%s15466_s1 + $0x8b4] ss:$8 sps:$4 sm:$0xff]  }
 0x38b   : > { %v2423_v21 = vpop.f32.mrb[226].mxu1  ;;  %5999 = vmatpush1.bf16.msra.mxu1 %v11272_v2  ;;  %v11284_v2 = vld [vmem:[%s15466_s1 + $0x8b0] ss:$8 sps:$4 sm:$0xff]  }
 0x38c   : > { %v2424_v11 = vadd.f32 %v14070_v13, %v2423_v21  ;;  %v2425_v51 = vpop.f32.mrb[227].mxu1  ;;  %6000 = vmatprep.subr.bf16.mxu1 %v11280_v24  ;;  %v11283_v13 = vld [vmem:[%s15466_s1 + $0xb54] ss:$8 sps:$4 sm:$0xff]   ;;  %v11289_v24 = vld [vmem:[%s15466_s1 + $0x8c4] ss:$8 sps:$4 sm:$0xff]  }
 0x38d   : > { %7600 = vmatpush1.bf16.msra.mxu0 %v11269_v41  ;;  %v11281_v41 = vld [vmem:[%s15466_s1 + $0xb50] ss:$8 sps:$4 sm:$0xff]  }
 0x38e   : > { %v14327_v43 = vpack.c.bf16 %v2424_v11, %v2421_v7  ;;  %5918 = vmatmul.mubr.bf16.gmra.mrb[252].mxu1 %v13373_v32  ;;  %7601 = vmatprep.subr.bf16.mxu0 %v11277_v39  ;;  %v11292_v39 = vld [vmem:[%s15466_s1 + $0xb64] ss:$8 sps:$4 sm:$0xff]  }
 0x38f   : > { %5927 = vmatprep.mubr.bf16.mxu1 %v13408_v26  ;;  %6001 = vmatpush1.bf16.msra.mxu1 %v11278_v12  ;;  %v11287_v12 = vld [vmem:[%s15466_s1 + $0x8c0] ss:$8 sps:$4 sm:$0xff]  }
 0x390   : > { %8892 = vmatmul.mubr.msk.bf16.gmra.mrb[144].mxu0 %vm864_vm0, %v14327_v43  ;;  %6002 = vmatprep.subr.bf16.mxu1 %v11286_v18  ;;  %v11290_v18 = vld [vmem:[%s15466_s1 + $0xb60] ss:$8 sps:$4 sm:$0xff]  }
 0x391   : > { %v2428_v19 = vpop.f32.mrb[228].mxu1  ;;  %4366 = vmatprep.mubr.bf16.mxu0 %v15739_v15  ;;  %7602 = vmatpush1.bf16.msra.mxu0 %v11275_v46 }
 0x392   : > { %v2429_v7 = vadd.f32 %v14082_v20, %v2428_v19  ;;  %v2430_v47 = vpop.f32.mrb[229].mxu1  ;;  %7603 = vmatprep.subr.bf16.mxu0 %v11283_v13  ;;  %v11295_v20 = vld [vmem:[%s15466_s1 + $0x8d4] ss:$8 sps:$4 sm:$0xff]   ;;  %v11293_v13 = vld [vmem:[%s15466_s1 + $0x8d0] ss:$8 sps:$4 sm:$0xff]  }
 0x393   : > { %v2431_v21 = vpop.f32.mrb[230].mxu1  ;;  %6003 = vmatpush1.bf16.msra.mxu1 %v11284_v2  ;;  %v11301_v2 = vld [vmem:[%s15466_s1 + $0x8e4] ss:$8 sps:$4 sm:$0xff]   ;;  %v11296_v19 = vld [vmem:[%s15466_s1 + $0xb70] ss:$8 sps:$4 sm:$0xff]  }
 0x394   : > { %v2432_v11 = vadd.f32 %v14090_v16, %v2431_v21  ;;  %v2433_v51 = vpop.f32.mrb[231].mxu1  ;;  %6004 = vmatprep.subr.bf16.mxu1 %v11289_v24  ;;  %v11298_v16 = vld [vmem:[%s15466_s1 + $0xb74] ss:$8 sps:$4 sm:$0xff]   ;;  %v11304_v47 = vld [vmem:[%s15466_s1 + $0xb84] ss:$8 sps:$4 sm:$0xff]  }
 0x395   : > { %7604 = vmatpush1.bf16.msra.mxu0 %v11281_v41  ;;  %v11299_v21 = vld [vmem:[%s15466_s1 + $0x8e0] ss:$8 sps:$4 sm:$0xff]  }
 0x396   : > { %v14360_v46 = vpack.c.bf16 %v2432_v11, %v2429_v7  ;;  %5928 = vmatmul.mubr.bf16.gmra.mrb[0].mxu1 %v13404_v31  ;;  %7605 = vmatprep.subr.bf16.mxu0 %v11292_v39 }
 0x397   : > { %5937 = vmatprep.mubr.bf16.mxu1 %v13439_v60  ;;  %6005 = vmatpush1.bf16.msra.mxu1 %v11287_v12 }
 0x398   : > { %8893 = vmatmul.mubr.msk.bf16.gmra.mrb[148].mxu0 %vm864_vm0, %v14360_v46  ;;  %6006 = vmatprep.subr.bf16.mxu1 %v11295_v20  ;;  %v11305_v20 = vld [vmem:[%s15466_s1 + $0x8f0] ss:$8 sps:$4 sm:$0xff]  }
 0x399   : > { %v2436_v24 = vpop.f32.mrb[232].mxu1  ;;  %4376 = vmatprep.mubr.bf16.mxu0 %v15739_v15  ;;  %7606 = vmatpush1.bf16.msra.mxu0 %v11290_v18 }
 0x39a   : > { %v2437_v41 = vadd.f32 %v14102_v57, %v2436_v24  ;;  %v2438_v7 = vpop.f32.mrb[233].mxu1  ;;  %7607 = vmatprep.subr.bf16.mxu0 %v11298_v16  ;;  %v11307_v57 = vld [vmem:[%s15466_s1 + $0x8f4] ss:$8 sps:$4 sm:$0xff]   ;;  %v11311_v24 = vld [vmem:[%s15466_s1 + $0x900] ss:$8 sps:$4 sm:$0xff]  }
 0x39b   : > { %v2439_v39 = vpop.f32.mrb[234].mxu1  ;;  %6007 = vmatpush1.bf16.msra.mxu1 %v11293_v13  ;;  %v11316_v7 = vld [vmem:[%s15466_s1 + $0x914] ss:$8 sps:$4 sm:$0xff]  }
 0x39c   : > { %v2440_v12 = vadd.f32 %v14110_v61, %v2439_v39  ;;  %v2441_v11 = vpop.f32.mrb[235].mxu1  ;;  %6008 = vmatprep.subr.bf16.mxu1 %v11301_v2  ;;  %v11313_v61 = vld [vmem:[%s15466_s1 + $0x904] ss:$8 sps:$4 sm:$0xff]   ;;  %v11320_v39 = vld [vmem:[%s15466_s1 + $0x920] ss:$8 sps:$4 sm:$0xff]  }
 0x39d   : > { %7608 = vmatpush1.bf16.msra.mxu0 %v11296_v19  ;;  %v11326_v11 = vld [vmem:[%s15466_s1 + $0x930] ss:$8 sps:$4 sm:$0xff]  }
 0x39e   : > { %v14390_v51 = vpack.c.bf16 %v2440_v12, %v2437_v41  ;;  %5938 = vmatmul.mubr.bf16.gmra.mrb[4].mxu1 %v13435_v0  ;;  %7710 = vmatprep.subr.bf16.mxu0 %v11304_v47  ;;  %v11302_v12 = vld [vmem:[%s15466_s1 + $0xb80] ss:$8 sps:$4 sm:$0xff]  }
 0x39f   : > { %5947 = vmatprep.mubr.bf16.mxu1 %v13470_v63  ;;  %6009 = vmatpush1.bf16.msra.mxu1 %v11299_v21  ;;  %v11328_v21 = vld [vmem:[%s15466_s1 + $0x934] ss:$8 sps:$4 sm:$0xff]  }
 0x3a0   : > { %8894 = vmatmul.mubr.msk.bf16.gmra.mrb[152].mxu0 %vm864_vm0, %v14390_v51  ;;  %6010 = vmatprep.subr.bf16.mxu1 %v11307_v57  ;;  %v11343_v57 = vld [vmem:[%s15466_s1 + $0x944] ss:$8 sps:$4 sm:$0xff]  }
 0x3a1   : > { %v2444_v18 = vpop.f32.mrb[236].mxu1  ;;  %4386 = vmatprep.mubr.bf16.mxu0 %v15739_v15 }
 0x3a2   : > { %v2445_v16 = vadd.f32 %v14122_v50, %v2444_v18  ;;  %v2446_v13 = vpop.f32.mrb[237].mxu1  ;;  %v11314_v50 = vld [vmem:[%s15466_s1 + $0x910] ss:$8 sps:$4 sm:$0xff]  }
 0x3a3   : > { %v2447_v2 = vpop.f32.mrb[238].mxu1  ;;  %6011 = vmatpush1.bf16.msra.mxu1 %v11305_v20  ;;  %v11308_v20 = vld [vmem:[%s15466_s1 + $0xb90] ss:$8 sps:$4 sm:$0xff]   ;;  %v11329_v13 = vld [vmem:[%s15466_s1 + $0xbc0] ss:$8 sps:$4 sm:$0xff]  }
 0x3a4   : > { %v2448_v19 = vadd.f32 %v14130_v42, %v2447_v2  ;;  %v2449_v41 = vpop.f32.mrb[239].mxu1  ;;  %6012 = vmatprep.subr.bf16.mxu1 %v11313_v61  ;;  %v11322_v42 = vld [vmem:[%s15466_s1 + $0x924] ss:$8 sps:$4 sm:$0xff]   ;;  %v11323_v18 = vld [vmem:[%s15466_s1 + $0xbb0] ss:$8 sps:$4 sm:$0xff]  }
 0x3a5   : > { %v11319_v61 = vld [vmem:[%s15466_s1 + $0xba4] ss:$8 sps:$4 sm:$0xff]   ;;  %v11347_v41 = vld [vmem:[%s15466_s1 + $0x950] ss:$8 sps:$4 sm:$0xff]  }
 0x3a6   : > { %v14411_v47 = vpack.c.bf16 %v2448_v19, %v2445_v16  ;;  %5948 = vmatmul.mubr.bf16.gmra.mrb[8].mxu1 %v13466_v23  ;;  %v11331_v16 = vld [vmem:[%s15466_s1 + $0xbc4] ss:$8 sps:$4 sm:$0xff]   ;;  %v11340_v19 = vld [vmem:[%s15466_s1 + $0xbf4] ss:$8 sps:$4 sm:$0xff]  }
 0x3a7   : > { %5957 = vmatprep.mubr.bf16.mxu1 %v13501_v34  ;;  %6013 = vmatpush1.bf16.msra.mxu1 %v11311_v24  ;;  %v11337_v2 = vld [vmem:[%s15466_s1 + $0xbe4] ss:$8 sps:$4 sm:$0xff]   ;;  %v11341_v24 = vld [vmem:[%s15466_s1 + $0x940] ss:$8 sps:$4 sm:$0xff]  }
 0x3a8   : > { %8895 = vmatmul.mubr.msk.bf16.gmra.mrb[156].mxu0 %vm864_vm0, %v14411_v47  ;;  %6014 = vmatprep.subr.bf16.mxu1 %v11316_v7  ;;  %v11355_v7 = vld [vmem:[%s15466_s1 + $0x964] ss:$8 sps:$4 sm:$0xff]  }
 0x3a9   : > { %7609 = vmatprep.mubr.bf16.mxu0 %v15774_v56  ;;  %v11310_v56 = vld [vmem:[%s15466_s1 + $0xb94] ss:$8 sps:$4 sm:$0xff]  }
 0x3ab   : > { %6015 = vmatpush1.bf16.msra.mxu1 %v11314_v50  ;;  %v11338_v50 = vld [vmem:[%s15466_s1 + $0xbf0] ss:$8 sps:$4 sm:$0xff]  }
 0x3ac   : > { %6016 = vmatprep.subr.bf16.mxu1 %v11322_v42  ;;  %v11346_v42 = vld [vmem:[%s15466_s1 + $0xc04] ss:$8 sps:$4 sm:$0xff]  }
 0x3ae   : > { %5958 = vmatmul.mubr.bf16.gmra.mrb[12].mxu1 %v13497_v30 }
 0x3af   : > { %5967 = vmatprep.mubr.bf16.mxu1 %v13528_v55  ;;  %6017 = vmatpush1.bf16.msra.mxu1 %v11320_v39  ;;  %v11344_v39 = vld [vmem:[%s15466_s1 + $0xc00] ss:$8 sps:$4 sm:$0xff]  }
 0x3b0   : > { %7610 = vmatmul.mubr.bf16.vlgmr.msra.gmra.mrb[160].mxu0 %v15777_v1  ;;  %6018 = vmatprep.subr.bf16.mxu1 %v11328_v21  ;;  %v11317_v1 = vld [vmem:[%s15466_s1 + $0xba0] ss:$8 sps:$4 sm:$0xff]   ;;  %v11352_v21 = vld [vmem:[%s15466_s1 + $0xc14] ss:$8 sps:$4 sm:$0xff]  }
 0x3b1   : > { %7619 = vmatprep.mubr.bf16.mxu0 %v15778_v62  ;;  %7711 = vmatpush1.bf16.msra.mxu0 %v11302_v12  ;;  %v11325_v62 = vld [vmem:[%s15466_s1 + $0xbb4] ss:$8 sps:$4 sm:$0xff]   ;;  %v11356_v12 = vld [vmem:[%s15466_s1 + $0x970] ss:$8 sps:$4 sm:$0xff]  }
 0x3b2   : > { %7712 = vmatprep.subr.bf16.mxu0 %v11310_v56  ;;  %v11364_v56 = vld [vmem:[%s15466_s1 + $0x984] ss:$8 sps:$4 sm:$0xff]  }
 0x3b3   : > { %6019 = vmatpush1.bf16.msra.mxu1 %v11326_v11  ;;  %v11350_v11 = vld [vmem:[%s15466_s1 + $0xc10] ss:$8 sps:$4 sm:$0xff]  }
 0x3b4   : > { %6121 = vmatprep.subr.bf16.mxu1 %v11343_v57  ;;  %v11361_v57 = vld [vmem:[%s15466_s1 + $0xc24] ss:$8 sps:$4 sm:$0xff]  }
 0x3b5   : > { %7713 = vmatpush1.bf16.msra.mxu0 %v11308_v20  ;;  %v11359_v20 = vld [vmem:[%s15466_s1 + $0xc20] ss:$8 sps:$4 sm:$0xff]  }
 0x3b6   : > { %5968 = vmatmul.mubr.bf16.gmra.mrb[16].mxu1 %v13524_v17  ;;  %7714 = vmatprep.subr.bf16.mxu0 %v11319_v61  ;;  %v11367_v61 = vld [vmem:[%s15466_s1 + $0xc34] ss:$8 sps:$4 sm:$0xff]  }
 0x3b7   : > { %5977 = vmatprep.mubr.bf16.mxu1 %v13550_v28 }
 0x3b8   : > { %7620 = vmatmul.mubr.bf16.gmra.mrb[164].mxu0 %v15781_v4  ;;  %v11334_v4 = vld [vmem:[%s15466_s1 + $0xbd4] ss:$8 sps:$4 sm:$0xff]  }
 0x3b9   : > { %7629 = vmatprep.mubr.bf16.mxu0 %v15782_v52  ;;  %7715 = vmatpush1.bf16.msra.mxu0 %v11317_v1  ;;  %v11332_v52 = vld [vmem:[%s15466_s1 + $0xbd0] ss:$8 sps:$4 sm:$0xff]   ;;  %v15842_v1 = vld [vmem:[#allocation27_spill] sm:$0xff] }
 0x3ba   : > { %7716 = vmatprep.subr.bf16.mxu0 %v11325_v62  ;;  %v11368_v62 = vld [vmem:[%s15466_s1 + $0x990] ss:$8 sps:$4 sm:$0xff]  }
 0x3bd   : > { %7717 = vmatpush1.bf16.msra.mxu0 %v11323_v18  ;;  %v15843_v18 = vld [vmem:[#allocation13_spill] sm:$0xff] }
 0x3be   : > { %5978 = vmatmul.mubr.bf16.gmra.mrb[20].mxu1 %v13546_v44  ;;  %7718 = vmatprep.subr.bf16.mxu0 %v11331_v16  ;;  %v11376_v16 = vld [vmem:[%s15466_s1 + $0x9a4] ss:$8 sps:$4 sm:$0xff]  }
 0x3bf   : > { %6020 = vmatprep.mubr.bf16.mxu1 %v13672_v53 }
 0x3c0   : > { %7630 = vmatmul.mubr.bf16.gmra.mrb[168].mxu0 %v15785_v38  ;;  %v11349_v38 = vld [vmem:[%s15466_s1 + $0x954] ss:$8 sps:$4 sm:$0xff]  }
 0x3c1   : > { %7639 = vmatprep.mubr.bf16.mxu0 %v15786_v5  ;;  %7719 = vmatpush1.bf16.msra.mxu0 %v11329_v13  ;;  %v11335_v5 = vld [vmem:[%s15466_s1 + $0xbe0] ss:$8 sps:$4 sm:$0xff]   ;;  %v15844_v13 = vld [vmem:[#allocation16_spill] sm:$0xff] }
 0x3c2   : > { %7720 = vmatprep.subr.bf16.mxu0 %v11334_v4  ;;  %v11365_v4 = vld [vmem:[%s15466_s1 + $0xc30] ss:$8 sps:$4 sm:$0xff]  }
 0x3c5   : > { %7721 = vmatpush1.bf16.msra.mxu0 %v11332_v52  ;;  %v11373_v52 = vld [vmem:[%s15466_s1 + $0xc44] ss:$8 sps:$4 sm:$0xff]  }
 0x3c6   : > { %6021 = vmatmul.mubr.bf16.vlgmr.msra.gmra.mrb[240].mxu1 %v13667_v36  ;;  %7722 = vmatprep.subr.bf16.mxu0 %v11337_v2  ;;  %v11374_v2 = vld [vmem:[%s15466_s1 + $0x9a0] ss:$8 sps:$4 sm:$0xff]  }
 0x3c7   : > { %6030 = vmatprep.mubr.bf16.mxu1 %v13702_v45  ;;  %6122 = vmatpush1.bf16.msra.mxu1 %v11341_v24  ;;  %v11382_v24 = vld [vmem:[%s15466_s1 + $0x9b4] ss:$8 sps:$4 sm:$0xff]  }
 0x3c8   : > { %7640 = vmatmul.mubr.bf16.gmra.mrb[172].mxu0 %v15789_v49  ;;  %6123 = vmatprep.subr.bf16.mxu1 %v11349_v38  ;;  %v11353_v49 = vld [vmem:[%s15466_s1 + $0x960] ss:$8 sps:$4 sm:$0xff]  }
 0x3c9   : > { %7649 = vmatprep.mubr.bf16.mxu0 %v15790_v37  ;;  %7723 = vmatpush1.bf16.msra.mxu0 %v11335_v5  ;;  %v11358_v37 = vld [vmem:[%s15466_s1 + $0x974] ss:$8 sps:$4 sm:$0xff]   ;;  %v11371_v38 = vld [vmem:[%s15466_s1 + $0xc40] ss:$8 sps:$4 sm:$0xff]  }
 0x3ca   : > { %7724 = vmatprep.subr.bf16.mxu0 %v11340_v19  ;;  %v15845_v5 = vld [vmem:[#allocation8_spill] sm:$0xff] }
 0x3cb   : > { %6124 = vmatpush1.bf16.msra.mxu1 %v11347_v41  ;;  %v11379_v19 = vld [vmem:[%s15466_s1 + $0xc54] ss:$8 sps:$4 sm:$0xff]  }
 0x3cc   : > { %6125 = vmatprep.subr.bf16.mxu1 %v11355_v7  ;;  %v15846_v41 = vld [vmem:[#allocation24_spill] sm:$0xff] }
 0x3cd   : > { %7725 = vmatpush1.bf16.msra.mxu0 %v11338_v50  ;;  %v11380_v7 = vld [vmem:[%s15466_s1 + $0x9b0] ss:$8 sps:$4 sm:$0xff]   ;;  %v15847_v50 = vld [vmem:[#allocation15_spill] sm:$0xff] }
 0x3ce   : > { %6031 = vmatmul.mubr.bf16.gmra.mrb[244].mxu1 %v13700_v9  ;;  %7726 = vmatprep.subr.bf16.mxu0 %v11346_v42  ;;  %v11385_v42 = vld [vmem:[%s15466_s1 + $0x9c4] ss:$8 sps:$4 sm:$0xff]  }
 0x3cf   : > { %6040 = vmatprep.mubr.bf16.mxu1 %v13723_v33  ;;  %6126 = vmatpush1.bf16.msra.mxu1 %v11353_v49  ;;  %v15848_v49 = vld [vmem:[#allocation18_spill] sm:$0xff] }
 0x3d0   : > { %7650 = vmatmul.mubr.bf16.gmra.mrb[176].mxu0 %v15793_v22  ;;  %6127 = vmatprep.subr.bf16.mxu1 %v11358_v37  ;;  %v11362_v22 = vld [vmem:[%s15466_s1 + $0x980] ss:$8 sps:$4 sm:$0xff]   ;;  %v11377_v37 = vld [vmem:[%s15466_s1 + $0xc50] ss:$8 sps:$4 sm:$0xff]  }
 0x3d1   : > { %7659 = vmatprep.mubr.bf16.mxu0 %v15794_v3  ;;  %7727 = vmatpush1.bf16.msra.mxu0 %v11344_v39  ;;  %v11370_v3 = vld [vmem:[%s15466_s1 + $0x994] ss:$8 sps:$4 sm:$0xff]   ;;  %v11388_v39 = vld [vmem:[%s15466_s1 + $0xc64] ss:$8 sps:$4 sm:$0xff]  }
 0x3d2   : > { %7728 = vmatprep.subr.bf16.mxu0 %v11352_v21  ;;  %v11383_v21 = vld [vmem:[%s15466_s1 + $0x9c0] ss:$8 sps:$4 sm:$0xff]  }
 0x3d3   : > { %6128 = vmatpush1.bf16.msra.mxu1 %v11356_v12  ;;  %v11391_v12 = vld [vmem:[%s15466_s1 + $0x9d4] ss:$8 sps:$4 sm:$0xff]  }
 0x3d4   : > { %6129 = vmatprep.subr.bf16.mxu1 %v11364_v56  ;;  %v11386_v56 = vld [vmem:[%s15466_s1 + $0xc60] ss:$8 sps:$4 sm:$0xff]  }
 0x3d5   : > { %7729 = vmatpush1.bf16.msra.mxu0 %v11350_v11  ;;  %v15849_v11 = vld [vmem:[#allocation23_spill] sm:$0xff] }
 0x3d6   : > { %6041 = vmatmul.mubr.bf16.gmra.mrb[248].mxu1 %v13721_v10  ;;  %7730 = vmatprep.subr.bf16.mxu0 %v11361_v57  ;;  %v11394_v57 = vld [vmem:[%s15466_s1 + $0xc74] ss:$8 sps:$4 sm:$0xff]  }
 0x3d7   : > { %6050 = vmatprep.mubr.bf16.mxu1 %v15842_v1  ;;  %6130 = vmatpush1.bf16.msra.mxu1 %v11362_v22  ;;  %v15850_v22 = vld [vmem:[#allocation26_spill] sm:$0xff] }
 0x3d8   : > { %7660 = vmatmul.mubr.bf16.gmra.mrb[180].mxu0 %v15843_v18  ;;  %6131 = vmatprep.subr.bf16.mxu1 %v11370_v3  ;;  %v11389_v3 = vld [vmem:[%s15466_s1 + $0x9d0] ss:$8 sps:$4 sm:$0xff]  }
 0x3d9   : > { %7669 = vmatprep.mubr.bf16.mxu0 %v15844_v13  ;;  %7731 = vmatpush1.bf16.msra.mxu0 %v11359_v20  ;;  %v15851_v20 = vld [vmem:[#allocation17_spill] sm:$0xff]  ;;  %v11395_v13 = vld [vmem:[%s15466_s1 + $0x9e0] ss:$8 sps:$4 sm:$0xff]  }
 0x3da   : > { %7732 = vmatprep.subr.bf16.mxu0 %v11367_v61  ;;  %v11397_v61 = vld [vmem:[%s15466_s1 + $0x9e4] ss:$8 sps:$4 sm:$0xff]   ;;  %v11392_v18 = vld [vmem:[%s15466_s1 + $0xc70] ss:$8 sps:$4 sm:$0xff]  }
 0x3db   : > { %6132 = vmatpush1.bf16.msra.mxu1 %v11368_v62  ;;  %v15852_v62 = vld [vmem:[#allocation20_spill] sm:$0xff] }
 0x3dc   : > { %6133 = vmatprep.subr.bf16.mxu1 %v11376_v16  ;;  %v11400_v16 = vld [vmem:[%s15466_s1 + $0xc84] ss:$8 sps:$4 sm:$0xff]  }
 0x3dd   : > { %7733 = vmatpush1.bf16.msra.mxu0 %v11365_v4  ;;  %v11403_v4 = vld [vmem:[%s15466_s1 + $0x9f4] ss:$8 sps:$4 sm:$0xff]  }
 0x3de   : > { %6051 = vmatmul.mubr.bf16.gmra.mrb[252].mxu1 %v15845_v5  ;;  %7734 = vmatprep.subr.bf16.mxu0 %v11373_v52  ;;  %v15853_v52 = vld [vmem:[#allocation25_spill] sm:$0xff] }
 0x3df   : > { %6060 = vmatprep.mubr.bf16.mxu1 %v15846_v41  ;;  %6134 = vmatpush1.bf16.msra.mxu1 %v11374_v2  ;;  %v15854_v2 = vld [vmem:[#allocation29_spill] sm:$0xff] }
 0x3e0   : > { %7670 = vmatmul.mubr.bf16.gmra.mrb[184].mxu0 %v15847_v50  ;;  %6135 = vmatprep.subr.bf16.mxu1 %v11382_v24  ;;  %v11401_v24 = vld [vmem:[%s15466_s1 + $0x9f0] ss:$8 sps:$4 sm:$0xff]   ;;  %v11407_v50 = vld [vmem:[%s15466_s1 + $0xa00] ss:$8 sps:$4 sm:$0xff]  }
 0x3e1   : > { %7679 = vmatprep.mubr.bf16.mxu0 %v15848_v49  ;;  %7735 = vmatpush1.bf16.msra.mxu0 %v11371_v38  ;;  %v15855_v38 = vld [vmem:[#allocation19_spill] sm:$0xff]  ;;  %v15857_v49 = vld [vmem:[#allocation28_spill] sm:$0xff] }
 0x3e2   : > { %7736 = vmatprep.subr.bf16.mxu0 %v11379_v19  ;;  %v11409_v19 = vld [vmem:[%s15466_s1 + $0xa04] ss:$8 sps:$4 sm:$0xff]  }
 0x3e3   : > { %6136 = vmatpush1.bf16.msra.mxu1 %v11380_v7  ;;  %v15856_v7 = vld [vmem:[#allocation22_spill] sm:$0xff] }
 0x3e4   : > { %6137 = vmatprep.subr.bf16.mxu1 %v11385_v42  ;;  %v11412_v42 = vld [vmem:[%s15466_s1 + $0xa14] ss:$8 sps:$4 sm:$0xff]  }
 0x3e5   : > { %7737 = vmatpush1.bf16.msra.mxu0 %v11377_v37  ;;  %v15858_v37 = vld [vmem:[#allocation33_spill] sm:$0xff] }
 0x3e6   : > { %6061 = vmatmul.mubr.bf16.gmra.mrb[0].mxu1 %v15849_v11  ;;  %7738 = vmatprep.subr.bf16.mxu0 %v11388_v39  ;;  %v11410_v39 = vld [vmem:[%s15466_s1 + $0xa10] ss:$8 sps:$4 sm:$0xff]  }
 0x3e7   : > { %6070 = vmatprep.mubr.bf16.mxu1 %v15850_v22  ;;  %6138 = vmatpush1.bf16.msra.mxu1 %v11383_v21  ;;  %v15859_v21 = vld [vmem:[#allocation21_spill] sm:$0xff] }
 0x3e8   : > { %7680 = vmatmul.mubr.bf16.gmra.mrb[188].mxu0 %v15851_v20  ;;  %6139 = vmatprep.subr.bf16.mxu1 %v11391_v12  ;;  %v11418_v12 = vld [vmem:[%s15466_s1 + $0xa24] ss:$8 sps:$4 sm:$0xff]   ;;  %v11398_v20 = vld [vmem:[%s15466_s1 + $0xc80] ss:$8 sps:$4 sm:$0xff]  }
 0x3e9   : > { %7689 = vmatprep.mubr.bf16.mxu0 %v15852_v62  ;;  %7739 = vmatpush1.bf16.msra.mxu0 %v11386_v56  ;;  %v15860_v56 = vld [vmem:[#allocation31_spill] sm:$0xff]  ;;  %v11406_v62 = vld [vmem:[%s15466_s1 + $0xc94] ss:$8 sps:$4 sm:$0xff]  }
 0x3ea   : > { %7740 = vmatprep.subr.bf16.mxu0 %v11394_v57  ;;  %v11416_v57 = vld [vmem:[%s15466_s1 + $0xa20] ss:$8 sps:$4 sm:$0xff]  }
 0x3eb   : > { %6140 = vmatpush1.bf16.msra.mxu1 %v11389_v3  ;;  %v11424_v3 = vld [vmem:[%s15466_s1 + $0xa34] ss:$8 sps:$4 sm:$0xff]  }
 0x3ec   : > { %6141 = vmatprep.subr.bf16.mxu1 %v11397_v61  ;;  %v15861_v61 = vld [vmem:[#allocation32_spill] sm:$0xff] }
 0x3ed   : > { %7741 = vmatpush1.bf16.msra.mxu0 %v11392_v18  ;;  %v15862_v18 = vld [vmem:[#allocation37_spill] sm:$0xff] }
 0x3ee   : > { %6071 = vmatmul.mubr.bf16.gmra.mrb[4].mxu1 %v15853_v52  ;;  %7843 = vmatprep.subr.bf16.mxu0 %v11400_v16  ;;  %v11422_v16 = vld [vmem:[%s15466_s1 + $0xa30] ss:$8 sps:$4 sm:$0xff]  }
 0x3ef   : > { %6080 = vmatprep.mubr.bf16.mxu1 %v15854_v2  ;;  %6142 = vmatpush1.bf16.msra.mxu1 %v11395_v13  ;;  %v15863_v13 = vld [vmem:[#allocation30_spill] sm:$0xff] }
 0x3f0   : > { %7690 = vmatmul.mubr.bf16.gmra.mrb[192].mxu0 %v15855_v38  ;;  %6143 = vmatprep.subr.bf16.mxu1 %v11403_v4  ;;  %v11469_v4 = vld [vmem:[%s15466_s1 + $0xa44] ss:$8 sps:$4 sm:$0xff]   ;;  %v11404_v38 = vld [vmem:[%s15466_s1 + $0xc90] ss:$8 sps:$4 sm:$0xff]  }
 0x3f1   : > { %7699 = vmatprep.mubr.bf16.mxu0 %v15856_v7  ;;  %v11413_v7 = vld [vmem:[%s15466_s1 + $0xca0] ss:$8 sps:$4 sm:$0xff]  }
 0x3f3   : > { %6144 = vmatpush1.bf16.msra.mxu1 %v11401_v24  ;;  %v15864_v24 = vld [vmem:[#allocation35_spill] sm:$0xff] }
 0x3f4   : > { %6145 = vmatprep.subr.bf16.mxu1 %v11409_v19  ;;  %v11415_v19 = vld [vmem:[%s15466_s1 + $0xca4] ss:$8 sps:$4 sm:$0xff]  }
 0x3f6   : > { %6081 = vmatmul.mubr.bf16.gmra.mrb[8].mxu1 %v15857_v49 }
 0x3f7   : > { %6090 = vmatprep.mubr.bf16.mxu1 %v15858_v37  ;;  %6146 = vmatpush1.bf16.msra.mxu1 %v11407_v50  ;;  %v15865_v50 = vld [vmem:[#allocation36_spill] sm:$0xff] }
 0x3f8   : > { %7700 = vmatmul.mubr.bf16.gmra.mrb[196].mxu0 %v15859_v21  ;;  %6147 = vmatprep.subr.bf16.mxu1 %v11412_v42  ;;  %v11421_v42 = vld [vmem:[%s15466_s1 + $0xcb4] ss:$8 sps:$4 sm:$0xff]   ;;  %v15867_v21 = vld [vmem:[#allocation34_spill] sm:$0xff] }
 0x3f9   : > { %7742 = vmatprep.mubr.bf16.mxu0 %v15860_v56  ;;  %v11419_v56 = vld [vmem:[%s15466_s1 + $0xcb0] ss:$8 sps:$4 sm:$0xff]  }
 0x3fb   : > { %6148 = vmatpush1.bf16.msra.mxu1 %v11410_v39  ;;  %v15866_v39 = vld [vmem:[#allocation41_spill] sm:$0xff] }
 0x3fc   : > { %6149 = vmatprep.subr.bf16.mxu1 %v11418_v12  ;;  %v15868_v12 = vld [vmem:[#allocation39_spill] sm:$0xff] }
 0x3fe   : > { %6091 = vmatmul.mubr.bf16.gmra.mrb[12].mxu1 %v15861_v61 }
 0x3ff   : > { %6100 = vmatprep.mubr.bf16.mxu1 %v15862_v18  ;;  %6150 = vmatpush1.bf16.msra.mxu1 %v11416_v57  ;;  %v11427_v57 = vld [vmem:[%s15466_s1 + $0xcc4] ss:$8 sps:$4 sm:$0xff]  }
 0x400   : > { %7743 = vmatmul.mubr.bf16.vlgmr.msra.gmra.mrb[160].mxu0 %v15863_v13  ;;  %6151 = vmatprep.subr.bf16.mxu1 %v11424_v3  ;;  %v11425_v3 = vld [vmem:[%s15466_s1 + $0xcc0] ss:$8 sps:$4 sm:$0xff]  }
 0x401   : > { %7752 = vmatprep.mubr.bf16.mxu0 %v15864_v24  ;;  %7844 = vmatpush1.bf16.msra.mxu0 %v11398_v20  ;;  %v15869_v20 = vld [vmem:[#allocation40_spill] sm:$0xff]  ;;  %v15871_v13 = vld [vmem:[#allocation38_spill] sm:$0xff] }
 0x402   : > { %7845 = vmatprep.subr.bf16.mxu0 %v11406_v62  ;;  %v11430_v62 = vld [vmem:[%s15466_s1 + $0xcd4] ss:$8 sps:$4 sm:$0xff]   ;;  %v11428_v24 = vld [vmem:[%s15466_s1 + $0xcd0] ss:$8 sps:$4 sm:$0xff]  }
 0x403   : > { %6152 = vmatpush1.bf16.msra.mxu1 %v11422_v16  ;;  %v15870_v16 = vld [vmem:[#allocation63_spill] sm:$0xff] }
 0x404   : > { %6254 = vmatprep.subr.bf16.mxu1 %v11469_v4  ;;  %v15872_v4 = vld [vmem:[#allocation43_spill] sm:$0xff] }
 0x405   : > { %7846 = vmatpush1.bf16.msra.mxu0 %v11404_v38  ;;  %v11433_v38 = vld [vmem:[%s15466_s1 + $0xce4] ss:$8 sps:$4 sm:$0xff]  }
 0x406   : > { %6101 = vmatmul.mubr.bf16.gmra.mrb[16].mxu1 %v15865_v50  ;;  %7847 = vmatprep.subr.bf16.mxu0 %v11415_v19  ;;  %v11467_v19 = vld [vmem:[%s15466_s1 + $0xa40] ss:$8 sps:$4 sm:$0xff]  }
 0x407   : > { %6110 = vmatprep.mubr.bf16.mxu1 %v15866_v39 }
 0x408   : > { %7753 = vmatmul.mubr.bf16.gmra.mrb[164].mxu0 %v15867_v21  ;;  %v15873_v21 = vld [vmem:[#allocation61_spill] sm:$0xff] }
 0x409   : > { %7762 = vmatprep.mubr.bf16.mxu0 %v15868_v12  ;;  %7848 = vmatpush1.bf16.msra.mxu0 %v11413_v7  ;;  %v11472_v7 = vld [vmem:[%s15466_s1 + $0xa54] ss:$8 sps:$4 sm:$0xff]  }
 0x40a   : > { %7849 = vmatprep.subr.bf16.mxu0 %v11421_v42  ;;  %v11431_v42 = vld [vmem:[%s15466_s1 + $0xce0] ss:$8 sps:$4 sm:$0xff]   ;;  %v11436_v12 = vld [vmem:[%s15466_s1 + $0xcf4] ss:$8 sps:$4 sm:$0xff]  }
 0x40d   : > { %7850 = vmatpush1.bf16.msra.mxu0 %v11419_v56  ;;  %v15874_v56 = vld [vmem:[#allocation69_spill] sm:$0xff] }
 0x40e   : > { %6111 = vmatmul.mubr.bf16.gmra.mrb[20].mxu1 %v15869_v20  ;;  %7851 = vmatprep.subr.bf16.mxu0 %v11427_v57  ;;  %v11470_v57 = vld [vmem:[%s15466_s1 + $0xa50] ss:$8 sps:$4 sm:$0xff]  }
 0x40f   : > { %6153 = vmatprep.mubr.bf16.mxu1 %v15870_v16  ;;  %v15892_v16 = vld [vmem:[#allocation84_spill] sm:$0xff] }
 0x410   : > { %7763 = vmatmul.mubr.bf16.gmra.mrb[168].mxu0 %v15871_v13  ;;  %v15876_v13 = vld [vmem:[#allocation47_spill] sm:$0xff]  ;;  %v15893_v20 = vld [vmem:[#allocation56_spill] sm:$0xff] }
 0x411   : > { %7772 = vmatprep.mubr.bf16.mxu0 %v15872_v4  ;;  %7852 = vmatpush1.bf16.msra.mxu0 %v11425_v3  ;;  %v15875_v3 = vld [vmem:[#allocation42_spill] sm:$0xff]  ;;  %v11434_v4 = vld [vmem:[%s15466_s1 + $0xcf0] ss:$8 sps:$4 sm:$0xff]  }
 0x412   : > { %7853 = vmatprep.subr.bf16.mxu0 %v11430_v62  ;;  %v11478_v62 = vld [vmem:[%s15466_s1 + $0xa64] ss:$8 sps:$4 sm:$0xff]  }
 0x415   : > { %7854 = vmatpush1.bf16.msra.mxu0 %v11428_v24  ;;  %v11439_v24 = vld [vmem:[%s15466_s1 + $0xd04] ss:$8 sps:$4 sm:$0xff]  }
 0x416   : > { %6154 = vmatmul.mubr.bf16.vlgmr.msra.gmra.mrb[240].mxu1 %v15873_v21  ;;  %7855 = vmatprep.subr.bf16.mxu0 %v11433_v38  ;;  %v11476_v38 = vld [vmem:[%s15466_s1 + $0xa60] ss:$8 sps:$4 sm:$0xff]  }
 0x417   : > { %6163 = vmatprep.mubr.bf16.mxu1 %v15874_v56  ;;  %6255 = vmatpush1.bf16.msra.mxu1 %v11467_v19  ;;  %v11484_v19 = vld [vmem:[%s15466_s1 + $0xa74] ss:$8 sps:$4 sm:$0xff]  }
 0x418   : > { %7773 = vmatmul.mubr.bf16.gmra.mrb[172].mxu0 %v15875_v3  ;;  %6256 = vmatprep.subr.bf16.mxu1 %v11472_v7  ;;  %v11437_v7 = vld [vmem:[%s15466_s1 + $0xd00] ss:$8 sps:$4 sm:$0xff]   ;;  %v11482_v3 = vld [vmem:[%s15466_s1 + $0xa70] ss:$8 sps:$4 sm:$0xff]  }
 0x419   : > { %7782 = vmatprep.mubr.bf16.mxu0 %v15876_v13  ;;  %7856 = vmatpush1.bf16.msra.mxu0 %v11431_v42  ;;  %v15877_v42 = vld [vmem:[#allocation67_spill] sm:$0xff] }
 0x41a   : > { %7857 = vmatprep.subr.bf16.mxu0 %v11436_v12  ;;  %v11442_v12 = vld [vmem:[%s15466_s1 + $0xd14] ss:$8 sps:$4 sm:$0xff]   ;;  %v15880_v13 = vld [vmem:[#allocation51_spill] sm:$0xff] }
 0x41b   : > { %6257 = vmatpush1.bf16.msra.mxu1 %v11470_v57  ;;  %v15878_v57 = vld [vmem:[#allocation73_spill] sm:$0xff] }
 0x41c   : > { %6258 = vmatprep.subr.bf16.mxu1 %v11478_v62  ;;  %v15879_v62 = vld [vmem:[#allocation46_spill] sm:$0xff] }
 0x41d   : > { %7858 = vmatpush1.bf16.msra.mxu0 %v11434_v4  ;;  %v11440_v4 = vld [vmem:[%s15466_s1 + $0xd10] ss:$8 sps:$4 sm:$0xff]  }
 0x41e   : > { %6164 = vmatmul.mubr.bf16.gmra.mrb[244].mxu1 %v15877_v42  ;;  %7859 = vmatprep.subr.bf16.mxu0 %v11439_v24  ;;  %v11445_v24 = vld [vmem:[%s15466_s1 + $0xd24] ss:$8 sps:$4 sm:$0xff]  }
 0x41f   : > { %6173 = vmatprep.mubr.bf16.mxu1 %v15878_v57  ;;  %6259 = vmatpush1.bf16.msra.mxu1 %v11476_v38  ;;  %v14772_v38 = vld [vmem:[%s15466_s1 + $0xf84] ss:$8 sps:$4 sm:$0xff]  }
 0x420   : > { %7783 = vmatmul.mubr.bf16.gmra.mrb[176].mxu0 %v15879_v62  ;;  %6260 = vmatprep.subr.bf16.mxu1 %v11484_v19  ;;  %v11443_v19 = vld [vmem:[%s15466_s1 + $0xd20] ss:$8 sps:$4 sm:$0xff]   ;;  %v15882_v62 = vld [vmem:[#allocation77_spill] sm:$0xff] }
 0x421   : > { %7792 = vmatprep.mubr.bf16.mxu0 %v15880_v13  ;;  %7860 = vmatpush1.bf16.msra.mxu0 %v11437_v7  ;;  %v15881_v7 = vld [vmem:[#allocation72_spill] sm:$0xff]  ;;  %v15884_v13 = vld [vmem:[#allocation54_spill] sm:$0xff] }
 0x422   : > { %7861 = vmatprep.subr.bf16.mxu0 %v11442_v12  ;;  %v11448_v12 = vld [vmem:[%s15466_s1 + $0xd34] ss:$8 sps:$4 sm:$0xff]  }
 0x423   : > { %6261 = vmatpush1.bf16.msra.mxu1 %v11482_v3  ;;  %v15883_v3 = vld [vmem:[#allocation50_spill] sm:$0xff] }
 0x424   : > { %9946 = vmatprep.subr.bf16.mxu1 %v14772_v38 }
 0x425   : > { %7862 = vmatpush1.bf16.msra.mxu0 %v11440_v4  ;;  %v11446_v4 = vld [vmem:[%s15466_s1 + $0xd30] ss:$8 sps:$4 sm:$0xff]  }
 0x426   : > { %6174 = vmatmul.mubr.bf16.gmra.mrb[248].mxu1 %v15881_v7  ;;  %7863 = vmatprep.subr.bf16.mxu0 %v11445_v24  ;;  %v11451_v24 = vld [vmem:[%s15466_s1 + $0xd44] ss:$8 sps:$4 sm:$0xff]   ;;  %v15885_v7 = vld [vmem:[#allocation76_spill] sm:$0xff] }
 0x427   : > { %6183 = vmatprep.mubr.bf16.mxu1 %v15882_v62  ;;  %v11449_v62 = vld [vmem:[%s15466_s1 + $0xd40] ss:$8 sps:$4 sm:$0xff]  }
 0x428   : > { %7793 = vmatmul.mubr.bf16.gmra.mrb[180].mxu0 %v15883_v3  ;;  %v15886_v3 = vld [vmem:[#allocation81_spill] sm:$0xff] }
 0x429   : > { %7802 = vmatprep.mubr.bf16.mxu0 %v15884_v13  ;;  %7864 = vmatpush1.bf16.msra.mxu0 %v11443_v19  ;;  %v11454_v19 = vld [vmem:[%s15466_s1 + $0xd54] ss:$8 sps:$4 sm:$0xff]  }
 0x42a   : > { %7865 = vmatprep.subr.bf16.mxu0 %v11448_v12  ;;  %v15887_v13 = vld [vmem:[#allocation53_spill] sm:$0xff] }
 0x42b   : > { %v15888_v12 = vld [vmem:[#allocation57_spill] sm:$0xff] }
 0x42d   : > { %7866 = vmatpush1.bf16.msra.mxu0 %v11446_v4  ;;  %v11452_v4 = vld [vmem:[%s15466_s1 + $0xd50] ss:$8 sps:$4 sm:$0xff]  }
 0x42e   : > { %6184 = vmatmul.mubr.bf16.gmra.mrb[252].mxu1 %v15885_v7  ;;  %7867 = vmatprep.subr.bf16.mxu0 %v11451_v24  ;;  %v11457_v24 = vld [vmem:[%s15466_s1 + $0xd64] ss:$8 sps:$4 sm:$0xff]  }
 0x42f   : > { %6193 = vmatprep.mubr.bf16.mxu1 %v15886_v3 }
 0x430   : > { %7803 = vmatmul.mubr.bf16.gmra.mrb[184].mxu0 %v15887_v13 }
 0x431   : > { %7812 = vmatprep.mubr.bf16.mxu0 %v15888_v12  ;;  %7868 = vmatpush1.bf16.msra.mxu0 %v11449_v62  ;;  %v11455_v62 = vld [vmem:[%s15466_s1 + $0xd60] ss:$8 sps:$4 sm:$0xff]  }
 0x432   : > { %7869 = vmatprep.subr.bf16.mxu0 %v11454_v19 }
 0x433   : > { %v4298_v7 = vpop.f32.mrb[120].mxu0 }
 0x434   : > { %v8896_v57 = vadd.f32 -1.0, %v4298_v7  ;;  %v4300_v3 = vpop.f32.mrb[121].mxu0 }
 0x435   : > { %v8897_v42 = vadd.f32 -1.0, %v4300_v3  ;;  %v4302_v13 = vpop.f32.mrb[122].mxu0  ;;  %7870 = vmatpush1.bf16.msra.mxu0 %v11452_v4  ;;  %v15891_v3 = vld [vmem:[#allocation80_spill] sm:$0xff] }
 0x436   : > { %v8898_v12 = vadd.f32 -1.0, %v4302_v13  ;;  %v4304_v7 = vpop.f32.mrb[123].mxu0  ;;  %6194 = vmatmul.mubr.bf16.gmra.mrb[0].mxu1 %v15891_v3  ;;  %7871 = vmatprep.subr.bf16.mxu0 %v11457_v24  ;;  %v11460_v4 = vld [vmem:[%s15466_s1 + $0xd74] ss:$8 sps:$4 sm:$0xff]   ;;  %v15894_v13 = vld [vmem:[#allocation62_spill] sm:$0xff] }
 0x437   : > { %v9810_v56 = vpack.c.bf16 %v8897_v42, %v8896_v57  ;;  %v8899_v21 = vadd.f32 -1.0, %v4304_v7  ;;  %6203 = vmatprep.mubr.bf16.mxu1 %v15892_v16  ;;  %v11458_v24 = vld [vmem:[%s15466_s1 + $0xd70] ss:$8 sps:$4 sm:$0xff]   ;;  %v11463_v42 = vld [vmem:[%s15466_s1 + $0xd84] ss:$8 sps:$4 sm:$0xff]  }
 0x438   : > { %7813 = vmatmul.mubr.bf16.gmra.mrb[188].mxu0 %v15893_v20  ;;  %v15896_v3 = vld [vmem:[#allocation86_spill] sm:$0xff] }
 0x439   : > { %4560 = vst.msk [vmem:[%s14814_s13] sm:$0xff] %vm14816_vm3, %v9810_v56  ;;  %v9811_v39 = vpack.c.bf16 %v8899_v21, %v8898_v12  ;;  %7822 = vmatprep.mubr.bf16.mxu0 %v15894_v13  ;;  %7872 = vmatpush1.bf16.msra.mxu0 %v11455_v62  ;;  %v15895_v13 = vld [vmem:[#allocation83_spill] sm:$0xff] }
 0x43a   : > { %7873 = vmatprep.subr.bf16.mxu0 %v11460_v4 }
 0x43b   : > { %4561 = vst.msk [vmem:[%s14814_s13 + $0x8] sm:$0xff] %vm14816_vm3, %v9811_v39  ;;  %v4308_v20 = vpop.f32.mrb[124].mxu0 }
 0x43c   : > { %v8900_v57 = vadd.f32 -1.0, %v4308_v20  ;;  %v4310_v21 = vpop.f32.mrb[125].mxu0 }
 0x43d   : > { %v8901_v56 = vadd.f32 -1.0, %v4310_v21  ;;  %v4312_v12 = vpop.f32.mrb[126].mxu0  ;;  %7874 = vmatpush1.bf16.msra.mxu0 %v11458_v24 }
 0x43e   : > { %v8902_v62 = vadd.f32 -1.0, %v4312_v12  ;;  %v4314_v7 = vpop.f32.mrb[127].mxu0  ;;  %6204 = vmatmul.mubr.bf16.gmra.mrb[4].mxu1 %v15895_v13  ;;  %7976 = vmatprep.subr.bf16.mxu0 %v11463_v42 }
 0x43f   : > { %v9812_v4 = vpack.c.bf16 %v8901_v56, %v8900_v57  ;;  %v8903_v16 = vadd.f32 -1.0, %v4314_v7  ;;  %6213 = vmatprep.mubr.bf16.mxu1 %v15896_v3  ;;  %v15897_v7 = vld [vmem:[#allocation85_spill] sm:$0xff] }
 0x440   : > { %7823 = vmatmul.mubr.bf16.gmra.mrb[192].mxu0 %v15831_v6 }
 0x441   : > { %4562 = vst.msk [vmem:[%s14814_s13 + $0x10] sm:$0xff] %vm14816_vm3, %v9812_v4  ;;  %v9813_v39 = vpack.c.bf16 %v8903_v16, %v8902_v62  ;;  %7832 = vmatprep.mubr.bf16.mxu0 %v15832_v58  ;;  %v15898_v4 = vld [vmem:[#allocation88_spill] sm:$0xff] }
 0x443   : > { %4563 = vst.msk [vmem:[%s14814_s13 + $0x18] sm:$0xff] %vm14816_vm3, %v9813_v39  ;;  %v4318_v24 = vpop.f32.mrb[128].mxu0 }
 0x444   : > { %v8904_v20 = vadd.f32 -1.0, %v4318_v24  ;;  %v4320_v42 = vpop.f32.mrb[129].mxu0 }
 0x445   : > { %v8905_v57 = vadd.f32 -1.0, %v4320_v42  ;;  %v4322_v21 = vpop.f32.mrb[130].mxu0  ;;  %v11461_v42 = vld [vmem:[%s15466_s1 + $0xd80] ss:$8 sps:$4 sm:$0xff]  }
 0x446   : > { %v8906_v56 = vadd.f32 -1.0, %v4322_v21  ;;  %v4324_v12 = vpop.f32.mrb[131].mxu0  ;;  %6214 = vmatmul.mubr.bf16.gmra.mrb[8].mxu1 %v15897_v7  ;;  %v15899_v21 = vld [vmem:[#allocation87_spill] sm:$0xff] }
 0x447   : > { %v9814_v6 = vpack.c.bf16 %v8905_v57, %v8904_v20  ;;  %v8907_v3 = vadd.f32 -1.0, %v4324_v12  ;;  %6223 = vmatprep.mubr.bf16.mxu1 %v15898_v4  ;;  %v15900_v12 = vld [vmem:[#allocation90_spill] sm:$0xff] }
 0x448   : > { %7833 = vmatmul.mubr.bf16.gmra.mrb[196].mxu0 %v15834_v25 }
 0x449   : > { %4564 = vst.msk [vmem:[%s14814_s13 + $0x20] sm:$0xff] %vm14816_vm3, %v9814_v6  ;;  %v9815_v58 = vpack.c.bf16 %v8907_v3, %v8906_v56  ;;  %7875 = vmatprep.mubr.bf16.mxu0 %v15835_v29  ;;  %v11466_v29 = vld [vmem:[%s15466_s1 + $0xd94] ss:$8 sps:$4 sm:$0xff]  }
 0x44b   : > { %4565 = vst.msk [vmem:[%s14814_s13 + $0x28] sm:$0xff] %vm14816_vm3, %v9815_v58  ;;  %v4328_v16 = vpop.f32.mrb[132].mxu0  ;;  %v11464_v58 = vld [vmem:[%s15466_s1 + $0xd90] ss:$8 sps:$4 sm:$0xff]  }
 0x44c   : > { %v8908_v62 = vadd.f32 -1.0, %v4328_v16  ;;  %v4330_v39 = vpop.f32.mrb[133].mxu0  ;;  %v11475_v16 = vld [vmem:[%s15466_s1 + $0xda4] ss:$8 sps:$4 sm:$0xff]  }
 0x44d   : > { %v8909_v24 = vadd.f32 -1.0, %v4330_v39  ;;  %v4332_v20 = vpop.f32.mrb[134].mxu0 }
 0x44e   : > { %v8910_v25 = vadd.f32 -1.0, %v4332_v20  ;;  %v4334_v57 = vpop.f32.mrb[135].mxu0  ;;  %6224 = vmatmul.mubr.bf16.gmra.mrb[12].mxu1 %v15899_v21 }
 0x44f   : > { %v9816_v3 = vpack.c.bf16 %v8909_v24, %v8908_v62  ;;  %v8911_v56 = vadd.f32 -1.0, %v4334_v57  ;;  %6233 = vmatprep.mubr.bf16.mxu1 %v15900_v12  ;;  %v15901_v57 = vld [vmem:[#allocation89_spill] sm:$0xff] }
 0x450   : > { %7876 = vmatmul.mubr.bf16.vlgmr.msra.gmra.mrb[160].mxu0 %v15837_v27 }
 0x451   : > { %4566 = vst.msk [vmem:[%s14814_s13 + $0x30] sm:$0xff] %vm14816_vm3, %v9816_v3  ;;  %v9817_v6 = vpack.c.bf16 %v8911_v56, %v8910_v25  ;;  %7885 = vmatprep.mubr.bf16.mxu0 %v15838_v48  ;;  %7977 = vmatpush1.bf16.msra.mxu0 %v11461_v42  ;;  %v11473_v48 = vld [vmem:[%s15466_s1 + $0xda0] ss:$8 sps:$4 sm:$0xff]  }
 0x452   : > { %7978 = vmatprep.subr.bf16.mxu0 %v11466_v29  ;;  %v11481_v29 = vld [vmem:[%s15466_s1 + $0xdb4] ss:$8 sps:$4 sm:$0xff]  }
 0x453   : > { %4567 = vst.msk [vmem:[%s14814_s13 + $0x38] sm:$0xff] %vm14816_vm3, %v9817_v6  ;;  %v4338_v27 = vpop.f32.mrb[136].mxu0  ;;  %v15902_v6 = vld [vmem:[#allocation92_spill] sm:$0xff] }
 0x454   : > { %v8912_v62 = vadd.f32 -1.0, %v4338_v27  ;;  %v4340_v39 = vpop.f32.mrb[137].mxu0  ;;  %v11487_v27 = vld [vmem:[%s15466_s1 + $0xdc4] ss:$8 sps:$4 sm:$0xff]  }
 0x455   : > { %v8913_v24 = vadd.f32 -1.0, %v4340_v39  ;;  %v4342_v20 = vpop.f32.mrb[138].mxu0  ;;  %7979 = vmatpush1.bf16.msra.mxu0 %v11464_v58 }
 0x456   : > { %v8914_v42 = vadd.f32 -1.0, %v4342_v20  ;;  %v4344_v25 = vpop.f32.mrb[139].mxu0  ;;  %6234 = vmatmul.mubr.bf16.gmra.mrb[16].mxu1 %v15901_v57  ;;  %7980 = vmatprep.subr.bf16.mxu0 %v11475_v16  ;;  %v11479_v16 = vld [vmem:[%s15466_s1 + $0xdb0] ss:$8 sps:$4 sm:$0xff]  }
 0x457   : > { %v9818_v3 = vpack.c.bf16 %v8913_v24, %v8912_v62  ;;  %v8915_v56 = vadd.f32 -1.0, %v4344_v25  ;;  %6243 = vmatprep.mubr.bf16.mxu1 %v15902_v6  ;;  %v15903_v25 = vld [vmem:[#allocation91_spill] sm:$0xff] }
 0x458   : > { %7886 = vmatmul.mubr.bf16.gmra.mrb[164].mxu0 %v15840_v54 }
 0x459   : > { %4568 = vst.msk [vmem:[%s14814_s13 + $0x40] sm:$0xff] %vm14816_vm3, %v9818_v3  ;;  %v9819_v58 = vpack.c.bf16 %v8915_v56, %v8914_v42  ;;  %7895 = vmatprep.mubr.bf16.mxu0 %v15841_v14  ;;  %7981 = vmatpush1.bf16.msra.mxu0 %v11473_v48  ;;  %v11485_v14 = vld [vmem:[%s15466_s1 + $0xdc0] ss:$8 sps:$4 sm:$0xff]  }
 0x45a   : > { %7982 = vmatprep.subr.bf16.mxu0 %v11481_v29  ;;  %v11490_v29 = vld [vmem:[%s15466_s1 + $0xdd4] ss:$8 sps:$4 sm:$0xff]  }
 0x45b   : > { %4569 = vst.msk [vmem:[%s14814_s13 + $0x48] sm:$0xff] %vm14816_vm3, %v9819_v58  ;;  %v4348_v54 = vpop.f32.mrb[140].mxu0 }
 0x45c   : > { %v8916_v62 = vadd.f32 -1.0, %v4348_v54  ;;  %v4350_v39 = vpop.f32.mrb[141].mxu0  ;;  %v14928_v54 = vld [vmem:[%s15466_s1 + $0xf80] ss:$8 sps:$4 sm:$0xff]  }
 0x45d   : > { %v8917_v24 = vadd.f32 -1.0, %v4350_v39  ;;  %v4352_v20 = vpop.f32.mrb[142].mxu0  ;;  %7983 = vmatpush1.bf16.msra.mxu0 %v11479_v16  ;;  %v11488_v16 = vld [vmem:[%s15466_s1 + $0xdd0] ss:$8 sps:$4 sm:$0xff]   ;;  %v14933_v39 = vld [vmem:[%s15466_s1 + $0xf94] ss:$8 sps:$4 sm:$0xff]  }
 0x45e   : > { %v8918_v48 = vadd.f32 -1.0, %v4352_v20  ;;  %v4354_v42 = vpop.f32.mrb[143].mxu0  ;;  %6244 = vmatmul.mubr.bf16.gmra.mrb[20].mxu1 %v15903_v25  ;;  %7984 = vmatprep.subr.bf16.mxu0 %v11487_v27  ;;  %v11493_v27 = vld [vmem:[%s15466_s1 + $0xde4] ss:$8 sps:$4 sm:$0xff]  }
 0x45f   : > { %v9820_v3 = vpack.c.bf16 %v8917_v24, %v8916_v62  ;;  %v8919_v56 = vadd.f32 -1.0, %v4354_v42  ;;  %6286 = vmatprep.mubr.bf16.mxu1 %v15739_v15 }
 0x460   : > { %7896 = vmatmul.mubr.bf16.gmra.mrb[168].mxu0 %v13337_v59 }
 0x461   : > { %4570 = vst.msk [vmem:[%s14814_s13 + $0x50] sm:$0xff] %vm14816_vm3, %v9820_v3  ;;  %v9821_v58 = vpack.c.bf16 %v8919_v56, %v8918_v48  ;;  %7905 = vmatprep.mubr.bf16.mxu0 %v13377_v35  ;;  %7985 = vmatpush1.bf16.msra.mxu0 %v11485_v14  ;;  %v11491_v14 = vld [vmem:[%s15466_s1 + $0xde0] ss:$8 sps:$4 sm:$0xff]   ;;  %v11496_v3 = vld [vmem:[%s15466_s1 + $0xdf4] ss:$8 sps:$4 sm:$0xff]  }
 0x462   : > { %7986 = vmatprep.subr.bf16.mxu0 %v11490_v29  ;;  %v15904_v29 = vld [vmem:[#allocation44_spill] sm:$0xff] }
 0x463   : > { %4571 = vst.msk [vmem:[%s14814_s13 + $0x58] sm:$0xff] %vm14816_vm3, %v9821_v58  ;;  %v4358_v59 = vpop.f32.mrb[144].mxu0 }
 0x464   : > { %v8920_v35 = vadd.f32 -1.0, %v4358_v59  ;;  %v4360_v62 = vpop.f32.mrb[145].mxu0 }
 0x465   : > { %v8921_v24 = vadd.f32 -1.0, %v4360_v62  ;;  %v4362_v20 = vpop.f32.mrb[146].mxu0  ;;  %7987 = vmatpush1.bf16.msra.mxu0 %v11488_v16  ;;  %v14948_v16 = vld [vmem:[%s15466_s1 + $0xf90] ss:$8 sps:$4 sm:$0xff]  }
 0x466   : > { %v8922_v48 = vadd.f32 -1.0, %v4362_v20  ;;  %v4364_v42 = vpop.f32.mrb[147].mxu0  ;;  %9292 = vmatmul.mubr.msk.bf16.vlgmr.msra.gmra.mrb[240].mxu1 %vm864_vm0, %v15904_v29  ;;  %7988 = vmatprep.subr.bf16.mxu0 %v11493_v27  ;;  %v14955_v27 = vld [vmem:[%s15466_s1 + $0xfa4] ss:$8 sps:$4 sm:$0xff]  }
 0x467   : > { %v9822_v56 = vpack.c.bf16 %v8921_v24, %v8920_v35  ;;  %v8923_v58 = vadd.f32 -1.0, %v4364_v42  ;;  %6296 = vmatprep.mubr.bf16.mxu1 %v15739_v15  ;;  %9950 = vmatpush1.bf16.msra.mxu1 %v14928_v54  ;;  %v11494_v35 = vld [vmem:[%s15466_s1 + $0xdf0] ss:$8 sps:$4 sm:$0xff]  }
 0x468   : > { %7906 = vmatmul.mubr.bf16.gmra.mrb[172].mxu0 %v13373_v32  ;;  %9947 = vmatprep.subr.bf16.mxu1 %v14933_v39  ;;  %v11499_v32 = vld [vmem:[%s15466_s1 + $0xe04] ss:$8 sps:$4 sm:$0xff]  }
 0x469   : > { %4572 = vst.msk [vmem:[%s14814_s13 + $0x60] sm:$0xff] %vm14816_vm3, %v9822_v56  ;;  %v9823_v59 = vpack.c.bf16 %v8923_v58, %v8922_v48  ;;  %7915 = vmatprep.mubr.bf16.mxu0 %v13408_v26  ;;  %7989 = vmatpush1.bf16.msra.mxu0 %v11491_v14  ;;  %v14974_v26 = vld [vmem:[%s15466_s1 + $0xfa0] ss:$8 sps:$4 sm:$0xff]   ;;  %v14980_v14 = vld [vmem:[%s15466_s1 + $0xfb4] ss:$8 sps:$4 sm:$0xff]  }
 0x46a   : > { %7990 = vmatprep.subr.bf16.mxu0 %v11496_v3  ;;  %v11497_v3 = vld [vmem:[%s15466_s1 + $0xe00] ss:$8 sps:$4 sm:$0xff]  }
 0x46b   : > { %4573 = vst.msk [vmem:[%s14814_s13 + $0x68] sm:$0xff] %vm14816_vm3, %v9823_v59  ;;  %v4368_v62 = vpop.f32.mrb[148].mxu0  ;;  %9951 = vmatpush1.bf16.msra.mxu1 %v14948_v16  ;;  %v11502_v59 = vld [vmem:[%s15466_s1 + $0xe14] ss:$8 sps:$4 sm:$0xff]  }
 0x46c   : > { %v8924_v24 = vadd.f32 -1.0, %v4368_v62  ;;  %v4370_v20 = vpop.f32.mrb[149].mxu0  ;;  %9948 = vmatprep.subr.bf16.mxu1 %v14955_v27 }
 0x46d   : > { %v8925_v48 = vadd.f32 -1.0, %v4370_v20  ;;  %v4372_v42 = vpop.f32.mrb[150].mxu0  ;;  %7991 = vmatpush1.bf16.msra.mxu0 %v11494_v35  ;;  %v14995_v35 = vld [vmem:[%s15466_s1 + $0xfb0] ss:$8 sps:$4 sm:$0xff]  }
 0x46e   : > { %v8926_v56 = vadd.f32 -1.0, %v4372_v42  ;;  %v4374_v58 = vpop.f32.mrb[151].mxu0  ;;  %9293 = vmatmul.mubr.msk.bf16.gmra.mrb[244].mxu1 %vm864_vm0, %v14180_v8  ;;  %7992 = vmatprep.subr.bf16.mxu0 %v11499_v32 }
 0x46f   : > { %v9824_v62 = vpack.c.bf16 %v8925_v48, %v8924_v24  ;;  %v8927_v20 = vadd.f32 -1.0, %v4374_v58  ;;  %6306 = vmatprep.mubr.bf16.mxu1 %v15739_v15  ;;  %9952 = vmatpush1.bf16.msra.mxu1 %v14974_v26  ;;  %v11500_v24 = vld [vmem:[%s15466_s1 + $0xe10] ss:$8 sps:$4 sm:$0xff]   ;;  %v11505_v48 = vld [vmem:[%s15466_s1 + $0xe24] ss:$8 sps:$4 sm:$0xff]  }
 0x470   : > { %7916 = vmatmul.mubr.bf16.gmra.mrb[176].mxu0 %v13404_v31  ;;  %9949 = vmatprep.subr.bf16.mxu1 %v14980_v14  ;;  %v11503_v58 = vld [vmem:[%s15466_s1 + $0xe20] ss:$8 sps:$4 sm:$0xff]  }
 0x471   : > { %4574 = vst.msk [vmem:[%s14814_s13 + $0x70] sm:$0xff] %vm14816_vm3, %v9824_v62  ;;  %v9825_v32 = vpack.c.bf16 %v8927_v20, %v8926_v56  ;;  %7925 = vmatprep.mubr.bf16.mxu0 %v13439_v60  ;;  %7993 = vmatpush1.bf16.msra.mxu0 %v11497_v3  ;;  %v15905_v20 = vld [vmem:[#allocation45_spill] sm:$0xff] }
 0x472   : > { %7994 = vmatprep.subr.bf16.mxu0 %v11502_v59 }
 0x473   : > { %4575 = vst.msk [vmem:[%s14814_s13 + $0x78] sm:$0xff] %vm14816_vm3, %v9825_v32  ;;  %v4378_v31 = vpop.f32.mrb[152].mxu0  ;;  %9953 = vmatpush1.bf16.msra.mxu1 %v14995_v35  ;;  %v11508_v32 = vld [vmem:[%s15466_s1 + $0xe34] ss:$8 sps:$4 sm:$0xff]  }
 0x474   : > { %v8928_v42 = vadd.f32 -1.0, %v4378_v31  ;;  %v4380_v56 = vpop.f32.mrb[153].mxu0 }
 0x475   : > { %v8929_v60 = vadd.f32 -1.0, %v4380_v56  ;;  %v4382_v3 = vpop.f32.mrb[154].mxu0  ;;  %7995 = vmatpush1.bf16.msra.mxu0 %v11500_v24 }
 0x476   : > { %v8930_v59 = vadd.f32 -1.0, %v4382_v3  ;;  %v4384_v62 = vpop.f32.mrb[155].mxu0  ;;  %9294 = vmatmul.mubr.msk.bf16.gmra.mrb[248].mxu1 %vm864_vm0, %v15905_v20  ;;  %7996 = vmatprep.subr.bf16.mxu0 %v11505_v48  ;;  %v11506_v48 = vld [vmem:[%s15466_s1 + $0xe30] ss:$8 sps:$4 sm:$0xff]  }
 0x477   : > { %v9826_v31 = vpack.c.bf16 %v8929_v60, %v8928_v42  ;;  %v8931_v29 = vadd.f32 -1.0, %v4384_v62  ;;  %6316 = vmatprep.mubr.bf16.mxu1 %v15739_v15  ;;  %v11511_v42 = vld [vmem:[%s15466_s1 + $0xe44] ss:$8 sps:$4 sm:$0xff]   ;;  %v15906_v62 = vld [vmem:[#allocation48_spill] sm:$0xff] }
 0x478   : > { %7926 = vmatmul.mubr.bf16.gmra.mrb[180].mxu0 %v13435_v0 }
 0x479   : > { %4576 = vst.msk [vmem:[%s14814_s13 + $0x80] sm:$0xff] %vm14816_vm3, %v9826_v31  ;;  %v9827_v24 = vpack.c.bf16 %v8931_v29, %v8930_v59  ;;  %7935 = vmatprep.mubr.bf16.mxu0 %v13470_v63  ;;  %7997 = vmatpush1.bf16.msra.mxu0 %v11503_v58  ;;  %v11509_v63 = vld [vmem:[%s15466_s1 + $0xe40] ss:$8 sps:$4 sm:$0xff]  }
 0x47a   : > { %7998 = vmatprep.subr.bf16.mxu0 %v11508_v32  ;;  %v11514_v32 = vld [vmem:[%s15466_s1 + $0xe54] ss:$8 sps:$4 sm:$0xff]  }
 0x47b   : > { %4577 = vst.msk [vmem:[%s14814_s13 + $0x88] sm:$0xff] %vm14816_vm3, %v9827_v24  ;;  %v4388_v0 = vpop.f32.mrb[156].mxu0 }
 0x47c   : > { %v8932_v56 = vadd.f32 -1.0, %v4388_v0  ;;  %v4390_v60 = vpop.f32.mrb[157].mxu0  ;;  %v11517_v0 = vld [vmem:[%s15466_s1 + $0xe64] ss:$8 sps:$4 sm:$0xff]  }
 0x47d   : > { %v8933_v29 = vadd.f32 -1.0, %v4390_v60  ;;  %v4392_v3 = vpop.f32.mrb[158].mxu0  ;;  %7999 = vmatpush1.bf16.msra.mxu0 %v11506_v48  ;;  %v11518_v60 = vld [vmem:[%s15466_s1 + $0xe70] ss:$8 sps:$4 sm:$0xff]  }
 0x47e   : > { %v8934_v58 = vadd.f32 -1.0, %v4392_v3  ;;  %v4394_v59 = vpop.f32.mrb[159].mxu0  ;;  %9295 = vmatmul.mubr.msk.bf16.gmra.mrb[252].mxu1 %vm864_vm0, %v15906_v62  ;;  %8000 = vmatprep.subr.bf16.mxu0 %v11511_v42  ;;  %v11512_v42 = vld [vmem:[%s15466_s1 + $0xe50] ss:$8 sps:$4 sm:$0xff]   ;;  %v11545_v3 = vld [vmem:[%s15466_s1 + $0xec0] ss:$8 sps:$4 sm:$0xff]  }
 0x47f   : > { %v9828_v31 = vpack.c.bf16 %v8933_v29, %v8932_v56  ;;  %v8935_v24 = vadd.f32 -1.0, %v4394_v59  ;;  %6326 = vmatprep.mubr.bf16.mxu1 %v15739_v15  ;;  %v15907_v56 = vld [vmem:[#allocation49_spill] sm:$0xff]  ;;  %v11523_v29 = vld [vmem:[%s15466_s1 + $0xe84] ss:$8 sps:$4 sm:$0xff]   ;;  %v11557_v59 = vld [vmem:[%s15466_s1 + $0xf00] ss:$8 sps:$4 sm:$0xff]  }
 0x480   : > { %7936 = vmatmul.mubr.bf16.gmra.mrb[184].mxu0 %v13466_v23  ;;  %v11515_v23 = vld [vmem:[%s15466_s1 + $0xe60] ss:$8 sps:$4 sm:$0xff]  }
 0x481   : > { %4578 = vst.msk [vmem:[%s14814_s13 + $0x90] sm:$0xff] %vm14816_vm3, %v9828_v31  ;;  %v9829_v48 = vpack.c.bf16 %v8935_v24, %v8934_v58  ;;  %7945 = vmatprep.mubr.bf16.mxu0 %v13501_v34  ;;  %8001 = vmatpush1.bf16.msra.mxu0 %v11509_v63  ;;  %v11520_v34 = vld [vmem:[%s15466_s1 + $0xe74] ss:$8 sps:$4 sm:$0xff]   ;;  %v11553_v63 = vld [vmem:[%s15466_s1 + $0xee4] ss:$8 sps:$4 sm:$0xff]  }
 0x482   : > { %8002 = vmatprep.subr.bf16.mxu0 %v11514_v32  ;;  %v11551_v58 = vld [vmem:[%s15466_s1 + $0xee0] ss:$8 sps:$4 sm:$0xff]   ;;  %v11577_v24 = vld [vmem:[%s15466_s1 + $0xf64] ss:$8 sps:$4 sm:$0xff]  }
 0x483   : > { %4579 = vst.msk [vmem:[%s14814_s13 + $0x98] sm:$0xff] %vm14816_vm3, %v9829_v48  ;;  %v11563_v32 = vld [vmem:[%s15466_s1 + $0xf20] ss:$8 sps:$4 sm:$0xff]  }
 0x484   : > { %v11569_v31 = vld [vmem:[%s15466_s1 + $0xf40] ss:$8 sps:$4 sm:$0xff]  }
 0x485   : > { %8003 = vmatpush1.bf16.msra.mxu0 %v11512_v42  ;;  %v11575_v48 = vld [vmem:[%s15466_s1 + $0xf60] ss:$8 sps:$4 sm:$0xff]  }
 0x486   : > { %9296 = vmatmul.mubr.msk.bf16.gmra.mrb[0].mxu1 %vm864_vm0, %v15907_v56  ;;  %8004 = vmatprep.subr.bf16.mxu0 %v11517_v0  ;;  %v15921_v42 = vld [vmem:[#allocation86_spill] sm:$0xff] }
 0x487   : > { %6336 = vmatprep.mubr.bf16.mxu1 %v15739_v15 }
 0x488   : > { %7946 = vmatmul.mubr.bf16.gmra.mrb[188].mxu0 %v13497_v30  ;;  %v11521_v30 = vld [vmem:[%s15466_s1 + $0xe80] ss:$8 sps:$4 sm:$0xff]  }
 0x489   : > { %7955 = vmatprep.mubr.bf16.mxu0 %v13528_v55  ;;  %8005 = vmatpush1.bf16.msra.mxu0 %v11515_v23  ;;  %v11524_v55 = vld [vmem:[%s15466_s1 + $0xe90] ss:$8 sps:$4 sm:$0xff]  }
 0x48a   : > { %8006 = vmatprep.subr.bf16.mxu0 %v11520_v34 }
 0x48d   : > { %8007 = vmatpush1.bf16.msra.mxu0 %v11518_v60 }
 0x48e   : > { %9297 = vmatmul.mubr.msk.bf16.gmra.mrb[4].mxu1 %vm864_vm0, %v14294_v40  ;;  %8109 = vmatprep.subr.bf16.mxu0 %v11523_v29 }
 0x48f   : > { %6346 = vmatprep.mubr.bf16.mxu1 %v15739_v15 }
 0x490   : > { %7956 = vmatmul.mubr.bf16.gmra.mrb[192].mxu0 %v13524_v17  ;;  %v11526_v17 = vld [vmem:[%s15466_s1 + $0xe94] ss:$8 sps:$4 sm:$0xff]  }
 0x491   : > { %7965 = vmatprep.mubr.bf16.mxu0 %v13550_v28  ;;  %v11530_v28 = vld [vmem:[%s15466_s1 + $0xea0] ss:$8 sps:$4 sm:$0xff]  }
 0x496   : > { %9298 = vmatmul.mubr.msk.bf16.gmra.mrb[8].mxu1 %vm864_vm0, %v14327_v43 }
 0x497   : > { %6356 = vmatprep.mubr.bf16.mxu1 %v15739_v15 }
 0x498   : > { %7966 = vmatmul.mubr.bf16.gmra.mrb[196].mxu0 %v13546_v44  ;;  %v11532_v44 = vld [vmem:[%s15466_s1 + $0xea4] ss:$8 sps:$4 sm:$0xff]  }
 0x499   : > { %8008 = vmatprep.mubr.bf16.mxu0 %v13672_v53  ;;  %v11539_v53 = vld [vmem:[%s15466_s1 + $0xeb0] ss:$8 sps:$4 sm:$0xff]  }
 0x49e   : > { %9299 = vmatmul.mubr.msk.bf16.gmra.mrb[12].mxu1 %vm864_vm0, %v14360_v46 }
 0x49f   : > { %6366 = vmatprep.mubr.bf16.mxu1 %v15739_v15 }
 0x4a0   : > { %8009 = vmatmul.mubr.bf16.vlgmr.msra.gmra.mrb[160].mxu0 %v13667_v36  ;;  %v11541_v36 = vld [vmem:[%s15466_s1 + $0xeb4] ss:$8 sps:$4 sm:$0xff]  }
 0x4a1   : > { %8018 = vmatprep.mubr.bf16.mxu0 %v13702_v45  ;;  %8110 = vmatpush1.bf16.msra.mxu0 %v11521_v30  ;;  %v11547_v45 = vld [vmem:[%s15466_s1 + $0xec4] ss:$8 sps:$4 sm:$0xff]  }
 0x4a2   : > { %8111 = vmatprep.subr.bf16.mxu0 %v11526_v17 }
 0x4a5   : > { %8112 = vmatpush1.bf16.msra.mxu0 %v11524_v55 }
 0x4a6   : > { %9300 = vmatmul.mubr.msk.bf16.gmra.mrb[16].mxu1 %vm864_vm0, %v14390_v51  ;;  %8113 = vmatprep.subr.bf16.mxu0 %v11532_v44 }
 0x4a7   : > { %6376 = vmatprep.mubr.bf16.mxu1 %v15739_v15 }
 0x4a8   : > { %8019 = vmatmul.mubr.bf16.gmra.mrb[164].mxu0 %v13700_v9  ;;  %v11550_v9 = vld [vmem:[%s15466_s1 + $0xed4] ss:$8 sps:$4 sm:$0xff]  }
 0x4a9   : > { %8028 = vmatprep.mubr.bf16.mxu0 %v13723_v33  ;;  %8114 = vmatpush1.bf16.msra.mxu0 %v11530_v28  ;;  %v11548_v33 = vld [vmem:[%s15466_s1 + $0xed0] ss:$8 sps:$4 sm:$0xff]  }
 0x4aa   : > { %8115 = vmatprep.subr.bf16.mxu0 %v11541_v36 }
 0x4ad   : > { %8116 = vmatpush1.bf16.msra.mxu0 %v11539_v53 }
 0x4ae   : > { %9301 = vmatmul.mubr.msk.bf16.gmra.mrb[20].mxu1 %vm864_vm0, %v14411_v47  ;;  %8117 = vmatprep.subr.bf16.mxu0 %v11547_v45 }
 0x4af   : > { %8284 = vmatprep.mubr.bf16.mxu1 %v15739_v15 }
 0x4b0   : > { %8029 = vmatmul.mubr.bf16.gmra.mrb[168].mxu0 %v13721_v10  ;;  %v11556_v10 = vld [vmem:[%s15466_s1 + $0xef4] ss:$8 sps:$4 sm:$0xff]  }
 0x4b1   : > { %8038 = vmatprep.mubr.bf16.mxu0 %v15842_v1  ;;  %8118 = vmatpush1.bf16.msra.mxu0 %v11545_v3  ;;  %v11554_v1 = vld [vmem:[%s15466_s1 + $0xef0] ss:$8 sps:$4 sm:$0xff]  }
 0x4b2   : > { %8119 = vmatprep.subr.bf16.mxu0 %v11550_v9 }
 0x4b5   : > { %8120 = vmatpush1.bf16.msra.mxu0 %v11548_v33 }
 0x4b6   : > { %9719 = vmatmul.mubr.msk.bf16.vlgmr.msra.gmra.mrb[24].mxu1 %vm864_vm0, %v14180_v8  ;;  %8121 = vmatprep.subr.bf16.mxu0 %v11553_v63  ;;  %v11559_v8 = vld [vmem:[%s15466_s1 + $0xf04] ss:$8 sps:$4 sm:$0xff]  }
 0x4b7   : > { %8294 = vmatprep.mubr.bf16.mxu1 %v15739_v15 }
 0x4b8   : > { %8039 = vmatmul.mubr.bf16.gmra.mrb[172].mxu0 %v15845_v5  ;;  %v11562_v5 = vld [vmem:[%s15466_s1 + $0xf14] ss:$8 sps:$4 sm:$0xff]  }
 0x4b9   : > { %8048 = vmatprep.mubr.bf16.mxu0 %v15846_v41  ;;  %8122 = vmatpush1.bf16.msra.mxu0 %v11551_v58  ;;  %v11560_v41 = vld [vmem:[%s15466_s1 + $0xf10] ss:$8 sps:$4 sm:$0xff]  }
 0x4ba   : > { %8123 = vmatprep.subr.bf16.mxu0 %v11556_v10 }
 0x4bd   : > { %8124 = vmatpush1.bf16.msra.mxu0 %v11554_v1 }
 0x4be   : > { %9720 = vmatmul.mubr.msk.bf16.gmra.mrb[28].mxu1 %vm864_vm0, %v15905_v20  ;;  %8125 = vmatprep.subr.bf16.mxu0 %v11559_v8  ;;  %v11565_v20 = vld [vmem:[%s15466_s1 + $0xf24] ss:$8 sps:$4 sm:$0xff]  }
 0x4bf   : > { %8304 = vmatprep.mubr.bf16.mxu1 %v15739_v15 }
 0x4c0   : > { %8049 = vmatmul.mubr.bf16.gmra.mrb[176].mxu0 %v15849_v11  ;;  %v11568_v11 = vld [vmem:[%s15466_s1 + $0xf34] ss:$8 sps:$4 sm:$0xff]  }
 0x4c1   : > { %8058 = vmatprep.mubr.bf16.mxu0 %v15850_v22  ;;  %8126 = vmatpush1.bf16.msra.mxu0 %v11557_v59  ;;  %v11566_v22 = vld [vmem:[%s15466_s1 + $0xf30] ss:$8 sps:$4 sm:$0xff]  }
 0x4c2   : > { %8127 = vmatprep.subr.bf16.mxu0 %v11562_v5 }
 0x4c5   : > { %8128 = vmatpush1.bf16.msra.mxu0 %v11560_v41 }
 0x4c6   : > { %9721 = vmatmul.mubr.msk.bf16.gmra.mrb[32].mxu1 %vm864_vm0, %v15906_v62  ;;  %8129 = vmatprep.subr.bf16.mxu0 %v11565_v20  ;;  %v11571_v62 = vld [vmem:[%s15466_s1 + $0xf44] ss:$8 sps:$4 sm:$0xff]  }
 0x4c7   : > { %8314 = vmatprep.mubr.bf16.mxu1 %v15739_v15 }
 0x4c8   : > { %8059 = vmatmul.mubr.bf16.gmra.mrb[180].mxu0 %v15853_v52  ;;  %v11574_v52 = vld [vmem:[%s15466_s1 + $0xf54] ss:$8 sps:$4 sm:$0xff]  }
 0x4c9   : > { %8068 = vmatprep.mubr.bf16.mxu0 %v15854_v2  ;;  %8130 = vmatpush1.bf16.msra.mxu0 %v11563_v32  ;;  %v11572_v2 = vld [vmem:[%s15466_s1 + $0xf50] ss:$8 sps:$4 sm:$0xff]  }
 0x4ca   : > { %8131 = vmatprep.subr.bf16.mxu0 %v11568_v11 }
 0x4cd   : > { %8132 = vmatpush1.bf16.msra.mxu0 %v11566_v22 }
 0x4ce   : > { %9722 = vmatmul.mubr.msk.bf16.gmra.mrb[36].mxu1 %vm864_vm0, %v15907_v56  ;;  %8133 = vmatprep.subr.bf16.mxu0 %v11571_v62 }
 0x4cf   : > { %8324 = vmatprep.mubr.bf16.mxu1 %v15739_v15 }
 0x4d0   : > { %8069 = vmatmul.mubr.bf16.gmra.mrb[184].mxu0 %v15857_v49  ;;  %v11580_v49 = vld [vmem:[%s15466_s1 + $0xf74] ss:$8 sps:$4 sm:$0xff]  }
 0x4d1   : > { %8078 = vmatprep.mubr.bf16.mxu0 %v15858_v37  ;;  %8134 = vmatpush1.bf16.msra.mxu0 %v11569_v31  ;;  %v11578_v37 = vld [vmem:[%s15466_s1 + $0xf70] ss:$8 sps:$4 sm:$0xff]  }
 0x4d2   : > { %8135 = vmatprep.subr.bf16.mxu0 %v11574_v52 }
 0x4d5   : > { %8136 = vmatpush1.bf16.msra.mxu0 %v11572_v2 }
 0x4d6   : > { %9723 = vmatmul.mubr.msk.bf16.gmra.mrb[40].mxu1 %vm864_vm0, %v14294_v40  ;;  %8137 = vmatprep.subr.bf16.mxu0 %v11577_v24  ;;  %v15908_v40 = vld [vmem:[#allocation41_spill] sm:$0xff] }
 0x4d7   : > { %8334 = vmatprep.mubr.bf16.mxu1 %v15739_v15 }
 0x4d8   : > { %8079 = vmatmul.mubr.bf16.gmra.mrb[188].mxu0 %v15861_v61  ;;  %v15909_v61 = vld [vmem:[#allocation40_spill] sm:$0xff] }
 0x4d9   : > { %8088 = vmatprep.mubr.bf16.mxu0 %v15862_v18  ;;  %8138 = vmatpush1.bf16.msra.mxu0 %v11575_v48  ;;  %v15910_v18 = vld [vmem:[#allocation63_spill] sm:$0xff] }
 0x4da   : > { %8139 = vmatprep.subr.bf16.mxu0 %v11580_v49 }
 0x4dd   : > { %8140 = vmatpush1.bf16.msra.mxu0 %v11578_v37 }
 0x4de   : > { %9724 = vmatmul.mubr.msk.bf16.gmra.mrb[44].mxu1 %vm864_vm0, %v14327_v43  ;;  %8242 = vmatprep.subr.bf16.mxu0 %v14772_v38  ;;  %v15911_v43 = vld [vmem:[#allocation61_spill] sm:$0xff] }
 0x4df   : > { %8344 = vmatprep.mubr.bf16.mxu1 %v15739_v15  ;;  %v15912_v38 = vld [vmem:[#allocation69_spill] sm:$0xff] }
 0x4e0   : > { %8089 = vmatmul.mubr.bf16.gmra.mrb[192].mxu0 %v15865_v50  ;;  %v15915_v50 = vld [vmem:[#allocation72_spill] sm:$0xff] }
 0x4e1   : > { %8098 = vmatprep.mubr.bf16.mxu0 %v15908_v40 }
 0x4e6   : > { %9725 = vmatmul.mubr.msk.bf16.gmra.mrb[48].mxu1 %vm864_vm0, %v14360_v46  ;;  %v15913_v46 = vld [vmem:[#allocation67_spill] sm:$0xff] }
 0x4e7   : > { %8354 = vmatprep.mubr.bf16.mxu1 %v15739_v15 }
 0x4e8   : > { %8099 = vmatmul.mubr.bf16.gmra.mrb[196].mxu0 %v15909_v61 }
 0x4e9   : > { %8141 = vmatprep.mubr.bf16.mxu0 %v15910_v18 }
 0x4ee   : > { %9726 = vmatmul.mubr.msk.bf16.gmra.mrb[52].mxu1 %vm864_vm0, %v14390_v51  ;;  %v15914_v51 = vld [vmem:[#allocation73_spill] sm:$0xff] }
 0x4ef   : > { %8364 = vmatprep.mubr.bf16.mxu1 %v15739_v15 }
 0x4f0   : > { %8142 = vmatmul.mubr.bf16.vlgmr.msra.gmra.mrb[160].mxu0 %v15911_v43 }
 0x4f1   : > { %8151 = vmatprep.mubr.bf16.mxu0 %v15912_v38  ;;  %8243 = vmatpush1.bf16.msra.mxu0 %v14928_v54  ;;  %v15916_v54 = vld [vmem:[#allocation77_spill] sm:$0xff] }
 0x4f2   : > { %8244 = vmatprep.subr.bf16.mxu0 %v14933_v39  ;;  %v15917_v39 = vld [vmem:[#allocation76_spill] sm:$0xff] }
 0x4f5   : > { %8245 = vmatpush1.bf16.msra.mxu0 %v14948_v16  ;;  %v15918_v16 = vld [vmem:[#allocation81_spill] sm:$0xff] }
 0x4f6   : > { %9727 = vmatmul.mubr.msk.bf16.gmra.mrb[56].mxu1 %vm864_vm0, %v14411_v47  ;;  %8246 = vmatprep.subr.bf16.mxu0 %v14955_v27  ;;  %v15919_v47 = vld [vmem:[#allocation80_spill] sm:$0xff] }
 0x4f7   : > { %v15920_v27 = vld [vmem:[#allocation84_spill] sm:$0xff] }
 0x4f8   : > { %8152 = vmatmul.mubr.bf16.gmra.mrb[164].mxu0 %v15913_v46 }
 0x4f9   : > { %8161 = vmatprep.mubr.bf16.mxu0 %v15914_v51  ;;  %8247 = vmatpush1.bf16.msra.mxu0 %v14974_v26 }
 0x4fa   : > { %8248 = vmatprep.subr.bf16.mxu0 %v14980_v14 }
 0x4fd   : > { %8249 = vmatpush1.bf16.msra.mxu0 %v14995_v35 }
 0x500   : > { %8162 = vmatmul.mubr.bf16.gmra.mrb[168].mxu0 %v15915_v50 }
 0x501   : > { %8171 = vmatprep.mubr.bf16.mxu0 %v15916_v54 }
 0x508   : > { %8172 = vmatmul.mubr.bf16.gmra.mrb[172].mxu0 %v15917_v39 }
 0x509   : > { %8181 = vmatprep.mubr.bf16.mxu0 %v15918_v16 }
 0x510   : > { %8182 = vmatmul.mubr.bf16.gmra.mrb[176].mxu0 %v15919_v47 }
 0x511   : > { %8191 = vmatprep.mubr.bf16.mxu0 %v15920_v27 }
 0x518   : > { %8192 = vmatmul.mubr.bf16.gmra.mrb[180].mxu0 %v15895_v13 }
 0x519   : > { %8201 = vmatprep.mubr.bf16.mxu0 %v15921_v42 }
 0x520   : > { %8202 = vmatmul.mubr.bf16.gmra.mrb[184].mxu0 %v15897_v7 }
 0x521   : > { %8211 = vmatprep.mubr.bf16.mxu0 %v15898_v4 }
 0x528   : > { %8212 = vmatmul.mubr.bf16.gmra.mrb[188].mxu0 %v15899_v21 }
 0x529   : > { %8221 = vmatprep.mubr.bf16.mxu0 %v15900_v12 }
 0x530   : > { %8222 = vmatmul.mubr.bf16.gmra.mrb[192].mxu0 %v15901_v57  ;;  %v15922_v57 = vld [vmem:[#allocation44_spill] sm:$0xff] }
 0x531   : > { %8231 = vmatprep.mubr.bf16.mxu0 %v15902_v6 }
 0x538   : > { %8232 = vmatmul.mubr.bf16.gmra.mrb[196].mxu0 %v15903_v25 }
 0x539   : > { %v6288_v26 = vpop.f32.mrb[240].mxu1  ;;  %8274 = vmatprep.mubr.bf16.mxu0 %v15739_v15 }
 0x53a   : > { %v9302_v13 = vadd.f32 -1.0, %v6288_v26  ;;  %v6290_v14 = vpop.f32.mrb[241].mxu1 }
 0x53b   : > { %v9303_v7 = vadd.f32 -1.0, %v6290_v14  ;;  %v6292_v35 = vpop.f32.mrb[242].mxu1 }
 0x53c   : > { %v9304_v4 = vadd.f32 -1.0, %v6292_v35  ;;  %v6294_v0 = vpop.f32.mrb[243].mxu1 }
 0x53d   : > { %v9830_v21 = vpack.c.bf16 %v9303_v7, %v9302_v13  ;;  %v9305_v23 = vadd.f32 -1.0, %v6294_v0 }
 0x53f   : > { %9362 = vst.msk [vmem:[%s14814_s13 + $0xa0] sm:$0xff] %vm14816_vm3, %v9830_v21  ;;  %v9831_v12 = vpack.c.bf16 %v9305_v23, %v9304_v4 }
 0x540   : > { %9718 = vmatmul.mubr.msk.bf16.vlgmr.msra.gmra.mrb[160].mxu0 %vm864_vm0, %v15922_v57 }
 0x541   : > { %9363 = vst.msk [vmem:[%s14814_s13 + $0xa8] sm:$0xff] %vm14816_vm3, %v9831_v12  ;;  %v6298_v15 = vpop.f32.mrb[244].mxu1 }
 0x542   : > { %v9306_v6 = vadd.f32 -1.0, %v6298_v15  ;;  %v6300_v25 = vpop.f32.mrb[245].mxu1 }
 0x543   : > { %v9307_v56 = vadd.f32 -1.0, %v6300_v25  ;;  %v6302_v34 = vpop.f32.mrb[246].mxu1 }
 0x544   : > { %v9308_v60 = vadd.f32 -1.0, %v6302_v34  ;;  %v6304_v29 = vpop.f32.mrb[247].mxu1 }
 0x545   : > { %v9832_v30 = vpack.c.bf16 %v9307_v56, %v9306_v6  ;;  %v9309_v17 = vadd.f32 -1.0, %v6304_v29 }
 0x547   : > { %9364 = vst.msk [vmem:[%s14814_s13 + $0xb0] sm:$0xff] %vm14816_vm3, %v9832_v30  ;;  %v9833_v55 = vpack.c.bf16 %v9309_v17, %v9308_v60 }
 0x549   : > { %9365 = vst.msk [vmem:[%s14814_s13 + $0xb8] sm:$0xff] %vm14816_vm3, %v9833_v55  ;;  %v6308_v44 = vpop.f32.mrb[248].mxu1 }
 0x54a   : > { %v9310_v28 = vadd.f32 -1.0, %v6308_v44  ;;  %v6310_v36 = vpop.f32.mrb[249].mxu1 }
 0x54b   : > { %v9311_v53 = vadd.f32 -1.0, %v6310_v36  ;;  %v6312_v45 = vpop.f32.mrb[250].mxu1 }
 0x54c   : > { %v9312_v3 = vadd.f32 -1.0, %v6312_v45  ;;  %v6314_v9 = vpop.f32.mrb[251].mxu1 }
 0x54d   : > { %v9834_v33 = vpack.c.bf16 %v9311_v53, %v9310_v28  ;;  %v9313_v63 = vadd.f32 -1.0, %v6314_v9 }
 0x54f   : > { %9366 = vst.msk [vmem:[%s14814_s13 + $0xc0] sm:$0xff] %vm14816_vm3, %v9834_v33  ;;  %v9835_v58 = vpack.c.bf16 %v9313_v63, %v9312_v3 }
 0x551   : > { %9367 = vst.msk [vmem:[%s14814_s13 + $0xc8] sm:$0xff] %vm14816_vm3, %v9835_v58  ;;  %v6318_v10 = vpop.f32.mrb[252].mxu1 }
 0x552   : > { %v9314_v1 = vadd.f32 -1.0, %v6318_v10  ;;  %v6320_v8 = vpop.f32.mrb[253].mxu1 }
 0x553   : > { %v9315_v59 = vadd.f32 -1.0, %v6320_v8  ;;  %v6322_v5 = vpop.f32.mrb[254].mxu1 }
 0x554   : > { %v9316_v41 = vadd.f32 -1.0, %v6322_v5  ;;  %v6324_v20 = vpop.f32.mrb[255].mxu1 }
 0x555   : > { %v9836_v32 = vpack.c.bf16 %v9315_v59, %v9314_v1  ;;  %v9317_v11 = vadd.f32 -1.0, %v6324_v20 }
 0x557   : > { %9368 = vst.msk [vmem:[%s14814_s13 + $0xd0] sm:$0xff] %vm14816_vm3, %v9836_v32  ;;  %v9837_v22 = vpack.c.bf16 %v9317_v11, %v9316_v41 }
 0x559   : > { %9369 = vst.msk [vmem:[%s14814_s13 + $0xd8] sm:$0xff] %vm14816_vm3, %v9837_v22  ;;  %v6328_v62 = vpop.f32.mrb[0].mxu1 }
 0x55a   : > { %v9318_v31 = vadd.f32 -1.0, %v6328_v62  ;;  %v6330_v52 = vpop.f32.mrb[1].mxu1 }
 0x55b   : > { %v9319_v2 = vadd.f32 -1.0, %v6330_v52  ;;  %v6332_v24 = vpop.f32.mrb[2].mxu1 }
 0x55c   : > { %v9320_v48 = vadd.f32 -1.0, %v6332_v24  ;;  %v6334_v49 = vpop.f32.mrb[3].mxu1 }
 0x55d   : > { %v9838_v37 = vpack.c.bf16 %v9319_v2, %v9318_v31  ;;  %v9321_v40 = vadd.f32 -1.0, %v6334_v49 }
 0x55f   : > { %9370 = vst.msk [vmem:[%s14814_s13 + $0xe0] sm:$0xff] %vm14816_vm3, %v9838_v37  ;;  %v9839_v61 = vpack.c.bf16 %v9321_v40, %v9320_v48 }
 0x561   : > { %9371 = vst.msk [vmem:[%s14814_s13 + $0xe8] sm:$0xff] %vm14816_vm3, %v9839_v61  ;;  %v6338_v18 = vpop.f32.mrb[4].mxu1 }
 0x562   : > { %v9322_v43 = vadd.f32 -1.0, %v6338_v18  ;;  %v6340_v38 = vpop.f32.mrb[5].mxu1 }
 0x563   : > { %v9323_v46 = vadd.f32 -1.0, %v6340_v38  ;;  %v6342_v51 = vpop.f32.mrb[6].mxu1 }
 0x564   : > { %v9324_v50 = vadd.f32 -1.0, %v6342_v51  ;;  %v6344_v54 = vpop.f32.mrb[7].mxu1 }
 0x565   : > { %v9840_v39 = vpack.c.bf16 %v9323_v46, %v9322_v43  ;;  %v9325_v16 = vadd.f32 -1.0, %v6344_v54 }
 0x567   : > { %9372 = vst.msk [vmem:[%s14814_s13 + $0xf0] sm:$0xff] %vm14816_vm3, %v9840_v39  ;;  %v9841_v47 = vpack.c.bf16 %v9325_v16, %v9324_v50 }
 0x569   : > { %9373 = vst.msk [vmem:[%s14814_s13 + $0xf8] sm:$0xff] %vm14816_vm3, %v9841_v47  ;;  %v6348_v27 = vpop.f32.mrb[8].mxu1 }
 0x56a   : > { %v9326_v42 = vadd.f32 -1.0, %v6348_v27  ;;  %v6350_v26 = vpop.f32.mrb[9].mxu1 }
 0x56b   : > { %v9327_v13 = vadd.f32 -1.0, %v6350_v26  ;;  %v6352_v14 = vpop.f32.mrb[10].mxu1 }
 0x56c   : > { %v9328_v7 = vadd.f32 -1.0, %v6352_v14  ;;  %v6354_v35 = vpop.f32.mrb[11].mxu1 }
 0x56d   : > { %v9842_v4 = vpack.c.bf16 %v9327_v13, %v9326_v42  ;;  %v9329_v0 = vadd.f32 -1.0, %v6354_v35 }
 0x56f   : > { %9374 = vst.msk [vmem:[%s14814_s13 + $0x100] sm:$0xff] %vm14816_vm3, %v9842_v4  ;;  %v9843_v21 = vpack.c.bf16 %v9329_v0, %v9328_v7 }
 0x571   : > { %9375 = vst.msk [vmem:[%s14814_s13 + $0x108] sm:$0xff] %vm14816_vm3, %v9843_v21  ;;  %v6358_v23 = vpop.f32.mrb[12].mxu1 }
 0x572   : > { %v9330_v12 = vadd.f32 -1.0, %v6358_v23  ;;  %v6360_v57 = vpop.f32.mrb[13].mxu1 }
 0x573   : > { %v9331_v15 = vadd.f32 -1.0, %v6360_v57  ;;  %v6362_v6 = vpop.f32.mrb[14].mxu1 }
 0x574   : > { %v9332_v25 = vadd.f32 -1.0, %v6362_v6  ;;  %v6364_v56 = vpop.f32.mrb[15].mxu1 }
 0x575   : > { %v9844_v34 = vpack.c.bf16 %v9331_v15, %v9330_v12  ;;  %v9333_v60 = vadd.f32 -1.0, %v6364_v56 }
 0x577   : > { %9376 = vst.msk [vmem:[%s14814_s13 + $0x110] sm:$0xff] %vm14816_vm3, %v9844_v34  ;;  %v9845_v29 = vpack.c.bf16 %v9333_v60, %v9332_v25 }
 0x579   : > { %9377 = vst.msk [vmem:[%s14814_s13 + $0x118] sm:$0xff] %vm14816_vm3, %v9845_v29  ;;  %v6368_v30 = vpop.f32.mrb[16].mxu1 }
 0x57a   : > { %v9334_v17 = vadd.f32 -1.0, %v6368_v30  ;;  %v6370_v55 = vpop.f32.mrb[17].mxu1 }
 0x57b   : > { %v9335_v44 = vadd.f32 -1.0, %v6370_v55  ;;  %v6372_v28 = vpop.f32.mrb[18].mxu1 }
 0x57c   : > { %v9336_v36 = vadd.f32 -1.0, %v6372_v28  ;;  %v6374_v53 = vpop.f32.mrb[19].mxu1 }
 0x57d   : > { %v9846_v45 = vpack.c.bf16 %v9335_v44, %v9334_v17  ;;  %v9337_v3 = vadd.f32 -1.0, %v6374_v53 }
 0x57f   : > { %9378 = vst.msk [vmem:[%s14814_s13 + $0x120] sm:$0xff] %vm14816_vm3, %v9846_v45  ;;  %v9847_v9 = vpack.c.bf16 %v9337_v3, %v9336_v36 }
 0x581   : > { %9379 = vst.msk [vmem:[%s14814_s13 + $0x128] sm:$0xff] %vm14816_vm3, %v9847_v9  ;;  %v6378_v33 = vpop.f32.mrb[20].mxu1 }
 0x582   : > { %v9338_v63 = vadd.f32 -1.0, %v6378_v33  ;;  %v6380_v58 = vpop.f32.mrb[21].mxu1 }
 0x583   : > { %v9339_v10 = vadd.f32 -1.0, %v6380_v58  ;;  %v6382_v1 = vpop.f32.mrb[22].mxu1 }
 0x584   : > { %v9340_v8 = vadd.f32 -1.0, %v6382_v1  ;;  %v6384_v59 = vpop.f32.mrb[23].mxu1 }
 0x585   : > { %v9848_v5 = vpack.c.bf16 %v9339_v10, %v9338_v63  ;;  %v9341_v41 = vadd.f32 -1.0, %v6384_v59 }
 0x587   : > { %9380 = vst.msk [vmem:[%s14814_s13 + $0x130] sm:$0xff] %vm14816_vm3, %v9848_v5  ;;  %v9849_v20 = vpack.c.bf16 %v9341_v41, %v9340_v8 }
 0x589   : > { %9381 = vst.msk [vmem:[%s14814_s13 + $0x138] sm:$0xff] %vm14816_vm3, %v9849_v20  ;;  %v8286_v32 = vpop.f32.mrb[24].mxu1 }
 0x58a   : > { %v8288_v11 = vpop.f32.mrb[25].mxu1 }
 0x58b   : > { %v8290_v22 = vpop.f32.mrb[26].mxu1 }
 0x58c   : > { %v8292_v62 = vpop.f32.mrb[27].mxu1 }
 0x591   : > { %v8296_v31 = vpop.f32.mrb[28].mxu1 }
 0x592   : > { %v8298_v52 = vpop.f32.mrb[29].mxu1 }
 0x593   : > { %v8300_v2 = vpop.f32.mrb[30].mxu1 }
 0x594   : > { %v8302_v24 = vpop.f32.mrb[31].mxu1 }
 0x599   : > { %v8306_v48 = vpop.f32.mrb[32].mxu1 }
 0x59a   : > { %v8308_v49 = vpop.f32.mrb[33].mxu1 }
 0x59b   : > { %v15324_v37 = vpop.f32.mrb[34].mxu1 }
 0x59c   : > { %v15326_v40 = vpop.f32.mrb[35].mxu1 }
 0x5a1   : > { %v15328_v61 = vpop.f32.mrb[36].mxu1 }
 0x5a2   : > { %v15330_v18 = vpop.f32.mrb[37].mxu1 }
 0x5a3   : > { %v15332_v43 = vpop.f32.mrb[38].mxu1 }
 0x5a4   : > { %v15334_v38 = vpop.f32.mrb[39].mxu1 }
 0x5a9   : > { %v15336_v46 = vpop.f32.mrb[40].mxu1 }
 0x5aa   : > { %v15338_v51 = vpop.f32.mrb[41].mxu1 }
 0x5ab   : > { %v15340_v50 = vpop.f32.mrb[42].mxu1 }
 0x5ac   : > { %v15342_v54 = vpop.f32.mrb[43].mxu1 }
 0x5b1   : > { %v15344_v39 = vpop.f32.mrb[44].mxu1 }
 0x5b2   : > { %v15346_v16 = vpop.f32.mrb[45].mxu1 }
 0x5b3   : > { %v15348_v47 = vpop.f32.mrb[46].mxu1 }
 0x5b4   : > { %v15350_v27 = vpop.f32.mrb[47].mxu1 }
 0x5b9   : > { %v15352_v42 = vpop.f32.mrb[48].mxu1 }
 0x5ba   : > { %v15354_v26 = vpop.f32.mrb[49].mxu1 }
 0x5bb   : > { %v15356_v13 = vpop.f32.mrb[50].mxu1 }
 0x5bc   : > { %v15358_v14 = vpop.f32.mrb[51].mxu1 }
 0x5c1   : > { %v15360_v7 = vpop.f32.mrb[52].mxu1 }
 0x5c2   : > { %v15362_v35 = vpop.f32.mrb[53].mxu1 }
 0x5c3   : > { %v15364_v4 = vpop.f32.mrb[54].mxu1 }
 0x5c4   : > { %v15366_v0 = vpop.f32.mrb[55].mxu1 }
 0x5c9   : > { %v15368_v21 = vpop.f32.mrb[56].mxu1 }
 0x5ca   : > { %v15370_v23 = vpop.f32.mrb[57].mxu1 }
 0x5cb   : > { %v8153_v12 = vpop.f32.mrb[164].mxu0  ;;  %v15372_v57 = vpop.f32.mrb[58].mxu1 }
 0x5cc   : > { %v10034_v15 = vadd.f32 %v8286_v32, %v8153_v12  ;;  %v8155_v6 = vpop.f32.mrb[165].mxu0  ;;  %v15374_v25 = vpop.f32.mrb[59].mxu1 }
 0x5cd   : > { %v10035_v56 = vadd.f32 %v8288_v11, %v8155_v6  ;;  %v8157_v34 = vpop.f32.mrb[166].mxu0 }
 0x5ce   : > { %v9732_v60 = vadd.f32 -1.0, %v10034_v15  ;;  %v10036_v29 = vadd.f32 %v8290_v22, %v8157_v34  ;;  %v8159_v30 = vpop.f32.mrb[167].mxu0 }
 0x5cf   : > { %v9733_v17 = vadd.f32 -1.0, %v10035_v56  ;;  %v10037_v55 = vadd.f32 %v8292_v62, %v8159_v30 }
 0x5d0   : > { %v9734_v44 = vadd.f32 -1.0, %v10036_v29 }
 0x5d1   : > { %v9852_v28 = vpack.c.bf16 %v9733_v17, %v9732_v60  ;;  %v9735_v36 = vadd.f32 -1.0, %v10037_v55 }
 0x5d3   : > { %9790 = vst.msk [vmem:[%s14814_s13 + $0x150] sm:$0xff] %vm14816_vm3, %v9852_v28  ;;  %v9853_v53 = vpack.c.bf16 %v9735_v36, %v9734_v44  ;;  %v8163_v45 = vpop.f32.mrb[168].mxu0 }
 0x5d4   : > { %v10038_v3 = vadd.f32 %v8296_v31, %v8163_v45  ;;  %v8165_v9 = vpop.f32.mrb[169].mxu0 }
 0x5d5   : > { %9791 = vst.msk [vmem:[%s14814_s13 + $0x158] sm:$0xff] %vm14816_vm3, %v9853_v53  ;;  %v10039_v33 = vadd.f32 %v8298_v52, %v8165_v9  ;;  %v8167_v63 = vpop.f32.mrb[170].mxu0 }
 0x5d6   : > { %v9736_v58 = vadd.f32 -1.0, %v10038_v3  ;;  %v10040_v10 = vadd.f32 %v8300_v2, %v8167_v63  ;;  %v8169_v1 = vpop.f32.mrb[171].mxu0 }
 0x5d7   : > { %v9737_v8 = vadd.f32 -1.0, %v10039_v33  ;;  %v10041_v59 = vadd.f32 %v8302_v24, %v8169_v1 }
 0x5d8   : > { %v9738_v5 = vadd.f32 -1.0, %v10040_v10 }
 0x5d9   : > { %v9854_v41 = vpack.c.bf16 %v9737_v8, %v9736_v58  ;;  %v9739_v20 = vadd.f32 -1.0, %v10041_v59 }
 0x5db   : > { %9792 = vst.msk [vmem:[%s14814_s13 + $0x160] sm:$0xff] %vm14816_vm3, %v9854_v41  ;;  %v9855_v32 = vpack.c.bf16 %v9739_v20, %v9738_v5  ;;  %v8173_v11 = vpop.f32.mrb[172].mxu0 }
 0x5dc   : > { %v10042_v22 = vadd.f32 %v8306_v48, %v8173_v11  ;;  %v8175_v62 = vpop.f32.mrb[173].mxu0 }
 0x5dd   : > { %9793 = vst.msk [vmem:[%s14814_s13 + $0x168] sm:$0xff] %vm14816_vm3, %v9855_v32  ;;  %v10043_v31 = vadd.f32 %v8308_v49, %v8175_v62  ;;  %v8177_v52 = vpop.f32.mrb[174].mxu0 }
 0x5de   : > { %v9740_v2 = vadd.f32 -1.0, %v10042_v22  ;;  %v10044_v24 = vadd.f32 %v15324_v37, %v8177_v52  ;;  %v8179_v12 = vpop.f32.mrb[175].mxu0 }
 0x5df   : > { %v9741_v15 = vadd.f32 -1.0, %v10043_v31  ;;  %v10045_v6 = vadd.f32 %v15326_v40, %v8179_v12 }
 0x5e0   : > { %v9742_v56 = vadd.f32 -1.0, %v10044_v24 }
 0x5e1   : > { %v9856_v34 = vpack.c.bf16 %v9741_v15, %v9740_v2  ;;  %v9743_v60 = vadd.f32 -1.0, %v10045_v6 }
 0x5e3   : > { %9794 = vst.msk [vmem:[%s14814_s13 + $0x170] sm:$0xff] %vm14816_vm3, %v9856_v34  ;;  %v9857_v48 = vpack.c.bf16 %v9743_v60, %v9742_v56  ;;  %v8183_v29 = vpop.f32.mrb[176].mxu0 }
 0x5e4   : > { %v10046_v30 = vadd.f32 %v15328_v61, %v8183_v29  ;;  %v8185_v49 = vpop.f32.mrb[177].mxu0 }
 0x5e5   : > { %9795 = vst.msk [vmem:[%s14814_s13 + $0x178] sm:$0xff] %vm14816_vm3, %v9857_v48  ;;  %v10047_v37 = vadd.f32 %v15330_v18, %v8185_v49  ;;  %v8187_v17 = vpop.f32.mrb[178].mxu0 }
 0x5e6   : > { %v9744_v40 = vadd.f32 -1.0, %v10046_v30  ;;  %v10048_v55 = vadd.f32 %v15332_v43, %v8187_v17  ;;  %v8189_v44 = vpop.f32.mrb[179].mxu0 }
 0x5e7   : > { %v9745_v28 = vadd.f32 -1.0, %v10047_v37  ;;  %v10049_v36 = vadd.f32 %v15334_v38, %v8189_v44 }
 0x5e8   : > { %v9746_v53 = vadd.f32 -1.0, %v10048_v55 }
 0x5e9   : > { %v9858_v45 = vpack.c.bf16 %v9745_v28, %v9744_v40  ;;  %v9747_v3 = vadd.f32 -1.0, %v10049_v36 }
 0x5eb   : > { %9796 = vst.msk [vmem:[%s14814_s13 + $0x180] sm:$0xff] %vm14816_vm3, %v9858_v45  ;;  %v9859_v61 = vpack.c.bf16 %v9747_v3, %v9746_v53  ;;  %v8193_v9 = vpop.f32.mrb[180].mxu0 }
 0x5ec   : > { %v10050_v33 = vadd.f32 %v15336_v46, %v8193_v9  ;;  %v8195_v18 = vpop.f32.mrb[181].mxu0 }
 0x5ed   : > { %9797 = vst.msk [vmem:[%s14814_s13 + $0x188] sm:$0xff] %vm14816_vm3, %v9859_v61  ;;  %v10051_v43 = vadd.f32 %v15338_v51, %v8195_v18  ;;  %v8197_v63 = vpop.f32.mrb[182].mxu0 }
 0x5ee   : > { %v9748_v38 = vadd.f32 -1.0, %v10050_v33  ;;  %v10052_v58 = vadd.f32 %v15340_v50, %v8197_v63  ;;  %v8199_v10 = vpop.f32.mrb[183].mxu0 }
 0x5ef   : > { %v9749_v1 = vadd.f32 -1.0, %v10051_v43  ;;  %v10053_v8 = vadd.f32 %v15342_v54, %v8199_v10 }
 0x5f0   : > { %v9750_v59 = vadd.f32 -1.0, %v10052_v58 }
 0x5f1   : > { %v9860_v5 = vpack.c.bf16 %v9749_v1, %v9748_v38  ;;  %v9751_v41 = vadd.f32 -1.0, %v10053_v8 }
 0x5f3   : > { %9798 = vst.msk [vmem:[%s14814_s13 + $0x190] sm:$0xff] %vm14816_vm3, %v9860_v5  ;;  %v9861_v46 = vpack.c.bf16 %v9751_v41, %v9750_v59  ;;  %v8203_v20 = vpop.f32.mrb[184].mxu0 }
 0x5f4   : > { %v10054_v32 = vadd.f32 %v15344_v39, %v8203_v20  ;;  %v8205_v51 = vpop.f32.mrb[185].mxu0 }
 0x5f5   : > { %9799 = vst.msk [vmem:[%s14814_s13 + $0x198] sm:$0xff] %vm14816_vm3, %v9861_v46  ;;  %v10055_v50 = vadd.f32 %v15346_v16, %v8205_v51  ;;  %v8207_v11 = vpop.f32.mrb[186].mxu0 }
 0x5f6   : > { %v9752_v54 = vadd.f32 -1.0, %v10054_v32  ;;  %v10056_v22 = vadd.f32 %v15348_v47, %v8207_v11  ;;  %v8209_v62 = vpop.f32.mrb[187].mxu0 }
 0x5f7   : > { %v9753_v31 = vadd.f32 -1.0, %v10055_v50  ;;  %v10057_v52 = vadd.f32 %v15350_v27, %v8209_v62 }
 0x5f8   : > { %v9754_v2 = vadd.f32 -1.0, %v10056_v22 }
 0x5f9   : > { %v9862_v24 = vpack.c.bf16 %v9753_v31, %v9752_v54  ;;  %v9755_v12 = vadd.f32 -1.0, %v10057_v52 }
 0x5fb   : > { %9800 = vst.msk [vmem:[%s14814_s13 + $0x1a0] sm:$0xff] %vm14816_vm3, %v9862_v24  ;;  %v9863_v39 = vpack.c.bf16 %v9755_v12, %v9754_v2  ;;  %v8213_v15 = vpop.f32.mrb[188].mxu0 }
 0x5fc   : > { %v10058_v6 = vadd.f32 %v15352_v42, %v8213_v15  ;;  %v8215_v16 = vpop.f32.mrb[189].mxu0 }
 0x5fd   : > { %9801 = vst.msk [vmem:[%s14814_s13 + $0x1a8] sm:$0xff] %vm14816_vm3, %v9863_v39  ;;  %v10059_v47 = vadd.f32 %v15354_v26, %v8215_v16  ;;  %v8217_v56 = vpop.f32.mrb[190].mxu0 }
 0x5fe   : > { %v9756_v27 = vadd.f32 -1.0, %v10058_v6  ;;  %v10060_v34 = vadd.f32 %v15356_v13, %v8217_v56  ;;  %v8219_v60 = vpop.f32.mrb[191].mxu0 }
 0x5ff   : > { %v9757_v48 = vadd.f32 -1.0, %v10059_v47  ;;  %v10061_v29 = vadd.f32 %v15358_v14, %v8219_v60 }
 0x600   : > { %v9758_v30 = vadd.f32 -1.0, %v10060_v34 }
 0x601   : > { %v9864_v49 = vpack.c.bf16 %v9757_v48, %v9756_v27  ;;  %v9759_v37 = vadd.f32 -1.0, %v10061_v29 }
 0x603   : > { %9802 = vst.msk [vmem:[%s14814_s13 + $0x1b0] sm:$0xff] %vm14816_vm3, %v9864_v49  ;;  %v9865_v42 = vpack.c.bf16 %v9759_v37, %v9758_v30  ;;  %v8223_v17 = vpop.f32.mrb[192].mxu0 }
 0x604   : > { %v10062_v40 = vadd.f32 %v15360_v7, %v8223_v17  ;;  %v8225_v26 = vpop.f32.mrb[193].mxu0 }
 0x605   : > { %9803 = vst.msk [vmem:[%s14814_s13 + $0x1b8] sm:$0xff] %vm14816_vm3, %v9865_v42  ;;  %v10063_v13 = vadd.f32 %v15362_v35, %v8225_v26  ;;  %v8227_v55 = vpop.f32.mrb[194].mxu0 }
 0x606   : > { %v9760_v14 = vadd.f32 -1.0, %v10062_v40  ;;  %v10064_v44 = vadd.f32 %v15364_v4, %v8227_v55  ;;  %v8229_v28 = vpop.f32.mrb[195].mxu0 }
 0x607   : > { %v9761_v36 = vadd.f32 -1.0, %v10063_v13  ;;  %v10065_v53 = vadd.f32 %v15366_v0, %v8229_v28 }
 0x608   : > { %v9762_v45 = vadd.f32 -1.0, %v10064_v44 }
 0x609   : > { %v9866_v3 = vpack.c.bf16 %v9761_v36, %v9760_v14  ;;  %v9763_v61 = vadd.f32 -1.0, %v10065_v53 }
 0x60b   : > { %9804 = vst.msk [vmem:[%s14814_s13 + $0x1c0] sm:$0xff] %vm14816_vm3, %v9866_v3  ;;  %v9867_v7 = vpack.c.bf16 %v9763_v61, %v9762_v45  ;;  %v8233_v9 = vpop.f32.mrb[196].mxu0 }
 0x60c   : > { %v10066_v33 = vadd.f32 %v15368_v21, %v8233_v9  ;;  %v8235_v35 = vpop.f32.mrb[197].mxu0 }
 0x60d   : > { %9805 = vst.msk [vmem:[%s14814_s13 + $0x1c8] sm:$0xff] %vm14816_vm3, %v9867_v7  ;;  %v10067_v4 = vadd.f32 %v15370_v23, %v8235_v35  ;;  %v8237_v18 = vpop.f32.mrb[198].mxu0 }
 0x60e   : > { %v9764_v0 = vadd.f32 -1.0, %v10066_v33  ;;  %v10068_v43 = vadd.f32 %v15372_v57, %v8237_v18  ;;  %v8239_v63 = vpop.f32.mrb[199].mxu0 }
 0x60f   : > { %v9765_v38 = vadd.f32 -1.0, %v10067_v4  ;;  %v10069_v58 = vadd.f32 %v15374_v25, %v8239_v63 }
 0x610   : > { %v9766_v10 = vadd.f32 -1.0, %v10068_v43 }
 0x611   : > { %v9868_v1 = vpack.c.bf16 %v9765_v38, %v9764_v0  ;;  %v9767_v21 = vadd.f32 -1.0, %v10069_v58 }
 0x613   : > { %9806 = vst.msk [vmem:[%s14814_s13 + $0x1d0] sm:$0xff] %vm14816_vm3, %v9868_v1  ;;  %v9869_v8 = vpack.c.bf16 %v9767_v21, %v9766_v10  ;;  %v8276_v59 = vpop.f32.mrb[160].mxu0 }
 0x614   : > { %v9728_v5 = vadd.f32 -1.0, %v8276_v59  ;;  %v8278_v23 = vpop.f32.mrb[161].mxu0 }
 0x615   : > { %9807 = vst.msk [vmem:[%s14814_s13 + $0x1d8] sm:$0xff] %vm14816_vm3, %v9869_v8  ;;  %v9729_v57 = vadd.f32 -1.0, %v8278_v23  ;;  %v8280_v41 = vpop.f32.mrb[162].mxu0 }
 0x616   : > { %v9730_v46 = vadd.f32 -1.0, %v8280_v41  ;;  %v8282_v20 = vpop.f32.mrb[163].mxu0 }
 0x617   : > { %v9850_v25 = vpack.c.bf16 %v9729_v57, %v9728_v5  ;;  %v9731_v32 = vadd.f32 -1.0, %v8282_v20 }
 0x619   : > { %9788 = vst.msk [vmem:[%s14814_s13 + $0x140] sm:$0xff] %vm14816_vm3, %v9850_v25  ;;  %v9851_v51 = vpack.c.bf16 %v9731_v32, %v9730_v46 }
 0x61b   : > { %9789 = vst.msk [vmem:[%s14814_s13 + $0x148] sm:$0xff] %vm14816_vm3, %v9851_v51 }
 0x61c PF: > { %s13_s12 = sadd.s32 1, %s11669_s12  }
 0x61d   : > { %p10_p4 = scmp.ge.s32.totalorder %s13_s12, 4  }
 0x61f   :  { %12 = sbr.rel (!%p10_p4) target bundleno = 1 (0x1), region = 66 }

// kernel: face_to_speaker_forward.3
= control target key start
LH: loop header
LB: loop body
LE: loop exit
PB: predicated region body
PF: predicated region fallthrough
CT: control target
= control target key end

     0   :  { %v9876_v32 = vmov 1983009808   ;;  %v39_v34 = vlaneseq  ;;  %s13437_s0 = inlined_call_operand.vmem [shape: f32[2,512], index: 0, kind: input, shape index: {}]   ;;  %s13438_s1 = inlined_call_operand.vmem [shape: bf16[512,1024], index: 1, kind: input, shape index: {}]   ;;  %s13439_s2 = inlined_call_operand.vmem [shape: f32[1,1024], index: 2, kind: input, shape index: {}]   ;;  %s13440_s3 = inlined_call_operand.vmem [shape: bf16[1024,1024], index: 3, kind: input, shape index: {}]   ;;  %s13441_s4 = inlined_call_operand.vmem [shape: f32[1,1024], index: 4, kind: input, shape index: {}]   ;;  %s13442_s5 = inlined_call_operand.vmem [shape: bf16[1024,512], index: 5, kind: input, shape index: {}]   ;;  %s13443_s6 = inlined_call_operand.vmem [shape: f32[1,512], index: 6, kind: input, shape index: {}]   ;;  %s13444_s7 = inlined_call_operand.vmem [shape: bf16[512,256], index: 7, kind: input, shape index: {}]   ;;  %s13445_s8 = inlined_call_operand.vmem [shape: f32[1,256], index: 8, kind: input, shape index: {}]   ;;  %s13446_s9 = inlined_call_operand.hbm [shape: f32[2,256], index: 9, kind: output, shape index: {}]  }
   0x1   :  { %v60_v0 = vld [vmem:[%s13438_s1] sm:$0xff]  ;;  %v37_v33 = vunpack.c.l.s4 %v9876_v32 }
   0x2   :  { %v64_v1 = vld [vmem:[%s13438_s1 + $0x20] sm:$0xff]  ;;  %v9994_v44 = vshrl.u32 %v39_v34, 7 }
   0x3   :  { %v188_v2 = vld [vmem:[%s13438_s1 + $0x400] sm:$0xff]  ;;  %v8167_v3 = vcombine.high %v60_v0, %v64_v1  ;;  %v8166_v5 = vcombine.low %v60_v0, %v64_v1  ;;  %v38_v43 = vunpack.c.0.s8 %v37_v33 }
   0x4   :  { %v192_v4 = vld [vmem:[%s13438_s1 + $0x420] sm:$0xff] }
   0x5   :  { %v68_v6 = vld [vmem:[%s13438_s1 + $0x40] sm:$0xff]  ;;  %v8295_v8 = vcombine.high %v188_v2, %v192_v4  ;;  %v8294_v9 = vcombine.low %v188_v2, %v192_v4  ;;  %1638 = vmatprep.subr.bf16.mxu1 %v8167_v3  ;;  %v41_v53 = vsub.s32 %v38_v43, %v9994_v44 }
   0x6   :  { %v72_v7 = vld [vmem:[%s13438_s1 + $0x60] sm:$0xff]  ;;  %1639 = vmatpush1.bf16.msra.mxu1 %v8166_v5 }
   0x7   :  { %v8175_v10 = vcombine.high %v68_v6, %v72_v7  ;;  %v196_v11 = vld [vmem:[%s13438_s1 + $0x440] sm:$0xff]  ;;  %1679 = vmatprep.subr.bf16.mxu0 %v8295_v8  ;;  %v8174_v18 = vcombine.low %v68_v6, %v72_v7 }
   0x8   :  { %v200_v12 = vld [vmem:[%s13438_s1 + $0x460] sm:$0xff]  ;;  %1680 = vmatpush1.bf16.msra.mxu0 %v8294_v9 }
   0x9   :  { %v76_v13 = vld [vmem:[%s13438_s1 + $0x80] sm:$0xff]  ;;  %v8303_v14 = vcombine.high %v196_v11, %v200_v12  ;;  %1640 = vmatprep.subr.bf16.mxu1 %v8175_v10  ;;  %v8302_v19 = vcombine.low %v196_v11, %v200_v12 }
   0xa   :  { %v80_v15 = vld [vmem:[%s13438_s1 + $0xa0] sm:$0xff]  ;;  %1641 = vmatpush1.bf16.msra.mxu1 %v8174_v18 }
   0xb   :  { %v204_v16 = vld [vmem:[%s13438_s1 + $0x480] sm:$0xff]  ;;  %v8183_v20 = vcombine.high %v76_v13, %v80_v15  ;;  %1681 = vmatprep.subr.bf16.mxu0 %v8303_v14  ;;  %v8182_v26 = vcombine.low %v76_v13, %v80_v15 }
   0xc   :  { %v208_v17 = vld [vmem:[%s13438_s1 + $0x4a0] sm:$0xff]  ;;  %1682 = vmatpush1.bf16.msra.mxu0 %v8302_v19 }
   0xd   :  { %v8311_v21 = vcombine.high %v204_v16, %v208_v17  ;;  %v84_v22 = vld [vmem:[%s13438_s1 + $0xc0] sm:$0xff]  ;;  %1642 = vmatprep.subr.bf16.mxu1 %v8183_v20  ;;  %v8310_v27 = vcombine.low %v204_v16, %v208_v17 }
   0xe   :  { %v88_v23 = vld [vmem:[%s13438_s1 + $0xe0] sm:$0xff]  ;;  %1643 = vmatpush1.bf16.msra.mxu1 %v8182_v26 }
   0xf   :  { %v212_v24 = vld [vmem:[%s13438_s1 + $0x4c0] sm:$0xff]  ;;  %v8191_v28 = vcombine.high %v84_v22, %v88_v23  ;;  %1683 = vmatprep.subr.bf16.mxu0 %v8311_v21  ;;  %v8190_v37 = vcombine.low %v84_v22, %v88_v23 }
  0x10   :  { %v216_v25 = vld [vmem:[%s13438_s1 + $0x4e0] sm:$0xff]  ;;  %1684 = vmatpush1.bf16.msra.mxu0 %v8310_v27 }
  0x11   :  { %v8319_v29 = vcombine.high %v212_v24, %v216_v25  ;;  %v92_v30 = vld [vmem:[%s13438_s1 + $0x100] sm:$0xff]  ;;  %1644 = vmatprep.subr.bf16.mxu1 %v8191_v28  ;;  %v8318_v38 = vcombine.low %v212_v24, %v216_v25 }
  0x12   :  { %v96_v31 = vld [vmem:[%s13438_s1 + $0x120] sm:$0xff]  ;;  %1645 = vmatpush1.bf16.msra.mxu1 %v8190_v37 }
  0x13   :  { %v220_v35 = vld [vmem:[%s13438_s1 + $0x500] sm:$0xff]  ;;  %v8199_v39 = vcombine.high %v92_v30, %v96_v31  ;;  %1685 = vmatprep.subr.bf16.mxu0 %v8319_v29  ;;  %v8198_v47 = vcombine.low %v92_v30, %v96_v31 }
  0x14   :  { %v224_v36 = vld [vmem:[%s13438_s1 + $0x520] sm:$0xff]  ;;  %1686 = vmatpush1.bf16.msra.mxu0 %v8318_v38 }
  0x15   :  { %v8327_v40 = vcombine.high %v220_v35, %v224_v36  ;;  %v100_v41 = vld [vmem:[%s13438_s1 + $0x140] sm:$0xff]  ;;  %1646 = vmatprep.subr.bf16.mxu1 %v8199_v39  ;;  %v8326_v48 = vcombine.low %v220_v35, %v224_v36 }
  0x16   :  { %v104_v42 = vld [vmem:[%s13438_s1 + $0x160] sm:$0xff]  ;;  %1647 = vmatpush1.bf16.msra.mxu1 %v8198_v47 }
  0x17   :  { %v228_v45 = vld [vmem:[%s13438_s1 + $0x540] sm:$0xff]  ;;  %v8207_v49 = vcombine.high %v100_v41, %v104_v42  ;;  %1687 = vmatprep.subr.bf16.mxu0 %v8327_v40  ;;  %v8206_v56 = vcombine.low %v100_v41, %v104_v42 }
  0x18   :  { %v232_v46 = vld [vmem:[%s13438_s1 + $0x560] sm:$0xff]  ;;  %1688 = vmatpush1.bf16.msra.mxu0 %v8326_v48 }
  0x19   :  { %v8335_v50 = vcombine.high %v228_v45, %v232_v46  ;;  %v108_v51 = vld [vmem:[%s13438_s1 + $0x180] sm:$0xff]  ;;  %1648 = vmatprep.subr.bf16.mxu1 %v8207_v49  ;;  %v8334_v57 = vcombine.low %v228_v45, %v232_v46 }
  0x1a   :  { %v112_v52 = vld [vmem:[%s13438_s1 + $0x1a0] sm:$0xff]  ;;  %1649 = vmatpush1.bf16.msra.mxu1 %v8206_v56 }
  0x1b   :  { %v236_v54 = vld [vmem:[%s13438_s1 + $0x580] sm:$0xff]  ;;  %v8215_v58 = vcombine.high %v108_v51, %v112_v52  ;;  %1689 = vmatprep.subr.bf16.mxu0 %v8335_v50  ;;  %v8214_v3 = vcombine.low %v108_v51, %v112_v52 }
  0x1c   :  { %v240_v55 = vld [vmem:[%s13438_s1 + $0x5a0] sm:$0xff]  ;;  %1690 = vmatpush1.bf16.msra.mxu0 %v8334_v57 }
  0x1d   :  { %v33_v59 = vld [vmem:[%s13437_s0] sm:$0xff]  ;;  %v8343_v60 = vcombine.high %v236_v54, %v240_v55  ;;  %1650 = vmatprep.subr.bf16.mxu1 %v8215_v58  ;;  %v8342_v6 = vcombine.low %v236_v54, %v240_v55 }
  0x1e   :  { %v116_v61 = vld [vmem:[%s13438_s1 + $0x1c0] sm:$0xff]  ;;  %v10024_v63 = vrot.slane %v33_v59, %v41_v53  ;;  %v35_v0 = vcombine.high %v33_v59, %v33_v59  ;;  %1651 = vmatpush1.bf16.msra.mxu1 %v8214_v3 }
  0x1f   :  { %v120_v62 = vld [vmem:[%s13438_s1 + $0x1e0] sm:$0xff]  ;;  %1691 = vmatprep.subr.bf16.mxu0 %v8343_v60 }
  0x20   :  { %v244_v1 = vld [vmem:[%s13438_s1 + $0x5c0] sm:$0xff]  ;;  %v50_v4 = vcombine.high %v10024_v63, %v10024_v63  ;;  %v10034_v5 = vrot.slane %v35_v0, %v41_v53  ;;  %v8223_v7 = vcombine.high %v116_v61, %v120_v62  ;;  %v8222_v15 = vcombine.low %v116_v61, %v120_v62  ;;  %1692 = vmatpush1.bf16.msra.mxu0 %v8342_v6 }
  0x21   :  { %v248_v2 = vld [vmem:[%s13438_s1 + $0x5e0] sm:$0xff] }
  0x22   :  { %v8351_v8 = vcombine.high %v244_v1, %v248_v2  ;;  %v124_v9 = vld [vmem:[%s13438_s1 + $0x200] sm:$0xff]  ;;  %v10042_v11 = vpack.c.bf16 %v50_v4, %v50_v4  ;;  %v51_v12 = vcombine.high %v10034_v5, %v10034_v5  ;;  %1652 = vmatprep.subr.bf16.mxu1 %v8223_v7  ;;  %v8350_v17 = vcombine.low %v244_v1, %v248_v2 }
  0x23   :  { %v128_v10 = vld [vmem:[%s13438_s1 + $0x220] sm:$0xff]  ;;  %1653 = vmatpush1.bf16.msra.mxu1 %v8222_v15 }
  0x24   :  { %v252_v13 = vld [vmem:[%s13438_s1 + $0x600] sm:$0xff]  ;;  %1670 = vmatprep.mubr.bf16.mxu1 %v10042_v11  ;;  %v10053_v16 = vpack.c.bf16 %v51_v12, %v51_v12  ;;  %v8231_v18 = vcombine.high %v124_v9, %v128_v10  ;;  %1693 = vmatprep.subr.bf16.mxu0 %v8351_v8  ;;  %v8230_v24 = vcombine.low %v124_v9, %v128_v10 }
  0x25   :  { %v256_v14 = vld [vmem:[%s13438_s1 + $0x620] sm:$0xff]  ;;  %1694 = vmatpush1.bf16.msra.mxu0 %v8350_v17  ;;  %v61_v17 = vld [vmem:[%s13438_s1 + $0x8] sm:$0xff] }
  0x26   :  { %v8359_v19 = vcombine.high %v252_v13, %v256_v14  ;;  %v132_v20 = vld [vmem:[%s13438_s1 + $0x240] sm:$0xff]  ;;  %1711 = vmatprep.mubr.bf16.mxu0 %v10053_v16  ;;  %1654 = vmatprep.subr.bf16.mxu1 %v8231_v18  ;;  %v8358_v25 = vcombine.low %v252_v13, %v256_v14  ;;  %v65_v18 = vld [vmem:[%s13438_s1 + $0x28] sm:$0xff] }
  0x27   :  { %v136_v21 = vld [vmem:[%s13438_s1 + $0x260] sm:$0xff]  ;;  %1655 = vmatpush1.bf16.msra.mxu1 %v8230_v24 }
  0x28   :  { %v260_v22 = vld [vmem:[%s13438_s1 + $0x640] sm:$0xff]  ;;  %v8239_v26 = vcombine.high %v132_v20, %v136_v21  ;;  %1695 = vmatprep.subr.bf16.mxu0 %v8359_v19  ;;  %v8238_v32 = vcombine.low %v132_v20, %v136_v21  ;;  %v62_v19 = vld [vmem:[%s13438_s1 + $0x10] sm:$0xff] }
  0x29   :  { %v264_v23 = vld [vmem:[%s13438_s1 + $0x660] sm:$0xff]  ;;  %1696 = vmatpush1.bf16.msra.mxu0 %v8358_v25  ;;  %v66_v20 = vld [vmem:[%s13438_s1 + $0x30] sm:$0xff]  ;;  %v69_v25 = vld [vmem:[%s13438_s1 + $0x48] sm:$0xff] }
  0x2a   :  { %v8367_v27 = vcombine.high %v260_v22, %v264_v23  ;;  %v140_v28 = vld [vmem:[%s13438_s1 + $0x280] sm:$0xff]  ;;  %1656 = vmatprep.subr.bf16.mxu1 %v8239_v26  ;;  %v8366_v33 = vcombine.low %v260_v22, %v264_v23  ;;  %v8169_v23 = vcombine.high %v61_v17, %v65_v18  ;;  %v8171_v24 = vcombine.high %v62_v19, %v66_v20  ;;  %v73_v26 = vld [vmem:[%s13438_s1 + $0x68] sm:$0xff] }
  0x2b   :  { %v144_v29 = vld [vmem:[%s13438_s1 + $0x2a0] sm:$0xff]  ;;  %1657 = vmatpush1.bf16.msra.mxu1 %v8238_v32  ;;  %v77_v32 = vld [vmem:[%s13438_s1 + $0x88] sm:$0xff] }
  0x2c   :  { %v268_v30 = vld [vmem:[%s13438_s1 + $0x680] sm:$0xff]  ;;  %v8247_v34 = vcombine.high %v140_v28, %v144_v29  ;;  %1697 = vmatprep.subr.bf16.mxu0 %v8367_v27  ;;  %v8246_v40 = vcombine.low %v140_v28, %v144_v29  ;;  %v10160_v27 = vpack.c.bf16 %v10024_v63, %v10024_v63  ;;  %v70_v28 = vld [vmem:[%s13438_s1 + $0x50] sm:$0xff]  ;;  %v81_v63 = vld [vmem:[%s13438_s1 + $0xa8] sm:$0xff] }
  0x2d   :  { %v272_v31 = vld [vmem:[%s13438_s1 + $0x6a0] sm:$0xff]  ;;  %1698 = vmatpush1.bf16.msra.mxu0 %v8366_v33  ;;  %v74_v29 = vld [vmem:[%s13438_s1 + $0x70] sm:$0xff]  ;;  %v8170_v33 = vcombine.low %v62_v19, %v66_v20  ;;  %v125_v19 = vld [vmem:[%s13438_s1 + $0x208] sm:$0xff] }
  0x2e   :  { %v8375_v35 = vcombine.high %v268_v30, %v272_v31  ;;  %v148_v36 = vld [vmem:[%s13438_s1 + $0x2c0] sm:$0xff]  ;;  %1658 = vmatprep.subr.bf16.mxu1 %v8247_v34  ;;  %v8374_v41 = vcombine.low %v268_v30, %v272_v31  ;;  %v8168_v30 = vcombine.low %v61_v17, %v65_v18  ;;  %v10170_v31 = vpack.c.bf16 %v10034_v5, %v10034_v5  ;;  %v82_v5 = vld [vmem:[%s13438_s1 + $0xb0] sm:$0xff]  ;;  %v129_v20 = vld [vmem:[%s13438_s1 + $0x228] sm:$0xff] }
  0x2f   :  { %v152_v37 = vld [vmem:[%s13438_s1 + $0x2e0] sm:$0xff]  ;;  %1659 = vmatpush1.bf16.msra.mxu1 %v8246_v40  ;;  %v8177_v34 = vcombine.high %v69_v25, %v73_v26  ;;  %v8178_v40 = vcombine.low %v70_v28, %v74_v29 }
  0x30   :  { %v276_v38 = vld [vmem:[%s13438_s1 + $0x6c0] sm:$0xff]  ;;  %v8255_v42 = vcombine.high %v148_v36, %v152_v37  ;;  %1699 = vmatprep.subr.bf16.mxu0 %v8375_v35  ;;  %v8254_v49 = vcombine.low %v148_v36, %v152_v37  ;;  %v78_v35 = vld [vmem:[%s13438_s1 + $0x90] sm:$0xff]  ;;  %v8179_v36 = vcombine.high %v70_v28, %v74_v29  ;;  %v8176_v37 = vcombine.low %v69_v25, %v73_v26  ;;  %v133_v28 = vld [vmem:[%s13438_s1 + $0x248] sm:$0xff] }
  0x31   :  { %v280_v39 = vld [vmem:[%s13438_s1 + $0x6e0] sm:$0xff]  ;;  %1700 = vmatpush1.bf16.msra.mxu0 %v8374_v41  ;;  %v8185_v41 = vcombine.high %v77_v32, %v81_v63  ;;  %v137_v29 = vld [vmem:[%s13438_s1 + $0x268] sm:$0xff] }
  0x32   :  { %v8383_v43 = vcombine.high %v276_v38, %v280_v39  ;;  %v156_v45 = vld [vmem:[%s13438_s1 + $0x300] sm:$0xff]  ;;  %1660 = vmatprep.subr.bf16.mxu1 %v8255_v42  ;;  %v8382_v50 = vcombine.low %v276_v38, %v280_v39  ;;  %v85_v38 = vld [vmem:[%s13438_s1 + $0xc8] sm:$0xff]  ;;  %v86_v42 = vld [vmem:[%s13438_s1 + $0xd0] sm:$0xff] }
  0x33   :  { %v160_v46 = vld [vmem:[%s13438_s1 + $0x320] sm:$0xff]  ;;  %1661 = vmatpush1.bf16.msra.mxu1 %v8254_v49  ;;  %v89_v39 = vld [vmem:[%s13438_s1 + $0xe8] sm:$0xff]  ;;  %v8186_v49 = vcombine.low %v78_v35, %v82_v5 }
  0x34   :  { %v284_v47 = vld [vmem:[%s13438_s1 + $0x700] sm:$0xff]  ;;  %v8263_v51 = vcombine.high %v156_v45, %v160_v46  ;;  %1701 = vmatprep.subr.bf16.mxu0 %v8383_v43  ;;  %v8262_v57 = vcombine.low %v156_v45, %v160_v46  ;;  %v90_v43 = vld [vmem:[%s13438_s1 + $0xf0] sm:$0xff]  ;;  %v8187_v45 = vcombine.high %v78_v35, %v82_v5  ;;  %v8184_v46 = vcombine.low %v77_v32, %v81_v63  ;;  %v141_v5 = vld [vmem:[%s13438_s1 + $0x288] sm:$0xff] }
  0x35   :  { %v288_v48 = vld [vmem:[%s13438_s1 + $0x720] sm:$0xff]  ;;  %1702 = vmatpush1.bf16.msra.mxu0 %v8382_v50  ;;  %v8193_v50 = vcombine.high %v85_v38, %v89_v39  ;;  %v8233_v32 = vcombine.high %v125_v19, %v129_v20  ;;  %v8232_v35 = vcombine.low %v125_v19, %v129_v20 }
  0x36   :  { %v8391_v52 = vcombine.high %v284_v47, %v288_v48  ;;  %v164_v53 = vld [vmem:[%s13438_s1 + $0x340] sm:$0xff]  ;;  %1662 = vmatprep.subr.bf16.mxu1 %v8263_v51  ;;  %v8390_v58 = vcombine.low %v284_v47, %v288_v48  ;;  %v93_v47 = vld [vmem:[%s13438_s1 + $0x108] sm:$0xff]  ;;  %v94_v51 = vld [vmem:[%s13438_s1 + $0x110] sm:$0xff] }
  0x37   :  { %v168_v54 = vld [vmem:[%s13438_s1 + $0x360] sm:$0xff]  ;;  %1663 = vmatpush1.bf16.msra.mxu1 %v8262_v57  ;;  %v97_v48 = vld [vmem:[%s13438_s1 + $0x128] sm:$0xff]  ;;  %v8194_v57 = vcombine.low %v86_v42, %v90_v43 }
  0x38   :  { %v292_v55 = vld [vmem:[%s13438_s1 + $0x740] sm:$0xff]  ;;  %v8271_v59 = vcombine.high %v164_v53, %v168_v54  ;;  %1703 = vmatprep.subr.bf16.mxu0 %v8391_v52  ;;  %v8270_v2 = vcombine.low %v164_v53, %v168_v54  ;;  %v98_v52 = vld [vmem:[%s13438_s1 + $0x130] sm:$0xff]  ;;  %v8195_v53 = vcombine.high %v86_v42, %v90_v43  ;;  %v8192_v54 = vcombine.low %v85_v38, %v89_v39  ;;  %v149_v43 = vld [vmem:[%s13438_s1 + $0x2c8] sm:$0xff] }
  0x39   :  { %v296_v56 = vld [vmem:[%s13438_s1 + $0x760] sm:$0xff]  ;;  %1704 = vmatpush1.bf16.msra.mxu0 %v8390_v58  ;;  %v8201_v58 = vcombine.high %v93_v47, %v97_v48  ;;  %v8241_v38 = vcombine.high %v133_v28, %v137_v29  ;;  %v8240_v42 = vcombine.low %v133_v28, %v137_v29 }
  0x3a   :  { %v8399_v60 = vcombine.high %v292_v55, %v296_v56  ;;  %v172_v61 = vld [vmem:[%s13438_s1 + $0x380] sm:$0xff]  ;;  %1664 = vmatprep.subr.bf16.mxu1 %v8271_v59  ;;  %v8398_v3 = vcombine.low %v292_v55, %v296_v56  ;;  %v101_v55 = vld [vmem:[%s13438_s1 + $0x148] sm:$0xff]  ;;  %v102_v59 = vld [vmem:[%s13438_s1 + $0x150] sm:$0xff] }
  0x3b   :  { %v176_v62 = vld [vmem:[%s13438_s1 + $0x3a0] sm:$0xff]  ;;  %1665 = vmatpush1.bf16.msra.mxu1 %v8270_v2  ;;  %v105_v56 = vld [vmem:[%s13438_s1 + $0x168] sm:$0xff]  ;;  %v8202_v2 = vcombine.low %v94_v51, %v98_v52 }
  0x3c   :  { %v300_v0 = vld [vmem:[%s13438_s1 + $0x780] sm:$0xff]  ;;  %v8279_v4 = vcombine.high %v172_v61, %v176_v62  ;;  %1705 = vmatprep.subr.bf16.mxu0 %v8399_v60  ;;  %v8278_v12 = vcombine.low %v172_v61, %v176_v62  ;;  %v106_v60 = vld [vmem:[%s13438_s1 + $0x170] sm:$0xff]  ;;  %v8203_v61 = vcombine.high %v94_v51, %v98_v52  ;;  %v8200_v62 = vcombine.low %v93_v47, %v97_v48  ;;  %v157_v52 = vld [vmem:[%s13438_s1 + $0x308] sm:$0xff] }
  0x3d   :  { %v304_v1 = vld [vmem:[%s13438_s1 + $0x7a0] sm:$0xff]  ;;  %1706 = vmatpush1.bf16.msra.mxu0 %v8398_v3  ;;  %v8209_v3 = vcombine.high %v101_v55, %v105_v56 }
  0x3e   :  { %v8407_v6 = vcombine.high %v300_v0, %v304_v1  ;;  %v180_v7 = vld [vmem:[%s13438_s1 + $0x3c0] sm:$0xff]  ;;  %1666 = vmatprep.subr.bf16.mxu1 %v8279_v4  ;;  %v8406_v13 = vcombine.low %v300_v0, %v304_v1  ;;  %v109_v0 = vld [vmem:[%s13438_s1 + $0x188] sm:$0xff]  ;;  %v110_v4 = vld [vmem:[%s13438_s1 + $0x190] sm:$0xff] }
  0x3f   :  { %v184_v8 = vld [vmem:[%s13438_s1 + $0x3e0] sm:$0xff]  ;;  %1667 = vmatpush1.bf16.msra.mxu1 %v8278_v12  ;;  %v113_v1 = vld [vmem:[%s13438_s1 + $0x1a8] sm:$0xff]  ;;  %v8210_v12 = vcombine.low %v102_v59, %v106_v60 }
  0x40   :  { %v308_v9 = vld [vmem:[%s13438_s1 + $0x7c0] sm:$0xff]  ;;  %v8287_v14 = vcombine.high %v180_v7, %v184_v8  ;;  %1707 = vmatprep.subr.bf16.mxu0 %v8407_v6  ;;  %v8286_v21 = vcombine.low %v180_v7, %v184_v8  ;;  %v114_v6 = vld [vmem:[%s13438_s1 + $0x1b0] sm:$0xff]  ;;  %v8211_v7 = vcombine.high %v102_v59, %v106_v60  ;;  %v8208_v8 = vcombine.low %v101_v55, %v105_v56  ;;  %v165_v60 = vld [vmem:[%s13438_s1 + $0x348] sm:$0xff] }
  0x41   :  { %v312_v10 = vld [vmem:[%s13438_s1 + $0x7e0] sm:$0xff]  ;;  %1708 = vmatpush1.bf16.msra.mxu0 %v8406_v13  ;;  %v8217_v13 = vcombine.high %v109_v0, %v113_v1  ;;  %v8219_v17 = vcombine.high %v110_v4, %v114_v6  ;;  %v8216_v18 = vcombine.low %v109_v0, %v113_v1 }
  0x42   :  { %v8415_v15 = vcombine.high %v308_v9, %v312_v10  ;;  %1668 = vmatprep.subr.bf16.mxu1 %v8287_v14  ;;  %v8414_v22 = vcombine.low %v308_v9, %v312_v10  ;;  %v117_v9 = vld [vmem:[%s13438_s1 + $0x1c8] sm:$0xff]  ;;  %v118_v14 = vld [vmem:[%s13438_s1 + $0x1d0] sm:$0xff] }
  0x43   :  { %1669 = vmatpush1.bf16.msra.mxu1 %v8286_v21  ;;  %v121_v10 = vld [vmem:[%s13438_s1 + $0x1e8] sm:$0xff]  ;;  %v8218_v21 = vcombine.low %v110_v4, %v114_v6 }
  0x44   :  { %1709 = vmatprep.subr.bf16.mxu0 %v8415_v15  ;;  %1720 = vmatprep.subr.bf16.mxu1 %v8169_v23  ;;  %v122_v15 = vld [vmem:[%s13438_s1 + $0x1f0] sm:$0xff]  ;;  %v8224_v26 = vcombine.low %v117_v9, %v121_v10  ;;  %v173_v6 = vld [vmem:[%s13438_s1 + $0x388] sm:$0xff] }
  0x45   :  { %1710 = vmatpush1.bf16.msra.mxu0 %v8414_v22  ;;  %v8225_v22 = vcombine.high %v117_v9, %v121_v10  ;;  %v126_v23 = vld [vmem:[%s13438_s1 + $0x210] sm:$0xff]  ;;  %v8227_v25 = vcombine.high %v118_v14, %v122_v15 }
  0x46   :  { %1802 = vmatprep.subr.bf16.mxu0 %v8171_v24  ;;  %1671 = vmatmul.mubr.bf16.vlgmr.msra.gmra.mrb[0].mxu1 %v10160_v27  ;;  %v130_v24 = vld [vmem:[%s13438_s1 + $0x230] sm:$0xff] }
  0x47   :  { %1721 = vmatpush1.bf16.msra.mxu1 %v8168_v30  ;;  %1752 = vmatprep.mubr.bf16.mxu1 %v10042_v11  ;;  %v8226_v30 = vcombine.low %v118_v14, %v122_v15  ;;  %v8235_v63 = vcombine.high %v126_v23, %v130_v24  ;;  %v181_v15 = vld [vmem:[%s13438_s1 + $0x3c8] sm:$0xff] }
  0x48   :  { %1712 = vmatmul.mubr.bf16.vlgmr.msra.gmra.mrb[0].mxu0 %v10170_v31  ;;  %1722 = vmatprep.subr.bf16.mxu1 %v8177_v34  ;;  %v138_v34 = vld [vmem:[%s13438_s1 + $0x270] sm:$0xff] }
  0x49   :  { %1803 = vmatpush1.bf16.msra.mxu0 %v8170_v33  ;;  %1834 = vmatprep.mubr.bf16.mxu0 %v10042_v11  ;;  %v134_v33 = vld [vmem:[%s13438_s1 + $0x250] sm:$0xff] }
  0x4a   :  { %1804 = vmatprep.subr.bf16.mxu0 %v8179_v36  ;;  %v145_v36 = vld [vmem:[%s13438_s1 + $0x2a8] sm:$0xff]  ;;  %v8243_v39 = vcombine.high %v134_v33, %v138_v34 }
  0x4b   :  { %1723 = vmatpush1.bf16.msra.mxu1 %v8176_v37  ;;  %v8234_v37 = vcombine.low %v126_v23, %v130_v24  ;;  %v8249_v47 = vcombine.high %v141_v5, %v145_v36  ;;  %v8248_v51 = vcombine.low %v141_v5, %v145_v36  ;;  %v189_v24 = vld [vmem:[%s13438_s1 + $0x408] sm:$0xff] }
  0x4c   :  { %1724 = vmatprep.subr.bf16.mxu1 %v8185_v41  ;;  %v146_v41 = vld [vmem:[%s13438_s1 + $0x2b0] sm:$0xff] }
  0x4d   :  { %1805 = vmatpush1.bf16.msra.mxu0 %v8178_v40  ;;  %v142_v40 = vld [vmem:[%s13438_s1 + $0x290] sm:$0xff] }
  0x4e   :  { %1806 = vmatprep.subr.bf16.mxu0 %v8187_v45  ;;  %v153_v45 = vld [vmem:[%s13438_s1 + $0x2e8] sm:$0xff]  ;;  %v8251_v48 = vcombine.high %v142_v40, %v146_v41 }
  0x4f   :  { %1725 = vmatpush1.bf16.msra.mxu1 %v8184_v46  ;;  %v8242_v46 = vcombine.low %v134_v33, %v138_v34  ;;  %v8257_v55 = vcombine.high %v149_v43, %v153_v45  ;;  %v8256_v59 = vcombine.low %v149_v43, %v153_v45  ;;  %v197_v33 = vld [vmem:[%s13438_s1 + $0x448] sm:$0xff] }
  0x50   :  { %1726 = vmatprep.subr.bf16.mxu1 %v8193_v50  ;;  %v154_v50 = vld [vmem:[%s13438_s1 + $0x2f0] sm:$0xff]  ;;  %v201_v34 = vld [vmem:[%s13438_s1 + $0x468] sm:$0xff] }
  0x51   :  { %1807 = vmatpush1.bf16.msra.mxu0 %v8186_v49  ;;  %v150_v49 = vld [vmem:[%s13438_s1 + $0x2d0] sm:$0xff]  ;;  %v8305_v43 = vcombine.high %v197_v33, %v201_v34 }
  0x52   :  { %1808 = vmatprep.subr.bf16.mxu0 %v8195_v53  ;;  %v161_v53 = vld [vmem:[%s13438_s1 + $0x328] sm:$0xff]  ;;  %v8259_v56 = vcombine.high %v150_v49, %v154_v50 }
  0x53   :  { %1727 = vmatpush1.bf16.msra.mxu1 %v8192_v54  ;;  %v8250_v54 = vcombine.low %v142_v40, %v146_v41  ;;  %v8265_v0 = vcombine.high %v157_v52, %v161_v53  ;;  %v8264_v4 = vcombine.low %v157_v52, %v161_v53  ;;  %v205_v40 = vld [vmem:[%s13438_s1 + $0x488] sm:$0xff] }
  0x54   :  { %1728 = vmatprep.subr.bf16.mxu1 %v8201_v58  ;;  %v162_v58 = vld [vmem:[%s13438_s1 + $0x330] sm:$0xff]  ;;  %v209_v41 = vld [vmem:[%s13438_s1 + $0x4a8] sm:$0xff] }
  0x55   :  { %1809 = vmatpush1.bf16.msra.mxu0 %v8194_v57  ;;  %v158_v57 = vld [vmem:[%s13438_s1 + $0x310] sm:$0xff]  ;;  %v8313_v52 = vcombine.high %v205_v40, %v209_v41 }
  0x56   :  { %1810 = vmatprep.subr.bf16.mxu0 %v8203_v61  ;;  %v169_v61 = vld [vmem:[%s13438_s1 + $0x368] sm:$0xff]  ;;  %v8267_v1 = vcombine.high %v158_v57, %v162_v58 }
  0x57   :  { %1729 = vmatpush1.bf16.msra.mxu1 %v8200_v62  ;;  %v8258_v62 = vcombine.low %v150_v49, %v154_v50  ;;  %v8273_v9 = vcombine.high %v165_v60, %v169_v61  ;;  %v8272_v14 = vcombine.low %v165_v60, %v169_v61  ;;  %v213_v49 = vld [vmem:[%s13438_s1 + $0x4c8] sm:$0xff] }
  0x58   :  { %1730 = vmatprep.subr.bf16.mxu1 %v8209_v3  ;;  %v170_v3 = vld [vmem:[%s13438_s1 + $0x370] sm:$0xff]  ;;  %v217_v50 = vld [vmem:[%s13438_s1 + $0x4e8] sm:$0xff] }
  0x59   :  { %1811 = vmatpush1.bf16.msra.mxu0 %v8202_v2  ;;  %v166_v2 = vld [vmem:[%s13438_s1 + $0x350] sm:$0xff]  ;;  %v8321_v60 = vcombine.high %v213_v49, %v217_v50 }
  0x5a   :  { %1812 = vmatprep.subr.bf16.mxu0 %v8211_v7  ;;  %v177_v7 = vld [vmem:[%s13438_s1 + $0x3a8] sm:$0xff]  ;;  %v8275_v10 = vcombine.high %v166_v2, %v170_v3 }
  0x5b   :  { %1731 = vmatpush1.bf16.msra.mxu1 %v8208_v8  ;;  %v8266_v8 = vcombine.low %v158_v57, %v162_v58  ;;  %v8281_v19 = vcombine.high %v173_v6, %v177_v7  ;;  %v8280_v23 = vcombine.low %v173_v6, %v177_v7  ;;  %v221_v57 = vld [vmem:[%s13438_s1 + $0x508] sm:$0xff] }
  0x5c   :  { %1732 = vmatprep.subr.bf16.mxu1 %v8217_v13  ;;  %v178_v13 = vld [vmem:[%s13438_s1 + $0x3b0] sm:$0xff]  ;;  %v225_v58 = vld [vmem:[%s13438_s1 + $0x528] sm:$0xff] }
  0x5d   :  { %1813 = vmatpush1.bf16.msra.mxu0 %v8210_v12  ;;  %v174_v12 = vld [vmem:[%s13438_s1 + $0x390] sm:$0xff]  ;;  %v8329_v6 = vcombine.high %v221_v57, %v225_v58 }
  0x5e   :  { %1814 = vmatprep.subr.bf16.mxu0 %v8219_v17  ;;  %v185_v17 = vld [vmem:[%s13438_s1 + $0x3e8] sm:$0xff]  ;;  %v8283_v20 = vcombine.high %v174_v12, %v178_v13 }
  0x5f   :  { %1733 = vmatpush1.bf16.msra.mxu1 %v8216_v18  ;;  %v8274_v18 = vcombine.low %v166_v2, %v170_v3  ;;  %v8289_v28 = vcombine.high %v181_v15, %v185_v17  ;;  %v229_v2 = vld [vmem:[%s13438_s1 + $0x548] sm:$0xff] }
  0x60   :  { %1734 = vmatprep.subr.bf16.mxu1 %v8225_v22  ;;  %v186_v22 = vld [vmem:[%s13438_s1 + $0x3f0] sm:$0xff]  ;;  %v233_v3 = vld [vmem:[%s13438_s1 + $0x568] sm:$0xff] }
  0x61   :  { %1815 = vmatpush1.bf16.msra.mxu0 %v8218_v21  ;;  %v182_v21 = vld [vmem:[%s13438_s1 + $0x3d0] sm:$0xff] }
  0x62   :  { %1816 = vmatprep.subr.bf16.mxu0 %v8227_v25  ;;  %v193_v25 = vld [vmem:[%s13438_s1 + $0x428] sm:$0xff]  ;;  %v8291_v29 = vcombine.high %v182_v21, %v186_v22 }
  0x63   :  { %1735 = vmatpush1.bf16.msra.mxu1 %v8224_v26  ;;  %v8282_v26 = vcombine.low %v174_v12, %v178_v13  ;;  %v8297_v5 = vcombine.high %v189_v24, %v193_v25  ;;  %v237_v12 = vld [vmem:[%s13438_s1 + $0x588] sm:$0xff] }
  0x64   :  { %1736 = vmatprep.subr.bf16.mxu1 %v8233_v32  ;;  %v194_v32 = vld [vmem:[%s13438_s1 + $0x430] sm:$0xff]  ;;  %v241_v13 = vld [vmem:[%s13438_s1 + $0x5a8] sm:$0xff] }
  0x65   :  { %1817 = vmatpush1.bf16.msra.mxu0 %v8226_v30  ;;  %v190_v30 = vld [vmem:[%s13438_s1 + $0x410] sm:$0xff] }
  0x66   :  { %1818 = vmatprep.subr.bf16.mxu0 %v8235_v63  ;;  %v8288_v63 = vcombine.low %v181_v15, %v185_v17  ;;  %v8299_v36 = vcombine.high %v190_v30, %v194_v32  ;;  %v8337_v15 = vcombine.high %v229_v2, %v233_v3 }
  0x67   :  { %1737 = vmatpush1.bf16.msra.mxu1 %v8232_v35  ;;  %v8290_v35 = vcombine.low %v182_v21, %v186_v22  ;;  %v8345_v22 = vcombine.high %v237_v12, %v241_v13 }
  0x68   :  { %1738 = vmatprep.subr.bf16.mxu1 %v8241_v38  ;;  %v202_v38 = vld [vmem:[%s13438_s1 + $0x470] sm:$0xff] }
  0x69   :  { %1819 = vmatpush1.bf16.msra.mxu0 %v8234_v37  ;;  %v198_v37 = vld [vmem:[%s13438_s1 + $0x450] sm:$0xff] }
  0x6a   :  { %1820 = vmatprep.subr.bf16.mxu0 %v8243_v39  ;;  %v8296_v39 = vcombine.low %v189_v24, %v193_v25  ;;  %v8307_v45 = vcombine.high %v198_v37, %v202_v38  ;;  %v249_v24 = vld [vmem:[%s13438_s1 + $0x5e8] sm:$0xff] }
  0x6b   :  { %1739 = vmatpush1.bf16.msra.mxu1 %v8240_v42  ;;  %v8298_v42 = vcombine.low %v190_v30, %v194_v32 }
  0x6c   :  { %1740 = vmatprep.subr.bf16.mxu1 %v8249_v47  ;;  %v210_v47 = vld [vmem:[%s13438_s1 + $0x4b0] sm:$0xff] }
  0x6d   :  { %1821 = vmatpush1.bf16.msra.mxu0 %v8242_v46  ;;  %v206_v46 = vld [vmem:[%s13438_s1 + $0x490] sm:$0xff] }
  0x6e   :  { %1822 = vmatprep.subr.bf16.mxu0 %v8251_v48  ;;  %v8304_v48 = vcombine.low %v197_v33, %v201_v34  ;;  %v8315_v53 = vcombine.high %v206_v46, %v210_v47  ;;  %v257_v33 = vld [vmem:[%s13438_s1 + $0x628] sm:$0xff] }
  0x6f   :  { %1741 = vmatpush1.bf16.msra.mxu1 %v8248_v51  ;;  %v8306_v51 = vcombine.low %v198_v37, %v202_v38  ;;  %v261_v37 = vld [vmem:[%s13438_s1 + $0x648] sm:$0xff] }
  0x70   :  { %1742 = vmatprep.subr.bf16.mxu1 %v8257_v55  ;;  %v218_v55 = vld [vmem:[%s13438_s1 + $0x4f0] sm:$0xff]  ;;  %v265_v38 = vld [vmem:[%s13438_s1 + $0x668] sm:$0xff] }
  0x71   :  { %1823 = vmatpush1.bf16.msra.mxu0 %v8250_v54  ;;  %v214_v54 = vld [vmem:[%s13438_s1 + $0x4d0] sm:$0xff] }
  0x72   :  { %1824 = vmatprep.subr.bf16.mxu0 %v8259_v56  ;;  %v8312_v56 = vcombine.low %v205_v40, %v209_v41  ;;  %v8323_v61 = vcombine.high %v214_v54, %v218_v55  ;;  %v262_v41 = vld [vmem:[%s13438_s1 + $0x650] sm:$0xff] }
  0x73   :  { %1743 = vmatpush1.bf16.msra.mxu1 %v8256_v59  ;;  %v8314_v59 = vcombine.low %v206_v46, %v210_v47  ;;  %v269_v46 = vld [vmem:[%s13438_s1 + $0x688] sm:$0xff] }
  0x74   :  { %1744 = vmatprep.subr.bf16.mxu1 %v8265_v0  ;;  %v226_v0 = vld [vmem:[%s13438_s1 + $0x530] sm:$0xff]  ;;  %v273_v47 = vld [vmem:[%s13438_s1 + $0x6a8] sm:$0xff] }
  0x75   :  { %1825 = vmatpush1.bf16.msra.mxu0 %v8258_v62  ;;  %v222_v62 = vld [vmem:[%s13438_s1 + $0x510] sm:$0xff] }
  0x76   :  { %1826 = vmatprep.subr.bf16.mxu0 %v8267_v1  ;;  %v8320_v1 = vcombine.low %v213_v49, %v217_v50  ;;  %v8331_v7 = vcombine.high %v222_v62, %v226_v0  ;;  %v8369_v49 = vcombine.high %v261_v37, %v265_v38  ;;  %v270_v50 = vld [vmem:[%s13438_s1 + $0x690] sm:$0xff] }
  0x77   :  { %1745 = vmatpush1.bf16.msra.mxu1 %v8264_v4  ;;  %v8322_v4 = vcombine.low %v214_v54, %v218_v55  ;;  %v277_v54 = vld [vmem:[%s13438_s1 + $0x6c8] sm:$0xff] }
  0x78   :  { %1746 = vmatprep.subr.bf16.mxu1 %v8273_v9  ;;  %v234_v9 = vld [vmem:[%s13438_s1 + $0x570] sm:$0xff]  ;;  %v281_v55 = vld [vmem:[%s13438_s1 + $0x6e8] sm:$0xff] }
  0x79   :  { %1827 = vmatpush1.bf16.msra.mxu0 %v8266_v8  ;;  %v230_v8 = vld [vmem:[%s13438_s1 + $0x550] sm:$0xff] }
  0x7a   :  { %1828 = vmatprep.subr.bf16.mxu0 %v8275_v10  ;;  %v8328_v10 = vcombine.low %v221_v57, %v225_v58  ;;  %v8339_v17 = vcombine.high %v230_v8, %v234_v9  ;;  %v8338_v21 = vcombine.low %v230_v8, %v234_v9  ;;  %v8377_v57 = vcombine.high %v269_v46, %v273_v47  ;;  %v278_v58 = vld [vmem:[%s13438_s1 + $0x6d0] sm:$0xff]  ;;  %v293_v8 = vld [vmem:[%s13438_s1 + $0x748] sm:$0xff] }
  0x7b   :  { %1747 = vmatpush1.bf16.msra.mxu1 %v8272_v14  ;;  %v8330_v14 = vcombine.low %v222_v62, %v226_v0  ;;  %v285_v62 = vld [vmem:[%s13438_s1 + $0x708] sm:$0xff] }
  0x7c   :  { %1748 = vmatprep.subr.bf16.mxu1 %v8281_v19  ;;  %v242_v19 = vld [vmem:[%s13438_s1 + $0x5b0] sm:$0xff]  ;;  %v289_v0 = vld [vmem:[%s13438_s1 + $0x728] sm:$0xff] }
  0x7d   :  { %1829 = vmatpush1.bf16.msra.mxu0 %v8274_v18  ;;  %v238_v18 = vld [vmem:[%s13438_s1 + $0x590] sm:$0xff]  ;;  %v297_v9 = vld [vmem:[%s13438_s1 + $0x768] sm:$0xff] }
  0x7e   :  { %1830 = vmatprep.subr.bf16.mxu0 %v8283_v20  ;;  %v8336_v20 = vcombine.low %v229_v2, %v233_v3  ;;  %v8347_v25 = vcombine.high %v238_v18, %v242_v19  ;;  %v8346_v30 = vcombine.low %v238_v18, %v242_v19  ;;  %v8385_v2 = vcombine.high %v277_v54, %v281_v55  ;;  %v286_v3 = vld [vmem:[%s13438_s1 + $0x710] sm:$0xff]  ;;  %v301_v18 = vld [vmem:[%s13438_s1 + $0x788] sm:$0xff] }
  0x7f   :  { %1749 = vmatpush1.bf16.msra.mxu1 %v8280_v23  ;;  %v245_v23 = vld [vmem:[%s13438_s1 + $0x5c8] sm:$0xff] }
  0x80   :  { %1750 = vmatprep.subr.bf16.mxu1 %v8289_v28  ;;  %v250_v28 = vld [vmem:[%s13438_s1 + $0x5f0] sm:$0xff]  ;;  %v8353_v32 = vcombine.high %v245_v23, %v249_v24  ;;  %v305_v19 = vld [vmem:[%s13438_s1 + $0x7a8] sm:$0xff] }
  0x81   :  { %1831 = vmatpush1.bf16.msra.mxu0 %v8282_v26  ;;  %v246_v26 = vld [vmem:[%s13438_s1 + $0x5d0] sm:$0xff] }
  0x82   :  { %1832 = vmatprep.subr.bf16.mxu0 %v8291_v29  ;;  %v8344_v29 = vcombine.low %v237_v12, %v241_v13  ;;  %v8355_v34 = vcombine.high %v246_v26, %v250_v28  ;;  %v8393_v12 = vcombine.high %v285_v62, %v289_v0  ;;  %v294_v13 = vld [vmem:[%s13438_s1 + $0x750] sm:$0xff] }
  0x83   :  { %1751 = vmatpush1.bf16.msra.mxu1 %v8288_v63  ;;  %v253_v63 = vld [vmem:[%s13438_s1 + $0x608] sm:$0xff] }
  0x84   :  { %1761 = vmatprep.subr.bf16.mxu1 %v8297_v5  ;;  %v258_v5 = vld [vmem:[%s13438_s1 + $0x630] sm:$0xff]  ;;  %v8361_v40 = vcombine.high %v253_v63, %v257_v33 }
  0x85   :  { %1833 = vmatpush1.bf16.msra.mxu0 %v8290_v35  ;;  %v254_v35 = vld [vmem:[%s13438_s1 + $0x610] sm:$0xff] }
  0x86   :  { %1843 = vmatprep.subr.bf16.mxu0 %v8299_v36  ;;  %1753 = vmatmul.mubr.bf16.vlgmr.msra.gmra.mrb[4].mxu1 %v10160_v27  ;;  %v8352_v36 = vcombine.low %v245_v23, %v249_v24  ;;  %v306_v23 = vld [vmem:[%s13438_s1 + $0x7b0] sm:$0xff] }
  0x87   :  { %1762 = vmatpush1.bf16.msra.mxu1 %v8296_v39  ;;  %1793 = vmatprep.mubr.bf16.mxu1 %v10053_v16  ;;  %v8354_v39 = vcombine.low %v246_v26, %v250_v28  ;;  %v309_v26 = vld [vmem:[%s13438_s1 + $0x7c8] sm:$0xff] }
  0x88   :  { %1835 = vmatmul.mubr.bf16.vlgmr.msra.gmra.mrb[4].mxu0 %v10160_v27  ;;  %1763 = vmatprep.subr.bf16.mxu1 %v8305_v43  ;;  %v8363_v43 = vcombine.high %v254_v35, %v258_v5  ;;  %v313_v28 = vld [vmem:[%s13438_s1 + $0x7e8] sm:$0xff] }
  0x89   :  { %1844 = vmatpush1.bf16.msra.mxu0 %v8298_v42  ;;  %1875 = vmatprep.mubr.bf16.mxu0 %v10053_v16  ;;  %v266_v42 = vld [vmem:[%s13438_s1 + $0x670] sm:$0xff] }
  0x8a   :  { %1845 = vmatprep.subr.bf16.mxu0 %v8307_v45  ;;  %v8360_v45 = vcombine.low %v253_v63, %v257_v33  ;;  %v314_v63 = vld [vmem:[%s13438_s1 + $0x7f0] sm:$0xff] }
  0x8b   :  { %1764 = vmatpush1.bf16.msra.mxu1 %v8304_v48  ;;  %v8362_v48 = vcombine.low %v254_v35, %v258_v5  ;;  %v63_v35 = vld [vmem:[%s13438_s1 + $0x18] sm:$0xff] }
  0x8c   :  { %1765 = vmatprep.subr.bf16.mxu1 %v8313_v52  ;;  %v8371_v52 = vcombine.high %v262_v41, %v266_v42  ;;  %v67_v5 = vld [vmem:[%s13438_s1 + $0x38] sm:$0xff] }
  0x8d   :  { %1846 = vmatpush1.bf16.msra.mxu0 %v8306_v51  ;;  %v274_v51 = vld [vmem:[%s13438_s1 + $0x6b0] sm:$0xff] }
  0x8e   :  { %1847 = vmatprep.subr.bf16.mxu0 %v8315_v53  ;;  %v8368_v53 = vcombine.low %v261_v37, %v265_v38  ;;  %v8417_v37 = vcombine.high %v309_v26, %v313_v28  ;;  %v1982_v38 = vld [vmem:[%s13440_s3] sm:$0xff] }
  0x8f   :  { %1766 = vmatpush1.bf16.msra.mxu1 %v8312_v56  ;;  %v8370_v56 = vcombine.low %v262_v41, %v266_v42  ;;  %v8416_v41 = vcombine.low %v309_v26, %v313_v28  ;;  %v71_v42 = vld [vmem:[%s13438_s1 + $0x58] sm:$0xff] }
  0x90   :  { %1767 = vmatprep.subr.bf16.mxu1 %v8321_v60  ;;  %v8379_v60 = vcombine.high %v270_v50, %v274_v51 }
  0x91   :  { %1848 = vmatpush1.bf16.msra.mxu0 %v8314_v59  ;;  %v282_v59 = vld [vmem:[%s13438_s1 + $0x6f0] sm:$0xff] }
  0x92   :  { %1849 = vmatprep.subr.bf16.mxu0 %v8323_v61  ;;  %v8376_v61 = vcombine.low %v269_v46, %v273_v47  ;;  %v8173_v46 = vcombine.high %v63_v35, %v67_v5  ;;  %v1990_v47 = vld [vmem:[%s13440_s3 + $0x40] sm:$0xff] }
  0x93   :  { %1768 = vmatpush1.bf16.msra.mxu1 %v8320_v1  ;;  %v8378_v1 = vcombine.low %v270_v50, %v274_v51  ;;  %v8172_v50 = vcombine.low %v63_v35, %v67_v5  ;;  %v79_v51 = vld [vmem:[%s13438_s1 + $0x98] sm:$0xff] }
  0x94   :  { %1769 = vmatprep.subr.bf16.mxu1 %v8329_v6  ;;  %v8387_v6 = vcombine.high %v278_v58, %v282_v59 }
  0x95   :  { %1850 = vmatpush1.bf16.msra.mxu0 %v8322_v4  ;;  %v290_v4 = vld [vmem:[%s13438_s1 + $0x730] sm:$0xff] }
  0x96   :  { %1851 = vmatprep.subr.bf16.mxu0 %v8331_v7  ;;  %v8384_v7 = vcombine.low %v277_v54, %v281_v55  ;;  %v1998_v55 = vld [vmem:[%s13440_s3 + $0x80] sm:$0xff] }
  0x97   :  { %1770 = vmatpush1.bf16.msra.mxu1 %v8328_v10  ;;  %v8386_v10 = vcombine.low %v278_v58, %v282_v59  ;;  %v87_v59 = vld [vmem:[%s13438_s1 + $0xd8] sm:$0xff] }
  0x98   :  { %1771 = vmatprep.subr.bf16.mxu1 %v8337_v15  ;;  %v8395_v15 = vcombine.high %v286_v3, %v290_v4 }
  0x99   :  { %1852 = vmatpush1.bf16.msra.mxu0 %v8330_v14  ;;  %v298_v14 = vld [vmem:[%s13438_s1 + $0x770] sm:$0xff] }
  0x9a   :  { %1853 = vmatprep.subr.bf16.mxu0 %v8339_v17  ;;  %v8392_v17 = vcombine.low %v285_v62, %v289_v0  ;;  %v8403_v24 = vcombine.high %v294_v13, %v298_v14  ;;  %v2006_v0 = vld [vmem:[%s13440_s3 + $0xc0] sm:$0xff] }
  0x9b   :  { %1772 = vmatpush1.bf16.msra.mxu1 %v8336_v20  ;;  %v8394_v20 = vcombine.low %v286_v3, %v290_v4  ;;  %v95_v4 = vld [vmem:[%s13438_s1 + $0x118] sm:$0xff] }
  0x9c   :  { %1773 = vmatprep.subr.bf16.mxu1 %v8345_v22  ;;  %v302_v22 = vld [vmem:[%s13438_s1 + $0x790] sm:$0xff] }
  0x9d   :  { %1854 = vmatpush1.bf16.msra.mxu0 %v8338_v21  ;;  %v8401_v21 = vcombine.high %v293_v8, %v297_v9  ;;  %v8411_v33 = vcombine.high %v302_v22, %v306_v23 }
  0x9e   :  { %1855 = vmatprep.subr.bf16.mxu0 %v8347_v25  ;;  %v8400_v25 = vcombine.low %v293_v8, %v297_v9  ;;  %v2014_v9 = vld [vmem:[%s13440_s3 + $0x100] sm:$0xff] }
  0x9f   :  { %1774 = vmatpush1.bf16.msra.mxu1 %v8344_v29  ;;  %v8402_v29 = vcombine.low %v294_v13, %v298_v14 }
  0xa0   :  { %1775 = vmatprep.subr.bf16.mxu1 %v8353_v32  ;;  %v310_v32 = vld [vmem:[%s13438_s1 + $0x7d0] sm:$0xff] }
  0xa1   :  { %1856 = vmatpush1.bf16.msra.mxu0 %v8346_v30  ;;  %v8409_v30 = vcombine.high %v301_v18, %v305_v19 }
  0xa2   :  { %1857 = vmatprep.subr.bf16.mxu0 %v8355_v34  ;;  %v8408_v34 = vcombine.low %v301_v18, %v305_v19 }
  0xa3   :  { %1776 = vmatpush1.bf16.msra.mxu1 %v8352_v36  ;;  %v8410_v36 = vcombine.low %v302_v22, %v306_v23 }
  0xa4   :  { %1777 = vmatprep.subr.bf16.mxu1 %v8361_v40  ;;  %v8419_v40 = vcombine.high %v310_v32, %v314_v63 }
  0xa5   :  { %1858 = vmatpush1.bf16.msra.mxu0 %v8354_v39  ;;  %v1986_v39 = vld [vmem:[%s13440_s3 + $0x20] sm:$0xff] }
  0xa6   :  { %1859 = vmatprep.subr.bf16.mxu0 %v8363_v43  ;;  %v75_v43 = vld [vmem:[%s13438_s1 + $0x78] sm:$0xff]  ;;  %v8422_v54 = vcombine.low %v1982_v38, %v1986_v39 }
  0xa7   :  { %1778 = vmatpush1.bf16.msra.mxu1 %v8360_v45  ;;  %v8418_v45 = vcombine.low %v310_v32, %v314_v63  ;;  %v8180_v58 = vcombine.low %v71_v42, %v75_v43 }
  0xa8   :  { %1779 = vmatprep.subr.bf16.mxu1 %v8369_v49  ;;  %v8423_v49 = vcombine.high %v1982_v38, %v1986_v39 }
  0xa9   :  { %1860 = vmatpush1.bf16.msra.mxu0 %v8362_v48  ;;  %v1994_v48 = vld [vmem:[%s13440_s3 + $0x60] sm:$0xff] }
  0xaa   :  { %1861 = vmatprep.subr.bf16.mxu0 %v8371_v52  ;;  %v83_v52 = vld [vmem:[%s13438_s1 + $0xb8] sm:$0xff]  ;;  %v8430_v62 = vcombine.low %v1990_v47, %v1994_v48 }
  0xab   :  { %1780 = vmatpush1.bf16.msra.mxu1 %v8368_v53  ;;  %v8181_v53 = vcombine.high %v71_v42, %v75_v43  ;;  %v8188_v3 = vcombine.low %v79_v51, %v83_v52 }
  0xac   :  { %1781 = vmatprep.subr.bf16.mxu1 %v8377_v57  ;;  %v8431_v57 = vcombine.high %v1990_v47, %v1994_v48 }
  0xad   :  { %1862 = vmatpush1.bf16.msra.mxu0 %v8370_v56  ;;  %v2002_v56 = vld [vmem:[%s13440_s3 + $0xa0] sm:$0xff] }
  0xae   :  { %1863 = vmatprep.subr.bf16.mxu0 %v8379_v60  ;;  %v91_v60 = vld [vmem:[%s13438_s1 + $0xf8] sm:$0xff]  ;;  %v8438_v8 = vcombine.low %v1998_v55, %v2002_v56 }
  0xaf   :  { %1782 = vmatpush1.bf16.msra.mxu1 %v8376_v61  ;;  %v8189_v61 = vcombine.high %v79_v51, %v83_v52 }
  0xb0   :  { %1783 = vmatprep.subr.bf16.mxu1 %v8385_v2  ;;  %v8439_v2 = vcombine.high %v1998_v55, %v2002_v56 }
  0xb1   :  { %1864 = vmatpush1.bf16.msra.mxu0 %v8378_v1  ;;  %v2010_v1 = vld [vmem:[%s13440_s3 + $0xe0] sm:$0xff] }
  0xb2   :  { %1865 = vmatprep.subr.bf16.mxu0 %v8387_v6  ;;  %v99_v6 = vld [vmem:[%s13438_s1 + $0x138] sm:$0xff]  ;;  %v8446_v14 = vcombine.low %v2006_v0, %v2010_v1 }
  0xb3   :  { %1784 = vmatpush1.bf16.msra.mxu1 %v8384_v7  ;;  %v8197_v7 = vcombine.high %v87_v59, %v91_v60  ;;  %v8205_v13 = vcombine.high %v95_v4, %v99_v6 }
  0xb4   :  { %1785 = vmatprep.subr.bf16.mxu1 %v8393_v12  ;;  %v8196_v12 = vcombine.low %v87_v59, %v91_v60 }
  0xb5   :  { %1866 = vmatpush1.bf16.msra.mxu0 %v8386_v10  ;;  %v8447_v10 = vcombine.high %v2006_v0, %v2010_v1 }
  0xb6   :  { %1867 = vmatprep.subr.bf16.mxu0 %v8395_v15  ;;  %v103_v15 = vld [vmem:[%s13438_s1 + $0x158] sm:$0xff] }
  0xb7   :  { %1786 = vmatpush1.bf16.msra.mxu1 %v8392_v17  ;;  %v107_v17 = vld [vmem:[%s13438_s1 + $0x178] sm:$0xff] }
  0xb8   :  { %1787 = vmatprep.subr.bf16.mxu1 %v8401_v21 }
  0xb9   :  { %1868 = vmatpush1.bf16.msra.mxu0 %v8394_v20 }
  0xba   :  { %1869 = vmatprep.subr.bf16.mxu0 %v8403_v24 }
  0xbb   :  { %1788 = vmatpush1.bf16.msra.mxu1 %v8400_v25 }
  0xbc   :  { %1789 = vmatprep.subr.bf16.mxu1 %v8409_v30 }
  0xbd   :  { %1870 = vmatpush1.bf16.msra.mxu0 %v8402_v29 }
  0xbe   :  { %1871 = vmatprep.subr.bf16.mxu0 %v8411_v33 }
  0xbf   :  { %1790 = vmatpush1.bf16.msra.mxu1 %v8408_v34 }
  0xc0   :  { %1791 = vmatprep.subr.bf16.mxu1 %v8417_v37 }
  0xc1   :  { %1872 = vmatpush1.bf16.msra.mxu0 %v8410_v36 }
  0xc2   :  { %1873 = vmatprep.subr.bf16.mxu0 %v8419_v40 }
  0xc3   :  { %1792 = vmatpush1.bf16.msra.mxu1 %v8416_v41 }
  0xc4   :  { %1884 = vmatprep.subr.bf16.mxu1 %v8173_v46 }
  0xc5   :  { %1874 = vmatpush1.bf16.msra.mxu0 %v8418_v45 }
  0xc6   :  { %5096 = vmatprep.subr.bf16.mxu0 %v8423_v49  ;;  %1794 = vmatmul.mubr.bf16.vlgmr.msra.gmra.mrb[4].mxu1 %v10170_v31 }
  0xc7   :  { %1885 = vmatpush1.bf16.msra.mxu1 %v8172_v50  ;;  %1916 = vmatprep.mubr.bf16.mxu1 %v10042_v11  ;;  %v2018_v11 = vld [vmem:[%s13440_s3 + $0x120] sm:$0xff] }
  0xc8   :  { %1876 = vmatmul.mubr.bf16.vlgmr.msra.gmra.mrb[4].mxu0 %v10170_v31  ;;  %1886 = vmatprep.subr.bf16.mxu1 %v8181_v53  ;;  %v8455_v18 = vcombine.high %v2014_v9, %v2018_v11 }
  0xc9   :  { %5097 = vmatpush1.bf16.msra.mxu0 %v8422_v54 }
  0xca   :  { %5098 = vmatprep.subr.bf16.mxu0 %v8431_v57 }
  0xcb   :  { %1887 = vmatpush1.bf16.msra.mxu1 %v8180_v58 }
  0xcc   :  { %1888 = vmatprep.subr.bf16.mxu1 %v8189_v61 }
  0xcd   :  { %5099 = vmatpush1.bf16.msra.mxu0 %v8430_v62 }
  0xce   :  { %5100 = vmatprep.subr.bf16.mxu0 %v8439_v2 }
  0xcf   :  { %1889 = vmatpush1.bf16.msra.mxu1 %v8188_v3 }
  0xd0   :  { %1890 = vmatprep.subr.bf16.mxu1 %v8197_v7 }
  0xd1   :  { %5101 = vmatpush1.bf16.msra.mxu0 %v8438_v8 }
  0xd2   :  { %5102 = vmatprep.subr.bf16.mxu0 %v8447_v10 }
  0xd3   :  { %14 = vsyncpa [#allocation3], 0  ;;  %v2022_v19 = vld [vmem:[%s13440_s3 + $0x140] sm:$0xff]  ;;  %1891 = vmatpush1.bf16.msra.mxu1 %v8196_v12  ;;  %v8204_v21 = vcombine.low %v95_v4, %v99_v6  ;;  %v8213_v22 = vcombine.high %v103_v15, %v107_v17  ;;  %v8454_v23 = vcombine.low %v2014_v9, %v2018_v11  ;;  %v111_v24 = vld [vmem:[%s13438_s1 + $0x198] sm:$0xff]  ;;  %v8212_v30 = vcombine.low %v103_v15, %v107_v17  ;;  %s9877_s18 = smov [#allocation2]  }
  0xd4   :  { %v2026_v20 = vld [vmem:[%s13440_s3 + $0x160] sm:$0xff]  ;;  %1892 = vmatprep.subr.bf16.mxu1 %v8205_v13  ;;  %v115_v25 = vld [vmem:[%s13438_s1 + $0x1b8] sm:$0xff]  ;;  %s8158_s19 = sshll.u32 %s9877_s18, 4  ;;  %s8159_s19 = int_to_ptr.vmem [resolvable:$true] %s8158_s19 }
  0xd5   :  { %5103 = vmatpush1.bf16.msra.mxu0 %v8446_v14  ;;  %v8463_v26 = vcombine.high %v2022_v19, %v2026_v20  ;;  %v2030_v28 = vld [vmem:[%s13440_s3 + $0x180] sm:$0xff]  ;;  %v8221_v32 = vcombine.high %v111_v24, %v115_v25  ;;  %v8462_v63 = vcombine.low %v2022_v19, %v2026_v20  ;;  %v119_v33 = vld [vmem:[%s13438_s1 + $0x1d8] sm:$0xff]  ;;  %v8220_v37 = vcombine.low %v111_v24, %v115_v25  ;;  %p9857_p1 = scmp.lt.s32.totalorder %s8159_s19, %s8159_s19 }
  0xd6   :  { %5104 = vmatprep.subr.bf16.mxu0 %v8455_v18  ;;  %v2034_v29 = vld [vmem:[%s13440_s3 + $0x1a0] sm:$0xff]  ;;  %v123_v34 = vld [vmem:[%s13438_s1 + $0x1f8] sm:$0xff] }
  0xd7   :  { %1893 = vmatpush1.bf16.msra.mxu1 %v8204_v21  ;;  %v8471_v35 = vcombine.high %v2030_v28, %v2034_v29  ;;  %v2038_v5 = vld [vmem:[%s13440_s3 + $0x1c0] sm:$0xff]  ;;  %v8229_v38 = vcombine.high %v119_v33, %v123_v34  ;;  %v8470_v39 = vcombine.low %v2030_v28, %v2034_v29  ;;  %v127_v40 = vld [vmem:[%s13438_s1 + $0x218] sm:$0xff]  ;;  %v8228_v46 = vcombine.low %v119_v33, %v123_v34 }
  0xd8   :  { %1894 = vmatprep.subr.bf16.mxu1 %v8213_v22  ;;  %v2042_v36 = vld [vmem:[%s13440_s3 + $0x1e0] sm:$0xff]  ;;  %v131_v41 = vld [vmem:[%s13438_s1 + $0x238] sm:$0xff] }
  0xd9   :  { %5105 = vmatpush1.bf16.msra.mxu0 %v8454_v23  ;;  %v8479_v42 = vcombine.high %v2038_v5, %v2042_v36  ;;  %v2046_v43 = vld [vmem:[%s13440_s3 + $0x200] sm:$0xff]  ;;  %v8237_v47 = vcombine.high %v127_v40, %v131_v41  ;;  %v8478_v48 = vcombine.low %v2038_v5, %v2042_v36  ;;  %v135_v49 = vld [vmem:[%s13438_s1 + $0x258] sm:$0xff]  ;;  %v8236_v54 = vcombine.low %v127_v40, %v131_v41 }
  0xda   :  { %5106 = vmatprep.subr.bf16.mxu0 %v8463_v26  ;;  %v2050_v45 = vld [vmem:[%s13440_s3 + $0x220] sm:$0xff]  ;;  %v139_v50 = vld [vmem:[%s13438_s1 + $0x278] sm:$0xff] }
  0xdb   :  { %1895 = vmatpush1.bf16.msra.mxu1 %v8212_v30  ;;  %v8487_v51 = vcombine.high %v2046_v43, %v2050_v45  ;;  %v2054_v52 = vld [vmem:[%s13440_s3 + $0x240] sm:$0xff]  ;;  %v8245_v55 = vcombine.high %v135_v49, %v139_v50  ;;  %v8486_v56 = vcombine.low %v2046_v43, %v2050_v45  ;;  %v143_v57 = vld [vmem:[%s13438_s1 + $0x298] sm:$0xff]  ;;  %v8244_v62 = vcombine.low %v135_v49, %v139_v50 }
  0xdc   :  { %1896 = vmatprep.subr.bf16.mxu1 %v8221_v32  ;;  %v2058_v53 = vld [vmem:[%s13440_s3 + $0x260] sm:$0xff]  ;;  %v147_v58 = vld [vmem:[%s13438_s1 + $0x2b8] sm:$0xff] }
  0xdd   :  { %5107 = vmatpush1.bf16.msra.mxu0 %v8462_v63  ;;  %v8495_v59 = vcombine.high %v2054_v52, %v2058_v53  ;;  %v2062_v60 = vld [vmem:[%s13440_s3 + $0x280] sm:$0xff]  ;;  %v8253_v0 = vcombine.high %v143_v57, %v147_v58  ;;  %v8494_v1 = vcombine.low %v2054_v52, %v2058_v53  ;;  %v151_v2 = vld [vmem:[%s13438_s1 + $0x2d8] sm:$0xff]  ;;  %v8252_v8 = vcombine.low %v143_v57, %v147_v58 }
  0xde   :  { %5108 = vmatprep.subr.bf16.mxu0 %v8471_v35  ;;  %v2066_v61 = vld [vmem:[%s13440_s3 + $0x2a0] sm:$0xff]  ;;  %v155_v3 = vld [vmem:[%s13438_s1 + $0x2f8] sm:$0xff] }
  0xdf   :  { %1897 = vmatpush1.bf16.msra.mxu1 %v8220_v37  ;;  %v8503_v4 = vcombine.high %v2062_v60, %v2066_v61  ;;  %v2070_v6 = vld [vmem:[%s13440_s3 + $0x2c0] sm:$0xff]  ;;  %v8261_v9 = vcombine.high %v151_v2, %v155_v3  ;;  %v8502_v11 = vcombine.low %v2062_v60, %v2066_v61  ;;  %v159_v10 = vld [vmem:[%s13438_s1 + $0x318] sm:$0xff]  ;;  %v8260_v17 = vcombine.low %v151_v2, %v155_v3 }
  0xe0   :  { %1898 = vmatprep.subr.bf16.mxu1 %v8229_v38  ;;  %v2074_v7 = vld [vmem:[%s13440_s3 + $0x2e0] sm:$0xff]  ;;  %v163_v12 = vld [vmem:[%s13438_s1 + $0x338] sm:$0xff] }
  0xe1   :  { %5109 = vmatpush1.bf16.msra.mxu0 %v8470_v39  ;;  %v8511_v13 = vcombine.high %v2070_v6, %v2074_v7  ;;  %v2078_v14 = vld [vmem:[%s13440_s3 + $0x300] sm:$0xff]  ;;  %v8269_v18 = vcombine.high %v159_v10, %v163_v12  ;;  %v8510_v19 = vcombine.low %v2070_v6, %v2074_v7  ;;  %v167_v20 = vld [vmem:[%s13438_s1 + $0x358] sm:$0xff]  ;;  %v8268_v25 = vcombine.low %v159_v10, %v163_v12 }
  0xe2   :  { %5110 = vmatprep.subr.bf16.mxu0 %v8479_v42  ;;  %v2082_v15 = vld [vmem:[%s13440_s3 + $0x320] sm:$0xff]  ;;  %v171_v21 = vld [vmem:[%s13438_s1 + $0x378] sm:$0xff]  ;;  %v10794_v10 = vsub.s32 1, %v9994_v44 }
  0xe3   :  { %1899 = vmatpush1.bf16.msra.mxu1 %v8228_v46  ;;  %v8519_v22 = vcombine.high %v2078_v14, %v2082_v15  ;;  %v2086_v23 = vld [vmem:[%s13440_s3 + $0x340] sm:$0xff]  ;;  %v8277_v26 = vcombine.high %v167_v20, %v171_v21  ;;  %v8518_v28 = vcombine.low %v2078_v14, %v2082_v15  ;;  %v175_v29 = vld [vmem:[%s13438_s1 + $0x398] sm:$0xff]  ;;  %v8276_v34 = vcombine.low %v167_v20, %v171_v21 }
  0xe4   :  { %1900 = vmatprep.subr.bf16.mxu1 %v8237_v47  ;;  %v2090_v24 = vld [vmem:[%s13440_s3 + $0x360] sm:$0xff]  ;;  %v179_v30 = vld [vmem:[%s13438_s1 + $0x3b8] sm:$0xff] }
  0xe5   :  { %5111 = vmatpush1.bf16.msra.mxu0 %v8478_v48  ;;  %v8527_v32 = vcombine.high %v2086_v23, %v2090_v24  ;;  %v2094_v63 = vld [vmem:[%s13440_s3 + $0x380] sm:$0xff]  ;;  %v8285_v35 = vcombine.high %v175_v29, %v179_v30  ;;  %v8526_v5 = vcombine.low %v2086_v23, %v2090_v24  ;;  %v183_v36 = vld [vmem:[%s13438_s1 + $0x3d8] sm:$0xff]  ;;  %v8284_v41 = vcombine.low %v175_v29, %v179_v30 }
  0xe6   :  { %5112 = vmatprep.subr.bf16.mxu0 %v8487_v51  ;;  %v2098_v33 = vld [vmem:[%s13440_s3 + $0x3a0] sm:$0xff]  ;;  %v187_v37 = vld [vmem:[%s13438_s1 + $0x3f8] sm:$0xff] }
  0xe7   :  { %1901 = vmatpush1.bf16.msra.mxu1 %v8236_v54  ;;  %v8535_v38 = vcombine.high %v2094_v63, %v2098_v33  ;;  %v2102_v39 = vld [vmem:[%s13440_s3 + $0x3c0] sm:$0xff]  ;;  %v8293_v42 = vcombine.high %v183_v36, %v187_v37  ;;  %v8534_v43 = vcombine.low %v2094_v63, %v2098_v33  ;;  %v191_v45 = vld [vmem:[%s13438_s1 + $0x418] sm:$0xff]  ;;  %v8292_v50 = vcombine.low %v183_v36, %v187_v37 }
  0xe8   :  { %1902 = vmatprep.subr.bf16.mxu1 %v8245_v55  ;;  %v2106_v40 = vld [vmem:[%s13440_s3 + $0x3e0] sm:$0xff]  ;;  %v195_v46 = vld [vmem:[%s13438_s1 + $0x438] sm:$0xff] }
  0xe9   :  { %5113 = vmatpush1.bf16.msra.mxu0 %v8486_v56  ;;  %v8543_v47 = vcombine.high %v2102_v39, %v2106_v40  ;;  %v10744_v48 = vld [vmem:[%s13440_s3 + $0x400] sm:$0xff]  ;;  %v8301_v51 = vcombine.high %v191_v45, %v195_v46  ;;  %v8542_v52 = vcombine.low %v2102_v39, %v2106_v40  ;;  %v199_v53 = vld [vmem:[%s13438_s1 + $0x458] sm:$0xff]  ;;  %v8300_v56 = vcombine.low %v191_v45, %v195_v46 }
  0xea   :  { %5114 = vmatprep.subr.bf16.mxu0 %v8495_v59  ;;  %v10749_v49 = vld [vmem:[%s13440_s3 + $0x420] sm:$0xff]  ;;  %v203_v54 = vld [vmem:[%s13438_s1 + $0x478] sm:$0xff] }
  0xeb   :  { %1903 = vmatpush1.bf16.msra.mxu1 %v8244_v62  ;;  %v8551_v55 = vcombine.high %v10744_v48, %v10749_v49  ;;  %v8309_v57 = vcombine.high %v199_v53, %v203_v54  ;;  %v207_v58 = vld [vmem:[%s13438_s1 + $0x498] sm:$0xff]  ;;  %v8308_v60 = vcombine.low %v199_v53, %v203_v54  ;;  %v2118_v39 = vld [vmem:[%s13440_s3 + $0x440] sm:$0xff]  ;;  %v8550_v53 = vcombine.low %v10744_v48, %v10749_v49 }
  0xec   :  { %1904 = vmatprep.subr.bf16.mxu1 %v8253_v0  ;;  %v211_v59 = vld [vmem:[%s13438_s1 + $0x4b8] sm:$0xff]  ;;  %v10832_v45 = vld [vmem:[%s13440_s3 + $0x820] sm:$0xff] }
  0xed   :  { %5115 = vmatpush1.bf16.msra.mxu0 %v8494_v1  ;;  %v8317_v61 = vcombine.high %v207_v58, %v211_v59  ;;  %v215_v62 = vld [vmem:[%s13438_s1 + $0x4d8] sm:$0xff]  ;;  %v8316_v1 = vcombine.low %v207_v58, %v211_v59  ;;  %v2130_v58 = vld [vmem:[%s13440_s3 + $0x4a0] sm:$0xff] }
  0xee   :  { %5116 = vmatprep.subr.bf16.mxu0 %v8503_v4  ;;  %v219_v0 = vld [vmem:[%s13438_s1 + $0x4f8] sm:$0xff] }
  0xef   :  { %1905 = vmatpush1.bf16.msra.mxu1 %v8252_v8  ;;  %v8325_v2 = vcombine.high %v215_v62, %v219_v0  ;;  %v8324_v3 = vcombine.low %v215_v62, %v219_v0  ;;  %v231_v6 = vld [vmem:[%s13438_s1 + $0x558] sm:$0xff]  ;;  %v10786_v8 = vsub.s32 0, %v9994_v44  ;;  %v2134_v0 = vld [vmem:[%s13440_s3 + $0x4c0] sm:$0xff] }
  0xf0   :  { %1906 = vmatprep.subr.bf16.mxu1 %v8261_v9  ;;  %v235_v7 = vld [vmem:[%s13438_s1 + $0x578] sm:$0xff] }
  0xf1   :  { %5117 = vmatpush1.bf16.msra.mxu0 %v8502_v11  ;;  %v10791_v11 = vld [vmem:[%s13439_s2] sm:$0xff]  ;;  %v8341_v12 = vcombine.high %v231_v6, %v235_v7  ;;  %v243_v14 = vld [vmem:[%s13438_s1 + $0x5b8] sm:$0xff] }
  0xf2   :  { %5118 = vmatprep.subr.bf16.mxu0 %v8511_v13  ;;  %v239_v13 = vld [vmem:[%s13438_s1 + $0x598] sm:$0xff]  ;;  %v321_v15 = vrot.slane %v10791_v11, %v10786_v8 }
  0xf3   :  { %1907 = vmatpush1.bf16.msra.mxu1 %v8260_v17  ;;  %v325_v17 = vrot.slane %v10791_v11, %v10794_v10  ;;  %v247_v21 = vld [vmem:[%s13438_s1 + $0x5d8] sm:$0xff]  ;;  %v8348_v30 = vcombine.low %v239_v13, %v243_v14 }
  0xf4   :  { %1908 = vmatprep.subr.bf16.mxu1 %v8269_v18  ;;  %v8340_v18 = vcombine.low %v231_v6, %v235_v7  ;;  %v259_v36 = vld [vmem:[%s13438_s1 + $0x638] sm:$0xff]  ;;  %v2142_v7 = vld [vmem:[%s13440_s3 + $0x500] sm:$0xff] }
  0xf5   :  { %5119 = vmatpush1.bf16.msra.mxu0 %v8510_v19  ;;  %v8349_v19 = vcombine.high %v239_v13, %v243_v14  ;;  %v271_v49 = vld [vmem:[%s13438_s1 + $0x698] sm:$0xff] }
  0xf6   :  { %5120 = vmatprep.subr.bf16.mxu0 %v8519_v22  ;;  %v251_v22 = vld [vmem:[%s13438_s1 + $0x5f8] sm:$0xff] }
  0xf7   :  { %1909 = vmatpush1.bf16.msra.mxu1 %v8268_v25  ;;  %v8357_v33 = vcombine.high %v247_v21, %v251_v22  ;;  %v275_v59 = vld [vmem:[%s13438_s1 + $0x6b8] sm:$0xff] }
  0xf8   :  { %1910 = vmatprep.subr.bf16.mxu1 %v8277_v26  ;;  %v8380_v6 = vcombine.low %v271_v49, %v275_v59  ;;  %v287_v13 = vld [vmem:[%s13438_s1 + $0x718] sm:$0xff] }
  0xf9   :  { %5121 = vmatpush1.bf16.msra.mxu0 %v8518_v28  ;;  %v291_v14 = vld [vmem:[%s13438_s1 + $0x738] sm:$0xff] }
  0xfa   :  { %5122 = vmatprep.subr.bf16.mxu0 %v8527_v32 }
  0xfb   :  { %1911 = vmatpush1.bf16.msra.mxu1 %v8276_v34 }
  0xfc   :  { %1912 = vmatprep.subr.bf16.mxu1 %v8285_v35 }
  0xfd   :  { %5123 = vmatpush1.bf16.msra.mxu0 %v8526_v5  ;;  %v255_v5 = vld [vmem:[%s13438_s1 + $0x618] sm:$0xff] }
  0xfe   :  { %5124 = vmatprep.subr.bf16.mxu0 %v8535_v38 }
  0xff   :  { %1913 = vmatpush1.bf16.msra.mxu1 %v8284_v41  ;;  %v8356_v41 = vcombine.low %v247_v21, %v251_v22  ;;  %v8397_v21 = vcombine.high %v287_v13, %v291_v14  ;;  %v295_v22 = vld [vmem:[%s13438_s1 + $0x758] sm:$0xff] }
 0x100   :  { %1914 = vmatprep.subr.bf16.mxu1 %v8293_v42  ;;  %v2122_v42 = vld [vmem:[%s13440_s3 + $0x460] sm:$0xff] }
 0x101   :  { %5125 = vmatpush1.bf16.msra.mxu0 %v8534_v43  ;;  %v10827_v43 = vld [vmem:[%s13440_s3 + $0x800] sm:$0xff] }
 0x102   :  { %5126 = vmatprep.subr.bf16.mxu0 %v8543_v47  ;;  %v8365_v47 = vcombine.high %v255_v5, %v259_v36  ;;  %v8678_v54 = vcombine.low %v10827_v43, %v10832_v45 }
 0x103   :  { %1915 = vmatpush1.bf16.msra.mxu1 %v8292_v50 }
 0x104   :  { %1925 = vmatprep.subr.bf16.mxu1 %v8301_v51  ;;  %v263_v51 = vld [vmem:[%s13438_s1 + $0x658] sm:$0xff] }
 0x105   :  { %5127 = vmatpush1.bf16.msra.mxu0 %v8542_v52  ;;  %v267_v52 = vld [vmem:[%s13438_s1 + $0x678] sm:$0xff] }
 0x106   :  { %5137 = vmatprep.subr.bf16.mxu0 %v8551_v55  ;;  %1917 = vmatmul.mubr.bf16.vlgmr.msra.gmra.mrb[8].mxu1 %v10160_v27  ;;  %v223_v27 = vld [vmem:[%s13438_s1 + $0x518] sm:$0xff]  ;;  %v8559_v55 = vcombine.high %v2118_v39, %v2122_v42  ;;  %v8373_v48 = vcombine.high %v263_v51, %v267_v52  ;;  %v8372_v62 = vcombine.low %v263_v51, %v267_v52  ;;  %v2178_v51 = vld [vmem:[%s13440_s3 + $0x620] sm:$0xff] }
 0x107   :  { %1926 = vmatpush1.bf16.msra.mxu1 %v8300_v56  ;;  %1957 = vmatprep.mubr.bf16.mxu1 %v10053_v16  ;;  %v227_v16 = vld [vmem:[%s13438_s1 + $0x538] sm:$0xff]  ;;  %v8364_v56 = vcombine.low %v255_v5, %v259_v36  ;;  %v2166_v5 = vld [vmem:[%s13440_s3 + $0x5c0] sm:$0xff] }
 0x108   :  { %1927 = vmatprep.subr.bf16.mxu1 %v8309_v57  ;;  %v8333_v4 = vcombine.high %v223_v27, %v227_v16  ;;  %v8332_v9 = vcombine.low %v223_v27, %v227_v16  ;;  %v2126_v57 = vld [vmem:[%s13440_s3 + $0x480] sm:$0xff]  ;;  %v279_v27 = vld [vmem:[%s13438_s1 + $0x6d8] sm:$0xff] }
 0x109   :  { %v283_v16 = vld [vmem:[%s13438_s1 + $0x6f8] sm:$0xff]  ;;  %v2170_v36 = vld [vmem:[%s13440_s3 + $0x5e0] sm:$0xff] }
 0x10b   :  { %1928 = vmatpush1.bf16.msra.mxu1 %v8308_v60  ;;  %v8558_v60 = vcombine.low %v2118_v39, %v2122_v42  ;;  %v315_v39 = vld [vmem:[%s13438_s1 + $0x7f8] sm:$0xff] }
 0x10c   :  { %1929 = vmatprep.subr.bf16.mxu1 %v8317_v61  ;;  %v8567_v61 = vcombine.high %v2126_v57, %v2130_v58 }
 0x10f   :  { %1930 = vmatpush1.bf16.msra.mxu1 %v8316_v1  ;;  %v2138_v1 = vld [vmem:[%s13440_s3 + $0x4e0] sm:$0xff] }
 0x110   :  { %1931 = vmatprep.subr.bf16.mxu1 %v8325_v2  ;;  %v8381_v2 = vcombine.high %v271_v49, %v275_v59  ;;  %v2186_v49 = vld [vmem:[%s13440_s3 + $0x660] sm:$0xff] }
 0x113   :  { %1932 = vmatpush1.bf16.msra.mxu1 %v8324_v3  ;;  %v8566_v3 = vcombine.low %v2126_v57, %v2130_v58 }
 0x114   :  { %1933 = vmatprep.subr.bf16.mxu1 %v8333_v4  ;;  %v8575_v4 = vcombine.high %v2134_v0, %v2138_v1 }
 0x117   :  { %1934 = vmatpush1.bf16.msra.mxu1 %v8332_v9  ;;  %v2146_v9 = vld [vmem:[%s13440_s3 + $0x520] sm:$0xff] }
 0x118   :  { %1935 = vmatprep.subr.bf16.mxu1 %v8341_v12  ;;  %v8389_v12 = vcombine.high %v279_v27, %v283_v16 }
 0x119   :  { %v1672_v20 = vpop.f32.mrb[0].mxu1 }
 0x11a   :  { %v1673_v23 = vadd.f32 %v1672_v20, %v321_v15  ;;  %v1674_v24 = vpop.f32.mrb[1].mxu1  ;;  %v8574_v15 = vcombine.low %v2134_v0, %v2138_v1  ;;  %v2154_v20 = vld [vmem:[%s13440_s3 + $0x560] sm:$0xff] }
 0x11b   :  { %v1713_v25 = vpop.f32.mrb[0].mxu0  ;;  %v1675_v26 = vadd.f32 %v1674_v24, %v325_v17  ;;  %v1676_v28 = vpop.f32.mrb[2].mxu1  ;;  %1936 = vmatpush1.bf16.msra.mxu1 %v8340_v18  ;;  %v8583_v17 = vcombine.high %v2142_v7, %v2146_v9  ;;  %v8388_v18 = vcombine.low %v279_v27, %v283_v16  ;;  %v8582_v24 = vcombine.low %v2142_v7, %v2146_v9  ;;  %v2194_v27 = vld [vmem:[%s13440_s3 + $0x6a0] sm:$0xff] }
 0x11c   :  { %v1715_v29 = vpop.f32.mrb[1].mxu0  ;;  %v1714_v32 = vadd.f32 %v1713_v25, %v1673_v23  ;;  %v1677_v63 = vpop.f32.mrb[3].mxu1  ;;  %1937 = vmatprep.subr.bf16.mxu1 %v8349_v19  ;;  %v2150_v19 = vld [vmem:[%s13440_s3 + $0x540] sm:$0xff]  ;;  %v299_v23 = vld [vmem:[%s13438_s1 + $0x778] sm:$0xff] }
 0x11d   :  { %v1717_v34 = vpop.f32.mrb[2].mxu0  ;;  %v1716_v35 = vadd.f32 %v1715_v29, %v1675_v26  ;;  %v8591_v25 = vcombine.high %v2150_v19, %v2154_v20  ;;  %v8396_v26 = vcombine.low %v287_v13, %v291_v14  ;;  %v2158_v28 = vld [vmem:[%s13440_s3 + $0x580] sm:$0xff]  ;;  %v307_v63 = vld [vmem:[%s13438_s1 + $0x7b8] sm:$0xff] }
 0x11e   :  { %v1718_v37 = vpop.f32.mrb[3].mxu0  ;;  %v1966_v38 = vmax.f32 %v1714_v32, 0.0  ;;  %v2162_v29 = vld [vmem:[%s13440_s3 + $0x5a0] sm:$0xff]  ;;  %v303_v32 = vld [vmem:[%s13438_s1 + $0x798] sm:$0xff] }
 0x11f   :  { %v1967_v40 = vmax.f32 %v1716_v35, 0.0  ;;  %1938 = vmatpush1.bf16.msra.mxu1 %v8348_v30  ;;  %v8405_v30 = vcombine.high %v295_v22, %v299_v23  ;;  %v8599_v34 = vcombine.high %v2158_v28, %v2162_v29  ;;  %v8404_v35 = vcombine.low %v295_v22, %v299_v23  ;;  %v2202_v13 = vld [vmem:[%s13440_s3 + $0x6e0] sm:$0xff]  ;;  %v2015_v23 = vld [vmem:[%s13440_s3 + $0x108] sm:$0xff] }
 0x120   :  { %v10834_v46 = vpack.c.bf16 %v1966_v38, %v1966_v38  ;;  %1939 = vmatprep.subr.bf16.mxu1 %v8357_v33  ;;  %v8590_v33 = vcombine.low %v2150_v19, %v2154_v20  ;;  %v8413_v37 = vcombine.high %v303_v32, %v307_v63  ;;  %v311_v38 = vld [vmem:[%s13438_s1 + $0x7d8] sm:$0xff]  ;;  %v8412_v42 = vcombine.low %v303_v32, %v307_v63  ;;  %v2206_v20 = vld [vmem:[%s13440_s3 + $0x700] sm:$0xff]  ;;  %v2023_v63 = vld [vmem:[%s13440_s3 + $0x148] sm:$0xff] }
 0x121   :  { %v10836_v50 = vpack.c.bf16 %v1967_v40, %v1967_v40  ;;  %v8598_v40 = vcombine.low %v2158_v28, %v2162_v29  ;;  %v8421_v52 = vcombine.high %v311_v38, %v315_v39  ;;  %v8420_v58 = vcombine.low %v311_v38, %v315_v39  ;;  %v2214_v29 = vld [vmem:[%s13440_s3 + $0x740] sm:$0xff]  ;;  %v2031_v39 = vld [vmem:[%s13440_s3 + $0x188] sm:$0xff] }
 0x123   :  { %1940 = vmatpush1.bf16.msra.mxu1 %v8356_v41  ;;  %5128 = vmatprep.mubr.bf16.mxu0 %v10836_v50  ;;  %v8607_v41 = vcombine.high %v2166_v5, %v2170_v36 }
 0x124   :  { %5129 = vmatmul.mubr.bf16.vlgmr.msra.gmra.mrb[8].mxu0 %v10834_v46  ;;  %1941 = vmatprep.subr.bf16.mxu1 %v8365_v47  ;;  %v2174_v47 = vld [vmem:[%s13440_s3 + $0x600] sm:$0xff] }
 0x125   :  { %5138 = vmatpush1.bf16.msra.mxu0 %v8550_v53  ;;  %v1983_v53 = vld [vmem:[%s13440_s3 + $0x8] sm:$0xff]  ;;  %v8615_v57 = vcombine.high %v2174_v47, %v2178_v51 }
 0x126   :  { %5139 = vmatprep.subr.bf16.mxu0 %v8559_v55  ;;  %v1987_v55 = vld [vmem:[%s13440_s3 + $0x28] sm:$0xff] }
 0x127   :  { %1942 = vmatpush1.bf16.msra.mxu1 %v8364_v56  ;;  %v8606_v56 = vcombine.low %v2166_v5, %v2170_v36  ;;  %v8425_v59 = vcombine.high %v1983_v53, %v1987_v55  ;;  %v8424_v1 = vcombine.low %v1983_v53, %v1987_v55  ;;  %v2222_v36 = vld [vmem:[%s13440_s3 + $0x780] sm:$0xff]  ;;  %v2039_v55 = vld [vmem:[%s13440_s3 + $0x1c8] sm:$0xff] }
 0x128   :  { %1943 = vmatprep.subr.bf16.mxu1 %v8373_v48  ;;  %v2182_v48 = vld [vmem:[%s13440_s3 + $0x640] sm:$0xff] }
 0x129   :  { %5140 = vmatpush1.bf16.msra.mxu0 %v8558_v60  ;;  %v1991_v60 = vld [vmem:[%s13440_s3 + $0x48] sm:$0xff]  ;;  %v8623_v0 = vcombine.high %v2182_v48, %v2186_v49 }
 0x12a   :  { %5141 = vmatprep.subr.bf16.mxu0 %v8567_v61  ;;  %v1995_v61 = vld [vmem:[%s13440_s3 + $0x68] sm:$0xff] }
 0x12b   :  { %1944 = vmatpush1.bf16.msra.mxu1 %v8372_v62  ;;  %v8614_v62 = vcombine.low %v2174_v47, %v2178_v51  ;;  %v8433_v16 = vcombine.high %v1991_v60, %v1995_v61  ;;  %v8432_v9 = vcombine.low %v1991_v60, %v1995_v61  ;;  %v2230_v51 = vld [vmem:[%s13440_s3 + $0x7c0] sm:$0xff]  ;;  %v2051_v60 = vld [vmem:[%s13440_s3 + $0x228] sm:$0xff] }
 0x12c   :  { %1945 = vmatprep.subr.bf16.mxu1 %v8381_v2  ;;  %v2190_v2 = vld [vmem:[%s13440_s3 + $0x680] sm:$0xff] }
 0x12d   :  { %5142 = vmatpush1.bf16.msra.mxu0 %v8566_v3  ;;  %v1999_v3 = vld [vmem:[%s13440_s3 + $0x88] sm:$0xff]  ;;  %v8631_v7 = vcombine.high %v2190_v2, %v2194_v27 }
 0x12e   :  { %5143 = vmatprep.subr.bf16.mxu0 %v8575_v4  ;;  %v2003_v4 = vld [vmem:[%s13440_s3 + $0xa8] sm:$0xff] }
 0x12f   :  { %1946 = vmatpush1.bf16.msra.mxu1 %v8380_v6  ;;  %v8622_v6 = vcombine.low %v2182_v48, %v2186_v49  ;;  %v8441_v14 = vcombine.high %v1999_v3, %v2003_v4  ;;  %v8440_v19 = vcombine.low %v1999_v3, %v2003_v4  ;;  %v2063_v4 = vld [vmem:[%s13440_s3 + $0x288] sm:$0xff] }
 0x130   :  { %1947 = vmatprep.subr.bf16.mxu1 %v8389_v12  ;;  %v2198_v12 = vld [vmem:[%s13440_s3 + $0x6c0] sm:$0xff] }
 0x131   :  { %5144 = vmatpush1.bf16.msra.mxu0 %v8574_v15  ;;  %v2011_v15 = vld [vmem:[%s13440_s3 + $0xe8] sm:$0xff] }
 0x132   :  { %5145 = vmatprep.subr.bf16.mxu0 %v8583_v17  ;;  %v8630_v17 = vcombine.low %v2190_v2, %v2194_v27  ;;  %v2055_v2 = vld [vmem:[%s13440_s3 + $0x248] sm:$0xff] }
 0x133   :  { %1948 = vmatpush1.bf16.msra.mxu1 %v8388_v18  ;;  %v8639_v18 = vcombine.high %v2198_v12, %v2202_v13  ;;  %v2059_v27 = vld [vmem:[%s13440_s3 + $0x268] sm:$0xff] }
 0x134   :  { %1949 = vmatprep.subr.bf16.mxu1 %v8397_v21  ;;  %v2210_v21 = vld [vmem:[%s13440_s3 + $0x720] sm:$0xff]  ;;  %v8497_v3 = vcombine.high %v2055_v2, %v2059_v27 }
 0x135   :  { %5146 = vmatpush1.bf16.msra.mxu0 %v8582_v24  ;;  %v2019_v24 = vld [vmem:[%s13440_s3 + $0x128] sm:$0xff] }
 0x136   :  { %5147 = vmatprep.subr.bf16.mxu0 %v8591_v25  ;;  %v8638_v25 = vcombine.low %v2198_v12, %v2202_v13  ;;  %v8457_v32 = vcombine.high %v2015_v23, %v2019_v24  ;;  %v8456_v5 = vcombine.low %v2015_v23, %v2019_v24  ;;  %v2071_v12 = vld [vmem:[%s13440_s3 + $0x2c8] sm:$0xff] }
 0x137   :  { %1950 = vmatpush1.bf16.msra.mxu1 %v8396_v26  ;;  %v8647_v26 = vcombine.high %v2206_v20, %v2210_v21  ;;  %v2075_v13 = vld [vmem:[%s13440_s3 + $0x2e8] sm:$0xff] }
 0x138   :  { %1951 = vmatprep.subr.bf16.mxu1 %v8405_v30  ;;  %v2218_v30 = vld [vmem:[%s13440_s3 + $0x760] sm:$0xff]  ;;  %v2095_v24 = vld [vmem:[%s13440_s3 + $0x388] sm:$0xff] }
 0x139   :  { %5148 = vmatpush1.bf16.msra.mxu0 %v8590_v33  ;;  %v2027_v33 = vld [vmem:[%s13440_s3 + $0x168] sm:$0xff] }
 0x13a   :  { %5149 = vmatprep.subr.bf16.mxu0 %v8599_v34  ;;  %v8646_v34 = vcombine.low %v2206_v20, %v2210_v21  ;;  %v8465_v38 = vcombine.high %v2023_v63, %v2027_v33  ;;  %v8464_v47 = vcombine.low %v2023_v63, %v2027_v33  ;;  %v2087_v20 = vld [vmem:[%s13440_s3 + $0x348] sm:$0xff] }
 0x13b   :  { %1952 = vmatpush1.bf16.msra.mxu1 %v8404_v35  ;;  %v8655_v35 = vcombine.high %v2214_v29, %v2218_v30  ;;  %v2091_v21 = vld [vmem:[%s13440_s3 + $0x368] sm:$0xff] }
 0x13c   :  { %1953 = vmatprep.subr.bf16.mxu1 %v8413_v37  ;;  %v2226_v37 = vld [vmem:[%s13440_s3 + $0x7a0] sm:$0xff]  ;;  %v8529_v23 = vcombine.high %v2087_v20, %v2091_v21  ;;  %v2111_v33 = vld [vmem:[%s13440_s3 + $0x408] sm:$0xff] }
 0x13d   :  { %5150 = vmatpush1.bf16.msra.mxu0 %v8598_v40  ;;  %v2035_v40 = vld [vmem:[%s13440_s3 + $0x1a8] sm:$0xff] }
 0x13e   :  { %5151 = vmatprep.subr.bf16.mxu0 %v8607_v41  ;;  %v8654_v41 = vcombine.low %v2214_v29, %v2218_v30  ;;  %v8473_v53 = vcombine.high %v2031_v39, %v2035_v40  ;;  %v8472_v48 = vcombine.low %v2031_v39, %v2035_v40  ;;  %v2103_v29 = vld [vmem:[%s13440_s3 + $0x3c8] sm:$0xff] }
 0x13f   :  { %1954 = vmatpush1.bf16.msra.mxu1 %v8412_v42  ;;  %v8663_v42 = vcombine.high %v2222_v36, %v2226_v37  ;;  %v2107_v30 = vld [vmem:[%s13440_s3 + $0x3e8] sm:$0xff] }
 0x140   :  { %1955 = vmatprep.subr.bf16.mxu1 %v8421_v52  ;;  %v2234_v52 = vld [vmem:[%s13440_s3 + $0x7e0] sm:$0xff]  ;;  %v8545_v63 = vcombine.high %v2103_v29, %v2107_v30  ;;  %v2127_v40 = vld [vmem:[%s13440_s3 + $0x488] sm:$0xff] }
 0x141   :  { %5152 = vmatpush1.bf16.msra.mxu0 %v8606_v56  ;;  %v2043_v56 = vld [vmem:[%s13440_s3 + $0x1e8] sm:$0xff]  ;;  %v8670_v61 = vcombine.low %v2230_v51, %v2234_v52 }
 0x142   :  { %5153 = vmatprep.subr.bf16.mxu0 %v8615_v57  ;;  %v8662_v57 = vcombine.low %v2222_v36, %v2226_v37  ;;  %v8481_v49 = vcombine.high %v2039_v55, %v2043_v56  ;;  %v2119_v36 = vld [vmem:[%s13440_s3 + $0x448] sm:$0xff] }
 0x143   :  { %1956 = vmatpush1.bf16.msra.mxu1 %v8420_v58  ;;  %v8671_v58 = vcombine.high %v2230_v51, %v2234_v52  ;;  %v2123_v37 = vld [vmem:[%s13440_s3 + $0x468] sm:$0xff] }
 0x144   :  { %5260 = vmatprep.subr.bf16.mxu1 %v8425_v59  ;;  %v2047_v59 = vld [vmem:[%s13440_s3 + $0x208] sm:$0xff]  ;;  %v8561_v39 = vcombine.high %v2119_v36, %v2123_v37 }
 0x145   :  { %5154 = vmatpush1.bf16.msra.mxu0 %v8614_v62  ;;  %v8679_v62 = vcombine.high %v10827_v43, %v10832_v45  ;;  %v2135_v51 = vld [vmem:[%s13440_s3 + $0x4c8] sm:$0xff] }
 0x146   :  { %1958 = vmatmul.mubr.bf16.vlgmr.msra.gmra.mrb[8].mxu1 %v10170_v31  ;;  %5155 = vmatprep.subr.bf16.mxu0 %v8623_v0  ;;  %v2007_v31 = vld [vmem:[%s13440_s3 + $0xc8] sm:$0xff]  ;;  %v8480_v0 = vcombine.low %v2039_v55, %v2043_v56 }
 0x147   :  { %5261 = vmatpush1.bf16.msra.mxu1 %v8424_v1  ;;  %5292 = vmatprep.mubr.bf16.mxu1 %v10836_v50  ;;  %v8449_v22 = vcombine.high %v2007_v31, %v2011_v15  ;;  %v8448_v28 = vcombine.low %v2007_v31, %v2011_v15  ;;  %v8489_v1 = vcombine.high %v2047_v59, %v2051_v60  ;;  %v2079_v15 = vld [vmem:[%s13440_s3 + $0x308] sm:$0xff] }
 0x148   :  { %5262 = vmatprep.subr.bf16.mxu1 %v8433_v16  ;;  %v8488_v16 = vcombine.low %v2047_v59, %v2051_v60  ;;  %v8513_v31 = vcombine.high %v2071_v12, %v2075_v13  ;;  %v2139_v52 = vld [vmem:[%s13440_s3 + $0x4e8] sm:$0xff]  ;;  %v11108_v60 = vsub.s32 2, %v9994_v44 }
 0x149   :  { %5156 = vmatpush1.bf16.msra.mxu0 %v8622_v6  ;;  %v2067_v6 = vld [vmem:[%s13440_s3 + $0x2a8] sm:$0xff]  ;;  %v8577_v55 = vcombine.high %v2135_v51, %v2139_v52 }
 0x14a   :  { %5157 = vmatprep.subr.bf16.mxu0 %v8631_v7  ;;  %v8496_v7 = vcombine.low %v2055_v2, %v2059_v27  ;;  %v2143_v56 = vld [vmem:[%s13440_s3 + $0x508] sm:$0xff] }
 0x14b   :  { %5263 = vmatpush1.bf16.msra.mxu1 %v8432_v9  ;;  %v8505_v9 = vcombine.high %v2063_v4, %v2067_v6  ;;  %v2155_v59 = vld [vmem:[%s13440_s3 + $0x568] sm:$0xff] }
 0x14c   :  { %5264 = vmatprep.subr.bf16.mxu1 %v8441_v14  ;;  %v8504_v14 = vcombine.low %v2063_v4, %v2067_v6  ;;  %v2159_v2 = vld [vmem:[%s13440_s3 + $0x588] sm:$0xff] }
 0x14d   :  { %5158 = vmatpush1.bf16.msra.mxu0 %v8630_v17  ;;  %v2083_v17 = vld [vmem:[%s13440_s3 + $0x328] sm:$0xff] }
 0x14e   :  { %5159 = vmatprep.subr.bf16.mxu0 %v8639_v18  ;;  %v8512_v18 = vcombine.low %v2071_v12, %v2075_v13  ;;  %v2163_v27 = vld [vmem:[%s13440_s3 + $0x5a8] sm:$0xff] }
 0x14f   :  { %5265 = vmatpush1.bf16.msra.mxu1 %v8440_v19  ;;  %v8521_v19 = vcombine.high %v2079_v15, %v2083_v17  ;;  %v2167_v12 = vld [vmem:[%s13440_s3 + $0x5c8] sm:$0xff] }
 0x150   :  { %5266 = vmatprep.subr.bf16.mxu1 %v8449_v22  ;;  %v8520_v22 = vcombine.low %v2079_v15, %v2083_v17  ;;  %v2171_v13 = vld [vmem:[%s13440_s3 + $0x5e8] sm:$0xff] }
 0x151   :  { %5160 = vmatpush1.bf16.msra.mxu0 %v8638_v25  ;;  %v2099_v25 = vld [vmem:[%s13440_s3 + $0x3a8] sm:$0xff] }
 0x152   :  { %5161 = vmatprep.subr.bf16.mxu0 %v8647_v26  ;;  %v8528_v26 = vcombine.low %v2087_v20, %v2091_v21  ;;  %v2191_v43 = vld [vmem:[%s13440_s3 + $0x688] sm:$0xff] }
 0x153   :  { %5267 = vmatpush1.bf16.msra.mxu1 %v8448_v28  ;;  %v8537_v28 = vcombine.high %v2095_v24, %v2099_v25  ;;  %v2195_v45 = vld [vmem:[%s13440_s3 + $0x6a8] sm:$0xff] }
 0x154   :  { %5268 = vmatprep.subr.bf16.mxu1 %v8457_v32  ;;  %v8536_v32 = vcombine.low %v2095_v24, %v2099_v25  ;;  %v8609_v24 = vcombine.high %v2167_v12, %v2171_v13 }
 0x155   :  { %5162 = vmatpush1.bf16.msra.mxu0 %v8646_v34  ;;  %v2115_v34 = vld [vmem:[%s13440_s3 + $0x428] sm:$0xff] }
 0x156   :  { %5163 = vmatprep.subr.bf16.mxu0 %v8655_v35  ;;  %v8544_v35 = vcombine.low %v2103_v29, %v2107_v30  ;;  %v2250_v29 = vld [vmem:[%s13440_s3 + $0x860] sm:$0xff] }
 0x157   :  { %5269 = vmatpush1.bf16.msra.mxu1 %v8456_v5  ;;  %v8553_v5 = vcombine.high %v2111_v33, %v2115_v34 }
 0x158   :  { %5270 = vmatprep.subr.bf16.mxu1 %v8465_v38  ;;  %v8552_v38 = vcombine.low %v2111_v33, %v2115_v34 }
 0x159   :  { %5164 = vmatpush1.bf16.msra.mxu0 %v8654_v41  ;;  %v2131_v41 = vld [vmem:[%s13440_s3 + $0x4a8] sm:$0xff] }
 0x15a   :  { %5165 = vmatprep.subr.bf16.mxu0 %v8663_v42  ;;  %v8560_v42 = vcombine.low %v2119_v36, %v2123_v37 }
 0x15b   :  { %5271 = vmatpush1.bf16.msra.mxu1 %v8464_v47  ;;  %v8569_v47 = vcombine.high %v2127_v40, %v2131_v41 }
 0x15c   :  { %5272 = vmatprep.subr.bf16.mxu1 %v8473_v53  ;;  %v8568_v53 = vcombine.low %v2127_v40, %v2131_v41  ;;  %v2183_v40 = vld [vmem:[%s13440_s3 + $0x648] sm:$0xff] }
 0x15d   :  { %5166 = vmatpush1.bf16.msra.mxu0 %v8662_v57  ;;  %v2147_v57 = vld [vmem:[%s13440_s3 + $0x528] sm:$0xff] }
 0x15e   :  { %5167 = vmatprep.subr.bf16.mxu0 %v8671_v58  ;;  %v8576_v58 = vcombine.low %v2135_v51, %v2139_v52  ;;  %v2187_v41 = vld [vmem:[%s13440_s3 + $0x668] sm:$0xff] }
 0x15f   :  { %5273 = vmatpush1.bf16.msra.mxu1 %v8472_v48  ;;  %v8585_v48 = vcombine.high %v2143_v56, %v2147_v57  ;;  %v8625_v52 = vcombine.high %v2183_v40, %v2187_v41 }
 0x160   :  { %5274 = vmatprep.subr.bf16.mxu1 %v8481_v49  ;;  %v2151_v49 = vld [vmem:[%s13440_s3 + $0x548] sm:$0xff] }
 0x161   :  { %5168 = vmatpush1.bf16.msra.mxu0 %v8670_v61  ;;  %v8584_v61 = vcombine.low %v2143_v56, %v2147_v57  ;;  %v8592_v4 = vcombine.low %v2151_v49, %v2155_v59  ;;  %v8624_v56 = vcombine.low %v2183_v40, %v2187_v41 }
 0x162   :  { %5178 = vmatprep.subr.bf16.mxu0 %v8679_v62  ;;  %v11111_v62 = vsub.s32 3, %v9994_v44 }
 0x163   :  { %5275 = vmatpush1.bf16.msra.mxu1 %v8480_v0  ;;  %v340_v0 = vsub.s32 5, %v9994_v44 }
 0x164   :  { %5276 = vmatprep.subr.bf16.mxu1 %v8489_v1  ;;  %v8593_v1 = vcombine.high %v2151_v49, %v2155_v59  ;;  %v2274_v49 = vld [vmem:[%s13440_s3 + $0x920] sm:$0xff]  ;;  %v2199_v59 = vld [vmem:[%s13440_s3 + $0x6c8] sm:$0xff] }
 0x165   :  { %v341_v6 = vrot.slane %v10791_v11, %v340_v0 }
 0x167   :  { %5277 = vmatpush1.bf16.msra.mxu1 %v8488_v16  ;;  %v329_v16 = vrot.slane %v10791_v11, %v11108_v60 }
 0x168   :  { %5278 = vmatprep.subr.bf16.mxu1 %v8497_v3  ;;  %v333_v3 = vrot.slane %v10791_v11, %v11111_v62  ;;  %v8600_v11 = vcombine.low %v2159_v2, %v2163_v27 }
 0x16b   :  { %5279 = vmatpush1.bf16.msra.mxu1 %v8496_v7  ;;  %v8601_v7 = vcombine.high %v2159_v2, %v2163_v27  ;;  %v8632_v2 = vcombine.low %v2191_v43, %v2195_v45 }
 0x16c   :  { %5280 = vmatprep.subr.bf16.mxu1 %v8505_v9 }
 0x16f   :  { %5281 = vmatpush1.bf16.msra.mxu1 %v8504_v14 }
 0x170   :  { %5282 = vmatprep.subr.bf16.mxu1 %v8513_v31 }
 0x173   :  { %5283 = vmatpush1.bf16.msra.mxu1 %v8512_v18 }
 0x174   :  { %5284 = vmatprep.subr.bf16.mxu1 %v8521_v19 }
 0x177   :  { %5285 = vmatpush1.bf16.msra.mxu1 %v8520_v22 }
 0x178   :  { %5286 = vmatprep.subr.bf16.mxu1 %v8529_v23 }
 0x17b   :  { %5287 = vmatpush1.bf16.msra.mxu1 %v8528_v26 }
 0x17c   :  { %5288 = vmatprep.subr.bf16.mxu1 %v8537_v28  ;;  %v2246_v28 = vld [vmem:[%s13440_s3 + $0x840] sm:$0xff] }
 0x17f   :  { %5289 = vmatpush1.bf16.msra.mxu1 %v8536_v32  ;;  %v2175_v32 = vld [vmem:[%s13440_s3 + $0x608] sm:$0xff] }
 0x180   :  { %5290 = vmatprep.subr.bf16.mxu1 %v8545_v63  ;;  %v2179_v63 = vld [vmem:[%s13440_s3 + $0x628] sm:$0xff] }
 0x181   :  { %v8617_v37 = vcombine.high %v2175_v32, %v2179_v63 }
 0x183   :  { %5291 = vmatpush1.bf16.msra.mxu1 %v8544_v35  ;;  %v8608_v35 = vcombine.low %v2167_v12, %v2171_v13 }
 0x184   :  { %5301 = vmatprep.subr.bf16.mxu1 %v8553_v5  ;;  %v8687_v5 = vcombine.high %v2246_v28, %v2250_v29 }
 0x186   :  { %5293 = vmatmul.mubr.bf16.vlgmr.msra.gmra.mrb[12].mxu1 %v10834_v46 }
 0x187   :  { %5302 = vmatpush1.bf16.msra.mxu1 %v8552_v38  ;;  %v2254_v38 = vld [vmem:[%s13440_s3 + $0x880] sm:$0xff] }
 0x188   :  { %5303 = vmatprep.subr.bf16.mxu1 %v8561_v39  ;;  %v2258_v39 = vld [vmem:[%s13440_s3 + $0x8a0] sm:$0xff] }
 0x189   :  { %v8695_v51 = vcombine.high %v2254_v38, %v2258_v39 }
 0x18b   :  { %5304 = vmatpush1.bf16.msra.mxu1 %v8560_v42  ;;  %v8686_v42 = vcombine.low %v2246_v28, %v2250_v29 }
 0x18c   :  { %5305 = vmatprep.subr.bf16.mxu1 %v8569_v47  ;;  %v8616_v47 = vcombine.low %v2175_v32, %v2179_v63  ;;  %v2302_v63 = vld [vmem:[%s13440_s3 + $0xa00] sm:$0xff] }
 0x18f   :  { %5306 = vmatpush1.bf16.msra.mxu1 %v8568_v53  ;;  %v2262_v53 = vld [vmem:[%s13440_s3 + $0x8c0] sm:$0xff] }
 0x190   :  { %5307 = vmatprep.subr.bf16.mxu1 %v8577_v55  ;;  %v2266_v55 = vld [vmem:[%s13440_s3 + $0x8e0] sm:$0xff] }
 0x191   :  { %v8703_v57 = vcombine.high %v2262_v53, %v2266_v55 }
 0x193   :  { %5308 = vmatpush1.bf16.msra.mxu1 %v8576_v58  ;;  %v8633_v58 = vcombine.high %v2191_v43, %v2195_v45 }
 0x194   :  { %5309 = vmatprep.subr.bf16.mxu1 %v8585_v48  ;;  %v2270_v48 = vld [vmem:[%s13440_s3 + $0x900] sm:$0xff] }
 0x195   :  { %v8711_v27 = vcombine.high %v2270_v48, %v2274_v49 }
 0x197   :  { %5310 = vmatpush1.bf16.msra.mxu1 %v8584_v61  ;;  %v2203_v61 = vld [vmem:[%s13440_s3 + $0x6e8] sm:$0xff] }
 0x198   :  { %5311 = vmatprep.subr.bf16.mxu1 %v8593_v1  ;;  %v8702_v1 = vcombine.low %v2262_v53, %v2266_v55  ;;  %v8640_v12 = vcombine.low %v2199_v59, %v2203_v61 }
 0x199   :  { %v1795_v9 = vpop.f32.mrb[4].mxu1 }
 0x19a   :  { %v9259_v14 = vadd.f32 %v1795_v9, %v329_v16  ;;  %v1797_v15 = vpop.f32.mrb[5].mxu1  ;;  %v8641_v16 = vcombine.high %v2199_v59, %v2203_v61  ;;  %v8710_v9 = vcombine.low %v2270_v48, %v2274_v49 }
 0x19b   :  { %v11133_v31 = vpop.f32.mrb[4].mxu0  ;;  %v9260_v17 = vadd.f32 %v1797_v15, %v333_v3  ;;  %v1799_v19 = vpop.f32.mrb[6].mxu1  ;;  %5312 = vmatpush1.bf16.msra.mxu1 %v8592_v4  ;;  %v2278_v3 = vld [vmem:[%s13440_s3 + $0x940] sm:$0xff] }
 0x19c   :  { %v1879_v18 = vpop.f32.mrb[5].mxu0  ;;  %v1968_v20 = vmax.f32 %v9259_v14, 0.0  ;;  %v1800_v23 = vpop.f32.mrb[7].mxu1  ;;  %5313 = vmatprep.subr.bf16.mxu1 %v8601_v7  ;;  %v2282_v4 = vld [vmem:[%s13440_s3 + $0x960] sm:$0xff]  ;;  %v2211_v7 = vld [vmem:[%s13440_s3 + $0x728] sm:$0xff] }
 0x19d   :  { %v9262_v21 = vadd.f32 %v1879_v18, %v341_v6  ;;  %v1881_v22 = vpop.f32.mrb[6].mxu0  ;;  %v1969_v25 = vmax.f32 %v9260_v17, 0.0  ;;  %v2207_v6 = vld [vmem:[%s13440_s3 + $0x708] sm:$0xff]  ;;  %v8719_v13 = vcombine.high %v2278_v3, %v2282_v4  ;;  %v2286_v15 = vld [vmem:[%s13440_s3 + $0x980] sm:$0xff] }
 0x19e   :  { %v1882_v26 = vpop.f32.mrb[7].mxu0  ;;  %v11149_v34 = vpack.c.bf16 %v1968_v20, %v1968_v20  ;;  %v8649_v14 = vcombine.high %v2207_v6, %v2211_v7  ;;  %v2290_v17 = vld [vmem:[%s13440_s3 + $0x9a0] sm:$0xff]  ;;  %v2215_v18 = vld [vmem:[%s13440_s3 + $0x748] sm:$0xff]  ;;  %v8648_v20 = vcombine.low %v2207_v6, %v2211_v7 }
 0x19f   :  { %v1971_v30 = vmax.f32 %v9262_v21, 0.0  ;;  %v11147_v33 = vpack.c.bf16 %v1969_v25, %v1969_v25  ;;  %5314 = vmatpush1.bf16.msra.mxu1 %v8600_v11  ;;  %v2219_v19 = vld [vmem:[%s13440_s3 + $0x768] sm:$0xff]  ;;  %v8718_v11 = vcombine.low %v2278_v3, %v2282_v4  ;;  %v8727_v21 = vcombine.high %v2286_v15, %v2290_v17  ;;  %v2294_v23 = vld [vmem:[%s13440_s3 + $0x9c0] sm:$0xff] }
 0x1a0   :  { %5315 = vmatprep.subr.bf16.mxu1 %v8609_v24  ;;  %v8657_v22 = vcombine.high %v2215_v18, %v2219_v19  ;;  %v2298_v24 = vld [vmem:[%s13440_s3 + $0x9e0] sm:$0xff]  ;;  %v2223_v25 = vld [vmem:[%s13440_s3 + $0x788] sm:$0xff]  ;;  %v8726_v28 = vcombine.low %v2286_v15, %v2290_v17  ;;  %v8656_v29 = vcombine.low %v2215_v18, %v2219_v19 }
 0x1a1   :  { %v11151_v36 = vpack.c.bf16 %v1971_v30, %v1971_v30  ;;  %5169 = vmatprep.mubr.bf16.mxu0 %v11147_v33  ;;  %5333 = vmatprep.mubr.bf16.mxu1 %v11147_v33  ;;  %v2227_v26 = vld [vmem:[%s13440_s3 + $0x7a8] sm:$0xff]  ;;  %v8735_v30 = vcombine.high %v2294_v23, %v2298_v24 }
 0x1a2   :  { %5170 = vmatmul.mubr.bf16.vlgmr.msra.gmra.mrb[8].mxu0 %v11149_v34  ;;  %v8665_v32 = vcombine.high %v2223_v25, %v2227_v26 }
 0x1a3   :  { %5179 = vmatpush1.bf16.msra.mxu0 %v8678_v54  ;;  %5210 = vmatprep.mubr.bf16.mxu0 %v11151_v36  ;;  %v8694_v54 = vcombine.low %v2254_v38, %v2258_v39  ;;  %v8734_v38 = vcombine.low %v2294_v23, %v2298_v24  ;;  %v8664_v39 = vcombine.low %v2223_v25, %v2227_v26  ;;  %v336_v24 = vsub.s32 4, %v9994_v44 }
 0x1a4   :  { %5316 = vmatpush1.bf16.msra.mxu1 %v8608_v35  ;;  %5180 = vmatprep.subr.bf16.mxu0 %v8687_v5  ;;  %v2306_v35 = vld [vmem:[%s13440_s3 + $0xa20] sm:$0xff]  ;;  %v2231_v5 = vld [vmem:[%s13440_s3 + $0x7c8] sm:$0xff] }
 0x1a5   :  { %5317 = vmatprep.subr.bf16.mxu1 %v8617_v37  ;;  %v2235_v37 = vld [vmem:[%s13440_s3 + $0x7e8] sm:$0xff]  ;;  %v8743_v40 = vcombine.high %v2302_v63, %v2306_v35  ;;  %v8742_v53 = vcombine.low %v2302_v63, %v2306_v35 }
 0x1a6   :  { %v8673_v41 = vcombine.high %v2231_v5, %v2235_v37  ;;  %v8672_v55 = vcombine.low %v2231_v5, %v2235_v37  ;;  %v2283_v63 = vld [vmem:[%s13440_s3 + $0x968] sm:$0xff]  ;;  %v11322_v5 = vld [vmem:[%s13439_s2] sm:$0xff] }
 0x1a7   :  { %5181 = vmatpush1.bf16.msra.mxu0 %v8686_v42  ;;  %v2310_v42 = vld [vmem:[%s13440_s3 + $0xa40] sm:$0xff]  ;;  %v337_v37 = vrot.slane %v11322_v5, %v336_v24 }
 0x1a8   :  { %5318 = vmatpush1.bf16.msra.mxu1 %v8616_v47  ;;  %5182 = vmatprep.subr.bf16.mxu0 %v8695_v51  ;;  %v2314_v47 = vld [vmem:[%s13440_s3 + $0xa60] sm:$0xff]  ;;  %v2239_v51 = vld [vmem:[%s13440_s3 + $0x808] sm:$0xff] }
 0x1a9   :  { %5319 = vmatprep.subr.bf16.mxu1 %v8625_v52  ;;  %v2243_v52 = vld [vmem:[%s13440_s3 + $0x828] sm:$0xff]  ;;  %v8751_v43 = vcombine.high %v2310_v42, %v2314_v47  ;;  %v8750_v48 = vcombine.low %v2310_v42, %v2314_v47  ;;  %v2362_v42 = vld [vmem:[%s13440_s3 + $0xbe0] sm:$0xff] }
 0x1aa   :  { %v8681_v45 = vcombine.high %v2239_v51, %v2243_v52  ;;  %v8680_v49 = vcombine.low %v2239_v51, %v2243_v52  ;;  %v2287_v47 = vld [vmem:[%s13440_s3 + $0x988] sm:$0xff] }
 0x1ab   :  { %5183 = vmatpush1.bf16.msra.mxu0 %v8694_v54  ;;  %v2318_v54 = vld [vmem:[%s13440_s3 + $0xa80] sm:$0xff]  ;;  %v2291_v51 = vld [vmem:[%s13440_s3 + $0x9a8] sm:$0xff] }
 0x1ac   :  { %5320 = vmatpush1.bf16.msra.mxu1 %v8624_v56  ;;  %5184 = vmatprep.subr.bf16.mxu0 %v8703_v57  ;;  %v2322_v56 = vld [vmem:[%s13440_s3 + $0xaa0] sm:$0xff]  ;;  %v2247_v57 = vld [vmem:[%s13440_s3 + $0x848] sm:$0xff] }
 0x1ad   :  { %5321 = vmatprep.subr.bf16.mxu1 %v8633_v58  ;;  %v2251_v58 = vld [vmem:[%s13440_s3 + $0x868] sm:$0xff]  ;;  %v8759_v59 = vcombine.high %v2318_v54, %v2322_v56  ;;  %v8758_v3 = vcombine.low %v2318_v54, %v2322_v56  ;;  %v2366_v54 = vld [vmem:[%s13440_s3 + $0xc00] sm:$0xff] }
 0x1ae   :  { %v8689_v61 = vcombine.high %v2247_v57, %v2251_v58  ;;  %v8688_v4 = vcombine.low %v2247_v57, %v2251_v58  ;;  %v2370_v56 = vld [vmem:[%s13440_s3 + $0xc20] sm:$0xff]  ;;  %v2295_v57 = vld [vmem:[%s13440_s3 + $0x9c8] sm:$0xff] }
 0x1af   :  { %5185 = vmatpush1.bf16.msra.mxu0 %v8702_v1  ;;  %v2326_v1 = vld [vmem:[%s13440_s3 + $0xac0] sm:$0xff] }
 0x1b0   :  { %5322 = vmatpush1.bf16.msra.mxu1 %v8632_v2  ;;  %5186 = vmatprep.subr.bf16.mxu0 %v8711_v27  ;;  %v2330_v2 = vld [vmem:[%s13440_s3 + $0xae0] sm:$0xff]  ;;  %v2255_v27 = vld [vmem:[%s13440_s3 + $0x888] sm:$0xff] }
 0x1b1   :  { %5323 = vmatprep.subr.bf16.mxu1 %v8641_v16  ;;  %v2259_v16 = vld [vmem:[%s13440_s3 + $0x8a8] sm:$0xff]  ;;  %v8767_v6 = vcombine.high %v2326_v1, %v2330_v2  ;;  %v8766_v15 = vcombine.low %v2326_v1, %v2330_v2  ;;  %v2374_v1 = vld [vmem:[%s13440_s3 + $0xc40] sm:$0xff] }
 0x1b2   :  { %v8697_v7 = vcombine.high %v2255_v27, %v2259_v16  ;;  %v8696_v17 = vcombine.low %v2255_v27, %v2259_v16  ;;  %v2378_v2 = vld [vmem:[%s13440_s3 + $0xc60] sm:$0xff]  ;;  %v2303_v27 = vld [vmem:[%s13440_s3 + $0xa08] sm:$0xff] }
 0x1b3   :  { %5187 = vmatpush1.bf16.msra.mxu0 %v8710_v9  ;;  %v2334_v9 = vld [vmem:[%s13440_s3 + $0xb00] sm:$0xff]  ;;  %v2307_v16 = vld [vmem:[%s13440_s3 + $0xa28] sm:$0xff] }
 0x1b4   :  { %5324 = vmatpush1.bf16.msra.mxu1 %v8640_v12  ;;  %5188 = vmatprep.subr.bf16.mxu0 %v8719_v13  ;;  %v2338_v12 = vld [vmem:[%s13440_s3 + $0xb20] sm:$0xff]  ;;  %v2263_v13 = vld [vmem:[%s13440_s3 + $0x8c8] sm:$0xff] }
 0x1b5   :  { %5325 = vmatprep.subr.bf16.mxu1 %v8649_v14  ;;  %v2267_v14 = vld [vmem:[%s13440_s3 + $0x8e8] sm:$0xff]  ;;  %v8775_v18 = vcombine.high %v2334_v9, %v2338_v12  ;;  %v8774_v23 = vcombine.low %v2334_v9, %v2338_v12  ;;  %v8745_v9 = vcombine.high %v2303_v27, %v2307_v16  ;;  %v2382_v12 = vld [vmem:[%s13440_s3 + $0xc80] sm:$0xff] }
 0x1b6   :  { %v8705_v19 = vcombine.high %v2263_v13, %v2267_v14  ;;  %v8704_v25 = vcombine.low %v2263_v13, %v2267_v14  ;;  %v2386_v13 = vld [vmem:[%s13440_s3 + $0xca0] sm:$0xff]  ;;  %v2311_v14 = vld [vmem:[%s13440_s3 + $0xa48] sm:$0xff] }
 0x1b7   :  { %5189 = vmatpush1.bf16.msra.mxu0 %v8718_v11  ;;  %v2342_v11 = vld [vmem:[%s13440_s3 + $0xb40] sm:$0xff] }
 0x1b8   :  { %5326 = vmatpush1.bf16.msra.mxu1 %v8648_v20  ;;  %5190 = vmatprep.subr.bf16.mxu0 %v8727_v21  ;;  %v2346_v20 = vld [vmem:[%s13440_s3 + $0xb60] sm:$0xff]  ;;  %v2271_v21 = vld [vmem:[%s13440_s3 + $0x908] sm:$0xff] }
 0x1b9   :  { %5327 = vmatprep.subr.bf16.mxu1 %v8657_v22  ;;  %v2275_v22 = vld [vmem:[%s13440_s3 + $0x928] sm:$0xff]  ;;  %v8783_v26 = vcombine.high %v2342_v11, %v2346_v20  ;;  %v8782_v35 = vcombine.low %v2342_v11, %v2346_v20  ;;  %v2390_v20 = vld [vmem:[%s13440_s3 + $0xcc0] sm:$0xff] }
 0x1bb   :  { %5191 = vmatpush1.bf16.msra.mxu0 %v8726_v28  ;;  %v8713_v28 = vcombine.high %v2271_v21, %v2275_v22 }
 0x1bc   :  { %5328 = vmatpush1.bf16.msra.mxu1 %v8656_v29  ;;  %5192 = vmatprep.subr.bf16.mxu0 %v8735_v30  ;;  %v2350_v29 = vld [vmem:[%s13440_s3 + $0xb80] sm:$0xff] }
 0x1bd   :  { %5329 = vmatprep.subr.bf16.mxu1 %v8665_v32  ;;  %v2354_v30 = vld [vmem:[%s13440_s3 + $0xba0] sm:$0xff]  ;;  %v2279_v32 = vld [vmem:[%s13440_s3 + $0x948] sm:$0xff] }
 0x1be   :  { %v8790_v52 = vcombine.low %v2350_v29, %v2354_v30 }
 0x1bf   :  { %5193 = vmatpush1.bf16.msra.mxu0 %v8734_v38  ;;  %v8712_v38 = vcombine.low %v2271_v21, %v2275_v22  ;;  %v2394_v21 = vld [vmem:[%s13440_s3 + $0xce0] sm:$0xff]  ;;  %v2319_v22 = vld [vmem:[%s13440_s3 + $0xa88] sm:$0xff] }
 0x1c0   :  { %5330 = vmatpush1.bf16.msra.mxu1 %v8664_v39  ;;  %5194 = vmatprep.subr.bf16.mxu0 %v8743_v40  ;;  %v8791_v39 = vcombine.high %v2350_v29, %v2354_v30  ;;  %v8721_v40 = vcombine.high %v2279_v32, %v2283_v63  ;;  %v2398_v30 = vld [vmem:[%s13440_s3 + $0xd00] sm:$0xff] }
 0x1c1   :  { %5331 = vmatprep.subr.bf16.mxu1 %v8673_v41  ;;  %v2358_v41 = vld [vmem:[%s13440_s3 + $0xbc0] sm:$0xff] }
 0x1c2   :  { %v8798_v58 = vcombine.low %v2358_v41, %v2362_v42 }
 0x1c3   :  { %5195 = vmatpush1.bf16.msra.mxu0 %v8742_v53  ;;  %v9261_v53 = vadd.f32 %v11133_v31, %v337_v37  ;;  %v2299_v31 = vld [vmem:[%s13440_s3 + $0x9e8] sm:$0xff]  ;;  %v8830_v37 = vcombine.low %v2390_v20, %v2394_v21 }
 0x1c4   :  { %5332 = vmatpush1.bf16.msra.mxu1 %v8672_v55  ;;  %5196 = vmatprep.subr.bf16.mxu0 %v8751_v43  ;;  %v8720_v55 = vcombine.low %v2279_v32, %v2283_v63  ;;  %v8799_v43 = vcombine.high %v2358_v41, %v2362_v42  ;;  %v2402_v32 = vld [vmem:[%s13440_s3 + $0xd20] sm:$0xff]  ;;  %v2327_v63 = vld [vmem:[%s13440_s3 + $0xac8] sm:$0xff] }
 0x1c5   :  { %5342 = vmatprep.subr.bf16.mxu1 %v8681_v45  ;;  %v8729_v45 = vcombine.high %v2287_v47, %v2291_v51  ;;  %v2406_v41 = vld [vmem:[%s13440_s3 + $0xd40] sm:$0xff] }
 0x1c6   :  { %v2410_v42 = vld [vmem:[%s13440_s3 + $0xd60] sm:$0xff] }
 0x1c7   :  { %5197 = vmatpush1.bf16.msra.mxu0 %v8750_v48  ;;  %5334 = vmatmul.mubr.bf16.vlgmr.msra.gmra.mrb[12].mxu1 %v11149_v34  ;;  %v1970_v48 = vmax.f32 %v9261_v53, 0.0 }
 0x1c8   :  { %5343 = vmatpush1.bf16.msra.mxu1 %v8680_v49  ;;  %5374 = vmatprep.mubr.bf16.mxu1 %v11151_v36  ;;  %v8728_v49 = vcombine.low %v2287_v47, %v2291_v51  ;;  %v2335_v47 = vld [vmem:[%s13440_s3 + $0xb08] sm:$0xff] }
 0x1c9   :  { %5198 = vmatprep.subr.bf16.mxu0 %v8759_v59  ;;  %5344 = vmatprep.subr.bf16.mxu1 %v8689_v61  ;;  %v8807_v59 = vcombine.high %v2366_v54, %v2370_v56  ;;  %v8737_v61 = vcombine.high %v2295_v57, %v2299_v31  ;;  %v2339_v51 = vld [vmem:[%s13440_s3 + $0xb28] sm:$0xff] }
 0x1cb   :  { %5199 = vmatpush1.bf16.msra.mxu0 %v8758_v3  ;;  %v8806_v3 = vcombine.low %v2366_v54, %v2370_v56  ;;  %v2418_v54 = vld [vmem:[%s13440_s3 + $0xda0] sm:$0xff]  ;;  %v2343_v56 = vld [vmem:[%s13440_s3 + $0xb48] sm:$0xff] }
 0x1cc   :  { %5345 = vmatpush1.bf16.msra.mxu1 %v8688_v4  ;;  %5200 = vmatprep.subr.bf16.mxu0 %v8767_v6  ;;  %v11364_v4 = vpack.c.bf16 %v1970_v48, %v1970_v48  ;;  %v8736_v6 = vcombine.low %v2295_v57, %v2299_v31  ;;  %v2347_v57 = vld [vmem:[%s13440_s3 + $0xb68] sm:$0xff]  ;;  %v8846_v31 = vcombine.low %v2406_v41, %v2410_v42 }
 0x1cd   :  { %5346 = vmatprep.subr.bf16.mxu1 %v8697_v7  ;;  %v8815_v7 = vcombine.high %v2374_v1, %v2378_v2 }
 0x1cf   :  { %5201 = vmatpush1.bf16.msra.mxu0 %v8766_v15  ;;  %v2315_v15 = vld [vmem:[%s13440_s3 + $0xa68] sm:$0xff] }
 0x1d0   :  { %5347 = vmatpush1.bf16.msra.mxu1 %v8696_v17  ;;  %5202 = vmatprep.subr.bf16.mxu0 %v8775_v18  ;;  %v8814_v17 = vcombine.low %v2374_v1, %v2378_v2  ;;  %v8744_v18 = vcombine.low %v2303_v27, %v2307_v16  ;;  %v8753_v11 = vcombine.high %v2311_v14, %v2315_v15  ;;  %v2351_v1 = vld [vmem:[%s13440_s3 + $0xb88] sm:$0xff] }
 0x1d1   :  { %5348 = vmatprep.subr.bf16.mxu1 %v8705_v19  ;;  %v8823_v19 = vcombine.high %v2382_v12, %v2386_v13  ;;  %v2355_v2 = vld [vmem:[%s13440_s3 + $0xba8] sm:$0xff]  ;;  %v8784_v16 = vcombine.low %v2343_v56, %v2347_v57 }
 0x1d3   :  { %5203 = vmatpush1.bf16.msra.mxu0 %v8774_v23  ;;  %v2323_v23 = vld [vmem:[%s13440_s3 + $0xaa8] sm:$0xff] }
 0x1d4   :  { %5349 = vmatpush1.bf16.msra.mxu1 %v8704_v25  ;;  %5204 = vmatprep.subr.bf16.mxu0 %v8783_v26  ;;  %v8822_v25 = vcombine.low %v2382_v12, %v2386_v13  ;;  %v8752_v26 = vcombine.low %v2311_v14, %v2315_v15  ;;  %v8761_v29 = vcombine.high %v2319_v22, %v2323_v23  ;;  %v2359_v12 = vld [vmem:[%s13440_s3 + $0xbc8] sm:$0xff] }
 0x1d5   :  { %5350 = vmatprep.subr.bf16.mxu1 %v8713_v28  ;;  %v8831_v28 = vcombine.high %v2390_v20, %v2394_v21  ;;  %v2363_v13 = vld [vmem:[%s13440_s3 + $0xbe8] sm:$0xff]  ;;  %v8792_v15 = vcombine.low %v2351_v1, %v2355_v2 }
 0x1d6   :  { %v2367_v20 = vld [vmem:[%s13440_s3 + $0xc08] sm:$0xff] }
 0x1d7   :  { %5205 = vmatpush1.bf16.msra.mxu0 %v8782_v35  ;;  %v2331_v35 = vld [vmem:[%s13440_s3 + $0xae8] sm:$0xff] }
 0x1d8   :  { %5351 = vmatpush1.bf16.msra.mxu1 %v8712_v38  ;;  %5206 = vmatprep.subr.bf16.mxu0 %v8791_v39  ;;  %v8760_v38 = vcombine.low %v2319_v22, %v2323_v23  ;;  %v8839_v39 = vcombine.high %v2398_v30, %v2402_v32  ;;  %v8768_v53 = vcombine.low %v2327_v63, %v2331_v35  ;;  %v2371_v21 = vld [vmem:[%s13440_s3 + $0xc28] sm:$0xff] }
 0x1d9   :  { %5352 = vmatprep.subr.bf16.mxu1 %v8721_v40  ;;  %v8769_v40 = vcombine.high %v2327_v63, %v2331_v35  ;;  %v8800_v23 = vcombine.low %v2359_v12, %v2363_v13  ;;  %v8808_v35 = vcombine.low %v2367_v20, %v2371_v21 }
 0x1db   :  { %5207 = vmatpush1.bf16.msra.mxu0 %v8790_v52  ;;  %v8838_v52 = vcombine.low %v2398_v30, %v2402_v32  ;;  %v2375_v30 = vld [vmem:[%s13440_s3 + $0xc48] sm:$0xff] }
 0x1dc   :  { %5353 = vmatpush1.bf16.msra.mxu1 %v8720_v55  ;;  %5208 = vmatprep.subr.bf16.mxu0 %v8799_v43  ;;  %v8847_v55 = vcombine.high %v2406_v41, %v2410_v42  ;;  %v8777_v43 = vcombine.high %v2335_v47, %v2339_v51  ;;  %v2379_v32 = vld [vmem:[%s13440_s3 + $0xc68] sm:$0xff] }
 0x1dd   :  { %5354 = vmatprep.subr.bf16.mxu1 %v8729_v45  ;;  %v2414_v45 = vld [vmem:[%s13440_s3 + $0xd80] sm:$0xff]  ;;  %v2383_v41 = vld [vmem:[%s13440_s3 + $0xc88] sm:$0xff] }
 0x1de   :  { %v8855_v48 = vcombine.high %v2414_v45, %v2418_v54  ;;  %v8854_v27 = vcombine.low %v2414_v45, %v2418_v54  ;;  %v2387_v42 = vld [vmem:[%s13440_s3 + $0xca8] sm:$0xff] }
 0x1df   :  { %5209 = vmatpush1.bf16.msra.mxu0 %v8798_v58  ;;  %v8776_v58 = vcombine.low %v2335_v47, %v2339_v51  ;;  %v8816_v51 = vcombine.low %v2375_v30, %v2379_v32  ;;  %v2391_v45 = vld [vmem:[%s13440_s3 + $0xcc8] sm:$0xff] }
 0x1e0   :  { %5355 = vmatpush1.bf16.msra.mxu1 %v8728_v49  ;;  %5219 = vmatprep.subr.bf16.mxu0 %v8807_v59  ;;  %v8785_v49 = vcombine.high %v2343_v56, %v2347_v57  ;;  %v2422_v59 = vld [vmem:[%s13440_s3 + $0xdc0] sm:$0xff]  ;;  %v2395_v54 = vld [vmem:[%s13440_s3 + $0xce8] sm:$0xff]  ;;  %v8824_v57 = vcombine.low %v2383_v41, %v2387_v42 }
 0x1e1   :  { %5356 = vmatprep.subr.bf16.mxu1 %v8737_v61  ;;  %v2426_v61 = vld [vmem:[%s13440_s3 + $0xde0] sm:$0xff] }
 0x1e2   :  { %5211 = vmatmul.mubr.bf16.vlgmr.msra.gmra.mrb[8].mxu0 %v11364_v4  ;;  %v8862_v14 = vcombine.low %v2422_v59, %v2426_v61 }
 0x1e3   :  { %5220 = vmatpush1.bf16.msra.mxu0 %v8806_v3  ;;  %v8863_v3 = vcombine.high %v2422_v59, %v2426_v61  ;;  %v2399_v59 = vld [vmem:[%s13440_s3 + $0xd08] sm:$0xff] }
 0x1e4   :  { %5357 = vmatpush1.bf16.msra.mxu1 %v8736_v6  ;;  %5221 = vmatprep.subr.bf16.mxu0 %v8815_v7  ;;  %v8793_v6 = vcombine.high %v2351_v1, %v2355_v2  ;;  %v2430_v7 = vld [vmem:[%s13440_s3 + $0xe00] sm:$0xff]  ;;  %v2403_v61 = vld [vmem:[%s13440_s3 + $0xd28] sm:$0xff]  ;;  %v8832_v2 = vcombine.low %v2391_v45, %v2395_v54 }
 0x1e5   :  { %5358 = vmatprep.subr.bf16.mxu1 %v8745_v9  ;;  %v2434_v9 = vld [vmem:[%s13440_s3 + $0xe20] sm:$0xff] }
 0x1e6   :  { %v8870_v22 = vcombine.low %v2430_v7, %v2434_v9 }
 0x1e7   :  { %5222 = vmatpush1.bf16.msra.mxu0 %v8814_v17  ;;  %v8871_v17 = vcombine.high %v2430_v7, %v2434_v9  ;;  %v344_v7 = vsub.s32 6, %v9994_v44  ;;  %v2407_v9 = vld [vmem:[%s13440_s3 + $0xd48] sm:$0xff] }
 0x1e8   :  { %5359 = vmatpush1.bf16.msra.mxu1 %v8744_v18  ;;  %5223 = vmatprep.subr.bf16.mxu0 %v8823_v19  ;;  %v8801_v18 = vcombine.high %v2359_v12, %v2363_v13  ;;  %v2438_v19 = vld [vmem:[%s13440_s3 + $0xe40] sm:$0xff]  ;;  %v2411_v12 = vld [vmem:[%s13440_s3 + $0xd68] sm:$0xff] }
 0x1e9   :  { %5360 = vmatprep.subr.bf16.mxu1 %v8753_v11  ;;  %v2442_v11 = vld [vmem:[%s13440_s3 + $0xe60] sm:$0xff] }
 0x1ea   :  { %v8878_v63 = vcombine.low %v2438_v19, %v2442_v11 }
 0x1eb   :  { %5224 = vmatpush1.bf16.msra.mxu0 %v8822_v25  ;;  %v8879_v25 = vcombine.high %v2438_v19, %v2442_v11  ;;  %v2486_v19 = vld [vmem:[%s13440_s3 + $0xfc0] sm:$0xff] }
 0x1ec   :  { %5361 = vmatpush1.bf16.msra.mxu1 %v8752_v26  ;;  %5225 = vmatprep.subr.bf16.mxu0 %v8831_v28  ;;  %v8809_v26 = vcombine.high %v2367_v20, %v2371_v21  ;;  %v2446_v28 = vld [vmem:[%s13440_s3 + $0xe80] sm:$0xff]  ;;  %v345_v20 = vrot.slane %v11322_v5, %v344_v7  ;;  %v2415_v21 = vld [vmem:[%s13440_s3 + $0xd88] sm:$0xff] }
 0x1ed   :  { %5362 = vmatprep.subr.bf16.mxu1 %v8761_v29  ;;  %v2450_v29 = vld [vmem:[%s13440_s3 + $0xea0] sm:$0xff] }
 0x1ee   :  { %v8886_v47 = vcombine.low %v2446_v28, %v2450_v29  ;;  %v2490_v11 = vld [vmem:[%s13440_s3 + $0xfe0] sm:$0xff] }
 0x1ef   :  { %5226 = vmatpush1.bf16.msra.mxu0 %v8830_v37  ;;  %v8887_v37 = vcombine.high %v2446_v28, %v2450_v29  ;;  %v8927_v28 = vcombine.high %v2486_v19, %v2490_v11 }
 0x1f0   :  { %5363 = vmatpush1.bf16.msra.mxu1 %v8760_v38  ;;  %5227 = vmatprep.subr.bf16.mxu0 %v8839_v39  ;;  %v8817_v38 = vcombine.high %v2375_v30, %v2379_v32  ;;  %v2454_v39 = vld [vmem:[%s13440_s3 + $0xec0] sm:$0xff]  ;;  %v1984_v32 = vld [vmem:[%s13440_s3 + $0x10] sm:$0xff] }
 0x1f1   :  { %5364 = vmatprep.subr.bf16.mxu1 %v8769_v40  ;;  %v2458_v40 = vld [vmem:[%s13440_s3 + $0xee0] sm:$0xff] }
 0x1f2   :  { %v8894_v56 = vcombine.low %v2454_v39, %v2458_v40 }
 0x1f3   :  { %5228 = vmatpush1.bf16.msra.mxu0 %v8838_v52  ;;  %v8895_v52 = vcombine.high %v2454_v39, %v2458_v40  ;;  %v8926_v39 = vcombine.low %v2486_v19, %v2490_v11  ;;  %v2423_v40 = vld [vmem:[%s13440_s3 + $0xdc8] sm:$0xff] }
 0x1f4   :  { %5365 = vmatpush1.bf16.msra.mxu1 %v8768_v53  ;;  %5229 = vmatprep.subr.bf16.mxu0 %v8847_v55  ;;  %v8825_v53 = vcombine.high %v2383_v41, %v2387_v42  ;;  %v2462_v55 = vld [vmem:[%s13440_s3 + $0xf00] sm:$0xff]  ;;  %v2427_v41 = vld [vmem:[%s13440_s3 + $0xde8] sm:$0xff] }
 0x1f5   :  { %5366 = vmatprep.subr.bf16.mxu1 %v8777_v43  ;;  %v2466_v43 = vld [vmem:[%s13440_s3 + $0xf20] sm:$0xff] }
 0x1f6   :  { %v8902_v1 = vcombine.low %v2462_v55, %v2466_v43 }
 0x1f7   :  { %5230 = vmatpush1.bf16.msra.mxu0 %v8846_v31  ;;  %v8903_v31 = vcombine.high %v2462_v55, %v2466_v43  ;;  %v1992_v55 = vld [vmem:[%s13440_s3 + $0x50] sm:$0xff] }
 0x1f8   :  { %5367 = vmatpush1.bf16.msra.mxu1 %v8776_v58  ;;  %5231 = vmatprep.subr.bf16.mxu0 %v8855_v48  ;;  %v8833_v58 = vcombine.high %v2391_v45, %v2395_v54  ;;  %v2470_v48 = vld [vmem:[%s13440_s3 + $0xf40] sm:$0xff]  ;;  %v1996_v43 = vld [vmem:[%s13440_s3 + $0x70] sm:$0xff]  ;;  %v8865_v45 = vcombine.high %v2423_v40, %v2427_v41  ;;  %v2431_v54 = vld [vmem:[%s13440_s3 + $0xe08] sm:$0xff] }
 0x1f9   :  { %5368 = vmatprep.subr.bf16.mxu1 %v8785_v49  ;;  %v2474_v49 = vld [vmem:[%s13440_s3 + $0xf60] sm:$0xff] }
 0x1fa   :  { %v8910_v13 = vcombine.low %v2470_v48, %v2474_v49 }
 0x1fb   :  { %5232 = vmatpush1.bf16.msra.mxu0 %v8854_v27  ;;  %v8911_v27 = vcombine.high %v2470_v48, %v2474_v49  ;;  %v8864_v48 = vcombine.low %v2423_v40, %v2427_v41  ;;  %v8435_v49 = vcombine.high %v1992_v55, %v1996_v43  ;;  %v2032_v41 = vld [vmem:[%s13440_s3 + $0x190] sm:$0xff] }
 0x1fc   :  { %5369 = vmatpush1.bf16.msra.mxu1 %v8784_v16  ;;  %5233 = vmatprep.subr.bf16.mxu0 %v8863_v3  ;;  %v8841_v16 = vcombine.high %v2399_v59, %v2403_v61  ;;  %v2478_v3 = vld [vmem:[%s13440_s3 + $0xf80] sm:$0xff] }
 0x1fd   :  { %5370 = vmatprep.subr.bf16.mxu1 %v8793_v6  ;;  %v2482_v6 = vld [vmem:[%s13440_s3 + $0xfa0] sm:$0xff] }
 0x1ff   :  { %5234 = vmatpush1.bf16.msra.mxu0 %v8862_v14  ;;  %v348_v14 = vsub.s32 7, %v9994_v44  ;;  %v9736_v44 = vld [vmem:[%s13442_s5 + $0x7c0] ss:$16 sps:$4 sm:$0xff]  }
 0x200   :  { %5371 = vmatpush1.bf16.msra.mxu1 %v8792_v15  ;;  %5235 = vmatprep.subr.bf16.mxu0 %v8871_v17  ;;  %v8840_v15 = vcombine.low %v2399_v59, %v2403_v61  ;;  %v8919_v17 = vcombine.high %v2478_v3, %v2482_v6  ;;  %v2000_v61 = vld [vmem:[%s13440_s3 + $0x90] sm:$0xff] }
 0x201   :  { %5372 = vmatprep.subr.bf16.mxu1 %v8801_v18  ;;  %v8849_v18 = vcombine.high %v2407_v9, %v2411_v12 }
 0x203   :  { %5236 = vmatpush1.bf16.msra.mxu0 %v8870_v22  ;;  %v2419_v22 = vld [vmem:[%s13440_s3 + $0xda8] sm:$0xff] }
 0x204   :  { %5373 = vmatpush1.bf16.msra.mxu1 %v8800_v23  ;;  %5237 = vmatprep.subr.bf16.mxu0 %v8879_v25  ;;  %v8918_v23 = vcombine.low %v2478_v3, %v2482_v6  ;;  %v349_v25 = vrot.slane %v11322_v5, %v348_v14  ;;  %v8857_v30 = vcombine.high %v2415_v21, %v2419_v22 }
 0x205   :  { %5383 = vmatprep.subr.bf16.mxu1 %v8809_v26  ;;  %v8848_v26 = vcombine.low %v2407_v9, %v2411_v12  ;;  %v2008_v12 = vld [vmem:[%s13440_s3 + $0xd0] sm:$0xff] }
 0x207   :  { %5238 = vmatpush1.bf16.msra.mxu0 %v8878_v63  ;;  %5375 = vmatmul.mubr.bf16.vlgmr.msra.gmra.mrb[12].mxu1 %v11364_v4  ;;  %v1988_v63 = vld [vmem:[%s13440_s3 + $0x30] sm:$0xff] }
 0x208   :  { %5384 = vmatpush1.bf16.msra.mxu1 %v8808_v35  ;;  %5239 = vmatprep.subr.bf16.mxu0 %v8887_v37 }
 0x209   :  { %5385 = vmatprep.subr.bf16.mxu1 %v8817_v38 }
 0x20b   :  { %5240 = vmatpush1.bf16.msra.mxu0 %v8886_v47 }
 0x20c   :  { %5386 = vmatpush1.bf16.msra.mxu1 %v8816_v51  ;;  %5241 = vmatprep.subr.bf16.mxu0 %v8895_v52  ;;  %v8856_v51 = vcombine.low %v2415_v21, %v2419_v22  ;;  %v8427_v52 = vcombine.high %v1984_v32, %v1988_v63  ;;  %v2016_v21 = vld [vmem:[%s13440_s3 + $0x110] sm:$0xff] }
 0x20d   :  { %5387 = vmatprep.subr.bf16.mxu1 %v8825_v53  ;;  %v2020_v22 = vld [vmem:[%s13440_s3 + $0x130] sm:$0xff] }
 0x20f   :  { %5242 = vmatpush1.bf16.msra.mxu0 %v8894_v56  ;;  %v2435_v56 = vld [vmem:[%s13440_s3 + $0xe28] sm:$0xff] }
 0x210   :  { %5388 = vmatpush1.bf16.msra.mxu1 %v8824_v57  ;;  %5243 = vmatprep.subr.bf16.mxu0 %v8903_v31  ;;  %v8426_v31 = vcombine.low %v1984_v32, %v1988_v63  ;;  %v8873_v59 = vcombine.high %v2431_v54, %v2435_v56  ;;  %v8872_v3 = vcombine.low %v2431_v54, %v2435_v56  ;;  %v2024_v32 = vld [vmem:[%s13440_s3 + $0x150] sm:$0xff]  ;;  %v2479_v56 = vld [vmem:[%s13440_s3 + $0xf88] sm:$0xff] }
 0x211   :  { %5389 = vmatprep.subr.bf16.mxu1 %v8833_v58  ;;  %v2028_v63 = vld [vmem:[%s13440_s3 + $0x170] sm:$0xff] }
 0x212   :  { %v2044_v54 = vld [vmem:[%s13440_s3 + $0x1f0] sm:$0xff] }
 0x213   :  { %5244 = vmatpush1.bf16.msra.mxu0 %v8902_v1  ;;  %v2004_v1 = vld [vmem:[%s13440_s3 + $0xb0] sm:$0xff] }
 0x214   :  { %5390 = vmatpush1.bf16.msra.mxu1 %v8832_v2  ;;  %5245 = vmatprep.subr.bf16.mxu0 %v8911_v27  ;;  %v2439_v2 = vld [vmem:[%s13440_s3 + $0xe48] sm:$0xff]  ;;  %v8443_v6 = vcombine.high %v2000_v61, %v2004_v1 }
 0x215   :  { %5391 = vmatprep.subr.bf16.mxu1 %v8841_v16  ;;  %v2443_v27 = vld [vmem:[%s13440_s3 + $0xe68] sm:$0xff]  ;;  %v8434_v16 = vcombine.low %v1992_v55, %v1996_v43 }
 0x216   :  { %v8881_v9 = vcombine.high %v2439_v2, %v2443_v27  ;;  %v8880_v19 = vcombine.low %v2439_v2, %v2443_v27  ;;  %v2052_v2 = vld [vmem:[%s13440_s3 + $0x230] sm:$0xff]  ;;  %v2487_v27 = vld [vmem:[%s13440_s3 + $0xfc8] sm:$0xff] }
 0x217   :  { %5246 = vmatpush1.bf16.msra.mxu0 %v8910_v13  ;;  %v2012_v13 = vld [vmem:[%s13440_s3 + $0xf0] sm:$0xff] }
 0x218   :  { %5392 = vmatpush1.bf16.msra.mxu1 %v8840_v15  ;;  %5247 = vmatprep.subr.bf16.mxu0 %v8919_v17  ;;  %v2447_v15 = vld [vmem:[%s13440_s3 + $0xe88] sm:$0xff]  ;;  %v8451_v11 = vcombine.high %v2008_v12, %v2012_v13 }
 0x219   :  { %v1959_v29 = vpop.f32.mrb[8].mxu1  ;;  %5393 = vmatprep.subr.bf16.mxu1 %v8849_v18  ;;  %v2451_v17 = vld [vmem:[%s13440_s3 + $0xea8] sm:$0xff]  ;;  %v8442_v18 = vcombine.low %v2000_v61, %v2004_v1  ;;  %v2048_v1 = vld [vmem:[%s13440_s3 + $0x210] sm:$0xff] }
 0x21a   :  { %v9263_v35 = vadd.f32 %v1959_v29, %v345_v20  ;;  %v1961_v37 = vpop.f32.mrb[9].mxu1  ;;  %v8889_v20 = vcombine.high %v2447_v15, %v2451_v17  ;;  %v8459_v29 = vcombine.high %v2016_v21, %v2020_v22 }
 0x21b   :  { %v9264_v38 = vadd.f32 %v1961_v37, %v349_v25  ;;  %5248 = vmatpush1.bf16.msra.mxu0 %v8918_v23  ;;  %v1963_v5 = vpop.f32.mrb[10].mxu1  ;;  %v2455_v23 = vld [vmem:[%s13440_s3 + $0xec8] sm:$0xff] }
 0x21c   :  { %v1972_v42 = vmax.f32 %v9263_v35, 0.0  ;;  %5394 = vmatpush1.bf16.msra.mxu1 %v8848_v26  ;;  %v1964_v47 = vpop.f32.mrb[11].mxu1  ;;  %5249 = vmatprep.subr.bf16.mxu0 %v8927_v28  ;;  %v2459_v25 = vld [vmem:[%s13440_s3 + $0xee8] sm:$0xff]  ;;  %v8450_v26 = vcombine.low %v2008_v12, %v2012_v13  ;;  %v8888_v28 = vcombine.low %v2447_v15, %v2451_v17  ;;  %v2056_v13 = vld [vmem:[%s13440_s3 + $0x250] sm:$0xff]  ;;  %v1985_v17 = vld [vmem:[%s13440_s3 + $0x18] sm:$0xff] }
 0x21d   :  { %v1973_v53 = vmax.f32 %v9264_v38, 0.0  ;;  %5395 = vmatprep.subr.bf16.mxu1 %v8857_v30  ;;  %v8897_v30 = vcombine.high %v2455_v23, %v2459_v25  ;;  %v2463_v35 = vld [vmem:[%s13440_s3 + $0xf08] sm:$0xff]  ;;  %v8458_v38 = vcombine.low %v2016_v21, %v2020_v22  ;;  %v8896_v5 = vcombine.low %v2455_v23, %v2459_v25  ;;  %v2060_v15 = vld [vmem:[%s13440_s3 + $0x270] sm:$0xff]  ;;  %v1993_v25 = vld [vmem:[%s13440_s3 + $0x58] sm:$0xff] }
 0x21e   :  { %v11570_v58 = vpack.c.bf16 %v1972_v42, %v1972_v42  ;;  %v2467_v37 = vld [vmem:[%s13440_s3 + $0xf28] sm:$0xff]  ;;  %v2036_v42 = vld [vmem:[%s13440_s3 + $0x1b0] sm:$0xff] }
 0x21f   :  { %v11568_v57 = vpack.c.bf16 %v1973_v53, %v1973_v53  ;;  %5250 = vmatpush1.bf16.msra.mxu0 %v8926_v39  ;;  %v8467_v39 = vcombine.high %v2024_v32, %v2028_v63  ;;  %v8905_v40 = vcombine.high %v2463_v35, %v2467_v37  ;;  %v2471_v47 = vld [vmem:[%s13440_s3 + $0xf48] sm:$0xff]  ;;  %v8904_v53 = vcombine.low %v2463_v35, %v2467_v37  ;;  %v2064_v22 = vld [vmem:[%s13440_s3 + $0x290] sm:$0xff]  ;;  %v2001_v37 = vld [vmem:[%s13440_s3 + $0x98] sm:$0xff] }
 0x220   :  { %5396 = vmatpush1.bf16.msra.mxu1 %v8856_v51  ;;  %5424 = vmatprep.subr.bf16.mxu0 %v8427_v52  ;;  %v2475_v51 = vld [vmem:[%s13440_s3 + $0xf68] sm:$0xff]  ;;  %v8466_v52 = vcombine.low %v2024_v32, %v2028_v63  ;;  %v8475_v55 = vcombine.high %v2032_v41, %v2036_v42  ;;  %v2068_v23 = vld [vmem:[%s13440_s3 + $0x2b0] sm:$0xff] }
 0x221   :  { %5251 = vmatprep.mubr.bf16.mxu0 %v11568_v57  ;;  %5415 = vmatprep.mubr.bf16.mxu1 %v11568_v57  ;;  %v8913_v43 = vcombine.high %v2471_v47, %v2475_v51  ;;  %v2072_v63 = vld [vmem:[%s13440_s3 + $0x2d0] sm:$0xff] }
 0x222   :  { %5252 = vmatmul.mubr.bf16.vlgmr.msra.gmra.mrb[8].mxu0 %v11570_v58  ;;  %5397 = vmatprep.subr.bf16.mxu1 %v8865_v45  ;;  %v2040_v45 = vld [vmem:[%s13440_s3 + $0x1d0] sm:$0xff] }
 0x223   :  { %5425 = vmatpush1.bf16.msra.mxu0 %v8426_v31  ;;  %5456 = vmatprep.mubr.bf16.mxu0 %v10836_v50  ;;  %v2483_v31 = vld [vmem:[%s13440_s3 + $0xfa8] sm:$0xff]  ;;  %v2076_v35 = vld [vmem:[%s13440_s3 + $0x2f0] sm:$0xff] }
 0x224   :  { %5398 = vmatpush1.bf16.msra.mxu1 %v8864_v48  ;;  %5426 = vmatprep.subr.bf16.mxu0 %v8435_v49  ;;  %v8474_v48 = vcombine.low %v2032_v41, %v2036_v42  ;;  %v8912_v49 = vcombine.low %v2471_v47, %v2475_v51  ;;  %v8921_v61 = vcombine.high %v2479_v56, %v2483_v31  ;;  %v2080_v42 = vld [vmem:[%s13440_s3 + $0x310] sm:$0xff]  ;;  %v2009_v51 = vld [vmem:[%s13440_s3 + $0xd8] sm:$0xff] }
 0x225   :  { %5399 = vmatprep.subr.bf16.mxu1 %v8873_v59  ;;  %v8483_v59 = vcombine.high %v2040_v45, %v2044_v54  ;;  %v2084_v47 = vld [vmem:[%s13440_s3 + $0x330] sm:$0xff] }
 0x227   :  { %5427 = vmatpush1.bf16.msra.mxu0 %v8434_v16  ;;  %v2491_v16 = vld [vmem:[%s13440_s3 + $0xfe8] sm:$0xff] }
 0x228   :  { %5400 = vmatpush1.bf16.msra.mxu1 %v8872_v3  ;;  %5428 = vmatprep.subr.bf16.mxu0 %v8443_v6  ;;  %v8482_v3 = vcombine.low %v2040_v45, %v2044_v54  ;;  %v8920_v6 = vcombine.low %v2479_v56, %v2483_v31  ;;  %v8929_v12 = vcombine.high %v2487_v27, %v2491_v16  ;;  %v2088_v45 = vld [vmem:[%s13440_s3 + $0x350] sm:$0xff]  ;;  %v2017_v56 = vld [vmem:[%s13440_s3 + $0x118] sm:$0xff] }
 0x229   :  { %5401 = vmatprep.subr.bf16.mxu1 %v8881_v9  ;;  %v8491_v9 = vcombine.high %v2048_v1, %v2052_v2  ;;  %v2092_v54 = vld [vmem:[%s13440_s3 + $0x370] sm:$0xff]  ;;  %v2021_v31 = vld [vmem:[%s13440_s3 + $0x138] sm:$0xff] }
 0x22b   :  { %5429 = vmatpush1.bf16.msra.mxu0 %v8442_v18  ;;  %v1989_v18 = vld [vmem:[%s13440_s3 + $0x38] sm:$0xff] }
 0x22c   :  { %5402 = vmatpush1.bf16.msra.mxu1 %v8880_v19  ;;  %5430 = vmatprep.subr.bf16.mxu0 %v8451_v11  ;;  %v8490_v19 = vcombine.low %v2048_v1, %v2052_v2  ;;  %v8928_v11 = vcombine.low %v2487_v27, %v2491_v16  ;;  %v8429_v21 = vcombine.high %v1985_v17, %v1989_v18  ;;  %v2096_v1 = vld [vmem:[%s13440_s3 + $0x390] sm:$0xff]  ;;  %v2025_v27 = vld [vmem:[%s13440_s3 + $0x158] sm:$0xff] }
 0x22d   :  { %5403 = vmatprep.subr.bf16.mxu1 %v8889_v20  ;;  %v8499_v20 = vcombine.high %v2056_v13, %v2060_v15  ;;  %v2100_v2 = vld [vmem:[%s13440_s3 + $0x3b0] sm:$0xff]  ;;  %v2029_v16 = vld [vmem:[%s13440_s3 + $0x178] sm:$0xff] }
 0x22f   :  { %5431 = vmatpush1.bf16.msra.mxu0 %v8450_v26  ;;  %v1997_v26 = vld [vmem:[%s13440_s3 + $0x78] sm:$0xff] }
 0x230   :  { %5404 = vmatpush1.bf16.msra.mxu1 %v8888_v28  ;;  %5432 = vmatprep.subr.bf16.mxu0 %v8459_v29  ;;  %v8498_v28 = vcombine.low %v2056_v13, %v2060_v15  ;;  %v8428_v29 = vcombine.low %v1985_v17, %v1989_v18  ;;  %v8437_v32 = vcombine.high %v1993_v25, %v1997_v26  ;;  %v2104_v13 = vld [vmem:[%s13440_s3 + $0x3d0] sm:$0xff]  ;;  %v2033_v17 = vld [vmem:[%s13440_s3 + $0x198] sm:$0xff] }
 0x231   :  { %5405 = vmatprep.subr.bf16.mxu1 %v8897_v30  ;;  %v8507_v30 = vcombine.high %v2064_v22, %v2068_v23  ;;  %v2108_v15 = vld [vmem:[%s13440_s3 + $0x3f0] sm:$0xff]  ;;  %v2037_v18 = vld [vmem:[%s13440_s3 + $0x1b8] sm:$0xff] }
 0x233   :  { %5433 = vmatpush1.bf16.msra.mxu0 %v8458_v38  ;;  %v2005_v38 = vld [vmem:[%s13440_s3 + $0xb8] sm:$0xff] }
 0x234   :  { %5406 = vmatpush1.bf16.msra.mxu1 %v8896_v5  ;;  %5434 = vmatprep.subr.bf16.mxu0 %v8467_v39  ;;  %v8506_v5 = vcombine.low %v2064_v22, %v2068_v23  ;;  %v8436_v39 = vcombine.low %v1993_v25, %v1997_v26  ;;  %v8445_v41 = vcombine.high %v2001_v37, %v2005_v38  ;;  %v2112_v22 = vld [vmem:[%s13440_s3 + $0x410] sm:$0xff]  ;;  %v2041_v25 = vld [vmem:[%s13440_s3 + $0x1d8] sm:$0xff] }
 0x235   :  { %5407 = vmatprep.subr.bf16.mxu1 %v8905_v40  ;;  %v8515_v40 = vcombine.high %v2072_v63, %v2076_v35  ;;  %v2116_v23 = vld [vmem:[%s13440_s3 + $0x430] sm:$0xff]  ;;  %v2045_v26 = vld [vmem:[%s13440_s3 + $0x1f8] sm:$0xff] }
 0x237   :  { %5435 = vmatpush1.bf16.msra.mxu0 %v8466_v52  ;;  %v8514_v52 = vcombine.low %v2072_v63, %v2076_v35  ;;  %v2120_v63 = vld [vmem:[%s13440_s3 + $0x450] sm:$0xff] }
 0x238   :  { %5408 = vmatpush1.bf16.msra.mxu1 %v8904_v53  ;;  %5436 = vmatprep.subr.bf16.mxu0 %v8475_v55  ;;  %v8444_v53 = vcombine.low %v2001_v37, %v2005_v38  ;;  %v8523_v55 = vcombine.high %v2080_v42, %v2084_v47  ;;  %v2124_v35 = vld [vmem:[%s13440_s3 + $0x470] sm:$0xff]  ;;  %v2049_v37 = vld [vmem:[%s13440_s3 + $0x218] sm:$0xff] }
 0x239   :  { %5409 = vmatprep.subr.bf16.mxu1 %v8913_v43  ;;  %v2053_v38 = vld [vmem:[%s13440_s3 + $0x238] sm:$0xff] }
 0x23b   :  { %5437 = vmatpush1.bf16.msra.mxu0 %v8474_v48  ;;  %v8522_v48 = vcombine.low %v2080_v42, %v2084_v47  ;;  %v2128_v42 = vld [vmem:[%s13440_s3 + $0x490] sm:$0xff] }
 0x23c   :  { %5410 = vmatpush1.bf16.msra.mxu1 %v8912_v49  ;;  %5438 = vmatprep.subr.bf16.mxu0 %v8483_v59  ;;  %v8531_v59 = vcombine.high %v2088_v45, %v2092_v54  ;;  %v2132_v47 = vld [vmem:[%s13440_s3 + $0x4b0] sm:$0xff] }
 0x23d   :  { %5411 = vmatprep.subr.bf16.mxu1 %v8921_v61  ;;  %v8461_v61 = vcombine.high %v2017_v56, %v2021_v31 }
 0x23f   :  { %5439 = vmatpush1.bf16.msra.mxu0 %v8482_v3  ;;  %v8530_v3 = vcombine.low %v2088_v45, %v2092_v54  ;;  %v2136_v45 = vld [vmem:[%s13440_s3 + $0x4d0] sm:$0xff] }
 0x240   :  { %5412 = vmatpush1.bf16.msra.mxu1 %v8920_v6  ;;  %5440 = vmatprep.subr.bf16.mxu0 %v8491_v9  ;;  %v8460_v6 = vcombine.low %v2017_v56, %v2021_v31  ;;  %v8539_v9 = vcombine.high %v2096_v1, %v2100_v2  ;;  %v2140_v54 = vld [vmem:[%s13440_s3 + $0x4f0] sm:$0xff]  ;;  %v2065_v56 = vld [vmem:[%s13440_s3 + $0x298] sm:$0xff] }
 0x241   :  { %5413 = vmatprep.subr.bf16.mxu1 %v8929_v12  ;;  %v8469_v12 = vcombine.high %v2025_v27, %v2029_v16  ;;  %v2069_v31 = vld [vmem:[%s13440_s3 + $0x2b8] sm:$0xff] }
 0x243   :  { %5441 = vmatpush1.bf16.msra.mxu0 %v8490_v19  ;;  %v8538_v19 = vcombine.low %v2096_v1, %v2100_v2  ;;  %v2144_v1 = vld [vmem:[%s13440_s3 + $0x510] sm:$0xff] }
 0x244   :  { %5414 = vmatpush1.bf16.msra.mxu1 %v8928_v11  ;;  %5442 = vmatprep.subr.bf16.mxu0 %v8499_v20  ;;  %v8468_v11 = vcombine.low %v2025_v27, %v2029_v16  ;;  %v8547_v20 = vcombine.high %v2104_v13, %v2108_v15  ;;  %v2148_v2 = vld [vmem:[%s13440_s3 + $0x530] sm:$0xff]  ;;  %v2073_v27 = vld [vmem:[%s13440_s3 + $0x2d8] sm:$0xff] }
 0x245   :  { %5588 = vmatprep.subr.bf16.mxu1 %v8429_v21  ;;  %v8477_v21 = vcombine.high %v2033_v17, %v2037_v18  ;;  %v2077_v16 = vld [vmem:[%s13440_s3 + $0x2f8] sm:$0xff] }
 0x247   :  { %5416 = vmatmul.mubr.bf16.vlgmr.msra.gmra.mrb[12].mxu1 %v11570_v58  ;;  %5443 = vmatpush1.bf16.msra.mxu0 %v8498_v28  ;;  %v8546_v28 = vcombine.low %v2104_v13, %v2108_v15  ;;  %v2152_v13 = vld [vmem:[%s13440_s3 + $0x550] sm:$0xff] }
 0x248   :  { %5589 = vmatpush1.bf16.msra.mxu1 %v8428_v29  ;;  %5620 = vmatprep.mubr.bf16.mxu1 %v10836_v50  ;;  %v2013_v50 = vld [vmem:[%s13440_s3 + $0xf8] sm:$0xff]  ;;  %v8476_v29 = vcombine.low %v2033_v17, %v2037_v18  ;;  %v2156_v15 = vld [vmem:[%s13440_s3 + $0x570] sm:$0xff] }
 0x249   :  { %5444 = vmatprep.subr.bf16.mxu0 %v8507_v30  ;;  %5590 = vmatprep.subr.bf16.mxu1 %v8437_v32  ;;  %v8453_v43 = vcombine.high %v2009_v51, %v2013_v50  ;;  %v8452_v49 = vcombine.low %v2009_v51, %v2013_v50  ;;  %v8555_v30 = vcombine.high %v2112_v22, %v2116_v23  ;;  %v2057_v51 = vld [vmem:[%s13440_s3 + $0x258] sm:$0xff] }
 0x24a   :  { %v8485_v32 = vcombine.high %v2041_v25, %v2045_v26  ;;  %v2061_v50 = vld [vmem:[%s13440_s3 + $0x278] sm:$0xff] }
 0x24b   :  { %5445 = vmatpush1.bf16.msra.mxu0 %v8506_v5  ;;  %v8554_v5 = vcombine.low %v2112_v22, %v2116_v23  ;;  %v2081_v17 = vld [vmem:[%s13440_s3 + $0x318] sm:$0xff]  ;;  %v2160_v22 = vld [vmem:[%s13440_s3 + $0x590] sm:$0xff] }
 0x24c   :  { %5591 = vmatpush1.bf16.msra.mxu1 %v8436_v39  ;;  %5446 = vmatprep.subr.bf16.mxu0 %v8515_v40  ;;  %v8484_v39 = vcombine.low %v2041_v25, %v2045_v26  ;;  %v8563_v40 = vcombine.high %v2120_v63, %v2124_v35  ;;  %v2085_v18 = vld [vmem:[%s13440_s3 + $0x338] sm:$0xff]  ;;  %v2164_v23 = vld [vmem:[%s13440_s3 + $0x5b0] sm:$0xff] }
 0x24d   :  { %5592 = vmatprep.subr.bf16.mxu1 %v8445_v41  ;;  %v8493_v41 = vcombine.high %v2049_v37, %v2053_v38  ;;  %v2089_v25 = vld [vmem:[%s13440_s3 + $0x358] sm:$0xff] }
 0x24e   :  { %v2093_v26 = vld [vmem:[%s13440_s3 + $0x378] sm:$0xff] }
 0x24f   :  { %5447 = vmatpush1.bf16.msra.mxu0 %v8514_v52  ;;  %v8562_v52 = vcombine.low %v2120_v63, %v2124_v35  ;;  %v2168_v63 = vld [vmem:[%s13440_s3 + $0x5d0] sm:$0xff] }
 0x250   :  { %5593 = vmatpush1.bf16.msra.mxu1 %v8444_v53  ;;  %5448 = vmatprep.subr.bf16.mxu0 %v8523_v55  ;;  %v8492_v53 = vcombine.low %v2049_v37, %v2053_v38  ;;  %v8571_v55 = vcombine.high %v2128_v42, %v2132_v47  ;;  %v2172_v35 = vld [vmem:[%s13440_s3 + $0x5f0] sm:$0xff]  ;;  %v2097_v37 = vld [vmem:[%s13440_s3 + $0x398] sm:$0xff] }
 0x251   :  { %5594 = vmatprep.subr.bf16.mxu1 %v8453_v43  ;;  %v8501_v43 = vcombine.high %v2057_v51, %v2061_v50  ;;  %v2101_v38 = vld [vmem:[%s13440_s3 + $0x3b8] sm:$0xff] }
 0x253   :  { %5449 = vmatpush1.bf16.msra.mxu0 %v8522_v48  ;;  %v8570_v48 = vcombine.low %v2128_v42, %v2132_v47  ;;  %v2176_v42 = vld [vmem:[%s13440_s3 + $0x610] sm:$0xff] }
 0x254   :  { %5595 = vmatpush1.bf16.msra.mxu1 %v8452_v49  ;;  %5450 = vmatprep.subr.bf16.mxu0 %v8531_v59  ;;  %v8500_v49 = vcombine.low %v2057_v51, %v2061_v50  ;;  %v8579_v59 = vcombine.high %v2136_v45, %v2140_v54  ;;  %v2180_v47 = vld [vmem:[%s13440_s3 + $0x630] sm:$0xff]  ;;  %v2105_v51 = vld [vmem:[%s13440_s3 + $0x3d8] sm:$0xff] }
 0x255   :  { %5596 = vmatprep.subr.bf16.mxu1 %v8461_v61  ;;  %v8509_v61 = vcombine.high %v2065_v56, %v2069_v31  ;;  %v2109_v50 = vld [vmem:[%s13440_s3 + $0x3f8] sm:$0xff] }
 0x257   :  { %5451 = vmatpush1.bf16.msra.mxu0 %v8530_v3  ;;  %v8578_v3 = vcombine.low %v2136_v45, %v2140_v54  ;;  %v2184_v45 = vld [vmem:[%s13440_s3 + $0x650] sm:$0xff] }
 0x258   :  { %5597 = vmatpush1.bf16.msra.mxu1 %v8460_v6  ;;  %5452 = vmatprep.subr.bf16.mxu0 %v8539_v9  ;;  %v8508_v6 = vcombine.low %v2065_v56, %v2069_v31  ;;  %v8587_v9 = vcombine.high %v2144_v1, %v2148_v2  ;;  %v2188_v54 = vld [vmem:[%s13440_s3 + $0x670] sm:$0xff]  ;;  %v2113_v56 = vld [vmem:[%s13440_s3 + $0x418] sm:$0xff] }
 0x259   :  { %5598 = vmatprep.subr.bf16.mxu1 %v8469_v12  ;;  %v8517_v12 = vcombine.high %v2073_v27, %v2077_v16  ;;  %v2117_v31 = vld [vmem:[%s13440_s3 + $0x438] sm:$0xff] }
 0x25b   :  { %5453 = vmatpush1.bf16.msra.mxu0 %v8538_v19  ;;  %v8586_v19 = vcombine.low %v2144_v1, %v2148_v2  ;;  %v2192_v1 = vld [vmem:[%s13440_s3 + $0x690] sm:$0xff] }
 0x25c   :  { %5599 = vmatpush1.bf16.msra.mxu1 %v8468_v11  ;;  %5454 = vmatprep.subr.bf16.mxu0 %v8547_v20  ;;  %v8516_v11 = vcombine.low %v2073_v27, %v2077_v16  ;;  %v8595_v20 = vcombine.high %v2152_v13, %v2156_v15  ;;  %v2196_v2 = vld [vmem:[%s13440_s3 + $0x6b0] sm:$0xff]  ;;  %v2121_v27 = vld [vmem:[%s13440_s3 + $0x458] sm:$0xff] }
 0x25d   :  { %5600 = vmatprep.subr.bf16.mxu1 %v8477_v21  ;;  %v8525_v21 = vcombine.high %v2081_v17, %v2085_v18  ;;  %v2125_v16 = vld [vmem:[%s13440_s3 + $0x478] sm:$0xff] }
 0x25f   :  { %5455 = vmatpush1.bf16.msra.mxu0 %v8546_v28  ;;  %v8594_v28 = vcombine.low %v2152_v13, %v2156_v15  ;;  %v2200_v13 = vld [vmem:[%s13440_s3 + $0x6d0] sm:$0xff] }
 0x260   :  { %5601 = vmatpush1.bf16.msra.mxu1 %v8476_v29  ;;  %5465 = vmatprep.subr.bf16.mxu0 %v8555_v30  ;;  %v8524_v29 = vcombine.low %v2081_v17, %v2085_v18  ;;  %v8603_v30 = vcombine.high %v2160_v22, %v2164_v23  ;;  %v2204_v15 = vld [vmem:[%s13440_s3 + $0x6f0] sm:$0xff]  ;;  %v2129_v17 = vld [vmem:[%s13440_s3 + $0x498] sm:$0xff] }
 0x261   :  { %5602 = vmatprep.subr.bf16.mxu1 %v8485_v32  ;;  %v8533_v32 = vcombine.high %v2089_v25, %v2093_v26  ;;  %v2133_v18 = vld [vmem:[%s13440_s3 + $0x4b8] sm:$0xff] }
 0x262   :  { %5457 = vmatmul.mubr.bf16.vlgmr.msra.gmra.mrb[12].mxu0 %v10834_v46 }
 0x263   :  { %5466 = vmatpush1.bf16.msra.mxu0 %v8554_v5  ;;  %5497 = vmatprep.mubr.bf16.mxu0 %v11147_v33  ;;  %v8602_v5 = vcombine.low %v2160_v22, %v2164_v23  ;;  %v2208_v22 = vld [vmem:[%s13440_s3 + $0x710] sm:$0xff] }
 0x264   :  { %5603 = vmatpush1.bf16.msra.mxu1 %v8484_v39  ;;  %5467 = vmatprep.subr.bf16.mxu0 %v8563_v40  ;;  %v8532_v39 = vcombine.low %v2089_v25, %v2093_v26  ;;  %v8611_v40 = vcombine.high %v2168_v63, %v2172_v35  ;;  %v2212_v23 = vld [vmem:[%s13440_s3 + $0x730] sm:$0xff]  ;;  %v8642_v25 = vcombine.low %v2200_v13, %v2204_v15 }
 0x265   :  { %5604 = vmatprep.subr.bf16.mxu1 %v8493_v41  ;;  %v8541_v41 = vcombine.high %v2097_v37, %v2101_v38  ;;  %v8572_v26 = vcombine.low %v2129_v17, %v2133_v18 }
 0x267   :  { %5468 = vmatpush1.bf16.msra.mxu0 %v8562_v52  ;;  %v8610_v52 = vcombine.low %v2168_v63, %v2172_v35  ;;  %v2145_v63 = vld [vmem:[%s13440_s3 + $0x518] sm:$0xff] }
 0x268   :  { %5605 = vmatpush1.bf16.msra.mxu1 %v8492_v53  ;;  %5469 = vmatprep.subr.bf16.mxu0 %v8571_v55  ;;  %v8540_v53 = vcombine.low %v2097_v37, %v2101_v38  ;;  %v8619_v55 = vcombine.high %v2176_v42, %v2180_v47  ;;  %v2149_v35 = vld [vmem:[%s13440_s3 + $0x538] sm:$0xff]  ;;  %v8650_v37 = vcombine.low %v2208_v22, %v2212_v23 }
 0x269   :  { %5606 = vmatprep.subr.bf16.mxu1 %v8501_v43  ;;  %v8549_v43 = vcombine.high %v2105_v51, %v2109_v50 }
 0x26b   :  { %5470 = vmatpush1.bf16.msra.mxu0 %v8570_v48  ;;  %v8618_v48 = vcombine.low %v2176_v42, %v2180_v47  ;;  %v2153_v42 = vld [vmem:[%s13440_s3 + $0x558] sm:$0xff] }
 0x26c   :  { %5607 = vmatpush1.bf16.msra.mxu1 %v8500_v49  ;;  %5471 = vmatprep.subr.bf16.mxu0 %v8579_v59  ;;  %v8548_v49 = vcombine.low %v2105_v51, %v2109_v50  ;;  %v8627_v59 = vcombine.high %v2184_v45, %v2188_v54  ;;  %v2157_v47 = vld [vmem:[%s13440_s3 + $0x578] sm:$0xff]  ;;  %v8588_v50 = vcombine.low %v2145_v63, %v2149_v35 }
 0x26d   :  { %5608 = vmatprep.subr.bf16.mxu1 %v8509_v61  ;;  %v8557_v61 = vcombine.high %v2113_v56, %v2117_v31 }
 0x26f   :  { %5472 = vmatpush1.bf16.msra.mxu0 %v8578_v3  ;;  %v8626_v3 = vcombine.low %v2184_v45, %v2188_v54  ;;  %v2161_v45 = vld [vmem:[%s13440_s3 + $0x598] sm:$0xff] }
 0x270   :  { %5609 = vmatpush1.bf16.msra.mxu1 %v8508_v6  ;;  %5473 = vmatprep.subr.bf16.mxu0 %v8587_v9  ;;  %v8556_v6 = vcombine.low %v2113_v56, %v2117_v31  ;;  %v8635_v9 = vcombine.high %v2192_v1, %v2196_v2  ;;  %v2165_v54 = vld [vmem:[%s13440_s3 + $0x5b8] sm:$0xff]  ;;  %v8596_v31 = vcombine.low %v2153_v42, %v2157_v47 }
 0x271   :  { %5610 = vmatprep.subr.bf16.mxu1 %v8517_v12  ;;  %v8565_v12 = vcombine.high %v2121_v27, %v2125_v16 }
 0x273   :  { %5474 = vmatpush1.bf16.msra.mxu0 %v8586_v19  ;;  %v8634_v19 = vcombine.low %v2192_v1, %v2196_v2  ;;  %v2169_v1 = vld [vmem:[%s13440_s3 + $0x5d8] sm:$0xff] }
 0x274   :  { %5611 = vmatpush1.bf16.msra.mxu1 %v8516_v11  ;;  %5475 = vmatprep.subr.bf16.mxu0 %v8595_v20  ;;  %v8564_v11 = vcombine.low %v2121_v27, %v2125_v16  ;;  %v8643_v20 = vcombine.high %v2200_v13, %v2204_v15  ;;  %v2173_v2 = vld [vmem:[%s13440_s3 + $0x5f8] sm:$0xff]  ;;  %v8604_v16 = vcombine.low %v2161_v45, %v2165_v54 }
 0x275   :  { %5612 = vmatprep.subr.bf16.mxu1 %v8525_v21  ;;  %v8573_v21 = vcombine.high %v2129_v17, %v2133_v18  ;;  %v2177_v13 = vld [vmem:[%s13440_s3 + $0x618] sm:$0xff]  ;;  %v8612_v18 = vcombine.low %v2169_v1, %v2173_v2 }
 0x276   :  { %v2181_v15 = vld [vmem:[%s13440_s3 + $0x638] sm:$0xff] }
 0x277   :  { %5476 = vmatpush1.bf16.msra.mxu0 %v8594_v28  ;;  %v8651_v28 = vcombine.high %v2208_v22, %v2212_v23  ;;  %v2185_v22 = vld [vmem:[%s13440_s3 + $0x658] sm:$0xff] }
 0x278   :  { %5613 = vmatpush1.bf16.msra.mxu1 %v8524_v29  ;;  %5477 = vmatprep.subr.bf16.mxu0 %v8603_v30  ;;  %v2216_v30 = vld [vmem:[%s13440_s3 + $0x750] sm:$0xff]  ;;  %v2189_v23 = vld [vmem:[%s13440_s3 + $0x678] sm:$0xff] }
 0x279   :  { %5614 = vmatprep.subr.bf16.mxu1 %v8533_v32  ;;  %v2220_v32 = vld [vmem:[%s13440_s3 + $0x770] sm:$0xff] }
 0x27a   :  { %v8658_v51 = vcombine.low %v2216_v30, %v2220_v32 }
 0x27b   :  { %5478 = vmatpush1.bf16.msra.mxu0 %v8602_v5  ;;  %v8659_v5 = vcombine.high %v2216_v30, %v2220_v32  ;;  %v2193_v30 = vld [vmem:[%s13440_s3 + $0x698] sm:$0xff] }
 0x27c   :  { %5615 = vmatpush1.bf16.msra.mxu1 %v8532_v39  ;;  %5479 = vmatprep.subr.bf16.mxu0 %v8611_v40  ;;  %v8589_v39 = vcombine.high %v2145_v63, %v2149_v35  ;;  %v2224_v40 = vld [vmem:[%s13440_s3 + $0x790] sm:$0xff]  ;;  %v2197_v32 = vld [vmem:[%s13440_s3 + $0x6b8] sm:$0xff]  ;;  %v8628_v35 = vcombine.low %v2185_v22, %v2189_v23 }
 0x27d   :  { %5616 = vmatprep.subr.bf16.mxu1 %v8541_v41  ;;  %v2228_v41 = vld [vmem:[%s13440_s3 + $0x7b0] sm:$0xff] }
 0x27e   :  { %v8666_v56 = vcombine.low %v2224_v40, %v2228_v41 }
 0x27f   :  { %5480 = vmatpush1.bf16.msra.mxu0 %v8610_v52  ;;  %v8667_v52 = vcombine.high %v2224_v40, %v2228_v41  ;;  %v2201_v40 = vld [vmem:[%s13440_s3 + $0x6d8] sm:$0xff] }
 0x280   :  { %5617 = vmatpush1.bf16.msra.mxu1 %v8540_v53  ;;  %5481 = vmatprep.subr.bf16.mxu0 %v8619_v55  ;;  %v8597_v53 = vcombine.high %v2153_v42, %v2157_v47  ;;  %v2232_v55 = vld [vmem:[%s13440_s3 + $0x7d0] sm:$0xff]  ;;  %v2205_v41 = vld [vmem:[%s13440_s3 + $0x6f8] sm:$0xff]  ;;  %v8636_v47 = vcombine.low %v2193_v30, %v2197_v32 }
 0x281   :  { %5618 = vmatprep.subr.bf16.mxu1 %v8549_v43  ;;  %v2236_v43 = vld [vmem:[%s13440_s3 + $0x7f0] sm:$0xff] }
 0x282   :  { %v8674_v27 = vcombine.low %v2232_v55, %v2236_v43 }
 0x283   :  { %5482 = vmatpush1.bf16.msra.mxu0 %v8618_v48  ;;  %v8675_v48 = vcombine.high %v2232_v55, %v2236_v43  ;;  %v2209_v55 = vld [vmem:[%s13440_s3 + $0x718] sm:$0xff] }
 0x284   :  { %5619 = vmatpush1.bf16.msra.mxu1 %v8548_v49  ;;  %5483 = vmatprep.subr.bf16.mxu0 %v8627_v59  ;;  %v8605_v49 = vcombine.high %v2161_v45, %v2165_v54  ;;  %v2240_v59 = vld [vmem:[%s13440_s3 + $0x810] sm:$0xff]  ;;  %v2213_v43 = vld [vmem:[%s13440_s3 + $0x738] sm:$0xff]  ;;  %v8644_v54 = vcombine.low %v2201_v40, %v2205_v41 }
 0x285   :  { %5629 = vmatprep.subr.bf16.mxu1 %v8557_v61  ;;  %v2244_v61 = vld [vmem:[%s13440_s3 + $0x830] sm:$0xff] }
 0x286   :  { %v8682_v17 = vcombine.low %v2240_v59, %v2244_v61 }
 0x287   :  { %5484 = vmatpush1.bf16.msra.mxu0 %v8626_v3  ;;  %5621 = vmatmul.mubr.bf16.vlgmr.msra.gmra.mrb[16].mxu1 %v10834_v46  ;;  %v2137_v46 = vld [vmem:[%s13440_s3 + $0x4d8] sm:$0xff]  ;;  %v8683_v3 = vcombine.high %v2240_v59, %v2244_v61 }
 0x288   :  { %5630 = vmatpush1.bf16.msra.mxu1 %v8556_v6  ;;  %5661 = vmatprep.mubr.bf16.mxu1 %v11147_v33  ;;  %v2141_v33 = vld [vmem:[%s13440_s3 + $0x4f8] sm:$0xff]  ;;  %v8613_v6 = vcombine.high %v2169_v1, %v2173_v2  ;;  %v8652_v2 = vcombine.low %v2209_v55, %v2213_v43 }
 0x289   :  { %5485 = vmatprep.subr.bf16.mxu0 %v8635_v9  ;;  %5631 = vmatprep.subr.bf16.mxu1 %v8565_v12  ;;  %v8581_v29 = vcombine.high %v2137_v46, %v2141_v33  ;;  %v8580_v38 = vcombine.low %v2137_v46, %v2141_v33  ;;  %v2248_v9 = vld [vmem:[%s13440_s3 + $0x850] sm:$0xff]  ;;  %v8620_v33 = vcombine.low %v2177_v13, %v2181_v15  ;;  %v2217_v59 = vld [vmem:[%s13440_s3 + $0x758] sm:$0xff] }
 0x28a   :  { %v2252_v12 = vld [vmem:[%s13440_s3 + $0x870] sm:$0xff]  ;;  %v2221_v61 = vld [vmem:[%s13440_s3 + $0x778] sm:$0xff] }
 0x28b   :  { %5486 = vmatpush1.bf16.msra.mxu0 %v8634_v19  ;;  %v8691_v19 = vcombine.high %v2248_v9, %v2252_v12  ;;  %v8690_v46 = vcombine.low %v2248_v9, %v2252_v12  ;;  %v2225_v9 = vld [vmem:[%s13440_s3 + $0x798] sm:$0xff] }
 0x28c   :  { %5632 = vmatpush1.bf16.msra.mxu1 %v8564_v11  ;;  %5487 = vmatprep.subr.bf16.mxu0 %v8643_v20  ;;  %v8621_v11 = vcombine.high %v2177_v13, %v2181_v15  ;;  %v2256_v20 = vld [vmem:[%s13440_s3 + $0x890] sm:$0xff]  ;;  %v2229_v12 = vld [vmem:[%s13440_s3 + $0x7b8] sm:$0xff]  ;;  %v8660_v15 = vcombine.low %v2217_v59, %v2221_v61 }
 0x28d   :  { %5633 = vmatprep.subr.bf16.mxu1 %v8573_v21  ;;  %v2260_v21 = vld [vmem:[%s13440_s3 + $0x8b0] sm:$0xff] }
 0x28e   :  { %v8698_v63 = vcombine.low %v2256_v20, %v2260_v21 }
 0x28f   :  { %5488 = vmatpush1.bf16.msra.mxu0 %v8642_v25  ;;  %v8699_v25 = vcombine.high %v2256_v20, %v2260_v21  ;;  %v2233_v20 = vld [vmem:[%s13440_s3 + $0x7d8] sm:$0xff] }
 0x290   :  { %5634 = vmatpush1.bf16.msra.mxu1 %v8572_v26  ;;  %5489 = vmatprep.subr.bf16.mxu0 %v8651_v28  ;;  %v8629_v26 = vcombine.high %v2185_v22, %v2189_v23  ;;  %v2264_v28 = vld [vmem:[%s13440_s3 + $0x8d0] sm:$0xff]  ;;  %v2237_v21 = vld [vmem:[%s13440_s3 + $0x7f8] sm:$0xff]  ;;  %v8668_v23 = vcombine.low %v2225_v9, %v2229_v12 }
 0x291   :  { %5635 = vmatprep.subr.bf16.mxu1 %v8581_v29  ;;  %v2268_v29 = vld [vmem:[%s13440_s3 + $0x8f0] sm:$0xff] }
 0x292   :  { %v8706_v42 = vcombine.low %v2264_v28, %v2268_v29 }
 0x293   :  { %5490 = vmatpush1.bf16.msra.mxu0 %v8650_v37  ;;  %v8707_v37 = vcombine.high %v2264_v28, %v2268_v29  ;;  %v2241_v28 = vld [vmem:[%s13440_s3 + $0x818] sm:$0xff] }
 0x294   :  { %5636 = vmatpush1.bf16.msra.mxu1 %v8580_v38  ;;  %5491 = vmatprep.subr.bf16.mxu0 %v8659_v5  ;;  %v8637_v38 = vcombine.high %v2193_v30, %v2197_v32  ;;  %v2272_v5 = vld [vmem:[%s13440_s3 + $0x910] sm:$0xff]  ;;  %v2245_v29 = vld [vmem:[%s13440_s3 + $0x838] sm:$0xff]  ;;  %v8676_v32 = vcombine.low %v2233_v20, %v2237_v21 }
 0x295   :  { %5637 = vmatprep.subr.bf16.mxu1 %v8589_v39  ;;  %v2276_v39 = vld [vmem:[%s13440_s3 + $0x930] sm:$0xff] }
 0x296   :  { %v8714_v45 = vcombine.low %v2272_v5, %v2276_v39 }
 0x297   :  { %5492 = vmatpush1.bf16.msra.mxu0 %v8658_v51  ;;  %v8715_v51 = vcombine.high %v2272_v5, %v2276_v39  ;;  %v2249_v5 = vld [vmem:[%s13440_s3 + $0x858] sm:$0xff] }
 0x298   :  { %5638 = vmatpush1.bf16.msra.mxu1 %v8588_v50  ;;  %5493 = vmatprep.subr.bf16.mxu0 %v8667_v52  ;;  %v8645_v50 = vcombine.high %v2201_v40, %v2205_v41  ;;  %v2280_v52 = vld [vmem:[%s13440_s3 + $0x950] sm:$0xff]  ;;  %v2253_v39 = vld [vmem:[%s13440_s3 + $0x878] sm:$0xff]  ;;  %v8684_v41 = vcombine.low %v2241_v28, %v2245_v29 }
 0x299   :  { %5639 = vmatprep.subr.bf16.mxu1 %v8597_v53  ;;  %v2284_v53 = vld [vmem:[%s13440_s3 + $0x970] sm:$0xff] }
 0x29a   :  { %v8722_v1 = vcombine.low %v2280_v52, %v2284_v53 }
 0x29b   :  { %5494 = vmatpush1.bf16.msra.mxu0 %v8666_v56  ;;  %v8723_v56 = vcombine.high %v2280_v52, %v2284_v53  ;;  %v2257_v52 = vld [vmem:[%s13440_s3 + $0x898] sm:$0xff] }
 0x29c   :  { %5640 = vmatpush1.bf16.msra.mxu1 %v8596_v31  ;;  %5495 = vmatprep.subr.bf16.mxu0 %v8675_v48  ;;  %v8653_v31 = vcombine.high %v2209_v55, %v2213_v43  ;;  %v2288_v48 = vld [vmem:[%s13440_s3 + $0x990] sm:$0xff]  ;;  %v2261_v53 = vld [vmem:[%s13440_s3 + $0x8b8] sm:$0xff]  ;;  %v8692_v43 = vcombine.low %v2249_v5, %v2253_v39 }
 0x29d   :  { %5641 = vmatprep.subr.bf16.mxu1 %v8605_v49  ;;  %v2292_v49 = vld [vmem:[%s13440_s3 + $0x9b0] sm:$0xff] }
 0x29e   :  { %v8730_v13 = vcombine.low %v2288_v48, %v2292_v49 }
 0x29f   :  { %5496 = vmatpush1.bf16.msra.mxu0 %v8674_v27  ;;  %v8731_v27 = vcombine.high %v2288_v48, %v2292_v49  ;;  %v8700_v49 = vcombine.low %v2257_v52, %v2261_v53 }
 0x2a0   :  { %5642 = vmatpush1.bf16.msra.mxu1 %v8604_v16  ;;  %5506 = vmatprep.subr.bf16.mxu0 %v8683_v3  ;;  %v8661_v16 = vcombine.high %v2217_v59, %v2221_v61  ;;  %v2296_v3 = vld [vmem:[%s13440_s3 + $0x9d0] sm:$0xff] }
 0x2a1   :  { %5643 = vmatprep.subr.bf16.mxu1 %v8613_v6  ;;  %v2300_v6 = vld [vmem:[%s13440_s3 + $0x9f0] sm:$0xff] }
 0x2a2   :  { %5498 = vmatmul.mubr.bf16.vlgmr.msra.gmra.mrb[12].mxu0 %v11149_v34  ;;  %v8738_v22 = vcombine.low %v2296_v3, %v2300_v6 }
 0x2a3   :  { %5507 = vmatpush1.bf16.msra.mxu0 %v8682_v17  ;;  %5538 = vmatprep.mubr.bf16.mxu0 %v11151_v36  ;;  %v8739_v17 = vcombine.high %v2296_v3, %v2300_v6 }
 0x2a4   :  { %5644 = vmatpush1.bf16.msra.mxu1 %v8612_v18  ;;  %5508 = vmatprep.subr.bf16.mxu0 %v8691_v19  ;;  %v8669_v18 = vcombine.high %v2225_v9, %v2229_v12  ;;  %v2304_v19 = vld [vmem:[%s13440_s3 + $0xa10] sm:$0xff] }
 0x2a5   :  { %5645 = vmatprep.subr.bf16.mxu1 %v8621_v11  ;;  %v2308_v11 = vld [vmem:[%s13440_s3 + $0xa30] sm:$0xff] }
 0x2a6   :  { %v8746_v30 = vcombine.low %v2304_v19, %v2308_v11 }
 0x2a7   :  { %5509 = vmatpush1.bf16.msra.mxu0 %v8690_v46  ;;  %v8747_v46 = vcombine.high %v2304_v19, %v2308_v11 }
 0x2a8   :  { %5646 = vmatpush1.bf16.msra.mxu1 %v8620_v33  ;;  %5510 = vmatprep.subr.bf16.mxu0 %v8699_v25  ;;  %v8677_v33 = vcombine.high %v2233_v20, %v2237_v21  ;;  %v2312_v25 = vld [vmem:[%s13440_s3 + $0xa50] sm:$0xff] }
 0x2a9   :  { %5647 = vmatprep.subr.bf16.mxu1 %v8629_v26  ;;  %v2316_v26 = vld [vmem:[%s13440_s3 + $0xa70] sm:$0xff] }
 0x2aa   :  { %v8754_v40 = vcombine.low %v2312_v25, %v2316_v26 }
 0x2ab   :  { %5511 = vmatpush1.bf16.msra.mxu0 %v8698_v63  ;;  %v8755_v63 = vcombine.high %v2312_v25, %v2316_v26 }
 0x2ac   :  { %5648 = vmatpush1.bf16.msra.mxu1 %v8628_v35  ;;  %5512 = vmatprep.subr.bf16.mxu0 %v8707_v37  ;;  %v8685_v35 = vcombine.high %v2241_v28, %v2245_v29  ;;  %v2320_v37 = vld [vmem:[%s13440_s3 + $0xa90] sm:$0xff] }
 0x2ad   :  { %5649 = vmatprep.subr.bf16.mxu1 %v8637_v38  ;;  %v2324_v38 = vld [vmem:[%s13440_s3 + $0xab0] sm:$0xff] }
 0x2ae   :  { %v8762_v55 = vcombine.low %v2320_v37, %v2324_v38 }
 0x2af   :  { %5513 = vmatpush1.bf16.msra.mxu0 %v8706_v42  ;;  %v8763_v42 = vcombine.high %v2320_v37, %v2324_v38 }
 0x2b0   :  { %5650 = vmatpush1.bf16.msra.mxu1 %v8636_v47  ;;  %5514 = vmatprep.subr.bf16.mxu0 %v8715_v51  ;;  %v8693_v47 = vcombine.high %v2249_v5, %v2253_v39  ;;  %v2328_v51 = vld [vmem:[%s13440_s3 + $0xad0] sm:$0xff] }
 0x2b1   :  { %5651 = vmatprep.subr.bf16.mxu1 %v8645_v50  ;;  %v2332_v50 = vld [vmem:[%s13440_s3 + $0xaf0] sm:$0xff] }
 0x2b2   :  { %v8770_v48 = vcombine.low %v2328_v51, %v2332_v50 }
 0x2b3   :  { %5515 = vmatpush1.bf16.msra.mxu0 %v8714_v45  ;;  %v8771_v45 = vcombine.high %v2328_v51, %v2332_v50 }
 0x2b4   :  { %5652 = vmatpush1.bf16.msra.mxu1 %v8644_v54  ;;  %5516 = vmatprep.subr.bf16.mxu0 %v8723_v56  ;;  %v8701_v54 = vcombine.high %v2257_v52, %v2261_v53  ;;  %v2336_v56 = vld [vmem:[%s13440_s3 + $0xb10] sm:$0xff] }
 0x2b5   :  { %5653 = vmatprep.subr.bf16.mxu1 %v8653_v31  ;;  %v2340_v31 = vld [vmem:[%s13440_s3 + $0xb30] sm:$0xff] }
 0x2b6   :  { %v8779_v59 = vcombine.high %v2336_v56, %v2340_v31  ;;  %v8778_v3 = vcombine.low %v2336_v56, %v2340_v31 }
 0x2b7   :  { %5517 = vmatpush1.bf16.msra.mxu0 %v8722_v1  ;;  %v2344_v1 = vld [vmem:[%s13440_s3 + $0xb50] sm:$0xff] }
 0x2b8   :  { %5654 = vmatpush1.bf16.msra.mxu1 %v8652_v2  ;;  %5518 = vmatprep.subr.bf16.mxu0 %v8731_v27  ;;  %v2348_v2 = vld [vmem:[%s13440_s3 + $0xb70] sm:$0xff]  ;;  %v2273_v27 = vld [vmem:[%s13440_s3 + $0x918] sm:$0xff] }
 0x2b9   :  { %5655 = vmatprep.subr.bf16.mxu1 %v8661_v16  ;;  %v2277_v16 = vld [vmem:[%s13440_s3 + $0x938] sm:$0xff]  ;;  %v8787_v9 = vcombine.high %v2344_v1, %v2348_v2  ;;  %v8786_v19 = vcombine.low %v2344_v1, %v2348_v2 }
 0x2ba   :  { %v8717_v12 = vcombine.high %v2273_v27, %v2277_v16  ;;  %v8716_v11 = vcombine.low %v2273_v27, %v2277_v16 }
 0x2bb   :  { %5519 = vmatpush1.bf16.msra.mxu0 %v8730_v13  ;;  %v2352_v13 = vld [vmem:[%s13440_s3 + $0xb90] sm:$0xff] }
 0x2bc   :  { %5656 = vmatpush1.bf16.msra.mxu1 %v8660_v15  ;;  %5520 = vmatprep.subr.bf16.mxu0 %v8739_v17  ;;  %v2356_v15 = vld [vmem:[%s13440_s3 + $0xbb0] sm:$0xff]  ;;  %v2281_v17 = vld [vmem:[%s13440_s3 + $0x958] sm:$0xff] }
 0x2bd   :  { %5657 = vmatprep.subr.bf16.mxu1 %v8669_v18  ;;  %v2285_v18 = vld [vmem:[%s13440_s3 + $0x978] sm:$0xff]  ;;  %v8795_v20 = vcombine.high %v2352_v13, %v2356_v15  ;;  %v8794_v25 = vcombine.low %v2352_v13, %v2356_v15 }
 0x2be   :  { %v8725_v21 = vcombine.high %v2281_v17, %v2285_v18  ;;  %v8724_v26 = vcombine.low %v2281_v17, %v2285_v18 }
 0x2bf   :  { %5521 = vmatpush1.bf16.msra.mxu0 %v8738_v22  ;;  %v2360_v22 = vld [vmem:[%s13440_s3 + $0xbd0] sm:$0xff] }
 0x2c0   :  { %5658 = vmatpush1.bf16.msra.mxu1 %v8668_v23  ;;  %5522 = vmatprep.subr.bf16.mxu0 %v8747_v46  ;;  %v2364_v23 = vld [vmem:[%s13440_s3 + $0xbf0] sm:$0xff]  ;;  %v2289_v46 = vld [vmem:[%s13440_s3 + $0x998] sm:$0xff] }
 0x2c1   :  { %5659 = vmatprep.subr.bf16.mxu1 %v8677_v33  ;;  %v2293_v33 = vld [vmem:[%s13440_s3 + $0x9b8] sm:$0xff]  ;;  %v8803_v28 = vcombine.high %v2360_v22, %v2364_v23  ;;  %v8802_v37 = vcombine.low %v2360_v22, %v2364_v23 }
 0x2c2   :  { %v8733_v29 = vcombine.high %v2289_v46, %v2293_v33  ;;  %v8732_v38 = vcombine.low %v2289_v46, %v2293_v33 }
 0x2c3   :  { %5523 = vmatpush1.bf16.msra.mxu0 %v8746_v30  ;;  %v2368_v30 = vld [vmem:[%s13440_s3 + $0xc10] sm:$0xff] }
 0x2c4   :  { %5660 = vmatpush1.bf16.msra.mxu1 %v8676_v32  ;;  %5524 = vmatprep.subr.bf16.mxu0 %v8755_v63  ;;  %v2372_v32 = vld [vmem:[%s13440_s3 + $0xc30] sm:$0xff]  ;;  %v2297_v63 = vld [vmem:[%s13440_s3 + $0x9d8] sm:$0xff] }
 0x2c5   :  { %5670 = vmatprep.subr.bf16.mxu1 %v8685_v35  ;;  %v2301_v35 = vld [vmem:[%s13440_s3 + $0x9f8] sm:$0xff]  ;;  %v8811_v5 = vcombine.high %v2368_v30, %v2372_v32  ;;  %v8810_v51 = vcombine.low %v2368_v30, %v2372_v32 }
 0x2c6   :  { %v8741_v39 = vcombine.high %v2297_v63, %v2301_v35  ;;  %v8740_v50 = vcombine.low %v2297_v63, %v2301_v35 }
 0x2c7   :  { %5525 = vmatpush1.bf16.msra.mxu0 %v8754_v40  ;;  %5662 = vmatmul.mubr.bf16.vlgmr.msra.gmra.mrb[16].mxu1 %v11149_v34  ;;  %v2265_v34 = vld [vmem:[%s13440_s3 + $0x8d8] sm:$0xff]  ;;  %v2376_v40 = vld [vmem:[%s13440_s3 + $0xc50] sm:$0xff] }
 0x2c8   :  { %5671 = vmatpush1.bf16.msra.mxu1 %v8684_v41  ;;  %5702 = vmatprep.mubr.bf16.mxu1 %v11151_v36  ;;  %v2269_v36 = vld [vmem:[%s13440_s3 + $0x8f8] sm:$0xff]  ;;  %v2380_v41 = vld [vmem:[%s13440_s3 + $0xc70] sm:$0xff] }
 0x2c9   :  { %5526 = vmatprep.subr.bf16.mxu0 %v8763_v42  ;;  %5672 = vmatprep.subr.bf16.mxu1 %v8693_v47  ;;  %v8709_v61 = vcombine.high %v2265_v34, %v2269_v36  ;;  %v8708_v6 = vcombine.low %v2265_v34, %v2269_v36  ;;  %v2305_v42 = vld [vmem:[%s13440_s3 + $0xa18] sm:$0xff]  ;;  %v8819_v52 = vcombine.high %v2376_v40, %v2380_v41 }
 0x2ca   :  { %v2309_v47 = vld [vmem:[%s13440_s3 + $0xa38] sm:$0xff]  ;;  %v8818_v56 = vcombine.low %v2376_v40, %v2380_v41 }
 0x2cb   :  { %5527 = vmatpush1.bf16.msra.mxu0 %v8762_v55  ;;  %v8749_v53 = vcombine.high %v2305_v42, %v2309_v47  ;;  %v2384_v55 = vld [vmem:[%s13440_s3 + $0xc90] sm:$0xff]  ;;  %v8748_v31 = vcombine.low %v2305_v42, %v2309_v47  ;;  %v2353_v40 = vld [vmem:[%s13440_s3 + $0xb98] sm:$0xff] }
 0x2cc   :  { %5673 = vmatpush1.bf16.msra.mxu1 %v8692_v43  ;;  %5528 = vmatprep.subr.bf16.mxu0 %v8771_v45  ;;  %v2388_v43 = vld [vmem:[%s13440_s3 + $0xcb0] sm:$0xff]  ;;  %v2313_v45 = vld [vmem:[%s13440_s3 + $0xa58] sm:$0xff] }
 0x2cd   :  { %5674 = vmatprep.subr.bf16.mxu1 %v8701_v54  ;;  %v2317_v54 = vld [vmem:[%s13440_s3 + $0xa78] sm:$0xff]  ;;  %v8827_v34 = vcombine.high %v2384_v55, %v2388_v43  ;;  %v8826_v1 = vcombine.low %v2384_v55, %v2388_v43  ;;  %v2432_v55 = vld [vmem:[%s13440_s3 + $0xe10] sm:$0xff] }
 0x2ce   :  { %v8757_v36 = vcombine.high %v2313_v45, %v2317_v54  ;;  %v8756_v2 = vcombine.low %v2313_v45, %v2317_v54  ;;  %v2357_v41 = vld [vmem:[%s13440_s3 + $0xbb8] sm:$0xff]  ;;  %v2436_v43 = vld [vmem:[%s13440_s3 + $0xe30] sm:$0xff] }
 0x2cf   :  { %5529 = vmatpush1.bf16.msra.mxu0 %v8770_v48  ;;  %v2392_v48 = vld [vmem:[%s13440_s3 + $0xcd0] sm:$0xff]  ;;  %v2361_v45 = vld [vmem:[%s13440_s3 + $0xbd8] sm:$0xff] }
 0x2d0   :  { %5675 = vmatpush1.bf16.msra.mxu1 %v8700_v49  ;;  %5530 = vmatprep.subr.bf16.mxu0 %v8779_v59  ;;  %v2396_v49 = vld [vmem:[%s13440_s3 + $0xcf0] sm:$0xff]  ;;  %v2321_v59 = vld [vmem:[%s13440_s3 + $0xa98] sm:$0xff] }
 0x2d1   :  { %5676 = vmatprep.subr.bf16.mxu1 %v8709_v61  ;;  %v2325_v61 = vld [vmem:[%s13440_s3 + $0xab8] sm:$0xff]  ;;  %v8835_v27 = vcombine.high %v2392_v48, %v2396_v49  ;;  %v8834_v13 = vcombine.low %v2392_v48, %v2396_v49  ;;  %v2440_v48 = vld [vmem:[%s13440_s3 + $0xe50] sm:$0xff] }
 0x2d2   :  { %v8765_v16 = vcombine.high %v2321_v59, %v2325_v61  ;;  %v8764_v15 = vcombine.low %v2321_v59, %v2325_v61  ;;  %v2365_v54 = vld [vmem:[%s13440_s3 + $0xbf8] sm:$0xff]  ;;  %v2444_v49 = vld [vmem:[%s13440_s3 + $0xe70] sm:$0xff] }
 0x2d3   :  { %5531 = vmatpush1.bf16.msra.mxu0 %v8778_v3  ;;  %v2400_v3 = vld [vmem:[%s13440_s3 + $0xd10] sm:$0xff]  ;;  %v2369_v59 = vld [vmem:[%s13440_s3 + $0xc18] sm:$0xff] }
 0x2d4   :  { %5677 = vmatpush1.bf16.msra.mxu1 %v8708_v6  ;;  %5532 = vmatprep.subr.bf16.mxu0 %v8787_v9  ;;  %v2404_v6 = vld [vmem:[%s13440_s3 + $0xd30] sm:$0xff]  ;;  %v2329_v9 = vld [vmem:[%s13440_s3 + $0xad8] sm:$0xff] }
 0x2d5   :  { %5678 = vmatprep.subr.bf16.mxu1 %v8717_v12  ;;  %v2333_v12 = vld [vmem:[%s13440_s3 + $0xaf8] sm:$0xff]  ;;  %v8843_v17 = vcombine.high %v2400_v3, %v2404_v6  ;;  %v8842_v22 = vcombine.low %v2400_v3, %v2404_v6  ;;  %v2448_v3 = vld [vmem:[%s13440_s3 + $0xe90] sm:$0xff] }
 0x2d6   :  { %v8773_v18 = vcombine.high %v2329_v9, %v2333_v12  ;;  %v8772_v23 = vcombine.low %v2329_v9, %v2333_v12  ;;  %v2373_v61 = vld [vmem:[%s13440_s3 + $0xc38] sm:$0xff]  ;;  %v2452_v6 = vld [vmem:[%s13440_s3 + $0xeb0] sm:$0xff] }
 0x2d7   :  { %5533 = vmatpush1.bf16.msra.mxu0 %v8786_v19  ;;  %v2408_v19 = vld [vmem:[%s13440_s3 + $0xd50] sm:$0xff]  ;;  %v2377_v9 = vld [vmem:[%s13440_s3 + $0xc58] sm:$0xff] }
 0x2d8   :  { %5679 = vmatpush1.bf16.msra.mxu1 %v8716_v11  ;;  %5534 = vmatprep.subr.bf16.mxu0 %v8795_v20  ;;  %v2412_v11 = vld [vmem:[%s13440_s3 + $0xd70] sm:$0xff]  ;;  %v2337_v20 = vld [vmem:[%s13440_s3 + $0xb18] sm:$0xff] }
 0x2d9   :  { %5680 = vmatprep.subr.bf16.mxu1 %v8725_v21  ;;  %v2341_v21 = vld [vmem:[%s13440_s3 + $0xb38] sm:$0xff]  ;;  %v8851_v46 = vcombine.high %v2408_v19, %v2412_v11  ;;  %v8850_v30 = vcombine.low %v2408_v19, %v2412_v11  ;;  %v2456_v19 = vld [vmem:[%s13440_s3 + $0xed0] sm:$0xff] }
 0x2da   :  { %v8781_v33 = vcombine.high %v2337_v20, %v2341_v21  ;;  %v8780_v32 = vcombine.low %v2337_v20, %v2341_v21  ;;  %v2381_v12 = vld [vmem:[%s13440_s3 + $0xc78] sm:$0xff]  ;;  %v2460_v11 = vld [vmem:[%s13440_s3 + $0xef0] sm:$0xff] }
 0x2db   :  { %5535 = vmatpush1.bf16.msra.mxu0 %v8794_v25  ;;  %v2416_v25 = vld [vmem:[%s13440_s3 + $0xd90] sm:$0xff]  ;;  %v2385_v20 = vld [vmem:[%s13440_s3 + $0xc98] sm:$0xff] }
 0x2dc   :  { %5681 = vmatpush1.bf16.msra.mxu1 %v8724_v26  ;;  %5536 = vmatprep.subr.bf16.mxu0 %v8803_v28  ;;  %v2420_v26 = vld [vmem:[%s13440_s3 + $0xdb0] sm:$0xff]  ;;  %v2345_v28 = vld [vmem:[%s13440_s3 + $0xb58] sm:$0xff] }
 0x2dd   :  { %5682 = vmatprep.subr.bf16.mxu1 %v8733_v29  ;;  %v2349_v29 = vld [vmem:[%s13440_s3 + $0xb78] sm:$0xff]  ;;  %v8859_v63 = vcombine.high %v2416_v25, %v2420_v26  ;;  %v8858_v47 = vcombine.low %v2416_v25, %v2420_v26  ;;  %v2464_v25 = vld [vmem:[%s13440_s3 + $0xf10] sm:$0xff] }
 0x2de   :  { %v2389_v21 = vld [vmem:[%s13440_s3 + $0xcb8] sm:$0xff]  ;;  %v2468_v26 = vld [vmem:[%s13440_s3 + $0xf30] sm:$0xff] }
 0x2df   :  { %5537 = vmatpush1.bf16.msra.mxu0 %v8802_v37  ;;  %v8789_v37 = vcombine.high %v2345_v28, %v2349_v29 }
 0x2e0   :  { %5683 = vmatpush1.bf16.msra.mxu1 %v8732_v38  ;;  %5547 = vmatprep.subr.bf16.mxu0 %v8811_v5  ;;  %v2424_v38 = vld [vmem:[%s13440_s3 + $0xdd0] sm:$0xff] }
 0x2e1   :  { %5684 = vmatprep.subr.bf16.mxu1 %v8741_v39  ;;  %v2428_v5 = vld [vmem:[%s13440_s3 + $0xdf0] sm:$0xff] }
 0x2e2   :  { %5539 = vmatmul.mubr.bf16.vlgmr.msra.gmra.mrb[12].mxu0 %v11364_v4 }
 0x2e3   :  { %5548 = vmatpush1.bf16.msra.mxu0 %v8810_v51  ;;  %5579 = vmatprep.mubr.bf16.mxu0 %v11568_v57 }
 0x2e4   :  { %5685 = vmatpush1.bf16.msra.mxu1 %v8740_v50  ;;  %5549 = vmatprep.subr.bf16.mxu0 %v8819_v52  ;;  %v8788_v50 = vcombine.low %v2345_v28, %v2349_v29  ;;  %v8867_v52 = vcombine.high %v2424_v38, %v2428_v5  ;;  %v8898_v28 = vcombine.low %v2456_v19, %v2460_v11 }
 0x2e5   :  { %5686 = vmatprep.subr.bf16.mxu1 %v8749_v53  ;;  %v8797_v53 = vcombine.high %v2353_v40, %v2357_v41  ;;  %v8828_v29 = vcombine.low %v2385_v20, %v2389_v21 }
 0x2e7   :  { %5550 = vmatpush1.bf16.msra.mxu0 %v8818_v56  ;;  %v8866_v56 = vcombine.low %v2424_v38, %v2428_v5  ;;  %v2401_v38 = vld [vmem:[%s13440_s3 + $0xd18] sm:$0xff] }
 0x2e8   :  { %5687 = vmatpush1.bf16.msra.mxu1 %v8748_v31  ;;  %5551 = vmatprep.subr.bf16.mxu0 %v8827_v34  ;;  %v8796_v31 = vcombine.low %v2353_v40, %v2357_v41  ;;  %v8875_v34 = vcombine.high %v2432_v55, %v2436_v43  ;;  %v2405_v5 = vld [vmem:[%s13440_s3 + $0xd38] sm:$0xff]  ;;  %v8906_v40 = vcombine.low %v2464_v25, %v2468_v26 }
 0x2e9   :  { %5688 = vmatprep.subr.bf16.mxu1 %v8757_v36  ;;  %v8805_v36 = vcombine.high %v2361_v45, %v2365_v54 }
 0x2eb   :  { %5552 = vmatpush1.bf16.msra.mxu0 %v8826_v1  ;;  %v8874_v1 = vcombine.low %v2432_v55, %v2436_v43  ;;  %v2413_v55 = vld [vmem:[%s13440_s3 + $0xd78] sm:$0xff] }
 0x2ec   :  { %5689 = vmatpush1.bf16.msra.mxu1 %v8756_v2  ;;  %5553 = vmatprep.subr.bf16.mxu0 %v8835_v27  ;;  %v8804_v2 = vcombine.low %v2361_v45, %v2365_v54  ;;  %v8883_v27 = vcombine.high %v2440_v48, %v2444_v49  ;;  %v8844_v45 = vcombine.low %v2401_v38, %v2405_v5 }
 0x2ed   :  { %5690 = vmatprep.subr.bf16.mxu1 %v8765_v16  ;;  %v8813_v16 = vcombine.high %v2369_v59, %v2373_v61 }
 0x2ef   :  { %5554 = vmatpush1.bf16.msra.mxu0 %v8834_v13  ;;  %v8882_v13 = vcombine.low %v2440_v48, %v2444_v49  ;;  %v2417_v48 = vld [vmem:[%s13440_s3 + $0xd98] sm:$0xff] }
 0x2f0   :  { %5691 = vmatpush1.bf16.msra.mxu1 %v8764_v15  ;;  %5555 = vmatprep.subr.bf16.mxu0 %v8843_v17  ;;  %v8812_v15 = vcombine.low %v2369_v59, %v2373_v61  ;;  %v8891_v17 = vcombine.high %v2448_v3, %v2452_v6  ;;  %v2421_v49 = vld [vmem:[%s13440_s3 + $0xdb8] sm:$0xff] }
 0x2f1   :  { %5692 = vmatprep.subr.bf16.mxu1 %v8773_v18  ;;  %v8821_v18 = vcombine.high %v2377_v9, %v2381_v12 }
 0x2f3   :  { %5556 = vmatpush1.bf16.msra.mxu0 %v8842_v22  ;;  %v8890_v22 = vcombine.low %v2448_v3, %v2452_v6  ;;  %v2425_v3 = vld [vmem:[%s13440_s3 + $0xdd8] sm:$0xff] }
 0x2f4   :  { %5693 = vmatpush1.bf16.msra.mxu1 %v8772_v23  ;;  %5557 = vmatprep.subr.bf16.mxu0 %v8851_v46  ;;  %v8820_v23 = vcombine.low %v2377_v9, %v2381_v12  ;;  %v8899_v46 = vcombine.high %v2456_v19, %v2460_v11  ;;  %v2429_v6 = vld [vmem:[%s13440_s3 + $0xdf8] sm:$0xff] }
 0x2f5   :  { %v12224_v35 = vpop.f32.mrb[8].mxu0  ;;  %5694 = vmatprep.subr.bf16.mxu1 %v8781_v33  ;;  %v8829_v33 = vcombine.high %v2385_v20, %v2389_v21  ;;  %v8869_v19 = vcombine.high %v2425_v3, %v2429_v6  ;;  %v2433_v11 = vld [vmem:[%s13440_s3 + $0xe18] sm:$0xff]  ;;  %v9370_v21 = vld [vmem:[%s13442_s5] ss:$16 sps:$4 sm:$0xff]  }
 0x2f6   :  { %v12232_v39 = vpop.f32.mrb[9].mxu0  ;;  %v2437_v20 = vld [vmem:[%s13440_s3 + $0xe38] sm:$0xff] }
 0x2f7   :  { %5558 = vmatpush1.bf16.msra.mxu0 %v8850_v30  ;;  %v5257_v42 = vpop.f32.mrb[10].mxu0  ;;  %v8907_v30 = vcombine.high %v2464_v25, %v2468_v26  ;;  %v2441_v25 = vld [vmem:[%s13440_s3 + $0xe58] sm:$0xff] }
 0x2f8   :  { %5695 = vmatpush1.bf16.msra.mxu1 %v8780_v32  ;;  %v5258_v51 = vpop.f32.mrb[11].mxu0  ;;  %5559 = vmatprep.subr.bf16.mxu0 %v8859_v63  ;;  %v2472_v63 = vld [vmem:[%s13440_s3 + $0xf50] sm:$0xff]  ;;  %v2445_v26 = vld [vmem:[%s13440_s3 + $0xe78] sm:$0xff] }
 0x2f9   :  { %5696 = vmatprep.subr.bf16.mxu1 %v8789_v37  ;;  %v2476_v37 = vld [vmem:[%s13440_s3 + $0xf70] sm:$0xff] }
 0x2fa   :  { %v8915_v42 = vcombine.high %v2472_v63, %v2476_v37  ;;  %v2480_v51 = vld [vmem:[%s13440_s3 + $0xf90] sm:$0xff]  ;;  %v8914_v43 = vcombine.low %v2472_v63, %v2476_v37  ;;  %v8884_v37 = vcombine.low %v2441_v25, %v2445_v26 }
 0x2fb   :  { %5560 = vmatpush1.bf16.msra.mxu0 %v8858_v47  ;;  %v8845_v47 = vcombine.high %v2401_v38, %v2405_v5  ;;  %v9376_v63 = vld [vmem:[%s13442_s5 + $0x40] ss:$16 sps:$4 sm:$0xff]   ;;  %v9381_v38 = vld [vmem:[%s13442_s5 + $0x64] ss:$16 sps:$4 sm:$0xff]  }
 0x2fc   :  { %5697 = vmatpush1.bf16.msra.mxu1 %v8788_v50  ;;  %5561 = vmatprep.subr.bf16.mxu0 %v8867_v52  ;;  %v2484_v50 = vld [vmem:[%s13440_s3 + $0xfb0] sm:$0xff]  ;;  %v12323_v52 = vld [vmem:[%s13441_s4] sm:$0xff] }
 0x2fd   :  { %5698 = vmatprep.subr.bf16.mxu1 %v8797_v53  ;;  %v2409_v53 = vld [vmem:[%s13440_s3 + $0xd58] sm:$0xff]  ;;  %v8923_v54 = vcombine.high %v2480_v51, %v2484_v50  ;;  %v8922_v59 = vcombine.low %v2480_v51, %v2484_v50  ;;  %v9384_v51 = vld [vmem:[%s13442_s5 + $0x84] ss:$16 sps:$4 sm:$0xff]  }
 0x2fe   :  { %v8852_v61 = vcombine.low %v2409_v53, %v2413_v55 }
 0x2ff   :  { %5562 = vmatpush1.bf16.msra.mxu0 %v8866_v56  ;;  %v2503_v56 = vrot.slane %v12323_v52, %v10794_v10 }
 0x300   :  { %5699 = vmatpush1.bf16.msra.mxu1 %v8796_v31  ;;  %5563 = vmatprep.subr.bf16.mxu0 %v8875_v34  ;;  %v8853_v31 = vcombine.high %v2409_v53, %v2413_v55  ;;  %v2488_v34 = vld [vmem:[%s13440_s3 + $0xfd0] sm:$0xff]  ;;  %v2465_v53 = vld [vmem:[%s13440_s3 + $0xf18] sm:$0xff] }
 0x301   :  { %5700 = vmatprep.subr.bf16.mxu1 %v8805_v36  ;;  %v2492_v36 = vld [vmem:[%s13440_s3 + $0xff0] sm:$0xff]  ;;  %v2469_v55 = vld [vmem:[%s13440_s3 + $0xf38] sm:$0xff] }
 0x302   :  { %v8930_v12 = vcombine.low %v2488_v34, %v2492_v36 }
 0x303   :  { %5564 = vmatpush1.bf16.msra.mxu0 %v8874_v1  ;;  %v8931_v1 = vcombine.high %v2488_v34, %v2492_v36  ;;  %v2477_v34 = vld [vmem:[%s13440_s3 + $0xf78] sm:$0xff]  ;;  %v9385_v36 = vld [vmem:[%s13442_s5 + $0xa0] ss:$16 sps:$4 sm:$0xff]  }
 0x304   :  { %5701 = vmatpush1.bf16.msra.mxu1 %v8804_v2  ;;  %5565 = vmatprep.subr.bf16.mxu0 %v8883_v27  ;;  %v9266_v2 = vadd.f32 %v12232_v39, %v2503_v56  ;;  %v8861_v27 = vcombine.high %v2417_v48, %v2421_v49  ;;  %v8860_v39 = vcombine.low %v2417_v48, %v2421_v49  ;;  %v9390_v49 = vld [vmem:[%s13442_s5 + $0xc4] ss:$16 sps:$4 sm:$0xff]  }
 0x305   :  { %5711 = vmatprep.subr.bf16.mxu1 %v8813_v16  ;;  %v8909_v56 = vcombine.high %v2465_v53, %v2469_v55  ;;  %v8908_v48 = vcombine.low %v2465_v53, %v2469_v55  ;;  %v9430_v55 = vld [vmem:[%s13442_s5 + $0xa8] ss:$16 sps:$4 sm:$0xff]  }
 0x307   :  { %5566 = vmatpush1.bf16.msra.mxu0 %v8882_v13  ;;  %5703 = vmatmul.mubr.bf16.vlgmr.msra.gmra.mrb[16].mxu1 %v11364_v4  ;;  %v2393_v4 = vld [vmem:[%s13440_s3 + $0xcd8] sm:$0xff] }
 0x308   :  { %5712 = vmatpush1.bf16.msra.mxu1 %v8812_v15  ;;  %5743 = vmatprep.mubr.bf16.mxu1 %v11568_v57  ;;  %v2397_v57 = vld [vmem:[%s13440_s3 + $0xcf8] sm:$0xff]  ;;  %v9372_v15 = vld [vmem:[%s13442_s5 + $0x4] ss:$16 sps:$4 sm:$0xff]  }
 0x309   :  { %5567 = vmatprep.subr.bf16.mxu0 %v8891_v17  ;;  %5713 = vmatprep.subr.bf16.mxu1 %v8821_v18  ;;  %v8837_v32 = vcombine.high %v2393_v4, %v2397_v57  ;;  %v8836_v41 = vcombine.low %v2393_v4, %v2397_v57  ;;  %v5753_v17 = vmax.f32 %v9266_v2, 0.0  ;;  %v9373_v4 = vld [vmem:[%s13442_s5 + $0x20] ss:$16 sps:$4 sm:$0xff]   ;;  %v8876_v57 = vcombine.low %v2433_v11, %v2437_v20 }
 0x30a   :  { %v9388_v2 = vld [vmem:[%s13442_s5 + $0xc0] ss:$16 sps:$4 sm:$0xff]  }
 0x30b   :  { %5568 = vmatpush1.bf16.msra.mxu0 %v8890_v22  ;;  %v8868_v22 = vcombine.low %v2425_v3, %v2429_v6  ;;  %v9393_v3 = vld [vmem:[%s13442_s5 + $0xe4] ss:$16 sps:$4 sm:$0xff]  }
 0x30c   :  { %5714 = vmatpush1.bf16.msra.mxu1 %v8820_v23  ;;  %5569 = vmatprep.subr.bf16.mxu0 %v8899_v46  ;;  %v9375_v23 = vld [vmem:[%s13442_s5 + $0x24] ss:$16 sps:$4 sm:$0xff]   ;;  %v12371_v46 = vpack.c.bf16 %v5753_v17, %v5753_v17 }
 0x30d   :  { %5715 = vmatprep.subr.bf16.mxu1 %v8829_v33  ;;  %v8877_v33 = vcombine.high %v2433_v11, %v2437_v20  ;;  %v9396_v17 = vld [vmem:[%s13442_s5 + $0x104] ss:$16 sps:$4 sm:$0xff]  }
 0x30e   :  { %v9399_v20 = vld [vmem:[%s13442_s5 + $0x124] ss:$16 sps:$4 sm:$0xff]  }
 0x30f   :  { %5570 = vmatpush1.bf16.msra.mxu0 %v8898_v28  ;;  %v9378_v28 = vld [vmem:[%s13442_s5 + $0x44] ss:$16 sps:$4 sm:$0xff]  }
 0x310   :  { %5716 = vmatpush1.bf16.msra.mxu1 %v8828_v29  ;;  %5571 = vmatprep.subr.bf16.mxu0 %v8907_v30  ;;  %v8885_v29 = vcombine.high %v2441_v25, %v2445_v26  ;;  %v2449_v30 = vld [vmem:[%s13440_s3 + $0xe98] sm:$0xff]  ;;  %v9403_v26 = vld [vmem:[%s13442_s5 + $0x140] ss:$16 sps:$4 sm:$0xff]  }
 0x311   :  { %5717 = vmatprep.subr.bf16.mxu1 %v8837_v32  ;;  %v2453_v32 = vld [vmem:[%s13440_s3 + $0xeb8] sm:$0xff] }
 0x312   :  { %v8893_v5 = vcombine.high %v2449_v30, %v2453_v32  ;;  %v9408_v25 = vld [vmem:[%s13442_s5 + $0x2c] ss:$16 sps:$4 sm:$0xff]  }
 0x313   :  { %5572 = vmatpush1.bf16.msra.mxu0 %v8906_v40  ;;  %v2457_v40 = vld [vmem:[%s13440_s3 + $0xed8] sm:$0xff] }
 0x314   :  { %5718 = vmatpush1.bf16.msra.mxu1 %v8836_v41  ;;  %5573 = vmatprep.subr.bf16.mxu0 %v8915_v42  ;;  %v2461_v41 = vld [vmem:[%s13440_s3 + $0xef8] sm:$0xff]  ;;  %v9379_v42 = vld [vmem:[%s13442_s5 + $0x60] ss:$16 sps:$4 sm:$0xff]  }
 0x315   :  { %5719 = vmatprep.subr.bf16.mxu1 %v8845_v47  ;;  %v8892_v47 = vcombine.low %v2449_v30, %v2453_v32  ;;  %v8901_v50 = vcombine.high %v2457_v40, %v2461_v41  ;;  %v9420_v30 = vld [vmem:[%s13442_s5 + $0x6c] ss:$16 sps:$4 sm:$0xff]   ;;  %v9415_v32 = vld [vmem:[%s13442_s5 + $0x180] ss:$16 sps:$4 sm:$0xff]  }
 0x317   :  { %5574 = vmatpush1.bf16.msra.mxu0 %v8914_v43  ;;  %v9382_v43 = vld [vmem:[%s13442_s5 + $0x80] ss:$16 sps:$4 sm:$0xff]  }
 0x318   :  { %5720 = vmatpush1.bf16.msra.mxu1 %v8844_v45  ;;  %5575 = vmatprep.subr.bf16.mxu0 %v8923_v54  ;;  %v8900_v45 = vcombine.low %v2457_v40, %v2461_v41  ;;  %v9387_v54 = vld [vmem:[%s13442_s5 + $0xa4] ss:$16 sps:$4 sm:$0xff]   ;;  %v2499_v40 = vrot.slane %v12323_v52, %v10786_v8  ;;  %v9424_v41 = vld [vmem:[%s13442_s5 + $0x88] ss:$16 sps:$4 sm:$0xff]  }
 0x319   :  { %5721 = vmatprep.subr.bf16.mxu1 %v8853_v31  ;;  %v2473_v31 = vld [vmem:[%s13440_s3 + $0xf58] sm:$0xff] }
 0x31a   :  { %v12346_v16 = vpop.f32.mrb[12].mxu1  ;;  %v9265_v53 = vadd.f32 %v12224_v35, %v2499_v40  ;;  %v9433_v35 = vld [vmem:[%s13442_s5 + $0x1e0] ss:$16 sps:$4 sm:$0xff]   ;;  %v9495_v40 = vld [vmem:[%s13442_s5 + $0x324] ss:$16 sps:$4 sm:$0xff]  }
 0x31b   :  { %v12354_v9 = vpop.f32.mrb[13].mxu1  ;;  %5576 = vmatpush1.bf16.msra.mxu0 %v8922_v59  ;;  %v8917_v59 = vcombine.high %v2473_v31, %v2477_v34 }
 0x31c   :  { %v5421_v13 = vpop.f32.mrb[14].mxu1  ;;  %5722 = vmatpush1.bf16.msra.mxu1 %v8852_v61  ;;  %5577 = vmatprep.subr.bf16.mxu0 %v8931_v1  ;;  %v2481_v61 = vld [vmem:[%s13440_s3 + $0xf98] sm:$0xff] }
 0x31d   :  { %v5422_v18 = vpop.f32.mrb[15].mxu1  ;;  %5723 = vmatprep.subr.bf16.mxu1 %v8861_v27  ;;  %v2485_v1 = vld [vmem:[%s13440_s3 + $0xfb8] sm:$0xff]  ;;  %v8916_v27 = vcombine.low %v2473_v31, %v2477_v34 }
 0x31e   :  { %v8925_v6 = vcombine.high %v2481_v61, %v2485_v1  ;;  %v2493_v13 = vld [vmem:[%s13440_s3 + $0xff8] sm:$0xff] }
 0x31f   :  { %5578 = vmatpush1.bf16.msra.mxu0 %v8930_v12  ;;  %v2489_v12 = vld [vmem:[%s13440_s3 + $0xfd8] sm:$0xff] }
 0x320   :  { %5724 = vmatpush1.bf16.msra.mxu1 %v8860_v39  ;;  %7326 = vmatprep.subr.bf16.mxu0 %v9372_v15  ;;  %v9391_v39 = vld [vmem:[%s13442_s5 + $0xe0] ss:$16 sps:$4 sm:$0xff]   ;;  %v8924_v15 = vcombine.low %v2481_v61, %v2485_v1  ;;  %v8933_v18 = vcombine.high %v2489_v12, %v2493_v13  ;;  %v8932_v11 = vcombine.low %v2489_v12, %v2493_v13  ;;  %v9436_v31 = vld [vmem:[%s13442_s5 + $0xc8] ss:$16 sps:$4 sm:$0xff]   ;;  %v9447_v61 = vld [vmem:[%s13442_s5 + $0x224] ss:$16 sps:$4 sm:$0xff]  }
 0x321   :  { %5725 = vmatprep.subr.bf16.mxu1 %v8869_v19  ;;  %v9394_v19 = vld [vmem:[%s13442_s5 + $0x100] ss:$16 sps:$4 sm:$0xff]   ;;  %v9456_v12 = vld [vmem:[%s13442_s5 + $0x12c] ss:$16 sps:$4 sm:$0xff]  }
 0x322   :  { %5580 = vmatmul.mubr.bf16.vlgmr.msra.gmra.mrb[12].mxu0 %v11570_v58  ;;  %v9451_v13 = vld [vmem:[%s13442_s5 + $0x240] ss:$16 sps:$4 sm:$0xff]  }
 0x323   :  { %7327 = vmatpush1.bf16.msra.mxu0 %v9370_v21  ;;  %7358 = vmatprep.mubr.bf16.mxu0 %v12371_v46  ;;  %v9402_v21 = vld [vmem:[%s13442_s5 + $0xc] ss:$16 sps:$4 sm:$0xff]  }
 0x324   :  { %5726 = vmatpush1.bf16.msra.mxu1 %v8868_v22  ;;  %7328 = vmatprep.subr.bf16.mxu0 %v9375_v23  ;;  %v9397_v22 = vld [vmem:[%s13442_s5 + $0x120] ss:$16 sps:$4 sm:$0xff]   ;;  %v9400_v23 = vld [vmem:[%s13442_s5 + $0x8] ss:$16 sps:$4 sm:$0xff]  }
 0x325   :  { %5727 = vmatprep.subr.bf16.mxu1 %v8877_v33  ;;  %v9405_v33 = vld [vmem:[%s13442_s5 + $0x144] ss:$16 sps:$4 sm:$0xff]  }
 0x327   :  { %7329 = vmatpush1.bf16.msra.mxu0 %v9373_v4  ;;  %v9406_v4 = vld [vmem:[%s13442_s5 + $0x28] ss:$16 sps:$4 sm:$0xff]  }
 0x328   :  { %5728 = vmatpush1.bf16.msra.mxu1 %v8876_v57  ;;  %7330 = vmatprep.subr.bf16.mxu0 %v9378_v28  ;;  %v9411_v57 = vld [vmem:[%s13442_s5 + $0x164] ss:$16 sps:$4 sm:$0xff]   ;;  %v9409_v28 = vld [vmem:[%s13442_s5 + $0x160] ss:$16 sps:$4 sm:$0xff]  }
 0x329   :  { %5729 = vmatprep.subr.bf16.mxu1 %v8885_v29  ;;  %v9417_v29 = vld [vmem:[%s13442_s5 + $0x184] ss:$16 sps:$4 sm:$0xff]  }
 0x32b   :  { %7331 = vmatpush1.bf16.msra.mxu0 %v9376_v63  ;;  %v9418_v63 = vld [vmem:[%s13442_s5 + $0x68] ss:$16 sps:$4 sm:$0xff]  }
 0x32c   :  { %5730 = vmatpush1.bf16.msra.mxu1 %v8884_v37  ;;  %7332 = vmatprep.subr.bf16.mxu0 %v9381_v38  ;;  %v9423_v37 = vld [vmem:[%s13442_s5 + $0x1a4] ss:$16 sps:$4 sm:$0xff]   ;;  %v9426_v38 = vld [vmem:[%s13442_s5 + $0x8c] ss:$16 sps:$4 sm:$0xff]  }
 0x32d   :  { %5731 = vmatprep.subr.bf16.mxu1 %v8893_v5  ;;  %v9421_v5 = vld [vmem:[%s13442_s5 + $0x1a0] ss:$16 sps:$4 sm:$0xff]  }
 0x32f   :  { %7333 = vmatpush1.bf16.msra.mxu0 %v9379_v42  ;;  %v9429_v42 = vld [vmem:[%s13442_s5 + $0x1c4] ss:$16 sps:$4 sm:$0xff]  }
 0x330   :  { %5732 = vmatpush1.bf16.msra.mxu1 %v8892_v47  ;;  %7334 = vmatprep.subr.bf16.mxu0 %v9384_v51  ;;  %v2511_v47 = vrot.slane %v12323_v52, %v11111_v62  ;;  %v9432_v51 = vld [vmem:[%s13442_s5 + $0xac] ss:$16 sps:$4 sm:$0xff]  }
 0x331   :  { %5733 = vmatprep.subr.bf16.mxu1 %v8901_v50  ;;  %v9427_v50 = vld [vmem:[%s13442_s5 + $0x1c0] ss:$16 sps:$4 sm:$0xff]  }
 0x333   :  { %7335 = vmatpush1.bf16.msra.mxu0 %v9382_v43  ;;  %v9435_v43 = vld [vmem:[%s13442_s5 + $0x1e4] ss:$16 sps:$4 sm:$0xff]  }
 0x334   :  { %5734 = vmatpush1.bf16.msra.mxu1 %v8900_v45  ;;  %7336 = vmatprep.subr.bf16.mxu0 %v9387_v54  ;;  %v9268_v45 = vadd.f32 %v12354_v9, %v2511_v47  ;;  %v9438_v54 = vld [vmem:[%s13442_s5 + $0xcc] ss:$16 sps:$4 sm:$0xff]   ;;  %v9441_v9 = vld [vmem:[%s13442_s5 + $0x204] ss:$16 sps:$4 sm:$0xff]   ;;  %v9496_v47 = vld [vmem:[%s13442_s5 + $0x208] ss:$16 sps:$4 sm:$0xff]  }
 0x335   :  { %5735 = vmatprep.subr.bf16.mxu1 %v8909_v56  ;;  %v5752_v56 = vmax.f32 %v9265_v53, 0.0  ;;  %v9499_v53 = vld [vmem:[%s13442_s5 + $0x340] ss:$16 sps:$4 sm:$0xff]  }
 0x336   :  { %v5755_v34 = vmax.f32 %v9268_v45, 0.0  ;;  %v9510_v45 = vld [vmem:[%s13442_s5 + $0x24c] ss:$16 sps:$4 sm:$0xff]  }
 0x337   :  { %7337 = vmatpush1.bf16.msra.mxu0 %v9385_v36  ;;  %v9444_v36 = vld [vmem:[%s13442_s5 + $0xec] ss:$16 sps:$4 sm:$0xff]  }
 0x338   :  { %5736 = vmatpush1.bf16.msra.mxu1 %v8908_v48  ;;  %7338 = vmatprep.subr.bf16.mxu0 %v9390_v49  ;;  %v9439_v48 = vld [vmem:[%s13442_s5 + $0x200] ss:$16 sps:$4 sm:$0xff]   ;;  %v12563_v49 = vpack.c.bf16 %v5752_v56, %v5752_v56  ;;  %v12571_v1 = vpack.c.bf16 %v5755_v34, %v5755_v34  ;;  %v9513_v56 = vld [vmem:[%s13442_s5 + $0x384] ss:$16 sps:$4 sm:$0xff]   ;;  %v9514_v34 = vld [vmem:[%s13442_s5 + $0x268] ss:$16 sps:$4 sm:$0xff]  }
 0x339   :  { %5737 = vmatprep.subr.bf16.mxu1 %v8917_v59  ;;  %v9442_v59 = vld [vmem:[%s13442_s5 + $0xe8] ss:$16 sps:$4 sm:$0xff]  }
 0x33b   :  { %7339 = vmatpush1.bf16.msra.mxu0 %v9388_v2  ;;  %v9450_v2 = vld [vmem:[%s13442_s5 + $0x10c] ss:$16 sps:$4 sm:$0xff]  }
 0x33c   :  { %5738 = vmatpush1.bf16.msra.mxu1 %v8916_v27  ;;  %7340 = vmatprep.subr.bf16.mxu0 %v9393_v3  ;;  %v9445_v27 = vld [vmem:[%s13442_s5 + $0x220] ss:$16 sps:$4 sm:$0xff]   ;;  %v9448_v3 = vld [vmem:[%s13442_s5 + $0x108] ss:$16 sps:$4 sm:$0xff]  }
 0x33d   :  { %5739 = vmatprep.subr.bf16.mxu1 %v8925_v6  ;;  %v9453_v6 = vld [vmem:[%s13442_s5 + $0x244] ss:$16 sps:$4 sm:$0xff]  }
 0x33f   :  { %7341 = vmatpush1.bf16.msra.mxu0 %v9391_v39  ;;  %v9454_v39 = vld [vmem:[%s13442_s5 + $0x128] ss:$16 sps:$4 sm:$0xff]  }
 0x340   :  { %5740 = vmatpush1.bf16.msra.mxu1 %v8924_v15  ;;  %7342 = vmatprep.subr.bf16.mxu0 %v9396_v17  ;;  %v9459_v15 = vld [vmem:[%s13442_s5 + $0x264] ss:$16 sps:$4 sm:$0xff]   ;;  %v9462_v17 = vld [vmem:[%s13442_s5 + $0x14c] ss:$16 sps:$4 sm:$0xff]  }
 0x341   :  { %5741 = vmatprep.subr.bf16.mxu1 %v8933_v18  ;;  %v9457_v18 = vld [vmem:[%s13442_s5 + $0x260] ss:$16 sps:$4 sm:$0xff]  }
 0x343   :  { %7343 = vmatpush1.bf16.msra.mxu0 %v9394_v19  ;;  %v9460_v19 = vld [vmem:[%s13442_s5 + $0x148] ss:$16 sps:$4 sm:$0xff]  }
 0x344   :  { %5742 = vmatpush1.bf16.msra.mxu1 %v8932_v11  ;;  %7344 = vmatprep.subr.bf16.mxu0 %v9399_v20  ;;  %v9465_v11 = vld [vmem:[%s13442_s5 + $0x284] ss:$16 sps:$4 sm:$0xff]   ;;  %v9468_v20 = vld [vmem:[%s13442_s5 + $0x16c] ss:$16 sps:$4 sm:$0xff]  }
 0x345   :  { %7490 = vmatprep.subr.bf16.mxu1 %v9402_v21  ;;  %v9463_v21 = vld [vmem:[%s13442_s5 + $0x280] ss:$16 sps:$4 sm:$0xff]  }
 0x347   :  { %5744 = vmatmul.mubr.bf16.vlgmr.msra.gmra.mrb[16].mxu1 %v11570_v58  ;;  %7345 = vmatpush1.bf16.msra.mxu0 %v9397_v22  ;;  %v9414_v58 = vld [vmem:[%s13442_s5 + $0x4c] ss:$16 sps:$4 sm:$0xff]   ;;  %v9466_v22 = vld [vmem:[%s13442_s5 + $0x168] ss:$16 sps:$4 sm:$0xff]  }
 0x348   :  { %7491 = vmatpush1.bf16.msra.mxu1 %v9400_v23  ;;  %7522 = vmatprep.mubr.bf16.mxu1 %v12371_v46  ;;  %v9412_v46 = vld [vmem:[%s13442_s5 + $0x48] ss:$16 sps:$4 sm:$0xff]   ;;  %v9471_v23 = vld [vmem:[%s13442_s5 + $0x2a4] ss:$16 sps:$4 sm:$0xff]  }
 0x349   :  { %7346 = vmatprep.subr.bf16.mxu0 %v9405_v33  ;;  %7492 = vmatprep.subr.bf16.mxu1 %v9408_v25  ;;  %v9474_v33 = vld [vmem:[%s13442_s5 + $0x18c] ss:$16 sps:$4 sm:$0xff]   ;;  %v9469_v25 = vld [vmem:[%s13442_s5 + $0x2a0] ss:$16 sps:$4 sm:$0xff]  }
 0x34b   :  { %7347 = vmatpush1.bf16.msra.mxu0 %v9403_v26  ;;  %v9472_v26 = vld [vmem:[%s13442_s5 + $0x188] ss:$16 sps:$4 sm:$0xff]  }
 0x34c   :  { %7493 = vmatpush1.bf16.msra.mxu1 %v9406_v4  ;;  %7348 = vmatprep.subr.bf16.mxu0 %v9411_v57  ;;  %v9477_v4 = vld [vmem:[%s13442_s5 + $0x2c4] ss:$16 sps:$4 sm:$0xff]   ;;  %v9480_v57 = vld [vmem:[%s13442_s5 + $0x1ac] ss:$16 sps:$4 sm:$0xff]  }
 0x34d   :  { %7494 = vmatprep.subr.bf16.mxu1 %v9414_v58  ;;  %v9475_v58 = vld [vmem:[%s13442_s5 + $0x2c0] ss:$16 sps:$4 sm:$0xff]  }
 0x34f   :  { %7349 = vmatpush1.bf16.msra.mxu0 %v9409_v28  ;;  %v9478_v28 = vld [vmem:[%s13442_s5 + $0x1a8] ss:$16 sps:$4 sm:$0xff]  }
 0x350   :  { %7495 = vmatpush1.bf16.msra.mxu1 %v9412_v46  ;;  %7350 = vmatprep.subr.bf16.mxu0 %v9417_v29  ;;  %v9483_v46 = vld [vmem:[%s13442_s5 + $0x2e4] ss:$16 sps:$4 sm:$0xff]   ;;  %v9486_v29 = vld [vmem:[%s13442_s5 + $0x1cc] ss:$16 sps:$4 sm:$0xff]  }
 0x351   :  { %7496 = vmatprep.subr.bf16.mxu1 %v9420_v30  ;;  %v9481_v30 = vld [vmem:[%s13442_s5 + $0x2e0] ss:$16 sps:$4 sm:$0xff]  }
 0x353   :  { %7351 = vmatpush1.bf16.msra.mxu0 %v9415_v32  ;;  %v9484_v32 = vld [vmem:[%s13442_s5 + $0x1c8] ss:$16 sps:$4 sm:$0xff]  }
 0x354   :  { %7497 = vmatpush1.bf16.msra.mxu1 %v9418_v63  ;;  %7352 = vmatprep.subr.bf16.mxu0 %v9423_v37  ;;  %v9489_v63 = vld [vmem:[%s13442_s5 + $0x304] ss:$16 sps:$4 sm:$0xff]   ;;  %v9492_v37 = vld [vmem:[%s13442_s5 + $0x1ec] ss:$16 sps:$4 sm:$0xff]  }
 0x355   :  { %7498 = vmatprep.subr.bf16.mxu1 %v9426_v38  ;;  %v9487_v38 = vld [vmem:[%s13442_s5 + $0x300] ss:$16 sps:$4 sm:$0xff]  }
 0x357   :  { %7353 = vmatpush1.bf16.msra.mxu0 %v9421_v5  ;;  %v9490_v5 = vld [vmem:[%s13442_s5 + $0x1e8] ss:$16 sps:$4 sm:$0xff]  }
 0x358   :  { %7499 = vmatpush1.bf16.msra.mxu1 %v9424_v41  ;;  %7354 = vmatprep.subr.bf16.mxu0 %v9429_v42  ;;  %v9498_v41 = vld [vmem:[%s13442_s5 + $0x20c] ss:$16 sps:$4 sm:$0xff]   ;;  %v9493_v42 = vld [vmem:[%s13442_s5 + $0x320] ss:$16 sps:$4 sm:$0xff]  }
 0x359   :  { %7500 = vmatprep.subr.bf16.mxu1 %v9432_v51  ;;  %v9501_v51 = vld [vmem:[%s13442_s5 + $0x344] ss:$16 sps:$4 sm:$0xff]  }
 0x35b   :  { %7355 = vmatpush1.bf16.msra.mxu0 %v9427_v50  ;;  %v9504_v50 = vld [vmem:[%s13442_s5 + $0x22c] ss:$16 sps:$4 sm:$0xff]  }
 0x35c   :  { %7501 = vmatpush1.bf16.msra.mxu1 %v9430_v55  ;;  %7356 = vmatprep.subr.bf16.mxu0 %v9435_v43  ;;  %v9502_v55 = vld [vmem:[%s13442_s5 + $0x228] ss:$16 sps:$4 sm:$0xff]   ;;  %v9507_v43 = vld [vmem:[%s13442_s5 + $0x364] ss:$16 sps:$4 sm:$0xff]  }
 0x35d   :  { %7502 = vmatprep.subr.bf16.mxu1 %v9438_v54  ;;  %v9505_v54 = vld [vmem:[%s13442_s5 + $0x360] ss:$16 sps:$4 sm:$0xff]  }
 0x35f   :  { %7357 = vmatpush1.bf16.msra.mxu0 %v9433_v35  ;;  %v9508_v35 = vld [vmem:[%s13442_s5 + $0x248] ss:$16 sps:$4 sm:$0xff]  }
 0x360   :  { %7503 = vmatpush1.bf16.msra.mxu1 %v9436_v31  ;;  %7367 = vmatprep.subr.bf16.mxu0 %v9441_v9  ;;  %v9516_v31 = vld [vmem:[%s13442_s5 + $0x26c] ss:$16 sps:$4 sm:$0xff]   ;;  %v9511_v9 = vld [vmem:[%s13442_s5 + $0x380] ss:$16 sps:$4 sm:$0xff]  }
 0x361   :  { %7504 = vmatprep.subr.bf16.mxu1 %v9444_v36  ;;  %v9519_v36 = vld [vmem:[%s13442_s5 + $0x3a4] ss:$16 sps:$4 sm:$0xff]  }
 0x362   :  { %7359 = vmatmul.mubr.bf16.vlgmr.msra.gmra.mrb[16].mxu0 %v12563_v49 }
 0x363   :  { %7368 = vmatpush1.bf16.msra.mxu0 %v9439_v48  ;;  %7399 = vmatprep.mubr.bf16.mxu0 %v12571_v1  ;;  %v9522_v48 = vld [vmem:[%s13442_s5 + $0x28c] ss:$16 sps:$4 sm:$0xff]  }
 0x364   :  { %7505 = vmatpush1.bf16.msra.mxu1 %v9442_v59  ;;  %7369 = vmatprep.subr.bf16.mxu0 %v9447_v61  ;;  %v2507_v59 = vrot.slane %v12323_v52, %v11108_v60  ;;  %v9520_v61 = vld [vmem:[%s13442_s5 + $0x288] ss:$16 sps:$4 sm:$0xff]  }
 0x365   :  { %7506 = vmatprep.subr.bf16.mxu1 %v9450_v2  ;;  %v9528_v2 = vld [vmem:[%s13442_s5 + $0x2ac] ss:$16 sps:$4 sm:$0xff]  }
 0x367   :  { %7370 = vmatpush1.bf16.msra.mxu0 %v9445_v27  ;;  %v9523_v27 = vld [vmem:[%s13442_s5 + $0x3c0] ss:$16 sps:$4 sm:$0xff]  }
 0x368   :  { %7507 = vmatpush1.bf16.msra.mxu1 %v9448_v3  ;;  %7371 = vmatprep.subr.bf16.mxu0 %v9453_v6  ;;  %v9267_v3 = vadd.f32 %v12346_v16, %v2507_v59  ;;  %v9526_v6 = vld [vmem:[%s13442_s5 + $0x2a8] ss:$16 sps:$4 sm:$0xff]   ;;  %v9529_v16 = vld [vmem:[%s13442_s5 + $0x3e0] ss:$16 sps:$4 sm:$0xff]   ;;  %v9579_v59 = vld [vmem:[%s13442_s5 + $0x42c] ss:$16 sps:$4 sm:$0xff]  }
 0x369   :  { %7508 = vmatprep.subr.bf16.mxu1 %v9456_v12  ;;  %v9531_v12 = vld [vmem:[%s13442_s5 + $0x3e4] ss:$16 sps:$4 sm:$0xff]  }
 0x36b   :  { %7372 = vmatpush1.bf16.msra.mxu0 %v9451_v13  ;;  %v9534_v13 = vld [vmem:[%s13442_s5 + $0x2cc] ss:$16 sps:$4 sm:$0xff]  }
 0x36c   :  { %7509 = vmatpush1.bf16.msra.mxu1 %v9454_v39  ;;  %7373 = vmatprep.subr.bf16.mxu0 %v9459_v15  ;;  %v5754_v39 = vmax.f32 %v9267_v3, 0.0  ;;  %v9532_v15 = vld [vmem:[%s13442_s5 + $0x2c8] ss:$16 sps:$4 sm:$0xff]   ;;  %v9622_v3 = vld [vmem:[%s13442_s5 + $0x560] ss:$16 sps:$4 sm:$0xff]  }
 0x36d   :  { %7510 = vmatprep.subr.bf16.mxu1 %v9462_v17  ;;  %v9558_v17 = vld [vmem:[%s13442_s5 + $0x404] ss:$16 sps:$4 sm:$0xff]  }
 0x36f   :  { %7374 = vmatpush1.bf16.msra.mxu0 %v9457_v18  ;;  %v9537_v18 = vld [vmem:[%s13442_s5 + $0x2ec] ss:$16 sps:$4 sm:$0xff]  }
 0x370   :  { %7511 = vmatpush1.bf16.msra.mxu1 %v9460_v19  ;;  %7375 = vmatprep.subr.bf16.mxu0 %v9465_v11  ;;  %v9556_v19 = vld [vmem:[%s13442_s5 + $0x400] ss:$16 sps:$4 sm:$0xff]   ;;  %v12766_v11 = vpack.c.bf16 %v5754_v39, %v5754_v39  ;;  %v9589_v39 = vld [vmem:[%s13442_s5 + $0x468] ss:$16 sps:$4 sm:$0xff]  }
 0x371   :  { %7512 = vmatprep.subr.bf16.mxu1 %v9468_v20  ;;  %v9535_v20 = vld [vmem:[%s13442_s5 + $0x2e8] ss:$16 sps:$4 sm:$0xff]  }
 0x373   :  { %7376 = vmatpush1.bf16.msra.mxu0 %v9463_v21  ;;  %v9564_v21 = vld [vmem:[%s13442_s5 + $0x424] ss:$16 sps:$4 sm:$0xff]  }
 0x374   :  { %7513 = vmatpush1.bf16.msra.mxu1 %v9466_v22  ;;  %7377 = vmatprep.subr.bf16.mxu0 %v9471_v23  ;;  %v9540_v22 = vld [vmem:[%s13442_s5 + $0x30c] ss:$16 sps:$4 sm:$0xff]   ;;  %v9562_v23 = vld [vmem:[%s13442_s5 + $0x420] ss:$16 sps:$4 sm:$0xff]  }
 0x375   :  { %7514 = vmatprep.subr.bf16.mxu1 %v9474_v33  ;;  %v9538_v33 = vld [vmem:[%s13442_s5 + $0x308] ss:$16 sps:$4 sm:$0xff]  }
 0x377   :  { %7378 = vmatpush1.bf16.msra.mxu0 %v9469_v25  ;;  %v9570_v25 = vld [vmem:[%s13442_s5 + $0x444] ss:$16 sps:$4 sm:$0xff]  }
 0x378   :  { %7515 = vmatpush1.bf16.msra.mxu1 %v9472_v26  ;;  %7379 = vmatprep.subr.bf16.mxu0 %v9477_v4  ;;  %v9543_v26 = vld [vmem:[%s13442_s5 + $0x32c] ss:$16 sps:$4 sm:$0xff]   ;;  %v9568_v4 = vld [vmem:[%s13442_s5 + $0x440] ss:$16 sps:$4 sm:$0xff]  }
 0x379   :  { %7516 = vmatprep.subr.bf16.mxu1 %v9480_v57  ;;  %v9541_v57 = vld [vmem:[%s13442_s5 + $0x328] ss:$16 sps:$4 sm:$0xff]  }
 0x37b   :  { %7380 = vmatpush1.bf16.msra.mxu0 %v9475_v58  ;;  %v9576_v58 = vld [vmem:[%s13442_s5 + $0x464] ss:$16 sps:$4 sm:$0xff]  }
 0x37c   :  { %7517 = vmatpush1.bf16.msra.mxu1 %v9478_v28  ;;  %7381 = vmatprep.subr.bf16.mxu0 %v9483_v46  ;;  %v9546_v28 = vld [vmem:[%s13442_s5 + $0x34c] ss:$16 sps:$4 sm:$0xff]   ;;  %v9574_v46 = vld [vmem:[%s13442_s5 + $0x460] ss:$16 sps:$4 sm:$0xff]  }
 0x37d   :  { %7518 = vmatprep.subr.bf16.mxu1 %v9486_v29  ;;  %v9544_v29 = vld [vmem:[%s13442_s5 + $0x348] ss:$16 sps:$4 sm:$0xff]  }
 0x37f   :  { %7382 = vmatpush1.bf16.msra.mxu0 %v9481_v30  ;;  %v9582_v30 = vld [vmem:[%s13442_s5 + $0x484] ss:$16 sps:$4 sm:$0xff]  }
 0x380   :  { %7519 = vmatpush1.bf16.msra.mxu1 %v9484_v32  ;;  %7383 = vmatprep.subr.bf16.mxu0 %v9489_v63  ;;  %v9549_v32 = vld [vmem:[%s13442_s5 + $0x36c] ss:$16 sps:$4 sm:$0xff]   ;;  %v9580_v63 = vld [vmem:[%s13442_s5 + $0x480] ss:$16 sps:$4 sm:$0xff]  }
 0x381   :  { %7520 = vmatprep.subr.bf16.mxu1 %v9492_v37  ;;  %v9547_v37 = vld [vmem:[%s13442_s5 + $0x368] ss:$16 sps:$4 sm:$0xff]  }
 0x383   :  { %7384 = vmatpush1.bf16.msra.mxu0 %v9487_v38  ;;  %v9588_v38 = vld [vmem:[%s13442_s5 + $0x4a4] ss:$16 sps:$4 sm:$0xff]  }
 0x384   :  { %7521 = vmatpush1.bf16.msra.mxu1 %v9490_v5  ;;  %7385 = vmatprep.subr.bf16.mxu0 %v9495_v40  ;;  %v9552_v5 = vld [vmem:[%s13442_s5 + $0x38c] ss:$16 sps:$4 sm:$0xff]   ;;  %v9586_v40 = vld [vmem:[%s13442_s5 + $0x4a0] ss:$16 sps:$4 sm:$0xff]  }
 0x385   :  { %7531 = vmatprep.subr.bf16.mxu1 %v9498_v41  ;;  %v9550_v41 = vld [vmem:[%s13442_s5 + $0x388] ss:$16 sps:$4 sm:$0xff]  }
 0x387   :  { %7386 = vmatpush1.bf16.msra.mxu0 %v9493_v42  ;;  %7523 = vmatmul.mubr.bf16.vlgmr.msra.gmra.mrb[20].mxu1 %v12563_v49  ;;  %v9517_v49 = vld [vmem:[%s13442_s5 + $0x3a0] ss:$16 sps:$4 sm:$0xff]   ;;  %v9594_v42 = vld [vmem:[%s13442_s5 + $0x4c4] ss:$16 sps:$4 sm:$0xff]  }
 0x388   :  { %7532 = vmatpush1.bf16.msra.mxu1 %v9496_v47  ;;  %7563 = vmatprep.mubr.bf16.mxu1 %v12571_v1  ;;  %v9525_v1 = vld [vmem:[%s13442_s5 + $0x3c4] ss:$16 sps:$4 sm:$0xff]   ;;  %v9555_v47 = vld [vmem:[%s13442_s5 + $0x3ac] ss:$16 sps:$4 sm:$0xff]  }
 0x389   :  { %7387 = vmatprep.subr.bf16.mxu0 %v9501_v51  ;;  %7533 = vmatprep.subr.bf16.mxu1 %v9504_v50  ;;  %v9592_v51 = vld [vmem:[%s13442_s5 + $0x4c0] ss:$16 sps:$4 sm:$0xff]   ;;  %v9553_v50 = vld [vmem:[%s13442_s5 + $0x3a8] ss:$16 sps:$4 sm:$0xff]  }
 0x38b   :  { %7388 = vmatpush1.bf16.msra.mxu0 %v9499_v53  ;;  %v9600_v53 = vld [vmem:[%s13442_s5 + $0x4e4] ss:$16 sps:$4 sm:$0xff]  }
 0x38c   :  { %7534 = vmatpush1.bf16.msra.mxu1 %v9502_v55  ;;  %7389 = vmatprep.subr.bf16.mxu0 %v9507_v43  ;;  %v9561_v55 = vld [vmem:[%s13442_s5 + $0x3cc] ss:$16 sps:$4 sm:$0xff]   ;;  %v9598_v43 = vld [vmem:[%s13442_s5 + $0x4e0] ss:$16 sps:$4 sm:$0xff]  }
 0x38d   :  { %7535 = vmatprep.subr.bf16.mxu1 %v9510_v45  ;;  %v9559_v45 = vld [vmem:[%s13442_s5 + $0x3c8] ss:$16 sps:$4 sm:$0xff]  }
 0x38f   :  { %7390 = vmatpush1.bf16.msra.mxu0 %v9505_v54  ;;  %v9606_v54 = vld [vmem:[%s13442_s5 + $0x504] ss:$16 sps:$4 sm:$0xff]  }
 0x390   :  { %7536 = vmatpush1.bf16.msra.mxu1 %v9508_v35  ;;  %7391 = vmatprep.subr.bf16.mxu0 %v9513_v56  ;;  %v9567_v35 = vld [vmem:[%s13442_s5 + $0x3ec] ss:$16 sps:$4 sm:$0xff]   ;;  %v9604_v56 = vld [vmem:[%s13442_s5 + $0x500] ss:$16 sps:$4 sm:$0xff]  }
 0x391   :  { %7537 = vmatprep.subr.bf16.mxu1 %v9516_v31  ;;  %v9565_v31 = vld [vmem:[%s13442_s5 + $0x3e8] ss:$16 sps:$4 sm:$0xff]  }
 0x393   :  { %7392 = vmatpush1.bf16.msra.mxu0 %v9511_v9  ;;  %v9612_v9 = vld [vmem:[%s13442_s5 + $0x524] ss:$16 sps:$4 sm:$0xff]  }
 0x394   :  { %7538 = vmatpush1.bf16.msra.mxu1 %v9514_v34  ;;  %7393 = vmatprep.subr.bf16.mxu0 %v9519_v36  ;;  %v9573_v34 = vld [vmem:[%s13442_s5 + $0x40c] ss:$16 sps:$4 sm:$0xff]   ;;  %v9610_v36 = vld [vmem:[%s13442_s5 + $0x520] ss:$16 sps:$4 sm:$0xff]  }
 0x395   :  { %7539 = vmatprep.subr.bf16.mxu1 %v9522_v48  ;;  %v9571_v48 = vld [vmem:[%s13442_s5 + $0x408] ss:$16 sps:$4 sm:$0xff]  }
 0x397   :  { %7394 = vmatpush1.bf16.msra.mxu0 %v9517_v49  ;;  %v9618_v49 = vld [vmem:[%s13442_s5 + $0x544] ss:$16 sps:$4 sm:$0xff]  }
 0x398   :  { %7540 = vmatpush1.bf16.msra.mxu1 %v9520_v61  ;;  %7395 = vmatprep.subr.bf16.mxu0 %v9525_v1  ;;  %v9616_v61 = vld [vmem:[%s13442_s5 + $0x540] ss:$16 sps:$4 sm:$0xff]   ;;  %v9577_v1 = vld [vmem:[%s13442_s5 + $0x428] ss:$16 sps:$4 sm:$0xff]  }
 0x399   :  { %7541 = vmatprep.subr.bf16.mxu1 %v9528_v2  ;;  %v9624_v2 = vld [vmem:[%s13442_s5 + $0x564] ss:$16 sps:$4 sm:$0xff]  }
 0x39b   :  { %7396 = vmatpush1.bf16.msra.mxu0 %v9523_v27  ;;  %v9585_v27 = vld [vmem:[%s13442_s5 + $0x44c] ss:$16 sps:$4 sm:$0xff]  }
 0x39c   :  { %7542 = vmatpush1.bf16.msra.mxu1 %v9526_v6  ;;  %7397 = vmatprep.subr.bf16.mxu0 %v9531_v12  ;;  %v9583_v6 = vld [vmem:[%s13442_s5 + $0x448] ss:$16 sps:$4 sm:$0xff]   ;;  %v9630_v12 = vld [vmem:[%s13442_s5 + $0x584] ss:$16 sps:$4 sm:$0xff]  }
 0x39d   :  { %7543 = vmatprep.subr.bf16.mxu1 %v9534_v13  ;;  %v9591_v13 = vld [vmem:[%s13442_s5 + $0x46c] ss:$16 sps:$4 sm:$0xff]  }
 0x39f   :  { %7398 = vmatpush1.bf16.msra.mxu0 %v9529_v16  ;;  %v9628_v16 = vld [vmem:[%s13442_s5 + $0x580] ss:$16 sps:$4 sm:$0xff]  }
 0x3a0   :  { %7544 = vmatpush1.bf16.msra.mxu1 %v9532_v15  ;;  %7408 = vmatprep.subr.bf16.mxu0 %v9558_v17  ;;  %v9636_v15 = vld [vmem:[%s13442_s5 + $0x5a4] ss:$16 sps:$4 sm:$0xff]   ;;  %v9597_v17 = vld [vmem:[%s13442_s5 + $0x48c] ss:$16 sps:$4 sm:$0xff]  }
 0x3a1   :  { %7545 = vmatprep.subr.bf16.mxu1 %v9537_v18  ;;  %v9634_v18 = vld [vmem:[%s13442_s5 + $0x5a0] ss:$16 sps:$4 sm:$0xff]  }
 0x3a2   :  { %7400 = vmatmul.mubr.bf16.vlgmr.msra.gmra.mrb[16].mxu0 %v12766_v11 }
 0x3a3   :  { %7409 = vmatpush1.bf16.msra.mxu0 %v9556_v19  ;;  %v9595_v19 = vld [vmem:[%s13442_s5 + $0x488] ss:$16 sps:$4 sm:$0xff]  }
 0x3a4   :  { %7546 = vmatpush1.bf16.msra.mxu1 %v9535_v20  ;;  %7410 = vmatprep.subr.bf16.mxu0 %v9564_v21  ;;  %v9603_v20 = vld [vmem:[%s13442_s5 + $0x4ac] ss:$16 sps:$4 sm:$0xff]   ;;  %v9640_v21 = vld [vmem:[%s13442_s5 + $0x5c0] ss:$16 sps:$4 sm:$0xff]  }
 0x3a5   :  { %7547 = vmatprep.subr.bf16.mxu1 %v9540_v22  ;;  %v9601_v22 = vld [vmem:[%s13442_s5 + $0x4a8] ss:$16 sps:$4 sm:$0xff]  }
 0x3a7   :  { %7411 = vmatpush1.bf16.msra.mxu0 %v9562_v23  ;;  %v9648_v23 = vld [vmem:[%s13442_s5 + $0x5e4] ss:$16 sps:$4 sm:$0xff]  }
 0x3a8   :  { %7548 = vmatpush1.bf16.msra.mxu1 %v9538_v33  ;;  %7412 = vmatprep.subr.bf16.mxu0 %v9570_v25  ;;  %v9609_v33 = vld [vmem:[%s13442_s5 + $0x4cc] ss:$16 sps:$4 sm:$0xff]   ;;  %v9646_v25 = vld [vmem:[%s13442_s5 + $0x5e0] ss:$16 sps:$4 sm:$0xff]  }
 0x3a9   :  { %7549 = vmatprep.subr.bf16.mxu1 %v9543_v26  ;;  %v9607_v26 = vld [vmem:[%s13442_s5 + $0x4c8] ss:$16 sps:$4 sm:$0xff]  }
 0x3ab   :  { %7413 = vmatpush1.bf16.msra.mxu0 %v9568_v4  ;;  %v9654_v4 = vld [vmem:[%s13442_s5 + $0x604] ss:$16 sps:$4 sm:$0xff]  }
 0x3ac   :  { %7550 = vmatpush1.bf16.msra.mxu1 %v9541_v57  ;;  %7414 = vmatprep.subr.bf16.mxu0 %v9576_v58  ;;  %v9615_v57 = vld [vmem:[%s13442_s5 + $0x4ec] ss:$16 sps:$4 sm:$0xff]   ;;  %v9613_v58 = vld [vmem:[%s13442_s5 + $0x4e8] ss:$16 sps:$4 sm:$0xff]  }
 0x3ad   :  { %7551 = vmatprep.subr.bf16.mxu1 %v9546_v28  ;;  %v9621_v28 = vld [vmem:[%s13442_s5 + $0x50c] ss:$16 sps:$4 sm:$0xff]  }
 0x3af   :  { %7415 = vmatpush1.bf16.msra.mxu0 %v9574_v46  ;;  %v9619_v46 = vld [vmem:[%s13442_s5 + $0x508] ss:$16 sps:$4 sm:$0xff]  }
 0x3b0   :  { %7552 = vmatpush1.bf16.msra.mxu1 %v9544_v29  ;;  %7416 = vmatprep.subr.bf16.mxu0 %v9582_v30  ;;  %v9627_v29 = vld [vmem:[%s13442_s5 + $0x52c] ss:$16 sps:$4 sm:$0xff]   ;;  %v9625_v30 = vld [vmem:[%s13442_s5 + $0x528] ss:$16 sps:$4 sm:$0xff]  }
 0x3b1   :  { %7553 = vmatprep.subr.bf16.mxu1 %v9549_v32  ;;  %v9633_v32 = vld [vmem:[%s13442_s5 + $0x54c] ss:$16 sps:$4 sm:$0xff]  }
 0x3b3   :  { %7417 = vmatpush1.bf16.msra.mxu0 %v9580_v63  ;;  %v9631_v63 = vld [vmem:[%s13442_s5 + $0x548] ss:$16 sps:$4 sm:$0xff]  }
 0x3b4   :  { %7554 = vmatpush1.bf16.msra.mxu1 %v9547_v37  ;;  %7418 = vmatprep.subr.bf16.mxu0 %v9588_v38  ;;  %v9639_v37 = vld [vmem:[%s13442_s5 + $0x56c] ss:$16 sps:$4 sm:$0xff]   ;;  %v9637_v38 = vld [vmem:[%s13442_s5 + $0x568] ss:$16 sps:$4 sm:$0xff]  }
 0x3b5   :  { %7555 = vmatprep.subr.bf16.mxu1 %v9552_v5  ;;  %v9645_v5 = vld [vmem:[%s13442_s5 + $0x58c] ss:$16 sps:$4 sm:$0xff]  }
 0x3b7   :  { %7419 = vmatpush1.bf16.msra.mxu0 %v9586_v40  ;;  %v2515_v40 = vrot.slane %v12323_v52, %v336_v24 }
 0x3b8   :  { %7556 = vmatpush1.bf16.msra.mxu1 %v9550_v41  ;;  %7420 = vmatprep.subr.bf16.mxu0 %v9594_v42  ;;  %v2519_v41 = vrot.slane %v12323_v52, %v340_v0  ;;  %v9643_v42 = vld [vmem:[%s13442_s5 + $0x588] ss:$16 sps:$4 sm:$0xff]  }
 0x3b9   :  { %7557 = vmatprep.subr.bf16.mxu1 %v9555_v47  ;;  %v9649_v0 = vld [vmem:[%s13442_s5 + $0x5a8] ss:$16 sps:$4 sm:$0xff]  }
 0x3bb   :  { %7421 = vmatpush1.bf16.msra.mxu0 %v9592_v51  ;;  %v9651_v51 = vld [vmem:[%s13442_s5 + $0x5ac] ss:$16 sps:$4 sm:$0xff]  }
 0x3bc   :  { %7558 = vmatpush1.bf16.msra.mxu1 %v9553_v50  ;;  %7422 = vmatprep.subr.bf16.mxu0 %v9600_v53 }
 0x3bd   :  { %7559 = vmatprep.subr.bf16.mxu1 %v9561_v55 }
 0x3bf   :  { %7423 = vmatpush1.bf16.msra.mxu0 %v9598_v43 }
 0x3c0   :  { %7560 = vmatpush1.bf16.msra.mxu1 %v9559_v45  ;;  %7424 = vmatprep.subr.bf16.mxu0 %v9606_v54  ;;  %v9657_v54 = vld [vmem:[%s13442_s5 + $0x5cc] ss:$16 sps:$4 sm:$0xff]  }
 0x3c1   :  { %7561 = vmatprep.subr.bf16.mxu1 %v9567_v35 }
 0x3c3   :  { %7425 = vmatpush1.bf16.msra.mxu0 %v9604_v56  ;;  %v9652_v56 = vld [vmem:[%s13442_s5 + $0x600] ss:$16 sps:$4 sm:$0xff]  }
 0x3c4   :  { %7562 = vmatpush1.bf16.msra.mxu1 %v9565_v31  ;;  %7426 = vmatprep.subr.bf16.mxu0 %v9612_v9  ;;  %v9655_v9 = vld [vmem:[%s13442_s5 + $0x5c8] ss:$16 sps:$4 sm:$0xff]  }
 0x3c5   :  { %7572 = vmatprep.subr.bf16.mxu1 %v9573_v34  ;;  %v9660_v34 = vld [vmem:[%s13442_s5 + $0x624] ss:$16 sps:$4 sm:$0xff]  }
 0x3c7   :  { %7564 = vmatmul.mubr.bf16.vlgmr.msra.gmra.mrb[20].mxu1 %v12766_v11  ;;  %7427 = vmatpush1.bf16.msra.mxu0 %v9610_v36  ;;  %v9642_v11 = vld [vmem:[%s13442_s5 + $0x5c4] ss:$16 sps:$4 sm:$0xff]   ;;  %v9663_v36 = vld [vmem:[%s13442_s5 + $0x5ec] ss:$16 sps:$4 sm:$0xff]  }
 0x3c8   :  { %7573 = vmatpush1.bf16.msra.mxu1 %v9571_v48  ;;  %7428 = vmatprep.subr.bf16.mxu0 %v9618_v49  ;;  %v9658_v48 = vld [vmem:[%s13442_s5 + $0x620] ss:$16 sps:$4 sm:$0xff]   ;;  %v9661_v49 = vld [vmem:[%s13442_s5 + $0x5e8] ss:$16 sps:$4 sm:$0xff]  }
 0x3c9   :  { %7574 = vmatprep.subr.bf16.mxu1 %v9579_v59  ;;  %v9666_v59 = vld [vmem:[%s13442_s5 + $0x644] ss:$16 sps:$4 sm:$0xff]  }
 0x3cb   :  { %7429 = vmatpush1.bf16.msra.mxu0 %v9616_v61  ;;  %v9669_v61 = vld [vmem:[%s13442_s5 + $0x60c] ss:$16 sps:$4 sm:$0xff]  }
 0x3cc   :  { %7575 = vmatpush1.bf16.msra.mxu1 %v9577_v1  ;;  %7430 = vmatprep.subr.bf16.mxu0 %v9624_v2  ;;  %v9664_v1 = vld [vmem:[%s13442_s5 + $0x640] ss:$16 sps:$4 sm:$0xff]   ;;  %v9667_v2 = vld [vmem:[%s13442_s5 + $0x608] ss:$16 sps:$4 sm:$0xff]  }
 0x3cd   :  { %7576 = vmatprep.subr.bf16.mxu1 %v9585_v27  ;;  %v9672_v27 = vld [vmem:[%s13442_s5 + $0x664] ss:$16 sps:$4 sm:$0xff]  }
 0x3cf   :  { %7431 = vmatpush1.bf16.msra.mxu0 %v9622_v3  ;;  %v9675_v3 = vld [vmem:[%s13442_s5 + $0x62c] ss:$16 sps:$4 sm:$0xff]  }
 0x3d0   :  { %7577 = vmatpush1.bf16.msra.mxu1 %v9583_v6  ;;  %7432 = vmatprep.subr.bf16.mxu0 %v9630_v12  ;;  %v9670_v6 = vld [vmem:[%s13442_s5 + $0x660] ss:$16 sps:$4 sm:$0xff]   ;;  %v9673_v12 = vld [vmem:[%s13442_s5 + $0x628] ss:$16 sps:$4 sm:$0xff]  }
 0x3d1   :  { %7578 = vmatprep.subr.bf16.mxu1 %v9591_v13  ;;  %v9678_v13 = vld [vmem:[%s13442_s5 + $0x684] ss:$16 sps:$4 sm:$0xff]  }
 0x3d3   :  { %7433 = vmatpush1.bf16.msra.mxu0 %v9628_v16  ;;  %v9681_v16 = vld [vmem:[%s13442_s5 + $0x64c] ss:$16 sps:$4 sm:$0xff]  }
 0x3d4   :  { %7579 = vmatpush1.bf16.msra.mxu1 %v9589_v39  ;;  %7434 = vmatprep.subr.bf16.mxu0 %v9636_v15  ;;  %v9676_v39 = vld [vmem:[%s13442_s5 + $0x680] ss:$16 sps:$4 sm:$0xff]   ;;  %v9679_v15 = vld [vmem:[%s13442_s5 + $0x648] ss:$16 sps:$4 sm:$0xff]  }
 0x3d5   :  { %7580 = vmatprep.subr.bf16.mxu1 %v9597_v17  ;;  %v9684_v17 = vld [vmem:[%s13442_s5 + $0x6a4] ss:$16 sps:$4 sm:$0xff]  }
 0x3d7   :  { %7435 = vmatpush1.bf16.msra.mxu0 %v9634_v18  ;;  %v9687_v18 = vld [vmem:[%s13442_s5 + $0x66c] ss:$16 sps:$4 sm:$0xff]  }
 0x3d8   :  { %7581 = vmatpush1.bf16.msra.mxu1 %v9595_v19  ;;  %7436 = vmatprep.subr.bf16.mxu0 %v9642_v11  ;;  %v9682_v19 = vld [vmem:[%s13442_s5 + $0x6a0] ss:$16 sps:$4 sm:$0xff]   ;;  %v9685_v11 = vld [vmem:[%s13442_s5 + $0x668] ss:$16 sps:$4 sm:$0xff]  }
 0x3d9   :  { %7582 = vmatprep.subr.bf16.mxu1 %v9603_v20  ;;  %v9690_v20 = vld [vmem:[%s13442_s5 + $0x6c4] ss:$16 sps:$4 sm:$0xff]  }
 0x3db   :  { %7437 = vmatpush1.bf16.msra.mxu0 %v9640_v21  ;;  %v9693_v21 = vld [vmem:[%s13442_s5 + $0x68c] ss:$16 sps:$4 sm:$0xff]  }
 0x3dc   :  { %7583 = vmatpush1.bf16.msra.mxu1 %v9601_v22  ;;  %7438 = vmatprep.subr.bf16.mxu0 %v9648_v23  ;;  %v9688_v22 = vld [vmem:[%s13442_s5 + $0x6c0] ss:$16 sps:$4 sm:$0xff]   ;;  %v9691_v23 = vld [vmem:[%s13442_s5 + $0x688] ss:$16 sps:$4 sm:$0xff]  }
 0x3dd   :  { %7584 = vmatprep.subr.bf16.mxu1 %v9609_v33  ;;  %v9696_v33 = vld [vmem:[%s13442_s5 + $0x6e4] ss:$16 sps:$4 sm:$0xff]  }
 0x3df   :  { %7439 = vmatpush1.bf16.msra.mxu0 %v9646_v25  ;;  %v9699_v25 = vld [vmem:[%s13442_s5 + $0x6ac] ss:$16 sps:$4 sm:$0xff]  }
 0x3e0   :  { %7585 = vmatpush1.bf16.msra.mxu1 %v9607_v26  ;;  %7449 = vmatprep.subr.bf16.mxu0 %v9654_v4  ;;  %v9694_v26 = vld [vmem:[%s13442_s5 + $0x6e0] ss:$16 sps:$4 sm:$0xff]  }
 0x3e1   :  { %7586 = vmatprep.subr.bf16.mxu1 %v9615_v57  ;;  %v9851_v4 = vld [vmem:[%s13441_s4] sm:$0xff] }
 0x3e2   :  { %v2527_v57 = vrot.slane %v9851_v4, %v348_v14  ;;  %v9700_v14 = vld [vmem:[%s13442_s5 + $0x700] ss:$16 sps:$4 sm:$0xff]  }
 0x3e4   :  { %7587 = vmatpush1.bf16.msra.mxu1 %v9613_v58  ;;  %v9697_v58 = vld [vmem:[%s13442_s5 + $0x6a8] ss:$16 sps:$4 sm:$0xff]  }
 0x3e5   :  { %7588 = vmatprep.subr.bf16.mxu1 %v9621_v28  ;;  %v9702_v28 = vld [vmem:[%s13442_s5 + $0x704] ss:$16 sps:$4 sm:$0xff]  }
 0x3e8   :  { %7589 = vmatpush1.bf16.msra.mxu1 %v9619_v46  ;;  %v9705_v46 = vld [vmem:[%s13442_s5 + $0x6cc] ss:$16 sps:$4 sm:$0xff]  }
 0x3e9   :  { %7590 = vmatprep.subr.bf16.mxu1 %v9627_v29 }
 0x3ec   :  { %7591 = vmatpush1.bf16.msra.mxu1 %v9625_v30 }
 0x3ed   :  { %7592 = vmatprep.subr.bf16.mxu1 %v9633_v32 }
 0x3f0   :  { %7593 = vmatpush1.bf16.msra.mxu1 %v9631_v63 }
 0x3f1   :  { %7594 = vmatprep.subr.bf16.mxu1 %v9639_v37  ;;  %v9703_v37 = vld [vmem:[%s13442_s5 + $0x6c8] ss:$16 sps:$4 sm:$0xff]  }
 0x3f4   :  { %7595 = vmatpush1.bf16.msra.mxu1 %v9637_v38  ;;  %v9708_v38 = vld [vmem:[%s13442_s5 + $0x724] ss:$16 sps:$4 sm:$0xff]  }
 0x3f5   :  { %v5581_v47 = vpop.f32.mrb[12].mxu0  ;;  %7596 = vmatprep.subr.bf16.mxu1 %v9645_v5 }
 0x3f6   :  { %v9269_v50 = vadd.f32 %v5581_v47, %v2515_v40  ;;  %v5583_v53 = vpop.f32.mrb[13].mxu0  ;;  %v9711_v40 = vld [vmem:[%s13442_s5 + $0x6ec] ss:$16 sps:$4 sm:$0xff]  }
 0x3f7   :  { %v9270_v55 = vadd.f32 %v5583_v53, %v2519_v41  ;;  %v5585_v43 = vpop.f32.mrb[14].mxu0  ;;  %v9717_v53 = vld [vmem:[%s13442_s5 + $0x70c] ss:$16 sps:$4 sm:$0xff]  }
 0x3f8   :  { %v5756_v24 = vmax.f32 %v9269_v50, 0.0  ;;  %v5586_v45 = vpop.f32.mrb[15].mxu0  ;;  %7597 = vmatpush1.bf16.msra.mxu1 %v9643_v42  ;;  %v9706_v42 = vld [vmem:[%s13442_s5 + $0x720] ss:$16 sps:$4 sm:$0xff]   ;;  %v9714_v50 = vld [vmem:[%s13442_s5 + $0x744] ss:$16 sps:$4 sm:$0xff]  }
 0x3f9   :  { %v5757_v52 = vmax.f32 %v9270_v55, 0.0  ;;  %7598 = vmatprep.subr.bf16.mxu1 %v9651_v51  ;;  %v9709_v51 = vld [vmem:[%s13442_s5 + $0x6e8] ss:$16 sps:$4 sm:$0xff]   ;;  %v9712_v55 = vld [vmem:[%s13442_s5 + $0x740] ss:$16 sps:$4 sm:$0xff]  }
 0x3fa   :  { %v5764_v31 = vpack.c.bf16 %v5756_v24, %v5756_v24  ;;  %v9715_v43 = vld [vmem:[%s13442_s5 + $0x708] ss:$16 sps:$4 sm:$0xff]   ;;  %v9720_v24 = vld [vmem:[%s13442_s5 + $0x764] ss:$16 sps:$4 sm:$0xff]   ;;  %v9723_v45 = vld [vmem:[%s13442_s5 + $0x72c] ss:$16 sps:$4 sm:$0xff]  }
 0x3fb   :  { %v5765_v35 = vpack.c.bf16 %v5757_v52, %v5757_v52  ;;  %v9721_v52 = vld [vmem:[%s13442_s5 + $0x728] ss:$16 sps:$4 sm:$0xff]  }
 0x3fc   :  { %7599 = vmatpush1.bf16.msra.mxu1 %v9649_v0  ;;  %v9718_v0 = vld [vmem:[%s13442_s5 + $0x760] ss:$16 sps:$4 sm:$0xff]  }
 0x3fd   :  { %7440 = vmatprep.mubr.bf16.mxu0 %v5765_v35  ;;  %7604 = vmatprep.mubr.bf16.mxu1 %v5765_v35  ;;  %v9729_v35 = vld [vmem:[%s13442_s5 + $0x74c] ss:$16 sps:$4 sm:$0xff]  }
 0x3fe   :  { %7441 = vmatmul.mubr.bf16.vlgmr.msra.gmra.mrb[16].mxu0 %v5764_v31  ;;  %7600 = vmatprep.subr.bf16.mxu1 %v9657_v54  ;;  %v9726_v54 = vld [vmem:[%s13442_s5 + $0x784] ss:$16 sps:$4 sm:$0xff]  }
 0x3ff   :  { %7450 = vmatpush1.bf16.msra.mxu0 %v9652_v56  ;;  %v9724_v56 = vld [vmem:[%s13442_s5 + $0x780] ss:$16 sps:$4 sm:$0xff]  }
 0x400   :  { %7601 = vmatpush1.bf16.msra.mxu1 %v9655_v9  ;;  %7451 = vmatprep.subr.bf16.mxu0 %v9660_v34  ;;  %v9732_v9 = vld [vmem:[%s13442_s5 + $0x7a4] ss:$16 sps:$4 sm:$0xff]   ;;  %v9735_v34 = vld [vmem:[%s13442_s5 + $0x76c] ss:$16 sps:$4 sm:$0xff]  }
 0x401   :  { %7602 = vmatprep.subr.bf16.mxu1 %v9663_v36  ;;  %v9730_v36 = vld [vmem:[%s13442_s5 + $0x7a0] ss:$16 sps:$4 sm:$0xff]  }
 0x403   :  { %7452 = vmatpush1.bf16.msra.mxu0 %v9658_v48  ;;  %v2523_v48 = vrot.slane %v9851_v4, %v344_v7  ;;  %v9771_v4 = vld [vmem:[%s13444_s7 + $0x54] ss:$8 sps:$4 sm:$0xff]  }
 0x404   :  { %7603 = vmatpush1.bf16.msra.mxu1 %v9661_v49  ;;  %7453 = vmatprep.subr.bf16.mxu0 %v9666_v59  ;;  %v9733_v49 = vld [vmem:[%s13442_s5 + $0x768] ss:$16 sps:$4 sm:$0xff]   ;;  %v9738_v59 = vld [vmem:[%s13442_s5 + $0x7c4] ss:$16 sps:$4 sm:$0xff]  }
 0x405   :  { %7613 = vmatprep.subr.bf16.mxu1 %v9669_v61  ;;  %v9741_v61 = vld [vmem:[%s13442_s5 + $0x78c] ss:$16 sps:$4 sm:$0xff]  }
 0x407   :  { %7454 = vmatpush1.bf16.msra.mxu0 %v9664_v1  ;;  %7605 = vmatmul.mubr.bf16.vlgmr.msra.gmra.mrb[20].mxu1 %v5764_v31  ;;  %v9727_v31 = vld [vmem:[%s13442_s5 + $0x748] ss:$16 sps:$4 sm:$0xff]  }
 0x408   :  { %7614 = vmatpush1.bf16.msra.mxu1 %v9667_v2  ;;  %7455 = vmatprep.subr.bf16.mxu0 %v9672_v27  ;;  %v9739_v1 = vld [vmem:[%s13442_s5 + $0x788] ss:$16 sps:$4 sm:$0xff]   ;;  %v9744_v2 = vld [vmem:[%s13442_s5 + $0x7e4] ss:$16 sps:$4 sm:$0xff]   ;;  %v9747_v27 = vld [vmem:[%s13442_s5 + $0x7ac] ss:$16 sps:$4 sm:$0xff]  }
 0x409   :  { %7615 = vmatprep.subr.bf16.mxu1 %v9675_v3  ;;  %v9742_v3 = vld [vmem:[%s13442_s5 + $0x7e0] ss:$16 sps:$4 sm:$0xff]  }
 0x40b   :  { %7456 = vmatpush1.bf16.msra.mxu0 %v9670_v6 }
 0x40c   :  { %7616 = vmatpush1.bf16.msra.mxu1 %v9673_v12  ;;  %7457 = vmatprep.subr.bf16.mxu0 %v9678_v13  ;;  %v9745_v12 = vld [vmem:[%s13442_s5 + $0x7a8] ss:$16 sps:$4 sm:$0xff]   ;;  %v9756_v13 = vld [vmem:[%s13444_s7 + $0x4] ss:$8 sps:$4 sm:$0xff]  }
 0x40d   :  { %7617 = vmatprep.subr.bf16.mxu1 %v9681_v16  ;;  %v9750_v16 = vld [vmem:[%s13442_s5 + $0x7cc] ss:$16 sps:$4 sm:$0xff]  }
 0x40f   :  { %7458 = vmatpush1.bf16.msra.mxu0 %v9676_v39  ;;  %v9754_v39 = vld [vmem:[%s13444_s7] ss:$8 sps:$4 sm:$0xff]  }
 0x410   :  { %7618 = vmatpush1.bf16.msra.mxu1 %v9679_v15  ;;  %7459 = vmatprep.subr.bf16.mxu0 %v9684_v17  ;;  %v9748_v17 = vld [vmem:[%s13442_s5 + $0x7c8] ss:$16 sps:$4 sm:$0xff]  }
 0x411   :  { %7619 = vmatprep.subr.bf16.mxu1 %v9687_v18  ;;  %v9759_v18 = vld [vmem:[%s13444_s7 + $0x14] ss:$8 sps:$4 sm:$0xff]  }
 0x413   :  { %7460 = vmatpush1.bf16.msra.mxu0 %v9682_v19  ;;  %v9753_v19 = vld [vmem:[%s13442_s5 + $0x7ec] ss:$16 sps:$4 sm:$0xff]  }
 0x414   :  { %7620 = vmatpush1.bf16.msra.mxu1 %v9685_v11  ;;  %7461 = vmatprep.subr.bf16.mxu0 %v9690_v20  ;;  %v9757_v11 = vld [vmem:[%s13444_s7 + $0x10] ss:$8 sps:$4 sm:$0xff]  }
 0x415   :  { %7621 = vmatprep.subr.bf16.mxu1 %v9693_v21  ;;  %v9751_v20 = vld [vmem:[%s13442_s5 + $0x7e8] ss:$16 sps:$4 sm:$0xff]   ;;  %v9762_v21 = vld [vmem:[%s13444_s7 + $0x24] ss:$8 sps:$4 sm:$0xff]  }
 0x417   :  { %7462 = vmatpush1.bf16.msra.mxu0 %v9688_v22  ;;  %v9760_v22 = vld [vmem:[%s13444_s7 + $0x20] ss:$8 sps:$4 sm:$0xff]  }
 0x418   :  { %7622 = vmatpush1.bf16.msra.mxu1 %v9691_v23  ;;  %7463 = vmatprep.subr.bf16.mxu0 %v9696_v33  ;;  %v9765_v23 = vld [vmem:[%s13444_s7 + $0x34] ss:$8 sps:$4 sm:$0xff]   ;;  %v9763_v33 = vld [vmem:[%s13444_s7 + $0x30] ss:$8 sps:$4 sm:$0xff]  }
 0x419   :  { %7623 = vmatprep.subr.bf16.mxu1 %v9699_v25  ;;  %v9768_v25 = vld [vmem:[%s13444_s7 + $0x44] ss:$8 sps:$4 sm:$0xff]  }
 0x41a   :  { %v5745_v29 = vpop.f32.mrb[16].mxu1 }
 0x41b   :  { %7464 = vmatpush1.bf16.msra.mxu0 %v9694_v26  ;;  %v5747_v30 = vpop.f32.mrb[17].mxu1  ;;  %v9271_v7 = vadd.f32 %v5745_v29, %v2523_v48  ;;  %v9766_v26 = vld [vmem:[%s13444_s7 + $0x40] ss:$8 sps:$4 sm:$0xff]   ;;  %v9775_v29 = vld [vmem:[%s13444_s7 + $0x70] ss:$8 sps:$4 sm:$0xff]  }
 0x41c   :  { %v9272_v32 = vadd.f32 %v5747_v30, %v2527_v57  ;;  %v5749_v63 = vpop.f32.mrb[18].mxu1  ;;  %7624 = vmatpush1.bf16.msra.mxu1 %v9697_v58  ;;  %7465 = vmatprep.subr.bf16.mxu0 %v9702_v28  ;;  %v9769_v57 = vld [vmem:[%s13444_s7 + $0x50] ss:$8 sps:$4 sm:$0xff]   ;;  %v9774_v58 = vld [vmem:[%s13444_s7 + $0x64] ss:$8 sps:$4 sm:$0xff]  }
 0x41d   :  { %v5750_v5 = vpop.f32.mrb[19].mxu1  ;;  %7625 = vmatprep.subr.bf16.mxu1 %v9705_v46  ;;  %v5758_v6 = vmax.f32 %v9271_v7, 0.0  ;;  %v9772_v28 = vld [vmem:[%s13444_s7 + $0x60] ss:$8 sps:$4 sm:$0xff]   ;;  %v9777_v46 = vld [vmem:[%s13444_s7 + $0x74] ss:$8 sps:$4 sm:$0xff]  }
 0x41e   :  { %v5759_v41 = vmax.f32 %v9272_v32, 0.0  ;;  %v9780_v30 = vld [vmem:[%s13444_s7 + $0x84] ss:$8 sps:$4 sm:$0xff]   ;;  %v9783_v32 = vld [vmem:[%s13444_s7 + $0x94] ss:$8 sps:$4 sm:$0xff]  }
 0x41f   :  { %7466 = vmatpush1.bf16.msra.mxu0 %v9700_v14  ;;  %v5766_v15 = vpack.c.bf16 %v5758_v6, %v5758_v6  ;;  %v9778_v14 = vld [vmem:[%s13444_s7 + $0x80] ss:$8 sps:$4 sm:$0xff]   ;;  %v9781_v63 = vld [vmem:[%s13444_s7 + $0x90] ss:$8 sps:$4 sm:$0xff]   ;;  %v9789_v5 = vld [vmem:[%s13444_s7 + $0xb4] ss:$8 sps:$4 sm:$0xff]  }
 0x420   :  { %v5767_v47 = vpack.c.bf16 %v5759_v41, %v5759_v41  ;;  %7626 = vmatpush1.bf16.msra.mxu1 %v9703_v37  ;;  %7467 = vmatprep.subr.bf16.mxu0 %v9708_v38  ;;  %v9786_v37 = vld [vmem:[%s13444_s7 + $0xa4] ss:$8 sps:$4 sm:$0xff]   ;;  %v9784_v38 = vld [vmem:[%s13444_s7 + $0xa0] ss:$8 sps:$4 sm:$0xff]   ;;  %v9807_v7 = vld [vmem:[%s13444_s7 + $0x114] ss:$8 sps:$4 sm:$0xff]  }
 0x421   :  { %7627 = vmatprep.subr.bf16.mxu1 %v9711_v40  ;;  %v9787_v40 = vld [vmem:[%s13444_s7 + $0xb0] ss:$8 sps:$4 sm:$0xff]   ;;  %v9792_v41 = vld [vmem:[%s13444_s7 + $0xc4] ss:$8 sps:$4 sm:$0xff]  }
 0x422   :  { %7481 = vmatprep.mubr.bf16.mxu0 %v5767_v47  ;;  %7645 = vmatprep.mubr.bf16.mxu1 %v5767_v47  ;;  %v9795_v47 = vld [vmem:[%s13444_s7 + $0xd4] ss:$8 sps:$4 sm:$0xff]  }
 0x423   :  { %7468 = vmatpush1.bf16.msra.mxu0 %v9706_v42  ;;  %v9790_v42 = vld [vmem:[%s13444_s7 + $0xc0] ss:$8 sps:$4 sm:$0xff]  }
 0x424   :  { %7628 = vmatpush1.bf16.msra.mxu1 %v9709_v51  ;;  %7469 = vmatprep.subr.bf16.mxu0 %v9714_v50  ;;  %v9793_v51 = vld [vmem:[%s13444_s7 + $0xd0] ss:$8 sps:$4 sm:$0xff]   ;;  %v9798_v50 = vld [vmem:[%s13444_s7 + $0xe4] ss:$8 sps:$4 sm:$0xff]  }
 0x425   :  { %7629 = vmatprep.subr.bf16.mxu1 %v9717_v53  ;;  %v9796_v53 = vld [vmem:[%s13444_s7 + $0xe0] ss:$8 sps:$4 sm:$0xff]  }
 0x427   :  { %7470 = vmatpush1.bf16.msra.mxu0 %v9712_v55  ;;  %v9801_v55 = vld [vmem:[%s13444_s7 + $0xf4] ss:$8 sps:$4 sm:$0xff]  }
 0x428   :  { %7630 = vmatpush1.bf16.msra.mxu1 %v9715_v43  ;;  %7471 = vmatprep.subr.bf16.mxu0 %v9720_v24  ;;  %v9799_v43 = vld [vmem:[%s13444_s7 + $0xf0] ss:$8 sps:$4 sm:$0xff]   ;;  %v9804_v24 = vld [vmem:[%s13444_s7 + $0x104] ss:$8 sps:$4 sm:$0xff]  }
 0x429   :  { %7631 = vmatprep.subr.bf16.mxu1 %v9723_v45  ;;  %v13314_v45 = vld [vmem:[%s13443_s6] sm:$0xf] }
 0x42b   :  { %7472 = vmatpush1.bf16.msra.mxu0 %v9718_v0  ;;  %v6029_v0 = vrot.slane %v13314_v45, %v10786_v8 }
 0x42c   :  { %7632 = vmatpush1.bf16.msra.mxu1 %v9721_v52  ;;  %7473 = vmatprep.subr.bf16.mxu0 %v9726_v54  ;;  %v6033_v52 = vrot.slane %v13314_v45, %v10794_v10 }
 0x42d   :  { %7633 = vmatprep.subr.bf16.mxu1 %v9729_v35 }
 0x42f   :  { %7474 = vmatpush1.bf16.msra.mxu0 %v9724_v56 }
 0x430   :  { %7634 = vmatpush1.bf16.msra.mxu1 %v9727_v31  ;;  %7475 = vmatprep.subr.bf16.mxu0 %v9732_v9 }
 0x431   :  { %7635 = vmatprep.subr.bf16.mxu1 %v9735_v34 }
 0x433   :  { %7476 = vmatpush1.bf16.msra.mxu0 %v9730_v36 }
 0x434   :  { %7636 = vmatpush1.bf16.msra.mxu1 %v9733_v49  ;;  %7477 = vmatprep.subr.bf16.mxu0 %v9738_v59  ;;  %v9802_v59 = vld [vmem:[%s13444_s7 + $0x100] ss:$8 sps:$4 sm:$0xff]  }
 0x435   :  { %7637 = vmatprep.subr.bf16.mxu1 %v9741_v61 }
 0x437   :  { %7478 = vmatpush1.bf16.msra.mxu0 %v9736_v44  ;;  %v6041_v44 = vrot.slane %v13314_v45, %v11111_v62  ;;  %v9810_v62 = vld [vmem:[%s13444_s7 + $0x124] ss:$8 sps:$4 sm:$0xff]  }
 0x438   :  { %7638 = vmatpush1.bf16.msra.mxu1 %v9739_v1  ;;  %7479 = vmatprep.subr.bf16.mxu0 %v9744_v2 }
 0x439   :  { %7639 = vmatprep.subr.bf16.mxu1 %v9747_v27  ;;  %v9805_v27 = vld [vmem:[%s13444_s7 + $0x110] ss:$8 sps:$4 sm:$0xff]  }
 0x43b   :  { %7480 = vmatpush1.bf16.msra.mxu0 %v9742_v3 }
 0x43c   :  { %7640 = vmatpush1.bf16.msra.mxu1 %v9745_v12  ;;  %8058 = vmatprep.subr.bf16.mxu0 %v9756_v13 }
 0x43d   :  { %7641 = vmatprep.subr.bf16.mxu1 %v9750_v16  ;;  %v9808_v16 = vld [vmem:[%s13444_s7 + $0x120] ss:$8 sps:$4 sm:$0xff]  }
 0x43e   :  { %7482 = vmatmul.mubr.bf16.vlgmr.msra.gmra.mrb[16].mxu0 %v5766_v15 }
 0x43f   :  { %8059 = vmatpush1.bf16.msra.mxu0 %v9754_v39 }
 0x440   :  { %7642 = vmatpush1.bf16.msra.mxu1 %v9748_v17  ;;  %8060 = vmatprep.subr.bf16.mxu0 %v9759_v18  ;;  %v9811_v17 = vld [vmem:[%s13444_s7 + $0x130] ss:$8 sps:$4 sm:$0xff]   ;;  %v9816_v18 = vld [vmem:[%s13444_s7 + $0x144] ss:$8 sps:$4 sm:$0xff]  }
 0x441   :  { %7643 = vmatprep.subr.bf16.mxu1 %v9753_v19  ;;  %v9814_v19 = vld [vmem:[%s13444_s7 + $0x140] ss:$8 sps:$4 sm:$0xff]  }
 0x443   :  { %8061 = vmatpush1.bf16.msra.mxu0 %v9757_v11  ;;  %v9819_v11 = vld [vmem:[%s13444_s7 + $0x154] ss:$8 sps:$4 sm:$0xff]  }
 0x444   :  { %7644 = vmatpush1.bf16.msra.mxu1 %v9751_v20  ;;  %8062 = vmatprep.subr.bf16.mxu0 %v9762_v21  ;;  %v9817_v20 = vld [vmem:[%s13444_s7 + $0x150] ss:$8 sps:$4 sm:$0xff]   ;;  %v9822_v21 = vld [vmem:[%s13444_s7 + $0x164] ss:$8 sps:$4 sm:$0xff]  }
 0x447   :  { %7646 = vmatmul.mubr.bf16.vlgmr.msra.gmra.mrb[20].mxu1 %v5766_v15  ;;  %8063 = vmatpush1.bf16.msra.mxu0 %v9760_v22  ;;  %v9813_v15 = vld [vmem:[%s13444_s7 + $0x134] ss:$8 sps:$4 sm:$0xff]   ;;  %v9820_v22 = vld [vmem:[%s13444_s7 + $0x160] ss:$8 sps:$4 sm:$0xff]  }
 0x448   :  { %8064 = vmatprep.subr.bf16.mxu0 %v9765_v23  ;;  %v9825_v23 = vld [vmem:[%s13444_s7 + $0x174] ss:$8 sps:$4 sm:$0xff]  }
 0x44b   :  { %8065 = vmatpush1.bf16.msra.mxu0 %v9763_v33  ;;  %v9823_v33 = vld [vmem:[%s13444_s7 + $0x170] ss:$8 sps:$4 sm:$0xff]  }
 0x44c   :  { %8066 = vmatprep.subr.bf16.mxu0 %v9768_v25  ;;  %v9828_v25 = vld [vmem:[%s13444_s7 + $0x184] ss:$8 sps:$4 sm:$0xff]  }
 0x44f   :  { %8067 = vmatpush1.bf16.msra.mxu0 %v9766_v26  ;;  %v9826_v26 = vld [vmem:[%s13444_s7 + $0x180] ss:$8 sps:$4 sm:$0xff]  }
 0x450   :  { %8068 = vmatprep.subr.bf16.mxu0 %v9771_v4  ;;  %v9831_v4 = vld [vmem:[%s13444_s7 + $0x194] ss:$8 sps:$4 sm:$0xff]  }
 0x453   :  { %8069 = vmatpush1.bf16.msra.mxu0 %v9769_v57  ;;  %v9829_v57 = vld [vmem:[%s13444_s7 + $0x190] ss:$8 sps:$4 sm:$0xff]  }
 0x454   :  { %8070 = vmatprep.subr.bf16.mxu0 %v9774_v58  ;;  %v9834_v58 = vld [vmem:[%s13444_s7 + $0x1a4] ss:$8 sps:$4 sm:$0xff]  }
 0x457   :  { %8071 = vmatpush1.bf16.msra.mxu0 %v9772_v28  ;;  %v9832_v28 = vld [vmem:[%s13444_s7 + $0x1a0] ss:$8 sps:$4 sm:$0xff]  }
 0x458   :  { %8072 = vmatprep.subr.bf16.mxu0 %v9777_v46  ;;  %v9837_v46 = vld [vmem:[%s13444_s7 + $0x1b4] ss:$8 sps:$4 sm:$0xff]  }
 0x45b   :  { %8073 = vmatpush1.bf16.msra.mxu0 %v9775_v29  ;;  %v9835_v29 = vld [vmem:[%s13444_s7 + $0x1b0] ss:$8 sps:$4 sm:$0xff]  }
 0x45c   :  { %8074 = vmatprep.subr.bf16.mxu0 %v9780_v30  ;;  %v9840_v30 = vld [vmem:[%s13444_s7 + $0x1c4] ss:$8 sps:$4 sm:$0xff]  }
 0x45f   :  { %8075 = vmatpush1.bf16.msra.mxu0 %v9778_v14  ;;  %v9838_v14 = vld [vmem:[%s13444_s7 + $0x1c0] ss:$8 sps:$4 sm:$0xff]  }
 0x460   :  { %8076 = vmatprep.subr.bf16.mxu0 %v9783_v32  ;;  %v9843_v32 = vld [vmem:[%s13444_s7 + $0x1d4] ss:$8 sps:$4 sm:$0xff]  }
 0x463   :  { %8077 = vmatpush1.bf16.msra.mxu0 %v9781_v63  ;;  %v9841_v63 = vld [vmem:[%s13444_s7 + $0x1d0] ss:$8 sps:$4 sm:$0xff]  }
 0x464   :  { %8078 = vmatprep.subr.bf16.mxu0 %v9786_v37  ;;  %v6037_v37 = vrot.slane %v13314_v45, %v11108_v60  ;;  %v9847_v60 = vld [vmem:[%s13444_s7 + $0x1f0] ss:$8 sps:$4 sm:$0xff]  }
 0x467   :  { %8079 = vmatpush1.bf16.msra.mxu0 %v9784_v38  ;;  %v9846_v38 = vld [vmem:[%s13444_s7 + $0x1e4] ss:$8 sps:$4 sm:$0xff]  }
 0x468   :  { %8080 = vmatprep.subr.bf16.mxu0 %v9789_v5  ;;  %v9844_v5 = vld [vmem:[%s13444_s7 + $0x1e0] ss:$8 sps:$4 sm:$0xff]  }
 0x46b   :  { %8081 = vmatpush1.bf16.msra.mxu0 %v9787_v40 }
 0x46c   :  { %8082 = vmatprep.subr.bf16.mxu0 %v9792_v41  ;;  %v9849_v41 = vld [vmem:[%s13444_s7 + $0x1f4] ss:$8 sps:$4 sm:$0xff]   ;;  %s9852_s7 = scalar_lea.vmem %s8159_s19, 64 }
 0x46d   :  { %p9853_p0 = scmp.ne.s32.totalorder %s8159_s19, %s9852_s7  ;;  %p9858_p2 = scmp.lt.s32.totalorder %s9852_s7, %s9852_s7 }
 0x46f   :  { %8083 = vmatpush1.bf16.msra.mxu0 %v9790_v42  ;;  %p9859_p3 = por %p9858_p2, %p9857_p1 }
 0x470   :  { %8084 = vmatprep.subr.bf16.mxu0 %v9795_v47 }
 0x471   :  { %p9860_p4 = pnand %p9859_p3, %p9853_p0 }
 0x473   :  { %8085 = vmatpush1.bf16.msra.mxu0 %v9793_v51  ;;  %v7726_v51 = vld [vmem:[%s13445_s8] sm:$0x3] }
 0x474   :  { %8086 = vmatprep.subr.bf16.mxu0 %v9798_v50  ;;  %v7731_v50 = vrot.slane %v7726_v51, %v10786_v8 }
 0x477   :  { %8087 = vmatpush1.bf16.msra.mxu0 %v9796_v53  ;;  %v7735_v53 = vrot.slane %v7726_v51, %v10794_v10 }
 0x478   :  { %8088 = vmatprep.subr.bf16.mxu0 %v9801_v55 }
 0x47b   :  { %8089 = vmatpush1.bf16.msra.mxu0 %v9799_v43 }
 0x47c   :  { %8099 = vmatprep.subr.bf16.mxu0 %v9804_v24 }
 0x511   :  { %v7483_v54 = vpop.f32.mrb[16].mxu0 }
 0x512   :  { %v9273_v35 = vadd.f32 %v7483_v54, %v6029_v0  ;;  %v7485_v56 = vpop.f32.mrb[17].mxu0 }
 0x513   :  { %v9274_v31 = vadd.f32 %v7485_v56, %v6033_v52  ;;  %v7487_v9 = vpop.f32.mrb[18].mxu0 }
 0x514   :  { %v7654_v34 = vmax.f32 %v9273_v35, 0.0  ;;  %v7488_v36 = vpop.f32.mrb[19].mxu0 }
 0x515   :  { %v7655_v48 = vmax.f32 %v9274_v31, 0.0 }
 0x516   :  { %v7658_v61 = vpack.c.bf16 %v7654_v34, %v7654_v34 }
 0x517   :  { %v7659_v49 = vpack.c.bf16 %v7655_v48, %v7655_v48 }
 0x519   :  { %8090 = vmatprep.mubr.bf16.mxu0 %v7659_v49 }
 0x51a   :  { %8091 = vmatmul.mubr.bf16.vlgmr.msra.gmra.mrb[20].mxu0 %v7658_v61  ;;  %v13328_v1 = vpop.f32.mrb[20].mxu1 }
 0x51b   :  { %8100 = vmatpush1.bf16.msra.mxu0 %v9802_v59  ;;  %v7649_v2 = vpop.f32.mrb[21].mxu1  ;;  %v9275_v40 = vadd.f32 %v13328_v1, %v6037_v37 }
 0x51c   :  { %v9276_v3 = vadd.f32 %v7649_v2, %v6041_v44  ;;  %v7651_v6 = vpop.f32.mrb[22].mxu1  ;;  %8101 = vmatprep.subr.bf16.mxu0 %v9807_v7 }
 0x51d   :  { %v7652_v12 = vpop.f32.mrb[23].mxu1  ;;  %v7656_v42 = vmax.f32 %v9275_v40, 0.0 }
 0x51e   :  { %v7657_v13 = vmax.f32 %v9276_v3, 0.0 }
 0x51f   :  { %8102 = vmatpush1.bf16.msra.mxu0 %v9805_v27  ;;  %v7660_v47 = vpack.c.bf16 %v7656_v42, %v7656_v42 }
 0x520   :  { %v7661_v39 = vpack.c.bf16 %v7657_v13, %v7657_v13  ;;  %8103 = vmatprep.subr.bf16.mxu0 %v9810_v62 }
 0x522   :  { %8131 = vmatprep.mubr.bf16.mxu0 %v7661_v39 }
 0x523   :  { %8104 = vmatpush1.bf16.msra.mxu0 %v9808_v16 }
 0x524   :  { %8105 = vmatprep.subr.bf16.mxu0 %v9813_v15 }
 0x527   :  { %8106 = vmatpush1.bf16.msra.mxu0 %v9811_v17 }
 0x528   :  { %8107 = vmatprep.subr.bf16.mxu0 %v9816_v18 }
 0x52b   :  { %8108 = vmatpush1.bf16.msra.mxu0 %v9814_v19 }
 0x52c   :  { %8109 = vmatprep.subr.bf16.mxu0 %v9819_v11 }
 0x52f   :  { %8110 = vmatpush1.bf16.msra.mxu0 %v9817_v20 }
 0x530   :  { %8111 = vmatprep.subr.bf16.mxu0 %v9822_v21 }
 0x533   :  { %8112 = vmatpush1.bf16.msra.mxu0 %v9820_v22 }
 0x534   :  { %8113 = vmatprep.subr.bf16.mxu0 %v9825_v23 }
 0x537   :  { %8114 = vmatpush1.bf16.msra.mxu0 %v9823_v33 }
 0x538   :  { %8115 = vmatprep.subr.bf16.mxu0 %v9828_v25 }
 0x53b   :  { %8116 = vmatpush1.bf16.msra.mxu0 %v9826_v26 }
 0x53c   :  { %8117 = vmatprep.subr.bf16.mxu0 %v9831_v4 }
 0x53f   :  { %8118 = vmatpush1.bf16.msra.mxu0 %v9829_v57 }
 0x540   :  { %8119 = vmatprep.subr.bf16.mxu0 %v9834_v58 }
 0x543   :  { %8120 = vmatpush1.bf16.msra.mxu0 %v9832_v28 }
 0x544   :  { %8121 = vmatprep.subr.bf16.mxu0 %v9837_v46 }
 0x547   :  { %8122 = vmatpush1.bf16.msra.mxu0 %v9835_v29 }
 0x548   :  { %8123 = vmatprep.subr.bf16.mxu0 %v9840_v30 }
 0x54b   :  { %8124 = vmatpush1.bf16.msra.mxu0 %v9838_v14 }
 0x54c   :  { %8125 = vmatprep.subr.bf16.mxu0 %v9843_v32 }
 0x54f   :  { %8126 = vmatpush1.bf16.msra.mxu0 %v9841_v63 }
 0x550   :  { %8127 = vmatprep.subr.bf16.mxu0 %v9846_v38 }
 0x553   :  { %8128 = vmatpush1.bf16.msra.mxu0 %v9844_v5 }
 0x554   :  { %8129 = vmatprep.subr.bf16.mxu0 %v9849_v41 }
 0x557   :  { %8130 = vmatpush1.bf16.msra.mxu0 %v9847_v60 }
 0x55a   :  { %8132 = vmatmul.mubr.bf16.vlgmr.msra.gmra.mrb[20].mxu0 %v7660_v47 }
 0x62d   :  { %v8133_v55 = vpop.f32.mrb[20].mxu0 }
 0x62e   :  { %v9277_v43 = vadd.f32 %v8133_v55, %v7731_v50  ;;  %v8135_v24 = vpop.f32.mrb[21].mxu0 }
 0x62f   :  { %v9278_v45 = vadd.f32 %v8135_v24, %v7735_v53  ;;  %v8137_v0 = vpop.f32.mrb[22].mxu0 }
 0x630   :  { %v8138_v52 = vpop.f32.mrb[23].mxu0 }
 0x631   :  { %v8142_v54 = vcombine.low %v9277_v43, %v9278_v45 }
 0x633   :  { %9254 = vst.sshfl [vmem:[#allocation2] sm:$0x33 pattern:$0x76325410] %v8142_v54 }
 0x634   :  { %9863 = shalt.err (!%p9860_p4)
}
 0x635   :  { %s9864_s21 = scalar_lea.hbm %s13446_s9, 64 }
 0x636   :  { %p9865_p5 = scmp.ne.s32.totalorder %s13446_s9, %s9864_s21  ;;  %p9868_p6 = scmp.lt.u32.totalorder %s9864_s21, %s13446_s9 }
 0x638   :  { %p9870_p7 = pnand %p9868_p6, %p9865_p5 }
 0x63a   :  { %9873 = shalt.err (!%p9870_p7)
}
 0x63b   :  { %8161 = dma.vmem_to_hbm [thread:$0]  %s8159_s19, 64, %s13446_s9, [#allocation3]  }
 0x63c   :  { %9874 = dma.done.wait [#allocation3], 64  }
 0x63d   :  { %9875 = vsyncadd [#allocation3], 4294967232 }
 0x63e   :  { %8165 = vsyncpa [#allocation3], 1 }

</bundles_post_ra>
